<compile_context>
chip_gen: v7x
topology: tpu7x:2x2x1
jax: 0.10.0
libtpu: 0.0.40
codegen_flags: <defaults>
</compile_context>

<pallas_src>
import jax
import jax.numpy as jnp
from jax.experimental import pallas as pl
from jax.experimental.pallas import tpu as pltpu

_LANES = 128


def _basic_block_kernel(x_ref, w1_ref, b1_ref, w2_ref, b2_ref, out_ref,
                        mid_scr, col_scr):
    # x_ref   : (b, H+2, W+2, Cp)  spatially + channel padded input (f32)
    # w1_ref  : (9*Cp, Cp)         conv1 im2col weights, BN1 scale folded (bf16)
    # b1_ref  : (1, Cp)            BN1 bias (f32)
    # w2_ref  : (9*Cp, Cp)         conv2 im2col weights, BN2 scale folded (bf16)
    # b2_ref  : (1, Cp)            BN2 bias (f32)
    # out_ref : (b, H, W, Cp)      lane-dense output block (f32)
    # mid_scr : (b, H+2, W+2, Cp)  spatially padded ReLU(BN1(conv1)) (bf16)
    # col_scr : (b*H*W, 9*Cp)      shared im2col LHS scratch (bf16)
    b, H, W, Cp = out_ref.shape
    M = b * H * W
    f32 = jnp.float32
    bf16 = jnp.bfloat16

    # ---- load the padded input once; cast to bf16 once (MXU operand dtype).
    x_f32 = x_ref[...]                                   # (b, H+2, W+2, Cp)
    x_bf = x_f32.astype(bf16)

    # ---- conv1 (+BN1 scale) as ONE im2col matmul.
    # 9 lane-aligned, sublane-aligned (unmasked) stores build the LHS.
    for t in range(9):
        kh, kw = divmod(t, 3)
        tap = x_bf[:, kh:kh + H, kw:kw + W, :]           # (b, H, W, Cp) bf16
        col_scr[:, t * Cp:(t + 1) * Cp] = tap.reshape(M, Cp)
    acc1 = jnp.dot(col_scr[...], w1_ref[...], preferred_element_type=f32)

    # ---- BN1 bias + ReLU (f32), store into the spatially padded mid scratch.
    out1 = jnp.maximum(acc1 + b1_ref[0], 0.0)            # (M, Cp) f32
    # Full unmasked zero fill keeps the 1-px border zero every step (safe when
    # the batch grid axis is split across v7x's two TensorCores).
    mid_scr[...] = jnp.zeros(mid_scr.shape, mid_scr.dtype)
    mid_scr[:, 1:H + 1, 1:W + 1, :] = out1.reshape(b, H, W, Cp).astype(bf16)

    # ---- conv2 (+BN2 scale) as ONE im2col matmul (reuse col_scr).
    for t in range(9):
        kh, kw = divmod(t, 3)
        tap = mid_scr[:, kh:kh + H, kw:kw + W, :]        # (b, H, W, Cp) bf16
        col_scr[:, t * Cp:(t + 1) * Cp] = tap.reshape(M, Cp)
    acc2 = jnp.dot(col_scr[...], w2_ref[...], preferred_element_type=f32)

    # ---- BN2 bias + residual add (exact f32, already lane-padded) + ReLU.
    identity = x_f32[:, 1:H + 1, 1:W + 1, :].reshape(M, Cp)
    out = jnp.maximum(acc2 + b2_ref[0] + identity, 0.0)
    out_ref[...] = out.reshape(b, H, W, Cp).astype(out_ref.dtype)


def _tpu_vmem_and_cores():
    """Best-effort hardware query (VMEM per core, TensorCore count)."""
    vmem_cap = 128 * 1024 * 1024
    num_cores = 1
    try:
        info = pltpu.get_tpu_info()
        vmem_cap = int(getattr(info, "vmem_capacity_bytes", vmem_cap))
        for attr in ("num_cores", "tensorcore_count", "num_tensorcores",
                     "core_count"):
            v = getattr(info, attr, None)
            if v:
                num_cores = int(v)
                break
    except Exception:
        pass
    if num_cores == 1:
        try:
            v = getattr(jax.devices()[0], "num_cores", None)
            if v:
                num_cores = int(v)
        except Exception:
            pass
    # Heuristic: 64 MiB/TC parts (v7x) have two TensorCores per chip.
    if num_cores == 1 and vmem_cap <= 64 * 1024 * 1024:
        num_cores = 2
    return vmem_cap, num_cores


def basic_block_forward(x_nchw, w1, g1, beta1, m1, v1, w2, g2, beta2, m2, v2,
                        *, eps=1e-5, b_tile=None):
    """PyTorch BasicBlock forward (inference BN), NCHW in / NCHW out."""
    N, C, H, W = x_nchw.shape
    Cout = w1.shape[0]
    assert w1.shape == (Cout, C, 3, 3) and w2.shape == (Cout, Cout, 3, 3)
    assert Cout == C, "identity skip requires inplanes == planes"
    # TODO(synk): stride>1 / dilation>1 / downsample branch not implemented.

    Cp = -(-Cout // _LANES) * _LANES      # channels padded to full 128-lane vregs
    Hp, Wp = H + 2, W + 2

    vmem_cap, num_cores = _tpu_vmem_and_cores()

    def _vmem_need(bt):
        m = bt * H * W
        return (2 * bt * Hp * Wp * Cp * 4       # input block (f32, double-buffered)
                + 2 * m * Cp * 4                # output block (f32, double-buffered)
                + 2 * 2 * 9 * Cp * Cp * 2       # w1p/w2p (bf16, double-buffered)
                + 2 * 2 * Cp * 4                # biases
                + bt * Hp * Wp * Cp * 2         # mid_scr (bf16)
                + m * 9 * Cp * 2)               # col_scr (bf16)

    if b_tile is None:
        b_tile = 1
        budget = int(0.45 * vmem_cap)
        min_steps = 2 if num_cores >= 2 else 1   # keep both TCs busy on v7x
        for cand in range(2, N + 1):
            if (N % cand == 0 and N // cand >= min_steps
                    and _vmem_need(cand) <= budget):
                b_tile = cand
    assert N % b_tile == 0
    grid = (N // b_tile,)

    vmem_limit = min(int(0.85 * vmem_cap),
                     max(32 * 1024 * 1024, _vmem_need(b_tile) + (8 << 20)))

    # NCHW -> NHWC (channels on the 128-wide lane dim); channel-pad to Cp and
    # 1-px spatial pad ONCE in HBM so the kernel gets a clean rectangular DMA.
    # (In a real NHWC network these wrapper transposes/pads disappear.)
    x_nhwc = jnp.transpose(x_nchw, (0, 2, 3, 1))
    x_pad = jnp.pad(x_nhwc, ((0, 0), (1, 1), (1, 1), (0, Cp - C))
                    ).astype(jnp.float32)

    # Fold BatchNorm (running stats) into conv weights (scale) + bias.
    s1 = g1 / jnp.sqrt(v1 + eps)
    s2 = g2 / jnp.sqrt(v2 + eps)
    bias1 = beta1 - m1 * s1
    bias2 = beta2 - m2 * s2

    # OIHW -> HWIO, BN scale folded into Cout, both channel dims zero-padded
    # to Cp, flattened to im2col layout (9*Cp, Cp), cast to bf16 for the MXU.
    w1_hwio = jnp.transpose(w1, (2, 3, 1, 0)) * s1
    w2_hwio = jnp.transpose(w2, (2, 3, 1, 0)) * s2
    w1p = jnp.pad(w1_hwio, ((0, 0), (0, 0), (0, Cp - C), (0, Cp - Cout)))
    w1p = w1p.reshape(9 * Cp, Cp).astype(jnp.bfloat16)
    w2p = jnp.pad(w2_hwio, ((0, 0), (0, 0), (0, Cp - Cout), (0, Cp - Cout)))
    w2p = w2p.reshape(9 * Cp, Cp).astype(jnp.bfloat16)
    bias1p = jnp.pad(bias1, (0, Cp - Cout)).reshape(1, Cp).astype(jnp.float32)
    bias2p = jnp.pad(bias2, (0, Cp - Cout)).reshape(1, Cp).astype(jnp.float32)

    out_padded = pl.pallas_call(
        _basic_block_kernel,
        out_shape=jax.ShapeDtypeStruct((N, H, W, Cp), jnp.float32),
        grid_spec=pltpu.PrefetchScalarGridSpec(
            num_scalar_prefetch=0,
            grid=grid,
            in_specs=[
                pl.BlockSpec((b_tile, Hp, Wp, Cp), lambda n: (n, 0, 0, 0)),
                pl.BlockSpec((9 * Cp, Cp), lambda n: (0, 0)),
                pl.BlockSpec((1, Cp), lambda n: (0, 0)),
                pl.BlockSpec((9 * Cp, Cp), lambda n: (0, 0)),
                pl.BlockSpec((1, Cp), lambda n: (0, 0)),
            ],
            out_specs=pl.BlockSpec((b_tile, H, W, Cp),
                                   lambda n: (n, 0, 0, 0)),
            scratch_shapes=[
                pltpu.VMEM((b_tile, Hp, Wp, Cp), jnp.bfloat16),
                pltpu.VMEM((b_tile * H * W, 9 * Cp), jnp.bfloat16),
            ],
        ),
        compiler_params=pltpu.CompilerParams(
            dimension_semantics=("parallel",),
            vmem_limit_bytes=vmem_limit,
        ),
    )(x_pad, w1p, bias1p, w2p, bias2p)

    # Drop the lane padding, back to NCHW.
    return jnp.transpose(out_padded[..., :Cout], (0, 3, 1, 2))


def _reference(x, w1, g1, b1, m1, v1, w2, g2, b2, m2, v2, eps=1e-5):
    """Pure-JAX f32 reference of BasicBlock.forward (NCHW / OIHW)."""
    def conv(x, w):
        return jax.lax.conv_general_dilated(
            x, w, window_strides=(1, 1), padding=((1, 1), (1, 1)),
            dimension_numbers=('NCHW', 'OIHW', 'NCHW'))

    def bn(y, g, b, m, v):
        s = g / jnp.sqrt(v + eps)
        return y * s[None, :, None, None] + (b - m * s)[None, :, None, None]

    out = jnp.maximum(bn(conv(x, w1), g1, b1, m1, v1), 0.0)
    out = bn(conv(out, w2), g2, b2, m2, v2) + x
    return jnp.maximum(out, 0.0)


if __name__ == "__main__":
    # BasicBlock(inplanes=4, planes=4, stride=1); PyTorch-style NCHW input.
    N, C, H, W = 2, 4, 16, 16

    key = jax.random.PRNGKey(0)
    (kx, kw1, kw2, kg1, kb1, km1, kv1, kg2, kb2, km2, kv2) = jax.random.split(key, 11)

    x = jax.random.normal(kx, (N, C, H, W), dtype=jnp.float32)

    # Conv weights in PyTorch OIHW layout (Cout, Cin, kh, kw), no bias.
    w1 = jax.random.normal(kw1, (C, C, 3, 3), dtype=jnp.float32) * 0.1
    w2 = jax.random.normal(kw2, (C, C, 3, 3), dtype=jnp.float32) * 0.1

    # BatchNorm params (inference / running-stats semantics).
    g1 = 1.0 + 0.1 * jax.random.normal(kg1, (C,), dtype=jnp.float32)
    b1 = 0.1 * jax.random.normal(kb1, (C,), dtype=jnp.float32)
    m1 = 0.1 * jax.random.normal(km1, (C,), dtype=jnp.float32)
    v1 = jnp.abs(jax.random.normal(kv1, (C,), dtype=jnp.float32)) + 1.0
    g2 = 1.0 + 0.1 * jax.random.normal(kg2, (C,), dtype=jnp.float32)
    b2 = 0.1 * jax.random.normal(kb2, (C,), dtype=jnp.float32)
    m2 = 0.1 * jax.random.normal(km2, (C,), dtype=jnp.float32)
    v2 = jnp.abs(jax.random.normal(kv2, (C,), dtype=jnp.float32)) + 1.0

    out = basic_block_forward(x, w1, g1, b1, m1, v1, w2, g2, b2, m2, v2)
    out = jax.block_until_ready(out)

    ref = _reference(x, w1, g1, b1, m1, v1, w2, g2, b2, m2, v2)
    assert out.shape == (N, C, H, W)
    max_err = float(jnp.max(jnp.abs(out - ref)))
    # bf16 MXU operands + bf16 intermediate vs f32 reference -> loose tolerance.
    assert max_err < 1e-1, f"mismatch vs reference: {max_err}"

    print("KERNEL_OK")
</pallas_src>

<mosaic_0001>
module attributes {stable_mosaic.version = 11 : i64} {
  func.func @_basic_block_kernel(%arg0: i32, %arg1: memref<2x18x18x128xf32, #tpu.memory_space<vmem>>, %arg2: memref<1152x128xbf16, #tpu.memory_space<vmem>>, %arg3: memref<1x128xf32, #tpu.memory_space<vmem>>, %arg4: memref<1152x128xbf16, #tpu.memory_space<vmem>>, %arg5: memref<1x128xf32, #tpu.memory_space<vmem>>, %arg6: memref<2x16x16x128xf32, #tpu.memory_space<vmem>>, %arg7: memref<2x18x18x128xbf16, #tpu.memory_space<vmem>>, %arg8: memref<512x1152xbf16, #tpu.memory_space<vmem>>) attributes {dimension_semantics = [#tpu.dimension_semantics<parallel>], iteration_bounds = array<i64: 1>, scalar_prefetch = 0 : i64, scratch_operands = 2 : i64, tpu.core_type = #tpu.core_type<tc>, window_params = [{transform_indices = @transform_0, window_bounds = array<i64: 2, 18, 18, 128>}, {pipeline_mode = #tpu.pipeline_mode<synchronous>, transform_indices = @transform_1, window_bounds = array<i64: 1152, 128>}, {pipeline_mode = #tpu.pipeline_mode<synchronous>, transform_indices = @transform_2, window_bounds = array<i64: 1, 128>}, {pipeline_mode = #tpu.pipeline_mode<synchronous>, transform_indices = @transform_3, window_bounds = array<i64: 1152, 128>}, {pipeline_mode = #tpu.pipeline_mode<synchronous>, transform_indices = @transform_4, window_bounds = array<i64: 1, 128>}, {transform_indices = @transform_5, window_bounds = array<i64: 2, 16, 16, 128>}]} {
    %c0 = arith.constant 0 : index
    %c0_0 = arith.constant 0 : index
    %c0_1 = arith.constant 0 : index
    %c0_2 = arith.constant 0 : index
    %0 = vector.load %arg1[%c0, %c0_0, %c0_1, %c0_2] : memref<2x18x18x128xf32, #tpu.memory_space<vmem>>, vector<2x18x18x128xf32>
    %1 = arith.truncf %0 : vector<2x18x18x128xf32> to vector<2x18x18x128xbf16>
    %2 = vector.extract_strided_slice %1 {offsets = [0, 0, 0, 0], sizes = [2, 16, 16, 128], strides = [1, 1, 1, 1]} : vector<2x18x18x128xbf16> to vector<2x16x16x128xbf16>
    %3 = vector.shape_cast %2 : vector<2x16x16x128xbf16> to vector<512x128xbf16>
    %c0_3 = arith.constant 0 : index
    %c0_4 = arith.constant 0 : index
    %4 = vector.load %arg8[%c0_3, %c0_4] : memref<512x1152xbf16, #tpu.memory_space<vmem>>, vector<512x128xbf16>
    tpu.vector_store %arg8[%c0_3, %c0_4], %3 {strides = array<i32>} : memref<512x1152xbf16, #tpu.memory_space<vmem>>, vector<512x128xbf16>,
    %5 = vector.extract_strided_slice %1 {offsets = [0, 0, 1, 0], sizes = [2, 16, 16, 128], strides = [1, 1, 1, 1]} : vector<2x18x18x128xbf16> to vector<2x16x16x128xbf16>
    %6 = vector.shape_cast %5 : vector<2x16x16x128xbf16> to vector<512x128xbf16>
    %c0_5 = arith.constant 0 : index
    %c128 = arith.constant 128 : index
    %7 = vector.load %arg8[%c0_5, %c128] : memref<512x1152xbf16, #tpu.memory_space<vmem>>, vector<512x128xbf16>
    tpu.vector_store %arg8[%c0_5, %c128], %6 {strides = array<i32>} : memref<512x1152xbf16, #tpu.memory_space<vmem>>, vector<512x128xbf16>,
    %8 = vector.extract_strided_slice %1 {offsets = [0, 0, 2, 0], sizes = [2, 16, 16, 128], strides = [1, 1, 1, 1]} : vector<2x18x18x128xbf16> to vector<2x16x16x128xbf16>
    %9 = vector.shape_cast %8 : vector<2x16x16x128xbf16> to vector<512x128xbf16>
    %c0_6 = arith.constant 0 : index
    %c256 = arith.constant 256 : index
    %10 = vector.load %arg8[%c0_6, %c256] : memref<512x1152xbf16, #tpu.memory_space<vmem>>, vector<512x128xbf16>
    tpu.vector_store %arg8[%c0_6, %c256], %9 {strides = array<i32>} : memref<512x1152xbf16, #tpu.memory_space<vmem>>, vector<512x128xbf16>,
    %11 = vector.extract_strided_slice %1 {offsets = [0, 1, 0, 0], sizes = [2, 16, 16, 128], strides = [1, 1, 1, 1]} : vector<2x18x18x128xbf16> to vector<2x16x16x128xbf16>
    %12 = vector.shape_cast %11 : vector<2x16x16x128xbf16> to vector<512x128xbf16>
    %c0_7 = arith.constant 0 : index
    %c384 = arith.constant 384 : index
    %13 = vector.load %arg8[%c0_7, %c384] : memref<512x1152xbf16, #tpu.memory_space<vmem>>, vector<512x128xbf16>
    tpu.vector_store %arg8[%c0_7, %c384], %12 {strides = array<i32>} : memref<512x1152xbf16, #tpu.memory_space<vmem>>, vector<512x128xbf16>,
    %14 = vector.extract_strided_slice %1 {offsets = [0, 1, 1, 0], sizes = [2, 16, 16, 128], strides = [1, 1, 1, 1]} : vector<2x18x18x128xbf16> to vector<2x16x16x128xbf16>
    %15 = vector.shape_cast %14 : vector<2x16x16x128xbf16> to vector<512x128xbf16>
    %c0_8 = arith.constant 0 : index
    %c512 = arith.constant 512 : index
    %16 = vector.load %arg8[%c0_8, %c512] : memref<512x1152xbf16, #tpu.memory_space<vmem>>, vector<512x128xbf16>
    tpu.vector_store %arg8[%c0_8, %c512], %15 {strides = array<i32>} : memref<512x1152xbf16, #tpu.memory_space<vmem>>, vector<512x128xbf16>,
    %17 = vector.extract_strided_slice %1 {offsets = [0, 1, 2, 0], sizes = [2, 16, 16, 128], strides = [1, 1, 1, 1]} : vector<2x18x18x128xbf16> to vector<2x16x16x128xbf16>
    %18 = vector.shape_cast %17 : vector<2x16x16x128xbf16> to vector<512x128xbf16>
    %c0_9 = arith.constant 0 : index
    %c640 = arith.constant 640 : index
    %19 = vector.load %arg8[%c0_9, %c640] : memref<512x1152xbf16, #tpu.memory_space<vmem>>, vector<512x128xbf16>
    tpu.vector_store %arg8[%c0_9, %c640], %18 {strides = array<i32>} : memref<512x1152xbf16, #tpu.memory_space<vmem>>, vector<512x128xbf16>,
    %20 = vector.extract_strided_slice %1 {offsets = [0, 2, 0, 0], sizes = [2, 16, 16, 128], strides = [1, 1, 1, 1]} : vector<2x18x18x128xbf16> to vector<2x16x16x128xbf16>
    %21 = vector.shape_cast %20 : vector<2x16x16x128xbf16> to vector<512x128xbf16>
    %c0_10 = arith.constant 0 : index
    %c768 = arith.constant 768 : index
    %22 = vector.load %arg8[%c0_10, %c768] : memref<512x1152xbf16, #tpu.memory_space<vmem>>, vector<512x128xbf16>
    tpu.vector_store %arg8[%c0_10, %c768], %21 {strides = array<i32>} : memref<512x1152xbf16, #tpu.memory_space<vmem>>, vector<512x128xbf16>,
    %23 = vector.extract_strided_slice %1 {offsets = [0, 2, 1, 0], sizes = [2, 16, 16, 128], strides = [1, 1, 1, 1]} : vector<2x18x18x128xbf16> to vector<2x16x16x128xbf16>
    %24 = vector.shape_cast %23 : vector<2x16x16x128xbf16> to vector<512x128xbf16>
    %c0_11 = arith.constant 0 : index
    %c896 = arith.constant 896 : index
    %25 = vector.load %arg8[%c0_11, %c896] : memref<512x1152xbf16, #tpu.memory_space<vmem>>, vector<512x128xbf16>
    tpu.vector_store %arg8[%c0_11, %c896], %24 {strides = array<i32>} : memref<512x1152xbf16, #tpu.memory_space<vmem>>, vector<512x128xbf16>,
    %26 = vector.extract_strided_slice %1 {offsets = [0, 2, 2, 0], sizes = [2, 16, 16, 128], strides = [1, 1, 1, 1]} : vector<2x18x18x128xbf16> to vector<2x16x16x128xbf16>
    %27 = vector.shape_cast %26 : vector<2x16x16x128xbf16> to vector<512x128xbf16>
    %c0_12 = arith.constant 0 : index
    %c1024 = arith.constant 1024 : index
    %28 = vector.load %arg8[%c0_12, %c1024] : memref<512x1152xbf16, #tpu.memory_space<vmem>>, vector<512x128xbf16>
    tpu.vector_store %arg8[%c0_12, %c1024], %27 {strides = array<i32>} : memref<512x1152xbf16, #tpu.memory_space<vmem>>, vector<512x128xbf16>,
    %c0_13 = arith.constant 0 : index
    %c0_14 = arith.constant 0 : index
    %29 = vector.load %arg8[%c0_13, %c0_14] : memref<512x1152xbf16, #tpu.memory_space<vmem>>, vector<512x1152xbf16>
    %c0_15 = arith.constant 0 : index
    %c0_16 = arith.constant 0 : index
    %30 = vector.load %arg2[%c0_15, %c0_16] : memref<1152x128xbf16, #tpu.memory_space<vmem>>, vector<1152x128xbf16>
    %cst = arith.constant dense<0.000000e+00> : vector<512x128xf32>
    %31 = tpu.matmul %29, %30, %cst {dimension_numbers = #tpu.dot_dimension_numbers<[1], [0], [0], [1], [0, 0, 1, 1], [], []>} : vector<512x1152xbf16>, vector<1152x128xbf16>, vector<512x128xf32> -> vector<512x128xf32>
    %c0_17 = arith.constant 0 : index
    %c0_18 = arith.constant 0 : index
    %32 = vector.load %arg3[%c0_17, %c0_18] : memref<1x128xf32, #tpu.memory_space<vmem>>, vector<1x128xf32>
    %33 = vector.shape_cast %32 : vector<1x128xf32> to vector<128xf32>
    %34 = vector.shape_cast %33 : vector<128xf32> to vector<1x128xf32>
    %35 = vector.broadcast %34 : vector<1x128xf32> to vector<512x128xf32>
    %36 = arith.addf %31, %35 : vector<512x128xf32>
    %cst_19 = arith.constant 0.000000e+00 : f32
    %37 = vector.broadcast %cst_19 : f32 to vector<512x128xf32>
    %38 = arith.maximumf %36, %37 : vector<512x128xf32>
    %cst_20 = arith.constant 0.000000e+00 : bf16
    %39 = vector.broadcast %cst_20 : bf16 to vector<2x18x18x128xbf16>
    %c0_21 = arith.constant 0 : index
    %c0_22 = arith.constant 0 : index
    %c0_23 = arith.constant 0 : index
    %c0_24 = arith.constant 0 : index
    %40 = vector.load %arg7[%c0_21, %c0_22, %c0_23, %c0_24] : memref<2x18x18x128xbf16, #tpu.memory_space<vmem>>, vector<2x18x18x128xbf16>
    tpu.vector_store %arg7[%c0_21, %c0_22, %c0_23, %c0_24], %39 {strides = array<i32>} : memref<2x18x18x128xbf16, #tpu.memory_space<vmem>>, vector<2x18x18x128xbf16>,
    %41 = vector.shape_cast %38 : vector<512x128xf32> to vector<2x16x16x128xf32>
    %42 = arith.truncf %41 : vector<2x16x16x128xf32> to vector<2x16x16x128xbf16>
    %c0_25 = arith.constant 0 : index
    %c1 = arith.constant 1 : index
    %c1_26 = arith.constant 1 : index
    %c0_27 = arith.constant 0 : index
    %43 = vector.load %arg7[%c0_25, %c1, %c1_26, %c0_27] : memref<2x18x18x128xbf16, #tpu.memory_space<vmem>>, vector<2x16x16x128xbf16>
    tpu.vector_store %arg7[%c0_25, %c1, %c1_26, %c0_27], %42 {strides = array<i32>} : memref<2x18x18x128xbf16, #tpu.memory_space<vmem>>, vector<2x16x16x128xbf16>,
    %c0_28 = arith.constant 0 : index
    %c0_29 = arith.constant 0 : index
    %c0_30 = arith.constant 0 : index
    %c0_31 = arith.constant 0 : index
    %44 = vector.load %arg7[%c0_28, %c0_29, %c0_30, %c0_31] : memref<2x18x18x128xbf16, #tpu.memory_space<vmem>>, vector<2x16x16x128xbf16>
    %45 = vector.shape_cast %44 : vector<2x16x16x128xbf16> to vector<512x128xbf16>
    %c0_32 = arith.constant 0 : index
    %c0_33 = arith.constant 0 : index
    %46 = vector.load %arg8[%c0_32, %c0_33] : memref<512x1152xbf16, #tpu.memory_space<vmem>>, vector<512x128xbf16>
    tpu.vector_store %arg8[%c0_32, %c0_33], %45 {strides = array<i32>} : memref<512x1152xbf16, #tpu.memory_space<vmem>>, vector<512x128xbf16>,
    %c0_34 = arith.constant 0 : index
    %c0_35 = arith.constant 0 : index
    %c1_36 = arith.constant 1 : index
    %c0_37 = arith.constant 0 : index
    %47 = vector.load %arg7[%c0_34, %c0_35, %c1_36, %c0_37] : memref<2x18x18x128xbf16, #tpu.memory_space<vmem>>, vector<2x16x16x128xbf16>
    %48 = vector.shape_cast %47 : vector<2x16x16x128xbf16> to vector<512x128xbf16>
    %c0_38 = arith.constant 0 : index
    %c128_39 = arith.constant 128 : index
    %49 = vector.load %arg8[%c0_38, %c128_39] : memref<512x1152xbf16, #tpu.memory_space<vmem>>, vector<512x128xbf16>
    tpu.vector_store %arg8[%c0_38, %c128_39], %48 {strides = array<i32>} : memref<512x1152xbf16, #tpu.memory_space<vmem>>, vector<512x128xbf16>,
    %c0_40 = arith.constant 0 : index
    %c0_41 = arith.constant 0 : index
    %c2 = arith.constant 2 : index
    %c0_42 = arith.constant 0 : index
    %50 = vector.load %arg7[%c0_40, %c0_41, %c2, %c0_42] : memref<2x18x18x128xbf16, #tpu.memory_space<vmem>>, vector<2x16x16x128xbf16>
    %51 = vector.shape_cast %50 : vector<2x16x16x128xbf16> to vector<512x128xbf16>
    %c0_43 = arith.constant 0 : index
    %c256_44 = arith.constant 256 : index
    %52 = vector.load %arg8[%c0_43, %c256_44] : memref<512x1152xbf16, #tpu.memory_space<vmem>>, vector<512x128xbf16>
    tpu.vector_store %arg8[%c0_43, %c256_44], %51 {strides = array<i32>} : memref<512x1152xbf16, #tpu.memory_space<vmem>>, vector<512x128xbf16>,
    %c0_45 = arith.constant 0 : index
    %c1_46 = arith.constant 1 : index
    %c0_47 = arith.constant 0 : index
    %c0_48 = arith.constant 0 : index
    %53 = vector.load %arg7[%c0_45, %c1_46, %c0_47, %c0_48] : memref<2x18x18x128xbf16, #tpu.memory_space<vmem>>, vector<2x16x16x128xbf16>
    %54 = vector.shape_cast %53 : vector<2x16x16x128xbf16> to vector<512x128xbf16>
    %c0_49 = arith.constant 0 : index
    %c384_50 = arith.constant 384 : index
    %55 = vector.load %arg8[%c0_49, %c384_50] : memref<512x1152xbf16, #tpu.memory_space<vmem>>, vector<512x128xbf16>
    tpu.vector_store %arg8[%c0_49, %c384_50], %54 {strides = array<i32>} : memref<512x1152xbf16, #tpu.memory_space<vmem>>, vector<512x128xbf16>,
    %c0_51 = arith.constant 0 : index
    %c1_52 = arith.constant 1 : index
    %c1_53 = arith.constant 1 : index
    %c0_54 = arith.constant 0 : index
    %56 = vector.load %arg7[%c0_51, %c1_52, %c1_53, %c0_54] : memref<2x18x18x128xbf16, #tpu.memory_space<vmem>>, vector<2x16x16x128xbf16>
    %57 = vector.shape_cast %56 : vector<2x16x16x128xbf16> to vector<512x128xbf16>
    %c0_55 = arith.constant 0 : index
    %c512_56 = arith.constant 512 : index
    %58 = vector.load %arg8[%c0_55, %c512_56] : memref<512x1152xbf16, #tpu.memory_space<vmem>>, vector<512x128xbf16>
    tpu.vector_store %arg8[%c0_55, %c512_56], %57 {strides = array<i32>} : memref<512x1152xbf16, #tpu.memory_space<vmem>>, vector<512x128xbf16>,
    %c0_57 = arith.constant 0 : index
    %c1_58 = arith.constant 1 : index
    %c2_59 = arith.constant 2 : index
    %c0_60 = arith.constant 0 : index
    %59 = vector.load %arg7[%c0_57, %c1_58, %c2_59, %c0_60] : memref<2x18x18x128xbf16, #tpu.memory_space<vmem>>, vector<2x16x16x128xbf16>
    %60 = vector.shape_cast %59 : vector<2x16x16x128xbf16> to vector<512x128xbf16>
    %c0_61 = arith.constant 0 : index
    %c640_62 = arith.constant 640 : index
    %61 = vector.load %arg8[%c0_61, %c640_62] : memref<512x1152xbf16, #tpu.memory_space<vmem>>, vector<512x128xbf16>
    tpu.vector_store %arg8[%c0_61, %c640_62], %60 {strides = array<i32>} : memref<512x1152xbf16, #tpu.memory_space<vmem>>, vector<512x128xbf16>,
    %c0_63 = arith.constant 0 : index
    %c2_64 = arith.constant 2 : index
    %c0_65 = arith.constant 0 : index
    %c0_66 = arith.constant 0 : index
    %62 = vector.load %arg7[%c0_63, %c2_64, %c0_65, %c0_66] : memref<2x18x18x128xbf16, #tpu.memory_space<vmem>>, vector<2x16x16x128xbf16>
    %63 = vector.shape_cast %62 : vector<2x16x16x128xbf16> to vector<512x128xbf16>
    %c0_67 = arith.constant 0 : index
    %c768_68 = arith.constant 768 : index
    %64 = vector.load %arg8[%c0_67, %c768_68] : memref<512x1152xbf16, #tpu.memory_space<vmem>>, vector<512x128xbf16>
    tpu.vector_store %arg8[%c0_67, %c768_68], %63 {strides = array<i32>} : memref<512x1152xbf16, #tpu.memory_space<vmem>>, vector<512x128xbf16>,
    %c0_69 = arith.constant 0 : index
    %c2_70 = arith.constant 2 : index
    %c1_71 = arith.constant 1 : index
    %c0_72 = arith.constant 0 : index
    %65 = vector.load %arg7[%c0_69, %c2_70, %c1_71, %c0_72] : memref<2x18x18x128xbf16, #tpu.memory_space<vmem>>, vector<2x16x16x128xbf16>
    %66 = vector.shape_cast %65 : vector<2x16x16x128xbf16> to vector<512x128xbf16>
    %c0_73 = arith.constant 0 : index
    %c896_74 = arith.constant 896 : index
    %67 = vector.load %arg8[%c0_73, %c896_74] : memref<512x1152xbf16, #tpu.memory_space<vmem>>, vector<512x128xbf16>
    tpu.vector_store %arg8[%c0_73, %c896_74], %66 {strides = array<i32>} : memref<512x1152xbf16, #tpu.memory_space<vmem>>, vector<512x128xbf16>,
    %c0_75 = arith.constant 0 : index
    %c2_76 = arith.constant 2 : index
    %c2_77 = arith.constant 2 : index
    %c0_78 = arith.constant 0 : index
    %68 = vector.load %arg7[%c0_75, %c2_76, %c2_77, %c0_78] : memref<2x18x18x128xbf16, #tpu.memory_space<vmem>>, vector<2x16x16x128xbf16>
    %69 = vector.shape_cast %68 : vector<2x16x16x128xbf16> to vector<512x128xbf16>
    %c0_79 = arith.constant 0 : index
    %c1024_80 = arith.constant 1024 : index
    %70 = vector.load %arg8[%c0_79, %c1024_80] : memref<512x1152xbf16, #tpu.memory_space<vmem>>, vector<512x128xbf16>
    tpu.vector_store %arg8[%c0_79, %c1024_80], %69 {strides = array<i32>} : memref<512x1152xbf16, #tpu.memory_space<vmem>>, vector<512x128xbf16>,
    %c0_81 = arith.constant 0 : index
    %c0_82 = arith.constant 0 : index
    %71 = vector.load %arg8[%c0_81, %c0_82] : memref<512x1152xbf16, #tpu.memory_space<vmem>>, vector<512x1152xbf16>
    %c0_83 = arith.constant 0 : index
    %c0_84 = arith.constant 0 : index
    %72 = vector.load %arg4[%c0_83, %c0_84] : memref<1152x128xbf16, #tpu.memory_space<vmem>>, vector<1152x128xbf16>
    %cst_85 = arith.constant dense<0.000000e+00> : vector<512x128xf32>
    %73 = tpu.matmul %71, %72, %cst_85 {dimension_numbers = #tpu.dot_dimension_numbers<[1], [0], [0], [1], [0, 0, 1, 1], [], []>} : vector<512x1152xbf16>, vector<1152x128xbf16>, vector<512x128xf32> -> vector<512x128xf32>
    %74 = vector.extract_strided_slice %0 {offsets = [0, 1, 1, 0], sizes = [2, 16, 16, 128], strides = [1, 1, 1, 1]} : vector<2x18x18x128xf32> to vector<2x16x16x128xf32>
    %75 = vector.shape_cast %74 : vector<2x16x16x128xf32> to vector<512x128xf32>
    %c0_86 = arith.constant 0 : index
    %c0_87 = arith.constant 0 : index
    %76 = vector.load %arg5[%c0_86, %c0_87] : memref<1x128xf32, #tpu.memory_space<vmem>>, vector<1x128xf32>
    %77 = vector.shape_cast %76 : vector<1x128xf32> to vector<128xf32>
    %78 = vector.shape_cast %77 : vector<128xf32> to vector<1x128xf32>
    %79 = vector.broadcast %78 : vector<1x128xf32> to vector<512x128xf32>
    %80 = arith.addf %73, %79 : vector<512x128xf32>
    %81 = arith.addf %80, %75 : vector<512x128xf32>
    %cst_88 = arith.constant 0.000000e+00 : f32
    %82 = vector.broadcast %cst_88 : f32 to vector<512x128xf32>
    %83 = arith.maximumf %81, %82 : vector<512x128xf32>
    %84 = vector.shape_cast %83 : vector<512x128xf32> to vector<2x16x16x128xf32>
    %c0_89 = arith.constant 0 : index
    %c0_90 = arith.constant 0 : index
    %c0_91 = arith.constant 0 : index
    %c0_92 = arith.constant 0 : index
    %85 = vector.load %arg6[%c0_89, %c0_90, %c0_91, %c0_92] : memref<2x16x16x128xf32, #tpu.memory_space<vmem>>, vector<2x16x16x128xf32>
    tpu.vector_store %arg6[%c0_89, %c0_90, %c0_91, %c0_92], %84 {strides = array<i32>} : memref<2x16x16x128xf32, #tpu.memory_space<vmem>>, vector<2x16x16x128xf32>,
    return
  }
  func.func @transform_0(%arg0: i32) -> (i32, i32, i32, i32) {
    %c0_i32 = arith.constant 0 : i32
    %c0_i32_0 = arith.constant 0 : i32
    %c0_i32_1 = arith.constant 0 : i32
    %c0_i32_2 = arith.constant 0 : i32
    return %arg0, %c0_i32, %c0_i32_0, %c0_i32_1 : i32, i32, i32, i32
  }
  func.func @transform_1(%arg0: i32) -> (i32, i32) {
    %c0_i32 = arith.constant 0 : i32
    %c0_i32_0 = arith.constant 0 : i32
    %c0_i32_1 = arith.constant 0 : i32
    return %c0_i32, %c0_i32_0 : i32, i32
  }
  func.func @transform_2(%arg0: i32) -> (i32, i32) {
    %c0_i32 = arith.constant 0 : i32
    %c0_i32_0 = arith.constant 0 : i32
    %c0_i32_1 = arith.constant 0 : i32
    return %c0_i32, %c0_i32_0 : i32, i32
  }
  func.func @transform_3(%arg0: i32) -> (i32, i32) {
    %c0_i32 = arith.constant 0 : i32
    %c0_i32_0 = arith.constant 0 : i32
    %c0_i32_1 = arith.constant 0 : i32
    return %c0_i32, %c0_i32_0 : i32, i32
  }
  func.func @transform_4(%arg0: i32) -> (i32, i32) {
    %c0_i32 = arith.constant 0 : i32
    %c0_i32_0 = arith.constant 0 : i32
    %c0_i32_1 = arith.constant 0 : i32
    return %c0_i32, %c0_i32_0 : i32, i32
  }
  func.func @transform_5(%arg0: i32) -> (i32, i32, i32, i32) {
    %c0_i32 = arith.constant 0 : i32
    %c0_i32_0 = arith.constant 0 : i32
    %c0_i32_1 = arith.constant 0 : i32
    %c0_i32_2 = arith.constant 0 : i32
    return %arg0, %c0_i32, %c0_i32_0, %c0_i32_1 : i32, i32, i32, i32
  }
}

</mosaic_0001>

<bundles_post_ra>
// kernel: tpu_custom_call.1
= control target key start
LH: loop header
LB: loop body
LE: loop exit
PB: predicated region body
PF: predicated region fallthrough
CT: control target
= control target key end

     0   :  { %v19411_v1 = vmov 0   ;;  %vm234_vm0 = vsmask.f32 7424  ;;  %s19401_s0 = inlined_call_operand.vmem [shape: f32[2,18,18,128], index: 0, kind: input, shape index: {}]   ;;  %s19402_s1 = inlined_call_operand.vmem [shape: bf16[1152,128], index: 1, kind: input, shape index: {}]   ;;  %s19403_s2 = inlined_call_operand.vmem [shape: f32[1,128], index: 2, kind: input, shape index: {}]   ;;  %s19404_s3 = inlined_call_operand.vmem [shape: bf16[1152,128], index: 3, kind: input, shape index: {}]   ;;  %s19405_s4 = inlined_call_operand.vmem [shape: f32[1,128], index: 4, kind: input, shape index: {}]   ;;  %s19406_s5 = inlined_call_operand.hbm [shape: f32[2,16,16,128], index: 5, kind: output, shape index: {}]  }
   0x1   :  { %v15470_v0 = vld [vmem:[%s19402_s1] sm:$0xff]   ;;  %2047 = vmatprep.subr.bf16.mxu0 %v19411_v1  ;;  %3556 = vst [vmem:[#allocation2] sm:$0xf] %v19411_v1  ;;  %3557 = vst [vmem:[#allocation2 + $0x4] sm:$0xf] %v19411_v1  ;;  %v15060_v2 = vld [vmem:[%s19402_s1 + $0x8] sm:$0xff]  }
   0x2   :  { %3558 = vst [vmem:[#allocation2 + $0x8] sm:$0x1] %v19411_v1  ;;  %3559 = vst [vmem:[#allocation2 + $0xc] sm:$0xf] %v19411_v1  ;;  %2048 = vmatpush1.bf16.msra.mxu0 %v15470_v0  ;;  %v15061_v3 = vld [vmem:[%s19402_s1 + $0x10] sm:$0xff]   ;;  %v15062_v4 = vld [vmem:[%s19402_s1 + $0x18] sm:$0xff]  }
   0x3   :  { %3560 = vst [vmem:[#allocation2 + $0x10] sm:$0xf] %v19411_v1  ;;  %3561 = vst [vmem:[#allocation2 + $0x14] sm:$0x1] %v19411_v1  ;;  %2049 = vmatprep.subr.bf16.mxu0 %v19411_v1  ;;  %v15063_v5 = vld [vmem:[%s19402_s1 + $0x20] sm:$0xff]   ;;  %v23_v7 = vld [vmem:[%s19401_s0 + $0x8] sm:$0xff] }
   0x4   :  { %3562 = vst [vmem:[#allocation2 + $0x18] sm:$0xf] %v19411_v1  ;;  %3563 = vst [vmem:[#allocation2 + $0x1c] sm:$0xf] %v19411_v1  ;;  %v22_v6 = vld [vmem:[%s19401_s0] sm:$0xff]  ;;  %v15064_v11 = vld [vmem:[%s19402_s1 + $0x28] sm:$0xff]  }
   0x5   :  { %3564 = vst [vmem:[#allocation2 + $0x20] sm:$0x1] %v19411_v1  ;;  %3565 = vst [vmem:[#allocation2 + $0x24] sm:$0xf] %v19411_v1  ;;  %v24_v8 = vld [vmem:[%s19401_s0 + $0x10] sm:$0x3]  ;;  %v15607_v9 = vpack.c.bf16 %v23_v7, %v22_v6 }
   0x6   :  { %3566 = vst [vmem:[#allocation2 + $0x28] sm:$0xf] %v19411_v1  ;;  %3567 = vst [vmem:[#allocation2 + $0x2c] sm:$0x1] %v19411_v1  ;;  %2050 = vmatpush1.bf16.msra.mxu0 %v15060_v2  ;;  %v15609_v10 = vpack.c.bf16 %v24_v8, %v24_v8  ;;  %v15065_v17 = vld [vmem:[%s19402_s1 + $0x30] sm:$0xff]   ;;  %v15066_v20 = vld [vmem:[%s19402_s1 + $0x38] sm:$0xff]  }
   0x7   :  { %3568 = vst [vmem:[#allocation2 + $0x30] sm:$0xf] %v19411_v1  ;;  %3569 = vst [vmem:[#allocation2 + $0x34] sm:$0xf] %v19411_v1  ;;  %2051 = vmatprep.subr.bf16.mxu0 %v19411_v1  ;;  %v236_v12 = vshrl.u32 %v15607_v9, 16  ;;  %v238_v13 = vshll.u32 %v15607_v9, 16 }
   0x8   :  { %3570 = vst [vmem:[#allocation2 + $0x38] sm:$0x1] %v19411_v1  ;;  %3571 = vst [vmem:[#allocation2 + $0x3c] sm:$0xf] %v19411_v1  ;;  %v243_v14 = vshll.u32 %v15609_v10, 16  ;;  %v15067_v21 = vld [vmem:[%s19402_s1 + $0x40] sm:$0xff]  }
   0x9   :  { %3572 = vst [vmem:[#allocation2 + $0x40] sm:$0xf] %v19411_v1  ;;  %3573 = vst [vmem:[#allocation2 + $0x44] sm:$0x1] %v19411_v1  ;;  %v240_v15 = vrot.slane %v238_v13, 1  ;;  %v15068_v22 = vld [vmem:[%s19402_s1 + $0x48] sm:$0xff]  }
   0xa   :  { %3574 = vst [vmem:[#allocation2 + $0x48] sm:$0xf] %v19411_v1  ;;  %3575 = vst [vmem:[#allocation2 + $0x4c] sm:$0xf] %v19411_v1  ;;  %2052 = vmatpush1.bf16.msra.mxu0 %v15061_v3  ;;  %v245_v16 = vrot.slane %v243_v14, 1  ;;  %v15069_v23 = vld [vmem:[%s19402_s1 + $0x50] sm:$0xff]  }
   0xb   :  { %3576 = vst [vmem:[#allocation2 + $0x50] sm:$0x1] %v19411_v1  ;;  %3577 = vst [vmem:[#allocation2 + $0x54] sm:$0xf] %v19411_v1  ;;  %2053 = vmatprep.subr.bf16.mxu0 %v19411_v1  ;;  %v241_v18 = vor.u32 %v240_v15, %v236_v12  ;;  %v15070_v24 = vld [vmem:[%s19402_s1 + $0x58] sm:$0xff]   ;;  %v26_v26 = vld [vmem:[%s19401_s0 + $0x20] sm:$0xff] }
   0xc   :  { %3578 = vst [vmem:[#allocation2 + $0x58] sm:$0xf] %v19411_v1  ;;  %3579 = vst [vmem:[#allocation2 + $0x5c] sm:$0x1] %v19411_v1  ;;  %v25_v25 = vld [vmem:[%s19401_s0 + $0x18] sm:$0xff]  ;;  %v15071_v27 = vld [vmem:[%s19402_s1 + $0x60] sm:$0xff]  }
   0xd   :  { %3580 = vst [vmem:[#allocation2 + $0x60] sm:$0xf] %v19411_v1  ;;  %3581 = vst [vmem:[#allocation2 + $0x64] sm:$0xf] %v19411_v1  ;;  %v246_v19 = vsel %vm234_vm0, %v241_v18, %v245_v16  ;;  %v15653_v28 = vpack.c.bf16 %v26_v26, %v25_v25  ;;  %v27_v29 = vld [vmem:[%s19401_s0 + $0x28] sm:$0x3] }
   0xe   :  { %3582 = vst [vmem:[#allocation2 + $0x68] sm:$0x1] %v19411_v1  ;;  %3583 = vst [vmem:[#allocation2 + $0x6c] sm:$0xf] %v19411_v1  ;;  %2054 = vmatpush1.bf16.msra.mxu0 %v15062_v4  ;;  %2079 = vmatprep.mubr.bf16.mxu0 %v246_v19  ;;  %v15072_v30 = vld [vmem:[%s19402_s1 + $0x68] sm:$0xff]   ;;  %v28_v31 = vld [vmem:[%s19401_s0 + $0x30] sm:$0xff]  ;;  %v15668_v33 = vpack.c.bf16 %v27_v29, %v27_v29 }
   0xf   :  { %3584 = vst [vmem:[#allocation2 + $0x70] sm:$0xf] %v19411_v1  ;;  %3585 = vst [vmem:[#allocation2 + $0x74] sm:$0x1] %v19411_v1  ;;  %2055 = vmatprep.subr.bf16.mxu0 %v19411_v1  ;;  %v29_v32 = vld [vmem:[%s19401_s0 + $0x38] sm:$0xff]  ;;  %v250_v34 = vshll.u32 %v15653_v28, 16 }
  0x10   :  { %3586 = vst [vmem:[#allocation2 + $0x78] sm:$0xf] %v19411_v1  ;;  %3587 = vst [vmem:[#allocation2 + $0x7c] sm:$0xf] %v19411_v1  ;;  %v15671_v35 = vpack.c.bf16 %v29_v32, %v28_v31  ;;  %v15073_v36 = vld [vmem:[%s19402_s1 + $0x70] sm:$0xff]   ;;  %v248_v37 = vshrl.u32 %v15653_v28, 16 }
  0x11   :  { %3588 = vst [vmem:[#allocation2 + $0x80] sm:$0x1] %v19411_v1  ;;  %3589 = vst [vmem:[#allocation2 + $0x84] sm:$0xf] %v19411_v1  ;;  %v30_v38 = vld [vmem:[%s19401_s0 + $0x40] sm:$0x3] }
  0x12   :  { %3590 = vst [vmem:[#allocation2 + $0x88] sm:$0xf] %v19411_v1  ;;  %3591 = vst [vmem:[#allocation2 + $0x8c] sm:$0x1] %v19411_v1  ;;  %2056 = vmatpush1.bf16.msra.mxu0 %v15063_v5  ;;  %v252_v39 = vrot.slane %v250_v34, 1  ;;  %v255_v40 = vshll.u32 %v15668_v33, 16  ;;  %v15692_v45 = vpack.c.bf16 %v30_v38, %v30_v38 }
  0x13   :  { %3592 = vst [vmem:[#allocation2 + $0x90] sm:$0xf] %v19411_v1  ;;  %3593 = vst [vmem:[#allocation2 + $0x94] sm:$0xf] %v19411_v1  ;;  %2057 = vmatprep.subr.bf16.mxu0 %v19411_v1  ;;  %v15074_v41 = vld [vmem:[%s19402_s1 + $0x78] sm:$0xff]   ;;  %v31_v42 = vld [vmem:[%s19401_s0 + $0x48] sm:$0xff] }
  0x14   :  { %3594 = vst [vmem:[#allocation2 + $0x98] sm:$0x1] %v19411_v1  ;;  %3595 = vst [vmem:[#allocation2 + $0x9c] sm:$0xf] %v19411_v1  ;;  %v262_v43 = vshll.u32 %v15671_v35, 16  ;;  %v32_v44 = vld [vmem:[%s19401_s0 + $0x50] sm:$0xff]  ;;  %v253_v46 = vor.u32 %v252_v39, %v248_v37 }
  0x15   :  { %3596 = vst [vmem:[#allocation2 + $0xa0] sm:$0xf] %v19411_v1  ;;  %3597 = vst [vmem:[#allocation2 + $0xa4] sm:$0x1] %v19411_v1  ;;  %v257_v47 = vrot.slane %v255_v40, 1  ;;  %v15075_v48 = vld [vmem:[%s19402_s1 + $0x80] sm:$0xff]   ;;  %v15699_v50 = vpack.c.bf16 %v32_v44, %v31_v42 }
  0x16   :  { %3598 = vst [vmem:[#allocation2 + $0xa8] sm:$0xf] %v19411_v1  ;;  %3599 = vst [vmem:[#allocation2 + $0xac] sm:$0xf] %v19411_v1  ;;  %2058 = vmatpush1.bf16.msra.mxu0 %v15064_v11  ;;  %v260_v49 = vshrl.u32 %v15671_v35, 16  ;;  %v264_v51 = vrot.slane %v262_v43, 1 }
  0x17   :  { %3600 = vst [vmem:[#allocation2 + $0xb0] sm:$0x1] %v19411_v1  ;;  %3601 = vst [vmem:[#allocation2 + $0xb4] sm:$0xf] %v19411_v1  ;;  %2059 = vmatprep.subr.bf16.mxu0 %v19411_v1  ;;  %v267_v52 = vshll.u32 %v15692_v45, 16  ;;  %v15707_v54 = vsel %vm234_vm0, %v253_v46, %v257_v47  ;;  %v15076_v55 = vld [vmem:[%s19402_s1 + $0x88] sm:$0xff]  }
  0x18   :  { %3602 = vst [vmem:[#allocation2 + $0xb8] sm:$0xf] %v19411_v1  ;;  %3603 = vst [vmem:[#allocation2 + $0xbc] sm:$0x1] %v19411_v1  ;;  %v33_v53 = vld [vmem:[%s19401_s0 + $0x58] sm:$0x3]  ;;  %v265_v60 = vor.u32 %v264_v51, %v260_v49 }
  0x19   :  { %3604 = vst [vmem:[#allocation2 + $0xc0] sm:$0xf] %v19411_v1  ;;  %3605 = vst [vmem:[#allocation2 + $0xc4] sm:$0xf] %v19411_v1  ;;  %v274_v56 = vshll.u32 %v15699_v50, 16  ;;  %v34_v57 = vld [vmem:[%s19401_s0 + $0x60] sm:$0xff]  ;;  %v15721_v59 = vpack.c.bf16 %v33_v53, %v33_v53 }
  0x1a   :  { %3606 = vst [vmem:[#allocation2 + $0xc8] sm:$0x1] %v19411_v1  ;;  %3607 = vst [vmem:[#allocation2 + $0xcc] sm:$0xf] %v19411_v1  ;;  %2060 = vmatpush1.bf16.msra.mxu0 %v15065_v17  ;;  %v35_v58 = vld [vmem:[%s19401_s0 + $0x68] sm:$0xff]  ;;  %v269_v61 = vrot.slane %v267_v52, 1 }
  0x1b   :  { %3608 = vst [vmem:[#allocation2 + $0xd0] sm:$0xf] %v19411_v1  ;;  %3609 = vst [vmem:[#allocation2 + $0xd4] sm:$0x1] %v19411_v1  ;;  %2061 = vmatprep.subr.bf16.mxu0 %v19411_v1  ;;  %v36_v62 = vld [vmem:[%s19401_s0 + $0x70] sm:$0x3]  ;;  %v15727_v63 = vpack.c.bf16 %v35_v58, %v34_v57 }
  0x1c   :  { %3610 = vst [vmem:[#allocation2 + $0xd8] sm:$0xf] %v19411_v1  ;;  %3611 = vst [vmem:[#allocation2 + $0xdc] sm:$0xf] %v19411_v1  ;;  %v272_v0 = vshrl.u32 %v15699_v50, 16  ;;  %v276_v2 = vrot.slane %v274_v56, 1  ;;  %v15735_v5 = vsel %vm234_vm0, %v265_v60, %v269_v61  ;;  %v15750_v12 = vpack.c.bf16 %v36_v62, %v36_v62 }
  0x1d   :  { %3612 = vst [vmem:[#allocation2 + $0xe0] sm:$0x1] %v19411_v1  ;;  %3613 = vst [vmem:[#allocation2 + $0xe4] sm:$0xf] %v19411_v1  ;;  %v279_v3 = vshll.u32 %v15721_v59, 16  ;;  %v15077_v4 = vld [vmem:[%s19402_s1 + $0x90] sm:$0xff]  }
  0x1e   :  { %3614 = vst [vmem:[#allocation2 + $0xe8] sm:$0xf] %v19411_v1  ;;  %3615 = vst [vmem:[#allocation2 + $0xec] sm:$0x1] %v19411_v1  ;;  %2062 = vmatpush1.bf16.msra.mxu0 %v15066_v20  ;;  %v37_v6 = vld [vmem:[%s19401_s0 + $0x78] sm:$0xff]  ;;  %v38_v7 = vld [vmem:[%s19401_s0 + $0x80] sm:$0xff]  ;;  %v277_v13 = vor.u32 %v276_v2, %v272_v0 }
  0x1f   :  { %3616 = vst [vmem:[#allocation2 + $0xf0] sm:$0xf] %v19411_v1  ;;  %3617 = vst [vmem:[#allocation2 + $0xf4] sm:$0xf] %v19411_v1  ;;  %2063 = vmatprep.subr.bf16.mxu0 %v19411_v1  ;;  %v286_v8 = vshll.u32 %v15727_v63, 16  ;;  %v15078_v11 = vld [vmem:[%s19402_s1 + $0x98] sm:$0xff]   ;;  %v15756_v16 = vpack.c.bf16 %v38_v7, %v37_v6 }
  0x20   :  { %3618 = vst [vmem:[#allocation2 + $0xf8] sm:$0x1] %v19411_v1  ;;  %3619 = vst [vmem:[#allocation2 + $0xfc] sm:$0xf] %v19411_v1  ;;  %v281_v14 = vrot.slane %v279_v3, 1  ;;  %v284_v17 = vshrl.u32 %v15727_v63, 16 }
  0x21   :  { %3620 = vst [vmem:[#allocation2 + $0x100] sm:$0xf] %v19411_v1  ;;  %3621 = vst [vmem:[#allocation2 + $0x104] sm:$0x1] %v19411_v1  ;;  %v39_v15 = vld [vmem:[%s19401_s0 + $0x88] sm:$0x3] }
  0x22   :  { %3622 = vst [vmem:[#allocation2 + $0x108] sm:$0xf] %v19411_v1  ;;  %3623 = vst [vmem:[#allocation2 + $0x10c] sm:$0xf] %v19411_v1  ;;  %2064 = vmatpush1.bf16.msra.mxu0 %v15067_v21  ;;  %v288_v18 = vrot.slane %v286_v8, 1  ;;  %v291_v19 = vshll.u32 %v15750_v12, 16  ;;  %v15764_v21 = vsel %vm234_vm0, %v277_v13, %v281_v14  ;;  %v15779_v26 = vpack.c.bf16 %v39_v15, %v39_v15 }
  0x23   :  { %3624 = vst [vmem:[#allocation2 + $0x110] sm:$0x1] %v19411_v1  ;;  %3625 = vst [vmem:[#allocation2 + $0x114] sm:$0xf] %v19411_v1  ;;  %2065 = vmatprep.subr.bf16.mxu0 %v19411_v1  ;;  %v15079_v20 = vld [vmem:[%s19402_s1 + $0xa0] sm:$0xff]   ;;  %v15080_v25 = vld [vmem:[%s19402_s1 + $0xa8] sm:$0xff]  }
  0x24   :  { %3626 = vst [vmem:[#allocation2 + $0x118] sm:$0xf] %v19411_v1  ;;  %3627 = vst [vmem:[#allocation2 + $0x11c] sm:$0x1] %v19411_v1  ;;  %v293_v29 = vrot.slane %v291_v19, 1  ;;  %v296_v32 = vshrl.u32 %v15756_v16, 16 }
  0x25   :  { %3628 = vst [vmem:[#allocation2 + $0x120] sm:$0xf] %v19411_v1  ;;  %3629 = vst [vmem:[#allocation2 + $0x124] sm:$0xf] %v19411_v1  ;;  %v15081_v37 = vld [vmem:[%s19402_s1 + $0xb0] sm:$0xff]   ;;  %v43_v39 = vld [vmem:[%s19401_s0 + $0xa8] sm:$0xff] }
  0x26   :  { %3630 = vst [vmem:[#allocation2 + $0x128] sm:$0x1] %v19411_v1  ;;  %3631 = vst [vmem:[#allocation2 + $0x12c] sm:$0xf] %v19411_v1  ;;  %2066 = vmatpush1.bf16.msra.mxu0 %v15068_v22  ;;  %v40_v22 = vld [vmem:[%s19401_s0 + $0x90] sm:$0xff]  ;;  %v15082_v42 = vld [vmem:[%s19402_s1 + $0xb8] sm:$0xff]  }
  0x27   :  { %3632 = vst [vmem:[#allocation2 + $0x130] sm:$0xf] %v19411_v1  ;;  %3633 = vst [vmem:[#allocation2 + $0x134] sm:$0x1] %v19411_v1  ;;  %2067 = vmatprep.subr.bf16.mxu0 %v19411_v1  ;;  %v44_v40 = vld [vmem:[%s19401_s0 + $0xb0] sm:$0xff]  ;;  %v15083_v53 = vld [vmem:[%s19402_s1 + $0xc0] sm:$0xff]  }
  0x28   :  { %3634 = vst [vmem:[#allocation2 + $0x138] sm:$0xf] %v19411_v1  ;;  %3635 = vst [vmem:[#allocation2 + $0x13c] sm:$0xf] %v19411_v1  ;;  %v45_v47 = vld [vmem:[%s19401_s0 + $0xb8] sm:$0x3] }
  0x29   :  { %3636 = vst [vmem:[#allocation2 + $0x140] sm:$0x1] %v19411_v1  ;;  %3637 = vst [vmem:[#allocation2 + $0x144] sm:$0xf] %v19411_v1  ;;  %v46_v56 = vld [vmem:[%s19401_s0 + $0xc0] sm:$0xff]  ;;  %v47_v58 = vld [vmem:[%s19401_s0 + $0xc8] sm:$0xff]  ;;  %v15837_v61 = vpack.c.bf16 %v45_v47, %v45_v47 }
  0x2a   :  { %3638 = vst [vmem:[#allocation2 + $0x148] sm:$0xf] %v19411_v1  ;;  %3639 = vst [vmem:[#allocation2 + $0x14c] sm:$0x1] %v19411_v1  ;;  %2068 = vmatpush1.bf16.msra.mxu0 %v15069_v23  ;;  %v298_v23 = vshll.u32 %v15756_v16, 16  ;;  %v15084_v60 = vld [vmem:[%s19402_s1 + $0xc8] sm:$0xff]   ;;  %v15843_v3 = vpack.c.bf16 %v47_v58, %v46_v56 }
  0x2b   :  { %3640 = vst [vmem:[#allocation2 + $0x150] sm:$0xf] %v19411_v1  ;;  %3641 = vst [vmem:[#allocation2 + $0x154] sm:$0xf] %v19411_v1  ;;  %2069 = vmatprep.subr.bf16.mxu0 %v19411_v1  ;;  %v48_v2 = vld [vmem:[%s19401_s0 + $0xd0] sm:$0x3] }
  0x2c   :  { %3642 = vst [vmem:[#allocation2 + $0x158] sm:$0x1] %v19411_v1  ;;  %3643 = vst [vmem:[#allocation2 + $0x15c] sm:$0xf] %v19411_v1  ;;  %v300_v34 = vrot.slane %v298_v23, 1  ;;  %v327_v7 = vshll.u32 %v15837_v61, 16 }
  0x2d   :  { %3644 = vst [vmem:[#allocation2 + $0x160] sm:$0xf] %v19411_v1  ;;  %3645 = vst [vmem:[#allocation2 + $0x164] sm:$0x1] %v19411_v1  ;;  %v15085_v8 = vld [vmem:[%s19402_s1 + $0xd0] sm:$0xff]   ;;  %v49_v13 = vld [vmem:[%s19401_s0 + $0xd8] sm:$0xff] }
  0x2e   :  { %3646 = vst [vmem:[#allocation2 + $0x168] sm:$0xf] %v19411_v1  ;;  %3647 = vst [vmem:[#allocation2 + $0x16c] sm:$0xf] %v19411_v1  ;;  %2070 = vmatpush1.bf16.msra.mxu0 %v15070_v24  ;;  %v41_v24 = vld [vmem:[%s19401_s0 + $0x98] sm:$0xff]  ;;  %v301_v44 = vor.u32 %v300_v34, %v296_v32  ;;  %v334_v14 = vshll.u32 %v15843_v3, 16 }
  0x2f   :  { %3648 = vst [vmem:[#allocation2 + $0x170] sm:$0x1] %v19411_v1  ;;  %3649 = vst [vmem:[#allocation2 + $0x174] sm:$0xf] %v19411_v1  ;;  %2071 = vmatprep.subr.bf16.mxu0 %v19411_v1  ;;  %v15785_v31 = vpack.c.bf16 %v41_v24, %v40_v22  ;;  %v50_v15 = vld [vmem:[%s19401_s0 + $0xe0] sm:$0xff]  ;;  %v329_v19 = vrot.slane %v327_v7, 1 }
  0x30   :  { %3650 = vst [vmem:[#allocation2 + $0x178] sm:$0xf] %v19411_v1  ;;  %3651 = vst [vmem:[#allocation2 + $0x17c] sm:$0x1] %v19411_v1  ;;  %v15869_v22 = vpack.c.bf16 %v50_v15, %v49_v13  ;;  %v332_v23 = vshrl.u32 %v15843_v3, 16  ;;  %v336_v24 = vrot.slane %v334_v14, 1 }
  0x31   :  { %3652 = vst [vmem:[#allocation2 + $0x180] sm:$0xf] %v19411_v1  ;;  %3653 = vst [vmem:[#allocation2 + $0x184] sm:$0xf] %v19411_v1  ;;  %v308_v49 = vshrl.u32 %v15785_v31, 16  ;;  %v53_v32 = vld [vmem:[%s19401_s0 + $0xf8] sm:$0xff] }
  0x32   :  { %3654 = vst [vmem:[#allocation2 + $0x188] sm:$0x1] %v19411_v1  ;;  %3655 = vst [vmem:[#allocation2 + $0x18c] sm:$0xf] %v19411_v1  ;;  %2072 = vmatpush1.bf16.msra.mxu0 %v15071_v27  ;;  %v289_v27 = vor.u32 %v288_v18, %v284_v17  ;;  %v15863_v17 = vpack.c.bf16 %v48_v2, %v48_v2  ;;  %v15086_v34 = vld [vmem:[%s19402_s1 + $0xd8] sm:$0xff]   ;;  %v15087_v13 = vld [vmem:[%s19402_s1 + $0xe0] sm:$0xff]  }
  0x33   :  { %3656 = vst [vmem:[#allocation2 + $0x190] sm:$0xf] %v19411_v1  ;;  %3657 = vst [vmem:[#allocation2 + $0x194] sm:$0x1] %v19411_v1  ;;  %2073 = vmatprep.subr.bf16.mxu0 %v19411_v1  ;;  %v57_v58 = vld [vmem:[%s19401_s0 + $0x118] sm:$0x3] }
  0x34   :  { %3658 = vst [vmem:[#allocation2 + $0x198] sm:$0xf] %v19411_v1  ;;  %3659 = vst [vmem:[#allocation2 + $0x19c] sm:$0xf] %v19411_v1  ;;  %v15793_v38 = vsel %vm234_vm0, %v289_v27, %v293_v29  ;;  %v52_v29 = vld [vmem:[%s19401_s0 + $0xf0] sm:$0xff]  ;;  %v15934_v14 = vpack.c.bf16 %v57_v58, %v57_v58  ;;  %v65_v58 = vld [vmem:[%s19401_s0 + $0x158] sm:$0xff] }
  0x35   :  { %3660 = vst [vmem:[#allocation2 + $0x1a0] sm:$0x1] %v19411_v1  ;;  %3661 = vst [vmem:[#allocation2 + $0x1a4] sm:$0xf] %v19411_v1 }
  0x36   :  { %3662 = vst [vmem:[#allocation2 + $0x1a8] sm:$0xf] %v19411_v1  ;;  %3663 = vst [vmem:[#allocation2 + $0x1ac] sm:$0x1] %v19411_v1  ;;  %2074 = vmatpush1.bf16.msra.mxu0 %v15072_v30  ;;  %v42_v30 = vld [vmem:[%s19401_s0 + $0xa0] sm:$0x3] }
  0x37   :  { %2075 = vmatprep.subr.bf16.mxu0 %v19411_v1  ;;  %19501 = vst [vmem:[#allocation7_spill] sm:$0xff] %v15707_v54  ;;  %19502 = vst [vmem:[#allocation8_spill] sm:$0xff] %v15735_v5  ;;  %v15808_v43 = vpack.c.bf16 %v42_v30, %v42_v30  ;;  %v346_v30 = vshll.u32 %v15869_v22, 16 }
  0x38   :  { %19503 = vst [vmem:[#allocation9_spill] sm:$0xff] %v15764_v21  ;;  %19504 = vst [vmem:[#allocation10_spill] sm:$0xff] %v15793_v38 }
  0x39   :  { %v315_v52 = vshll.u32 %v15808_v43, 16 }
  0x3a   :  { %2076 = vmatpush1.bf16.msra.mxu0 %v15073_v36  ;;  %v303_v36 = vshll.u32 %v15779_v26, 16 }
  0x3b   :  { %2077 = vmatprep.subr.bf16.mxu0 %v19411_v1  ;;  %v317_v0 = vrot.slane %v315_v52, 1  ;;  %v56_v52 = vld [vmem:[%s19401_s0 + $0x110] sm:$0xff] }
  0x3c   :  { %v305_v46 = vrot.slane %v303_v36, 1 }
  0x3e   :  { %2078 = vmatpush1.bf16.msra.mxu0 %v15074_v41  ;;  %v310_v41 = vshll.u32 %v15785_v31, 16 }
  0x3f   :  { %2336 = vmatprep.subr.bf16.mxu0 %v19411_v1 }
  0x40   :  { %v312_v51 = vrot.slane %v310_v41, 1  ;;  %v15894_v41 = vpack.c.bf16 %v53_v32, %v52_v29 }
  0x41   :  { %2080 = vmatmul.mubr.bf16.vlgmr.msra.gmra.mrb[0].mxu0 %v15607_v9 }
  0x42   :  { %2337 = vmatpush1.bf16.msra.mxu0 %v15075_v48  ;;  %2087 = vmatprep.mubr.bf16.mxu0 %v15707_v54  ;;  %v15814_v48 = vpack.c.bf16 %v44_v40, %v43_v39  ;;  %v313_v62 = vor.u32 %v312_v51, %v308_v49  ;;  %v54_v40 = vld [vmem:[%s19401_s0 + $0x100] sm:$0x3]  ;;  %19508 = vst [vmem:[#allocation14_spill] sm:$0xff] %v15894_v41  ;;  %v55_v49 = vld [vmem:[%s19401_s0 + $0x108] sm:$0xff]  ;;  %v358_v51 = vshll.u32 %v15894_v41, 16 }
  0x43   :  { %2338 = vmatprep.subr.bf16.mxu0 %v19411_v1 }
  0x44   :  { %v322_v57 = vshll.u32 %v15814_v48, 16 }
  0x46   :  { %2339 = vmatpush1.bf16.msra.mxu0 %v15076_v55  ;;  %v15822_v55 = vsel %vm234_vm0, %v301_v44, %v305_v46  ;;  %v324_v6 = vrot.slane %v322_v57, 1  ;;  %v348_v44 = vrot.slane %v346_v30, 1  ;;  %v61_v30 = vld [vmem:[%s19401_s0 + $0x138] sm:$0xff] }
  0x47   :  { %2340 = vmatprep.subr.bf16.mxu0 %v19411_v1  ;;  %19505 = vst [vmem:[#allocation11_spill] sm:$0xff] %v15822_v55 }
  0x49   :  { %2088 = vmatmul.mubr.bf16.gmra.mrb[4].mxu0 %v15653_v28 }
  0x4a   :  { %2095 = vmatprep.mubr.bf16.mxu0 %v15735_v5  ;;  %2341 = vmatpush1.bf16.msra.mxu0 %v15077_v4  ;;  %v320_v4 = vshrl.u32 %v15814_v48, 16 }
  0x4b   :  { %2342 = vmatprep.subr.bf16.mxu0 %v19411_v1 }
  0x4c   :  { %v325_v18 = vor.u32 %v324_v6, %v320_v4  ;;  %v58_v6 = vld [vmem:[%s19401_s0 + $0x120] sm:$0xff] }
  0x4e   :  { %2343 = vmatpush1.bf16.msra.mxu0 %v15078_v11  ;;  %v15851_v11 = vsel %vm234_vm0, %v313_v62, %v317_v0  ;;  %v15874_v27 = vsel %vm234_vm0, %v325_v18, %v329_v19  ;;  %v356_v62 = vshrl.u32 %v15894_v41, 16  ;;  %v360_v0 = vrot.slane %v358_v51, 1  ;;  %v60_v19 = vld [vmem:[%s19401_s0 + $0x130] sm:$0x3] }
  0x4f   :  { %2344 = vmatprep.subr.bf16.mxu0 %v19411_v1  ;;  %19506 = vst [vmem:[#allocation12_spill] sm:$0xff] %v15851_v11  ;;  %19507 = vst [vmem:[#allocation13_spill] sm:$0xff] %v15874_v27 }
  0x50   :  { %v361_v15 = vor.u32 %v360_v0, %v356_v62  ;;  %v15088_v62 = vld [vmem:[%s19402_s1 + $0xe8] sm:$0xff]  }
  0x51   :  { %2096 = vmatmul.mubr.bf16.gmra.mrb[8].mxu0 %v15671_v35 }
  0x52   :  { %2103 = vmatprep.mubr.bf16.mxu0 %v15764_v21  ;;  %2345 = vmatpush1.bf16.msra.mxu0 %v15079_v20  ;;  %v51_v20 = vld [vmem:[%s19401_s0 + $0xe8] sm:$0x3] }
  0x53   :  { %2346 = vmatprep.subr.bf16.mxu0 %v19411_v1  ;;  %v15888_v36 = vpack.c.bf16 %v51_v20, %v51_v20 }
  0x55   :  { %v351_v46 = vshll.u32 %v15888_v36, 16 }
  0x56   :  { %2347 = vmatpush1.bf16.msra.mxu0 %v15080_v25  ;;  %v339_v25 = vshll.u32 %v15863_v17, 16 }
  0x57   :  { %2348 = vmatprep.subr.bf16.mxu0 %v19411_v1  ;;  %v353_v57 = vrot.slane %v351_v46, 1 }
  0x58   :  { %v341_v39 = vrot.slane %v339_v25, 1  ;;  %v375_v25 = vshll.u32 %v15934_v14, 16 }
  0x59   :  { %2104 = vmatmul.mubr.bf16.gmra.mrb[12].mxu0 %v15699_v50 }
  0x5a   :  { %2111 = vmatprep.mubr.bf16.mxu0 %v15793_v38  ;;  %2349 = vmatpush1.bf16.msra.mxu0 %v15081_v37  ;;  %v337_v37 = vor.u32 %v336_v24, %v332_v23 }
  0x5b   :  { %2350 = vmatprep.subr.bf16.mxu0 %v19411_v1 }
  0x5c   :  { %v15899_v47 = vsel %vm234_vm0, %v337_v37, %v341_v39  ;;  %v15956_v37 = vpack.c.bf16 %v60_v19, %v60_v19 }
  0x5d   :  { %19509 = vst [vmem:[#allocation15_spill] sm:$0xff] %v15899_v47 }
  0x5e   :  { %2351 = vmatpush1.bf16.msra.mxu0 %v15082_v42  ;;  %v344_v42 = vshrl.u32 %v15869_v22, 16  ;;  %v387_v51 = vshll.u32 %v15956_v37, 16 }
  0x5f   :  { %2352 = vmatprep.subr.bf16.mxu0 %v19411_v1 }
  0x60   :  { %v349_v56 = vor.u32 %v348_v44, %v344_v42  ;;  %v63_v42 = vld [vmem:[%s19401_s0 + $0x148] sm:$0x3] }
  0x61   :  { %2112 = vmatmul.mubr.bf16.gmra.mrb[16].mxu0 %v15727_v63  ;;  %v15980_v0 = vpack.c.bf16 %v63_v42, %v63_v42 }
  0x62   :  { %2119 = vmatprep.mubr.bf16.mxu0 %v15822_v55  ;;  %2353 = vmatpush1.bf16.msra.mxu0 %v15083_v53  ;;  %v15910_v53 = vpack.c.bf16 %v54_v40, %v54_v40  ;;  %v15920_v4 = vsel %vm234_vm0, %v349_v56, %v353_v57  ;;  %v377_v40 = vrot.slane %v375_v25, 1  ;;  %v64_v56 = vld [vmem:[%s19401_s0 + $0x150] sm:$0xff]  ;;  %v67_v25 = vld [vmem:[%s19401_s0 + $0x168] sm:$0xff] }
  0x63   :  { %2354 = vmatprep.subr.bf16.mxu0 %v19411_v1  ;;  %19511 = vst [vmem:[#allocation17_spill] sm:$0xff] %v15920_v4 }
  0x64   :  { %v363_v2 = vshll.u32 %v15910_v53, 16 }
  0x66   :  { %2355 = vmatpush1.bf16.msra.mxu0 %v15084_v60  ;;  %v15915_v60 = vpack.c.bf16 %v56_v52, %v55_v49  ;;  %v365_v18 = vrot.slane %v363_v2, 1 }
  0x67   :  { %2356 = vmatprep.subr.bf16.mxu0 %v19411_v1 }
  0x68   :  { %19510 = vst [vmem:[#allocation16_spill] sm:$0xff] %v15915_v60  ;;  %v370_v7 = vshll.u32 %v15915_v60, 16  ;;  %v368_v23 = vshrl.u32 %v15915_v60, 16  ;;  %v15945_v29 = vsel %vm234_vm0, %v361_v15, %v365_v18  ;;  %v399_v18 = vshll.u32 %v15980_v0, 16 }
  0x69   :  { %2120 = vmatmul.mubr.bf16.gmra.mrb[20].mxu0 %v15756_v16  ;;  %19513 = vst [vmem:[#allocation19_spill] sm:$0xff] %v15945_v29 }
  0x6a   :  { %2127 = vmatprep.mubr.bf16.mxu0 %v15851_v11  ;;  %2357 = vmatpush1.bf16.msra.mxu0 %v15085_v8  ;;  %v59_v8 = vld [vmem:[%s19401_s0 + $0x128] sm:$0xff]  ;;  %v372_v24 = vrot.slane %v370_v7, 1  ;;  %v66_v7 = vld [vmem:[%s19401_s0 + $0x160] sm:$0x3] }
  0x6b   :  { %2358 = vmatprep.subr.bf16.mxu0 %v19411_v1  ;;  %v15940_v20 = vpack.c.bf16 %v59_v8, %v58_v6  ;;  %v389_v6 = vrot.slane %v387_v51, 1  ;;  %v15986_v8 = vpack.c.bf16 %v65_v58, %v64_v56  ;;  %v69_v51 = vld [vmem:[%s19401_s0 + $0x178] sm:$0x3]  ;;  %v15089_v56 = vld [vmem:[%s19402_s1 + $0xf0] sm:$0xff]  }
  0x6c   :  { %v373_v39 = vor.u32 %v372_v24, %v368_v23  ;;  %v15996_v24 = vpack.c.bf16 %v66_v7, %v66_v7 }
  0x6d   :  { %19512 = vst [vmem:[#allocation18_spill] sm:$0xff] %v15940_v20  ;;  %v382_v32 = vshll.u32 %v15940_v20, 16  ;;  %v380_v46 = vshrl.u32 %v15940_v20, 16  ;;  %19516 = vst [vmem:[#allocation22_spill] sm:$0xff] %v15986_v8  ;;  %v406_v23 = vshll.u32 %v15986_v8, 16 }
  0x6e   :  { %2359 = vmatpush1.bf16.msra.mxu0 %v15086_v34  ;;  %v62_v34 = vld [vmem:[%s19401_s0 + $0x140] sm:$0xff]  ;;  %v15966_v52 = vsel %vm234_vm0, %v373_v39, %v377_v40  ;;  %v404_v39 = vshrl.u32 %v15986_v8, 16  ;;  %v411_v42 = vshll.u32 %v15996_v24, 16 }
  0x6f   :  { %2360 = vmatprep.subr.bf16.mxu0 %v19411_v1  ;;  %v15961_v44 = vpack.c.bf16 %v62_v34, %v61_v30  ;;  %v384_v49 = vrot.slane %v382_v32, 1  ;;  %19515 = vst [vmem:[#allocation21_spill] sm:$0xff] %v15966_v52  ;;  %v401_v32 = vrot.slane %v399_v18, 1  ;;  %v68_v34 = vld [vmem:[%s19401_s0 + $0x170] sm:$0xff]  ;;  %v408_v40 = vrot.slane %v406_v23, 1 }
  0x71   :  { %2128 = vmatmul.mubr.bf16.gmra.mrb[24].mxu0 %v15785_v31  ;;  %19514 = vst [vmem:[#allocation20_spill] sm:$0xff] %v15961_v44  ;;  %v394_v57 = vshll.u32 %v15961_v44, 16  ;;  %v385_v2 = vor.u32 %v384_v49, %v380_v46  ;;  %v16009_v49 = vpack.c.bf16 %v68_v34, %v67_v25 }
  0x72   :  { %2135 = vmatprep.mubr.bf16.mxu0 %v15874_v27  ;;  %2361 = vmatpush1.bf16.msra.mxu0 %v15087_v13  ;;  %v392_v13 = vshrl.u32 %v15961_v44, 16 }
  0x73   :  { %2362 = vmatprep.subr.bf16.mxu0 %v19411_v1  ;;  %v396_v15 = vrot.slane %v394_v57, 1  ;;  %v15991_v19 = vsel %vm234_vm0, %v385_v2, %v389_v6  ;;  %19519 = vst [vmem:[#allocation25_spill] sm:$0xff] %v16009_v49 }
  0x74   :  { %19517 = vst [vmem:[#allocation23_spill] sm:$0xff] %v15991_v19 }
  0x75   :  { %v397_v30 = vor.u32 %v396_v15, %v392_v13 }
  0x76   :  { %2363 = vmatpush1.bf16.msra.mxu0 %v15088_v62 }
  0x77   :  { %2364 = vmatprep.subr.bf16.mxu0 %v19411_v1  ;;  %v16007_v46 = vsel %vm234_vm0, %v397_v30, %v401_v32 }
  0x78   :  { %19518 = vst [vmem:[#allocation24_spill] sm:$0xff] %v16007_v46 }
  0x79   :  { %2136 = vmatmul.mubr.bf16.gmra.mrb[28].mxu0 %v15814_v48 }
  0x7a   :  { %2143 = vmatprep.mubr.bf16.mxu0 %v15899_v47 }
  0x81   :  { %2144 = vmatmul.mubr.bf16.gmra.mrb[32].mxu0 %v15843_v3 }
  0x82   :  { %2151 = vmatprep.mubr.bf16.mxu0 %v15920_v4 }
  0x89   :  { %2152 = vmatmul.mubr.bf16.gmra.mrb[36].mxu0 %v15869_v22 }
  0x8a   :  { %2159 = vmatprep.mubr.bf16.mxu0 %v15945_v29 }
  0x91   :  { %2160 = vmatmul.mubr.bf16.gmra.mrb[40].mxu0 %v15894_v41 }
  0x92   :  { %2167 = vmatprep.mubr.bf16.mxu0 %v15966_v52 }
  0x99   :  { %2168 = vmatmul.mubr.bf16.gmra.mrb[44].mxu0 %v15915_v60 }
  0x9a   :  { %2175 = vmatprep.mubr.bf16.mxu0 %v15991_v19 }
  0xa1   :  { %2176 = vmatmul.mubr.bf16.gmra.mrb[48].mxu0 %v15940_v20 }
  0xa2   :  { %10 = vsyncpa [#allocation5], 0  ;;  %2183 = vmatprep.mubr.bf16.mxu0 %v16007_v46  ;;  %v409_v57 = vor.u32 %v408_v40, %v404_v39  ;;  %v413_v58 = vrot.slane %v411_v42, 1  ;;  %v16019_v62 = vpack.c.bf16 %v69_v51, %v69_v51  ;;  %v418_v2 = vshll.u32 %v16009_v49, 16  ;;  %2365 = vmatpush1.bf16.msra.mxu0 %v15089_v56  ;;  %v76_v6 = vld [vmem:[%s19401_s0 + $0x1b0] sm:$0xff]  ;;  %v77_v7 = vld [vmem:[%s19401_s0 + $0x1b8] sm:$0xff] }
  0xa3   :  { %2366 = vmatprep.subr.bf16.mxu0 %v19411_v1  ;;  %v416_v13 = vshrl.u32 %v16009_v49, 16  ;;  %v16034_v25 = vpack.c.bf16 %v77_v7, %v76_v6  ;;  %v78_v30 = vld [vmem:[%s19401_s0 + $0x1c0] sm:$0x3]  ;;  %v79_v42 = vld [vmem:[%s19401_s0 + $0x1c8] sm:$0xff]  ;;  %v80_v51 = vld [vmem:[%s19401_s0 + $0x1d0] sm:$0xff]  ;;  %vm747_vm1 = vcmask 1046528  }
  0xa4   :  { %v16031_v15 = vsel %vm234_vm0, %v409_v57, %v413_v58  ;;  %v420_v18 = vrot.slane %v418_v2, 1  ;;  %v423_v23 = vshll.u32 %v16019_v62, 16  ;;  %v16041_v39 = vpack.c.bf16 %v78_v30, %v78_v30  ;;  %v81_v7 = vld [vmem:[%s19401_s0 + $0x1d8] sm:$0x3]  ;;  %v91_v19 = vld [vmem:[%s19401_s0 + $0x228] sm:$0xff]  ;;  %v92_v52 = vld [vmem:[%s19401_s0 + $0x230] sm:$0xff] }
  0xa5   :  { %19520 = vst [vmem:[#allocation26_spill] sm:$0xff] %v16031_v15  ;;  %v430_v40 = vshll.u32 %v16034_v25, 16  ;;  %v16050_v56 = vpack.c.bf16 %v80_v51, %v79_v42  ;;  %v428_v58 = vshrl.u32 %v16034_v25, 16  ;;  %vm5113_vm2 = vsmask.f32 3328 }
  0xa6   :  { %v421_v32 = vor.u32 %v420_v18, %v416_v13  ;;  %v425_v34 = vrot.slane %v423_v23, 1  ;;  %v435_v6 = vshll.u32 %v16041_v39, 16  ;;  %v15090_v13 = vld [vmem:[%s19402_s1 + $0xf8] sm:$0xff]   ;;  %v16065_v18 = vpack.c.bf16 %v81_v7, %v81_v7 }
  0xa7   :  { %v432_v2 = vrot.slane %v430_v40, 1  ;;  %v442_v23 = vshll.u32 %v16050_v56, 16  ;;  %2367 = vmatpush1.bf16.msra.mxu0 %v15090_v13  ;;  %v83_v40 = vld [vmem:[%s19401_s0 + $0x1e8] sm:$0xff]  ;;  %v440_v42 = vshrl.u32 %v16050_v56, 16  ;;  %vm5114_vm3 = vsmask.f32 7440 }
  0xa8   :  { %v16053_v57 = vsel %vm234_vm0, %v421_v32, %v425_v34  ;;  %v437_v32 = vrot.slane %v435_v6, 1  ;;  %v82_v34 = vld [vmem:[%s19401_s0 + $0x1e0] sm:$0xff]  ;;  %2625 = vmatprep.subr.bf16.mxu0 %v19411_v1  ;;  %v447_v7 = vshll.u32 %v16065_v18, 16  ;;  %vm17021_vm4 = vmor %vm5113_vm2, %vm5114_vm3  ;;  %vm4500_vm5 = vcmask 1043456  }
  0xa9   :  { %2184 = vmatmul.mubr.bf16.gmra.mrb[52].mxu0 %v15961_v44  ;;  %19521 = vst [vmem:[#allocation27_spill] sm:$0xff] %v16053_v57  ;;  %v433_v30 = vor.u32 %v432_v2, %v428_v58  ;;  %v444_v51 = vrot.slane %v442_v23, 1  ;;  %v16078_v58 = vpack.c.bf16 %v83_v40, %v82_v34  ;;  %v84_v2 = vld [vmem:[%s19401_s0 + $0x1f0] sm:$0x3]  ;;  %v85_v23 = vld [vmem:[%s19401_s0 + $0x1f8] sm:$0xff]  ;;  %vm4507_vm9 = vcmask 1040384  }
  0xaa   :  { %2191 = vmatprep.mubr.bf16.mxu0 %v16031_v15  ;;  %v449_v13 = vrot.slane %v447_v7, 1  ;;  %v16084_v15 = vpack.c.bf16 %v84_v2, %v84_v2  ;;  %vm4501_vm6 = vsmask.f32 7938  ;;  %vm3856_vm7 = vsmask.f32 256 }
  0xab   :  { %19522 = vst [vmem:[#allocation28_spill] sm:$0xff] %v16078_v58  ;;  %v445_v6 = vor.u32 %v444_v51, %v440_v42  ;;  %v454_v1 = vshll.u32 %v16078_v58, 16  ;;  %v452_v34 = vshrl.u32 %v16078_v58, 16  ;;  %v87_v51 = vld [vmem:[%s19401_s0 + $0x208] sm:$0x3]  ;;  %vm17145_vm10 = vmand %vm4500_vm5, %vm4501_vm6  ;;  %vm6236_vm13 = vcmask 1042432  }
  0xac   :  { %v459_v40 = vshll.u32 %v16084_v15, 16  ;;  %v16105_v46 = vpack.c.bf16 %v87_v51, %v87_v51  ;;  %v90_v51 = vld [vmem:[%s19401_s0 + $0x220] sm:$0x3]  ;;  %vm3857_vm8 = vsmask.f32 4368  ;;  %vm17159_vm12 = vmand %vm4507_vm9, %vm3856_vm7  ;;  %vm6237_vm14 = vcmask 1046532  }
  0xad   :  { %vm17152_vm11 = vmor %vm3856_vm7, %vm3857_vm8 }
  0xae   :  { %v461_v2 = vrot.slane %v459_v40, 1  ;;  %v471_v40 = vshll.u32 %v16105_v46, 16  ;;  %vm17220_vm15 = vmor %vm6236_vm13, %vm6237_vm14 }
  0xb1   :  { %2192 = vmatmul.mubr.bf16.gmra.mrb[56].mxu0 %v15986_v8 }
  0xb2   :  { %2199 = vmatprep.mubr.bf16.mxu0 %v16053_v57  ;;  %v438_v57 = vsel %vm234_vm0, %v433_v30, %v437_v32  ;;  %v86_v30 = vld [vmem:[%s19401_s0 + $0x200] sm:$0xff]  ;;  %v16094_v32 = vsel %vm234_vm0, %v445_v6, %v449_v13  ;;  %v89_v13 = vld [vmem:[%s19401_s0 + $0x218] sm:$0xff] }
  0xb3   :  { %19523 = vst [vmem:[#allocation29_spill] sm:$0xff] %v16094_v32  ;;  %v16098_v42 = vpack.c.bf16 %v86_v30, %v85_v23 }
  0xb5   :  { %19524 = vst [vmem:[#allocation30_spill] sm:$0xff] %v16098_v42  ;;  %v466_v6 = vshll.u32 %v16098_v42, 16 }
  0xb9   :  { %2200 = vmatmul.mubr.bf16.gmra.mrb[60].mxu0 %v16009_v49 }
  0xba   :  { %2207 = vmatprep.mubr.bf16.mxu0 %v438_v57  ;;  %v456_v57 = vrot.slane %v454_v1, 1  ;;  %v88_v1 = vld [vmem:[%s19401_s0 + $0x210] sm:$0xff] }
  0xbb   :  { %v16114_v23 = vpack.c.bf16 %v89_v13, %v88_v1 }
  0xbc   :  { %v457_v7 = vor.u32 %v456_v57, %v452_v34  ;;  %v464_v34 = vshrl.u32 %v16098_v42, 16  ;;  %v468_v57 = vrot.slane %v466_v6, 1  ;;  %v473_v6 = vrot.slane %v471_v40, 1  ;;  %v93_v40 = vld [vmem:[%s19401_s0 + $0x238] sm:$0x3] }
  0xbd   :  { %19525 = vst [vmem:[#allocation31_spill] sm:$0xff] %v16114_v23  ;;  %v478_v1 = vshll.u32 %v16114_v23, 16  ;;  %v16153_v4 = vpack.c.bf16 %v93_v40, %v93_v40 }
  0xbe   :  { %v16117_v30 = vsel %vm234_vm0, %v457_v7, %v461_v2  ;;  %v754_v7 = vrot.slane %v15671_v35, 1  ;;  %v755_v2 = vrot.slane %v15692_v45, 1  ;;  %v469_v13 = vor.u32 %v468_v57, %v464_v34 }
  0xbf   :  { %19526 = vst [vmem:[#allocation32_spill] sm:$0xff] %v16117_v30  ;;  %v480_v29 = vrot.slane %v478_v1, 1  ;;  %v16146_v57 = vpack.c.bf16 %v92_v52, %v91_v19  ;;  %v95_v52 = vld [vmem:[%s19401_s0 + $0x248] sm:$0xff] }
  0xc0   :  { %v16144_v34 = vsel %vm234_vm0, %v469_v13, %v473_v6  ;;  %v94_v13 = vld [vmem:[%s19401_s0 + $0x240] sm:$0xff] }
  0xc1   :  { %2208 = vmatmul.mubr.bf16.gmra.mrb[64].mxu0 %v16034_v25  ;;  %19527 = vst [vmem:[#allocation33_spill] sm:$0xff] %v16144_v34  ;;  %19528 = vst [vmem:[#allocation34_spill] sm:$0xff] %v16146_v57  ;;  %v490_v1 = vshll.u32 %v16146_v57, 16  ;;  %v488_v6 = vshrl.u32 %v16146_v57, 16 }
  0xc2   :  { %2215 = vmatprep.mubr.bf16.mxu0 %v16094_v32  ;;  %v16126_v32 = vpack.c.bf16 %v90_v51, %v90_v51  ;;  %v16138_v51 = vsel %vm747_vm1, %v754_v7, %v755_v2 }
  0xc3   :  { %13999 = vmatprep.mubr.bf16.mxu1 %v16138_v51 }
  0xc4   :  { %v483_v45 = vshll.u32 %v16126_v32, 16 }
  0xc6   :  { %v485_v2 = vrot.slane %v483_v45, 1  ;;  %v96_v45 = vld [vmem:[%s19401_s0 + $0x250] sm:$0x3] }
  0xc7   :  { %v16174_v27 = vpack.c.bf16 %v96_v45, %v96_v45  ;;  %v99_v45 = vld [vmem:[%s19401_s0 + $0x268] sm:$0x3] }
  0xc9   :  { %2216 = vmatmul.mubr.bf16.gmra.mrb[68].mxu0 %v16050_v56  ;;  %19531 = vst [vmem:[#allocation37_spill] sm:$0xff] %v16174_v27 }
  0xca   :  { %2223 = vmatprep.mubr.bf16.mxu0 %v16117_v30  ;;  %v476_v30 = vshrl.u32 %v16114_v23, 16 }
  0xcc   :  { %v481_v7 = vor.u32 %v480_v29, %v476_v30  ;;  %v495_v29 = vshll.u32 %v16153_v4, 16  ;;  %v16167_v30 = vpack.c.bf16 %v95_v52, %v94_v13 }
  0xce   :  { %v16163_v19 = vsel %vm234_vm0, %v481_v7, %v485_v2  ;;  %19530 = vst [vmem:[#allocation36_spill] sm:$0xff] %v16167_v30  ;;  %v497_v47 = vrot.slane %v495_v29, 1  ;;  %v502_v7 = vshll.u32 %v16167_v30, 16  ;;  %v97_v2 = vld [vmem:[%s19401_s0 + $0x258] sm:$0xff]  ;;  %v507_v29 = vshll.u32 %v16174_v27, 16 }
  0xcf   :  { %19529 = vst [vmem:[#allocation35_spill] sm:$0xff] %v16163_v19 }
  0xd1   :  { %2224 = vmatmul.mubr.bf16.gmra.mrb[72].mxu0 %v16078_v58 }
  0xd2   :  { %2231 = vmatprep.mubr.bf16.mxu0 %v16144_v34  ;;  %v492_v34 = vrot.slane %v490_v1, 1  ;;  %v98_v1 = vld [vmem:[%s19401_s0 + $0x260] sm:$0xff] }
  0xd3   :  { %v16183_v13 = vpack.c.bf16 %v98_v1, %v97_v2 }
  0xd4   :  { %v493_v40 = vor.u32 %v492_v34, %v488_v6  ;;  %v500_v34 = vshrl.u32 %v16167_v30, 16  ;;  %v504_v6 = vrot.slane %v502_v7, 1  ;;  %v101_v7 = vld [vmem:[%s19401_s0 + $0x278] sm:$0xff] }
  0xd5   :  { %19532 = vst [vmem:[#allocation38_spill] sm:$0xff] %v16183_v13  ;;  %v514_v2 = vshll.u32 %v16183_v13, 16  ;;  %v512_v11 = vshrl.u32 %v16183_v13, 16 }
  0xd6   :  { %v16186_v52 = vsel %vm234_vm0, %v493_v40, %v497_v47  ;;  %v505_v1 = vor.u32 %v504_v6, %v500_v34  ;;  %v509_v47 = vrot.slane %v507_v29, 1  ;;  %v100_v40 = vld [vmem:[%s19401_s0 + $0x270] sm:$0xff]  ;;  %v102_v34 = vld [vmem:[%s19401_s0 + $0x280] sm:$0x3] }
  0xd7   :  { %19533 = vst [vmem:[#allocation39_spill] sm:$0xff] %v16186_v52  ;;  %v516_v55 = vrot.slane %v514_v2, 1  ;;  %v16216_v21 = vpack.c.bf16 %v102_v34, %v102_v34 }
  0xd9   :  { %2232 = vmatmul.mubr.bf16.gmra.mrb[76].mxu0 %v16098_v42  ;;  %v517_v6 = vor.u32 %v516_v55, %v512_v11  ;;  %19537 = vst [vmem:[#allocation43_spill] sm:$0xff] %v16216_v21  ;;  %v105_v11 = vld [vmem:[%s19401_s0 + $0x298] sm:$0x3] }
  0xda   :  { %2239 = vmatprep.mubr.bf16.mxu0 %v16163_v19  ;;  %v16195_v19 = vpack.c.bf16 %v99_v45, %v99_v45  ;;  %v16207_v45 = vsel %vm234_vm0, %v505_v1, %v509_v47  ;;  %v103_v1 = vld [vmem:[%s19401_s0 + $0x288] sm:$0xff]  ;;  %v104_v47 = vld [vmem:[%s19401_s0 + $0x290] sm:$0xff]  ;;  %v16237_v54 = vpack.c.bf16 %v105_v11, %v105_v11 }
  0xdb   :  { %19535 = vst [vmem:[#allocation41_spill] sm:$0xff] %v16207_v45  ;;  %v16230_v55 = vpack.c.bf16 %v104_v47, %v103_v1  ;;  %v108_v11 = vld [vmem:[%s19401_s0 + $0x2b0] sm:$0x3] }
  0xdc   :  { %19534 = vst [vmem:[#allocation40_spill] sm:$0xff] %v16195_v19  ;;  %v519_v38 = vshll.u32 %v16195_v19, 16  ;;  %19540 = vst [vmem:[#allocation46_spill] sm:$0xff] %v16237_v54 }
  0xdd   :  { %19539 = vst [vmem:[#allocation45_spill] sm:$0xff] %v16230_v55 }
  0xde   :  { %v521_v29 = vrot.slane %v519_v38, 1  ;;  %v531_v38 = vshll.u32 %v16216_v21, 16 }
  0xe0   :  { %v533_v5 = vrot.slane %v531_v38, 1  ;;  %v543_v38 = vshll.u32 %v16237_v54, 16 }
  0xe1   :  { %2240 = vmatmul.mubr.bf16.gmra.mrb[80].mxu0 %v16114_v23 }
  0xe2   :  { %2247 = vmatprep.mubr.bf16.mxu0 %v16186_v52  ;;  %v16209_v52 = vpack.c.bf16 %v101_v7, %v100_v40  ;;  %v16226_v40 = vsel %vm234_vm0, %v517_v6, %v521_v29  ;;  %v538_v6 = vshll.u32 %v16230_v55, 16  ;;  %v106_v29 = vld [vmem:[%s19401_s0 + $0x2a0] sm:$0xff] }
  0xe3   :  { %19538 = vst [vmem:[#allocation44_spill] sm:$0xff] %v16226_v40 }
  0xe4   :  { %19536 = vst [vmem:[#allocation42_spill] sm:$0xff] %v16209_v52  ;;  %v526_v2 = vshll.u32 %v16209_v52, 16  ;;  %v524_v7 = vshrl.u32 %v16209_v52, 16 }
  0xe9   :  { %2248 = vmatmul.mubr.bf16.gmra.mrb[84].mxu0 %v16146_v57 }
  0xea   :  { %2255 = vmatprep.mubr.bf16.mxu0 %v16207_v45  ;;  %v528_v45 = vrot.slane %v526_v2, 1  ;;  %v107_v2 = vld [vmem:[%s19401_s0 + $0x2a8] sm:$0xff] }
  0xeb   :  { %v16246_v1 = vpack.c.bf16 %v107_v2, %v106_v29 }
  0xec   :  { %v529_v34 = vor.u32 %v528_v45, %v524_v7  ;;  %v536_v45 = vshrl.u32 %v16230_v55, 16  ;;  %v540_v7 = vrot.slane %v538_v6, 1  ;;  %v110_v6 = vld [vmem:[%s19401_s0 + $0x2c0] sm:$0xff] }
  0xed   :  { %19541 = vst [vmem:[#allocation47_spill] sm:$0xff] %v16246_v1  ;;  %v550_v29 = vshll.u32 %v16246_v1, 16  ;;  %v548_v54 = vshrl.u32 %v16246_v1, 16 }
  0xee   :  { %v16249_v47 = vsel %vm234_vm0, %v529_v34, %v533_v5  ;;  %v541_v2 = vor.u32 %v540_v7, %v536_v45  ;;  %v545_v5 = vrot.slane %v543_v38, 1  ;;  %v109_v34 = vld [vmem:[%s19401_s0 + $0x2b8] sm:$0xff]  ;;  %v111_v45 = vld [vmem:[%s19401_s0 + $0x2c8] sm:$0x3] }
  0xef   :  { %19542 = vst [vmem:[#allocation48_spill] sm:$0xff] %v16249_v47  ;;  %v552_v21 = vrot.slane %v550_v29, 1  ;;  %v16279_v27 = vpack.c.bf16 %v111_v45, %v111_v45 }
  0xf1   :  { %2256 = vmatmul.mubr.bf16.gmra.mrb[88].mxu0 %v16167_v30  ;;  %v553_v7 = vor.u32 %v552_v21, %v548_v54  ;;  %19546 = vst [vmem:[#allocation52_spill] sm:$0xff] %v16279_v27  ;;  %v567_v54 = vshll.u32 %v16279_v27, 16 }
  0xf2   :  { %2263 = vmatprep.mubr.bf16.mxu0 %v16226_v40  ;;  %v16258_v40 = vpack.c.bf16 %v108_v11, %v108_v11  ;;  %v16270_v11 = vsel %vm234_vm0, %v541_v2, %v545_v5  ;;  %v112_v2 = vld [vmem:[%s19401_s0 + $0x2d0] sm:$0xff]  ;;  %v113_v5 = vld [vmem:[%s19401_s0 + $0x2d8] sm:$0xff] }
  0xf3   :  { %19544 = vst [vmem:[#allocation50_spill] sm:$0xff] %v16270_v11  ;;  %v16293_v21 = vpack.c.bf16 %v113_v5, %v112_v2 }
  0xf4   :  { %19543 = vst [vmem:[#allocation49_spill] sm:$0xff] %v16258_v40  ;;  %v555_v19 = vshll.u32 %v16258_v40, 16  ;;  %v569_v40 = vrot.slane %v567_v54, 1 }
  0xf5   :  { %19548 = vst [vmem:[#allocation54_spill] sm:$0xff] %v16293_v21 }
  0xf6   :  { %v557_v38 = vrot.slane %v555_v19, 1  ;;  %v114_v19 = vld [vmem:[%s19401_s0 + $0x2e0] sm:$0x3] }
  0xf9   :  { %2264 = vmatmul.mubr.bf16.gmra.mrb[92].mxu0 %v16183_v13 }
  0xfa   :  { %2271 = vmatprep.mubr.bf16.mxu0 %v16249_v47  ;;  %v16272_v47 = vpack.c.bf16 %v110_v6, %v109_v34  ;;  %v16289_v34 = vsel %vm234_vm0, %v553_v7, %v557_v38  ;;  %v574_v7 = vshll.u32 %v16293_v21, 16  ;;  %v115_v38 = vld [vmem:[%s19401_s0 + $0x2e8] sm:$0xff] }
  0xfb   :  { %19547 = vst [vmem:[#allocation53_spill] sm:$0xff] %v16289_v34 }
  0xfc   :  { %19545 = vst [vmem:[#allocation51_spill] sm:$0xff] %v16272_v47  ;;  %v562_v29 = vshll.u32 %v16272_v47, 16  ;;  %v560_v6 = vshrl.u32 %v16272_v47, 16 }
 0x101   :  { %2272 = vmatmul.mubr.bf16.gmra.mrb[96].mxu0 %v16209_v52  ;;  %v16300_v52 = vpack.c.bf16 %v114_v19, %v114_v19  ;;  %v117_v19 = vld [vmem:[%s19401_s0 + $0x2f8] sm:$0x3] }
 0x102   :  { %2279 = vmatprep.mubr.bf16.mxu0 %v16270_v11  ;;  %v564_v11 = vrot.slane %v562_v29, 1  ;;  %v116_v29 = vld [vmem:[%s19401_s0 + $0x2f0] sm:$0xff] }
 0x103   :  { %19549 = vst [vmem:[#allocation55_spill] sm:$0xff] %v16300_v52  ;;  %v16309_v2 = vpack.c.bf16 %v116_v29, %v115_v38  ;;  %v579_v54 = vshll.u32 %v16300_v52, 16 }
 0x104   :  { %v565_v45 = vor.u32 %v564_v11, %v560_v6  ;;  %v572_v11 = vshrl.u32 %v16293_v21, 16  ;;  %v576_v6 = vrot.slane %v574_v7, 1  ;;  %v119_v7 = vld [vmem:[%s19401_s0 + $0x308] sm:$0xff] }
 0x105   :  { %19550 = vst [vmem:[#allocation56_spill] sm:$0xff] %v16309_v2  ;;  %v586_v38 = vshll.u32 %v16309_v2, 16  ;;  %v584_v52 = vshrl.u32 %v16309_v2, 16 }
 0x106   :  { %v16312_v5 = vsel %vm234_vm0, %v565_v45, %v569_v40  ;;  %v577_v29 = vor.u32 %v576_v6, %v572_v11  ;;  %v581_v40 = vrot.slane %v579_v54, 1  ;;  %v118_v45 = vld [vmem:[%s19401_s0 + $0x300] sm:$0xff]  ;;  %v120_v11 = vld [vmem:[%s19401_s0 + $0x310] sm:$0x3] }
 0x107   :  { %19551 = vst [vmem:[#allocation57_spill] sm:$0xff] %v16312_v5  ;;  %v588_v27 = vrot.slane %v586_v38, 1 }
 0x109   :  { %2280 = vmatmul.mubr.bf16.gmra.mrb[100].mxu0 %v16230_v55  ;;  %v589_v6 = vor.u32 %v588_v27, %v584_v52  ;;  %v16342_v55 = vpack.c.bf16 %v120_v11, %v120_v11 }
 0x10a   :  { %2287 = vmatprep.mubr.bf16.mxu0 %v16289_v34  ;;  %v16321_v34 = vpack.c.bf16 %v117_v19, %v117_v19  ;;  %v16333_v19 = vsel %vm234_vm0, %v577_v29, %v581_v40  ;;  %v121_v29 = vld [vmem:[%s19401_s0 + $0x318] sm:$0xff]  ;;  %v122_v40 = vld [vmem:[%s19401_s0 + $0x320] sm:$0xff] }
 0x10b   :  { %19553 = vst [vmem:[#allocation59_spill] sm:$0xff] %v16333_v19  ;;  %19555 = vst [vmem:[#allocation61_spill] sm:$0xff] %v16342_v55  ;;  %v603_v27 = vshll.u32 %v16342_v55, 16  ;;  %v16356_v52 = vpack.c.bf16 %v122_v40, %v121_v29 }
 0x10c   :  { %19552 = vst [vmem:[#allocation58_spill] sm:$0xff] %v16321_v34 }
 0x10d   :  { %19557 = vst [vmem:[#allocation63_spill] sm:$0xff] %v16356_v52 }
 0x111   :  { %2288 = vmatmul.mubr.bf16.gmra.mrb[104].mxu0 %v16246_v1  ;;  %v591_v1 = vshll.u32 %v16321_v34, 16  ;;  %v605_v34 = vrot.slane %v603_v27, 1 }
 0x112   :  { %2295 = vmatprep.mubr.bf16.mxu0 %v16312_v5  ;;  %v16335_v5 = vpack.c.bf16 %v119_v7, %v118_v45 }
 0x113   :  { %v593_v54 = vrot.slane %v591_v1, 1  ;;  %v123_v1 = vld [vmem:[%s19401_s0 + $0x328] sm:$0x3] }
 0x114   :  { %19554 = vst [vmem:[#allocation60_spill] sm:$0xff] %v16335_v5  ;;  %v598_v38 = vshll.u32 %v16335_v5, 16  ;;  %v596_v7 = vshrl.u32 %v16335_v5, 16 }
 0x115   :  { %v16352_v45 = vsel %vm234_vm0, %v589_v6, %v593_v54  ;;  %v610_v6 = vshll.u32 %v16356_v52, 16 }
 0x116   :  { %19556 = vst [vmem:[#allocation62_spill] sm:$0xff] %v16352_v45 }
 0x117   :  { %v612_v29 = vrot.slane %v610_v6, 1  ;;  %v15093_v6 = vld [vmem:[%s19402_s1 + $0x110] sm:$0xff]  }
 0x119   :  { %2296 = vmatmul.mubr.bf16.gmra.mrb[108].mxu0 %v16272_v47  ;;  %v16363_v47 = vpack.c.bf16 %v123_v1, %v123_v1  ;;  %v15091_v1 = vld [vmem:[%s19402_s1 + $0x100] sm:$0xff]  }
 0x11a   :  { %2303 = vmatprep.mubr.bf16.mxu0 %v16333_v19  ;;  %v600_v19 = vrot.slane %v598_v38, 1  ;;  %v608_v38 = vshrl.u32 %v16356_v52, 16 }
 0x11b   :  { %v615_v40 = vshll.u32 %v16363_v47, 16 }
 0x11c   :  { %v601_v11 = vor.u32 %v600_v19, %v596_v7  ;;  %v613_v55 = vor.u32 %v612_v29, %v608_v38  ;;  %v748_v7 = vrot.slane %v15607_v9, 1  ;;  %v757_v38 = vrot.slane %v15699_v50, 1 }
 0x11d   :  { %v758_v29 = vrot.slane %v15721_v59, 1  ;;  %v760_v59 = vrot.slane %v15727_v63, 1 }
 0x11e   :  { %v16367_v54 = vsel %vm234_vm0, %v601_v11, %v605_v34  ;;  %v749_v34 = vrot.slane %v15609_v10, 1  ;;  %v15092_v10 = vld [vmem:[%s19402_s1 + $0x108] sm:$0xff]   ;;  %v19559_v11 = vmov 0  }
 0x11f   :  { %19558 = vst [vmem:[#allocation64_spill] sm:$0xff] %v16367_v54 }
 0x120   :  { %v750_v27 = vsel %vm747_vm1, %v748_v7, %v749_v34  ;;  %v16419_v34 = vsel %vm747_vm1, %v757_v38, %v758_v29  ;;  %v15097_v7 = vld [vmem:[%s19402_s1 + $0x130] sm:$0xff]   ;;  %v767_v38 = vrot.slane %v15808_v43, 1 }
 0x121   :  { %2304 = vmatmul.mubr.bf16.gmra.mrb[112].mxu0 %v16293_v21 }
 0x122   :  { %2311 = vmatprep.mubr.bf16.mxu0 %v16352_v45  ;;  %v617_v45 = vrot.slane %v615_v40, 1  ;;  %v15096_v40 = vld [vmem:[%s19402_s1 + $0x128] sm:$0xff]  }
 0x124   :  { %v16374_v19 = vsel %vm234_vm0, %v613_v55, %v617_v45  ;;  %v751_v55 = vrot.slane %v15653_v28, 1  ;;  %v752_v45 = vrot.slane %v15668_v33, 1  ;;  %v15095_v33 = vld [vmem:[%s19402_s1 + $0x120] sm:$0xff]  }
 0x126   :  { %v16394_v9 = vsel %vm747_vm1, %v751_v55, %v752_v45  ;;  %v15099_v45 = vld [vmem:[%s19402_s1 + $0x140] sm:$0xff]  }
 0x129   :  { %2312 = vmatmul.mubr.bf16.gmra.mrb[116].mxu0 %v16309_v2 }
 0x12a   :  { %2319 = vmatprep.mubr.bf16.mxu0 %v16367_v54 }
 0x131   :  { %2320 = vmatmul.mubr.bf16.gmra.mrb[120].mxu0 %v16335_v5 }
 0x132   :  { %2327 = vmatprep.mubr.bf16.mxu0 %v16374_v19 }
 0x139   :  { %2328 = vmatmul.mubr.bf16.gmra.mrb[124].mxu0 %v16356_v52 }
 0x13a   :  { %2368 = vmatprep.mubr.bf16.mxu0 %v15653_v28  ;;  %v15094_v28 = vld [vmem:[%s19402_s1 + $0x118] sm:$0xff]  }
 0x141   :  { %2369 = vmatmul.mubr.bf16.vlgmr.msra.gmra.mrb[0].mxu0 %v750_v27  ;;  %v761_v27 = vrot.slane %v15750_v12, 1  ;;  %v763_v12 = vrot.slane %v15756_v16, 1 }
 0x142   :  { %2626 = vmatpush1.bf16.msra.mxu0 %v15091_v1  ;;  %2376 = vmatprep.mubr.bf16.mxu0 %v15671_v35  ;;  %v15098_v1 = vld [vmem:[%s19402_s1 + $0x138] sm:$0xff]  }
 0x143   :  { %2627 = vmatprep.subr.bf16.mxu0 %v19559_v11  ;;  %v16434_v55 = vsel %vm747_vm1, %v760_v59, %v761_v27  ;;  %v770_v59 = vrot.slane %v15837_v61, 1  ;;  %v772_v27 = vrot.slane %v15843_v3, 1  ;;  %v15103_v61 = vld [vmem:[%s19402_s1 + $0x160] sm:$0xff]  }
 0x146   :  { %2628 = vmatpush1.bf16.msra.mxu0 %v15092_v10  ;;  %v764_v10 = vrot.slane %v15779_v26, 1  ;;  %v766_v26 = vrot.slane %v15785_v31, 1 }
 0x147   :  { %2629 = vmatprep.subr.bf16.mxu0 %v19559_v11 }
 0x148   :  { %v16461_v29 = vsel %vm747_vm1, %v766_v26, %v767_v38  ;;  %v781_v38 = vrot.slane %v15915_v60, 1 }
 0x149   :  { %2377 = vmatmul.mubr.bf16.gmra.mrb[4].mxu0 %v16394_v9 }
 0x14a   :  { %2384 = vmatprep.mubr.bf16.mxu0 %v15699_v50  ;;  %2630 = vmatpush1.bf16.msra.mxu0 %v15093_v6  ;;  %v15100_v6 = vld [vmem:[%s19402_s1 + $0x148] sm:$0xff]  }
 0x14b   :  { %2631 = vmatprep.subr.bf16.mxu0 %v19559_v11 }
 0x14e   :  { %2632 = vmatpush1.bf16.msra.mxu0 %v15094_v28  ;;  %v16449_v28 = vsel %vm747_vm1, %v763_v12, %v764_v10  ;;  %v775_v12 = vrot.slane %v15869_v22, 1  ;;  %v776_v10 = vrot.slane %v15888_v36, 1  ;;  %v15104_v36 = vld [vmem:[%s19402_s1 + $0x168] sm:$0xff]  }
 0x14f   :  { %2633 = vmatprep.subr.bf16.mxu0 %v19559_v11 }
 0x151   :  { %2385 = vmatmul.mubr.bf16.gmra.mrb[8].mxu0 %v16138_v51 }
 0x152   :  { %2392 = vmatprep.mubr.bf16.mxu0 %v15727_v63  ;;  %2634 = vmatpush1.bf16.msra.mxu0 %v15095_v33  ;;  %v15101_v33 = vld [vmem:[%s19402_s1 + $0x150] sm:$0xff]  }
 0x153   :  { %2635 = vmatprep.subr.bf16.mxu0 %v19559_v11 }
 0x156   :  { %2636 = vmatpush1.bf16.msra.mxu0 %v15096_v40  ;;  %v15102_v40 = vld [vmem:[%s19402_s1 + $0x158] sm:$0xff]  }
 0x157   :  { %2637 = vmatprep.subr.bf16.mxu0 %v19559_v11 }
 0x159   :  { %2393 = vmatmul.mubr.bf16.gmra.mrb[12].mxu0 %v16419_v34 }
 0x15a   :  { %2400 = vmatprep.mubr.bf16.mxu0 %v15756_v16  ;;  %2638 = vmatpush1.bf16.msra.mxu0 %v15097_v7  ;;  %v769_v7 = vrot.slane %v15814_v48, 1 }
 0x15b   :  { %2639 = vmatprep.subr.bf16.mxu0 %v19559_v11 }
 0x15c   :  { %v16472_v43 = vsel %vm747_vm1, %v769_v7, %v770_v59  ;;  %v784_v7 = vrot.slane %v15940_v20, 1  ;;  %v785_v59 = vrot.slane %v15956_v37, 1 }
 0x15e   :  { %2640 = vmatpush1.bf16.msra.mxu0 %v15098_v1  ;;  %v773_v1 = vrot.slane %v15863_v17, 1  ;;  %v16490_v17 = vsel %vm747_vm1, %v775_v12, %v776_v10  ;;  %v790_v12 = vrot.slane %v15986_v8, 1  ;;  %v791_v10 = vrot.slane %v15996_v24, 1 }
 0x15f   :  { %2641 = vmatprep.subr.bf16.mxu0 %v19559_v11  ;;  %v793_v24 = vrot.slane %v16009_v49, 1 }
 0x161   :  { %2401 = vmatmul.mubr.bf16.gmra.mrb[16].mxu0 %v16434_v55 }
 0x162   :  { %2408 = vmatprep.mubr.bf16.mxu0 %v15785_v31  ;;  %2642 = vmatpush1.bf16.msra.mxu0 %v15099_v45  ;;  %v16479_v45 = vsel %vm747_vm1, %v772_v27, %v773_v1  ;;  %v16515_v27 = vsel %vm747_vm1, %v784_v7, %v785_v59  ;;  %v787_v1 = vrot.slane %v15961_v44, 1  ;;  %v796_v59 = vrot.slane %v16034_v25, 1 }
 0x163   :  { %2643 = vmatprep.subr.bf16.mxu0 %v19559_v11  ;;  %v802_v25 = vrot.slane %v16078_v58, 1 }
 0x166   :  { %2644 = vmatpush1.bf16.msra.mxu0 %v15100_v6  ;;  %v778_v6 = vrot.slane %v15894_v41, 1 }
 0x167   :  { %2645 = vmatprep.subr.bf16.mxu0 %v19559_v11 }
 0x169   :  { %2409 = vmatmul.mubr.bf16.gmra.mrb[20].mxu0 %v16449_v28 }
 0x16a   :  { %2416 = vmatprep.mubr.bf16.mxu0 %v15814_v48  ;;  %2646 = vmatpush1.bf16.msra.mxu0 %v15101_v33  ;;  %v779_v33 = vrot.slane %v15910_v53, 1 }
 0x16b   :  { %2647 = vmatprep.subr.bf16.mxu0 %v19559_v11 }
 0x16c   :  { %v16497_v26 = vsel %vm747_vm1, %v778_v6, %v779_v33  ;;  %v70_v6 = vld [vmem:[%s19401_s0 + $0x180] sm:$0xff]  ;;  %v16539_v33 = vsel %vm747_vm1, %v790_v12, %v791_v10 }
 0x16e   :  { %2648 = vmatpush1.bf16.msra.mxu0 %v15102_v40  ;;  %v782_v40 = vrot.slane %v15934_v14, 1  ;;  %v15105_v14 = vld [vmem:[%s19402_s1 + $0x170] sm:$0xff]  }
 0x16f   :  { %2649 = vmatprep.subr.bf16.mxu0 %v19559_v11 }
 0x170   :  { %v16508_v53 = vsel %vm747_vm1, %v781_v38, %v782_v40  ;;  %v15106_v38 = vld [vmem:[%s19402_s1 + $0x178] sm:$0xff]   ;;  %v794_v40 = vrot.slane %v16019_v62, 1  ;;  %v799_v62 = vrot.slane %v16050_v56, 1 }
 0x171   :  { %2417 = vmatmul.mubr.bf16.gmra.mrb[24].mxu0 %v16461_v29 }
 0x172   :  { %2424 = vmatprep.mubr.bf16.mxu0 %v15843_v3  ;;  %2650 = vmatpush1.bf16.msra.mxu0 %v15103_v61  ;;  %v788_v61 = vrot.slane %v15980_v0, 1  ;;  %v71_v0 = vld [vmem:[%s19401_s0 + $0x188] sm:$0xff]  ;;  %v16552_v7 = vsel %vm747_vm1, %v793_v24, %v794_v40  ;;  %v812_v24 = vrot.slane %v16153_v4, 1  ;;  %v817_v4 = vrot.slane %v16183_v13, 1 }
 0x173   :  { %2651 = vmatprep.subr.bf16.mxu0 %v19559_v11 }
 0x174   :  { %v16526_v37 = vsel %vm747_vm1, %v787_v1, %v788_v61  ;;  %v800_v61 = vrot.slane %v16065_v18, 1  ;;  %v806_v18 = vrot.slane %v16105_v46, 1  ;;  %v811_v46 = vrot.slane %v16146_v57, 1 }
 0x176   :  { %2652 = vmatpush1.bf16.msra.mxu0 %v15104_v36  ;;  %v16541_v36 = vpack.c.bf16 %v71_v0, %v70_v6  ;;  %v16563_v12 = vsel %vm747_vm1, %v799_v62, %v800_v61  ;;  %v809_v0 = vrot.slane %v16126_v32, 1  ;;  %v16591_v40 = vsel %vm747_vm1, %v811_v46, %v812_v24  ;;  %v19561_v62 = vld [vmem:[#allocation42_spill] sm:$0xff]  ;;  %v19562_v61 = vld [vmem:[#allocation40_spill] sm:$0xff]  ;;  %v19565_v24 = vld [vmem:[#allocation47_spill] sm:$0xff] }
 0x177   :  { %2653 = vmatprep.subr.bf16.mxu0 %v19559_v11  ;;  %v814_v32 = vrot.slane %v16167_v30, 1 }
 0x179   :  { %2425 = vmatmul.mubr.bf16.gmra.mrb[28].mxu0 %v16472_v43 }
 0x17a   :  { %2432 = vmatprep.mubr.bf16.mxu0 %v15869_v22  ;;  %2654 = vmatpush1.bf16.msra.mxu0 %v15105_v14  ;;  %v797_v14 = vrot.slane %v16041_v39, 1  ;;  %v803_v39 = vrot.slane %v16084_v15, 1  ;;  %v808_v15 = vrot.slane %v16114_v23, 1 }
 0x17b   :  { %2655 = vmatprep.subr.bf16.mxu0 %v19559_v11 }
 0x17c   :  { %v798_v1 = vsel %vm747_vm1, %v796_v59, %v797_v14  ;;  %v16570_v10 = vsel %vm747_vm1, %v802_v25, %v803_v39  ;;  %v19560_v59 = vld [vmem:[#allocation37_spill] sm:$0xff]  ;;  %v818_v25 = vrot.slane %v19562_v61, 1  ;;  %v19567_v61 = vld [vmem:[#allocation51_spill] sm:$0xff] }
 0x17d   :  { %v815_v14 = vrot.slane %v19560_v59, 1  ;;  %v19566_v59 = vld [vmem:[#allocation46_spill] sm:$0xff] }
 0x17e   :  { %2656 = vmatpush1.bf16.msra.mxu0 %v15106_v38  ;;  %v16584_v38 = vsel %vm747_vm1, %v808_v15, %v809_v0  ;;  %v16605_v39 = vsel %vm747_vm1, %v817_v4, %v818_v25  ;;  %v19564_v15 = vld [vmem:[#allocation43_spill] sm:$0xff]  ;;  %v826_v25 = vrot.slane %v19565_v24, 1 }
 0x17f   :  { %2914 = vmatprep.subr.bf16.mxu0 %v19559_v11  ;;  %v821_v0 = vrot.slane %v19564_v15, 1  ;;  %v19568_v15 = vld [vmem:[#allocation49_spill] sm:$0xff] }
 0x181   :  { %2433 = vmatmul.mubr.bf16.gmra.mrb[32].mxu0 %v16479_v45 }
 0x182   :  { %2440 = vmatprep.mubr.bf16.mxu0 %v15894_v41 }
 0x189   :  { %2441 = vmatmul.mubr.bf16.gmra.mrb[36].mxu0 %v16490_v17 }
 0x18a   :  { %2448 = vmatprep.mubr.bf16.mxu0 %v15915_v60  ;;  %v15127_v60 = vld [vmem:[%s19402_s1 + $0x1f8] sm:$0xff]  }
 0x191   :  { %2449 = vmatmul.mubr.bf16.gmra.mrb[40].mxu0 %v16497_v26 }
 0x192   :  { %2456 = vmatprep.mubr.bf16.mxu0 %v15940_v20 }
 0x199   :  { %2457 = vmatmul.mubr.bf16.gmra.mrb[44].mxu0 %v16508_v53 }
 0x19a   :  { %2464 = vmatprep.mubr.bf16.mxu0 %v15961_v44  ;;  %v15126_v44 = vld [vmem:[%s19402_s1 + $0x220] sm:$0xff]  }
 0x1a1   :  { %2465 = vmatmul.mubr.bf16.gmra.mrb[48].mxu0 %v16515_v27 }
 0x1a2   :  { %2472 = vmatprep.mubr.bf16.mxu0 %v15986_v8  ;;  %v15125_v8 = vld [vmem:[%s19402_s1 + $0x218] sm:$0xff]  }
 0x1a9   :  { %2473 = vmatmul.mubr.bf16.gmra.mrb[52].mxu0 %v16526_v37 }
 0x1aa   :  { %2480 = vmatprep.mubr.bf16.mxu0 %v16009_v49  ;;  %v19586_v49 = vld [vmem:[#allocation26_spill] sm:$0xff] }
 0x1b1   :  { %2481 = vmatmul.mubr.bf16.gmra.mrb[56].mxu0 %v16539_v33 }
 0x1b2   :  { %2488 = vmatprep.mubr.bf16.mxu0 %v16541_v36 }
 0x1b9   :  { %2489 = vmatmul.mubr.bf16.gmra.mrb[60].mxu0 %v16552_v7 }
 0x1ba   :  { %2496 = vmatprep.mubr.bf16.mxu0 %v16050_v56  ;;  %v805_v56 = vrot.slane %v16098_v42, 1 }
 0x1bc   :  { %v16577_v6 = vsel %vm747_vm1, %v805_v56, %v806_v18  ;;  %v19563_v56 = vld [vmem:[#allocation45_spill] sm:$0xff]  ;;  %v820_v18 = vrot.slane %v19561_v62, 1 }
 0x1be   :  { %v16612_v46 = vsel %vm747_vm1, %v820_v18, %v821_v0  ;;  %v827_v18 = vrot.slane %v19568_v15, 1  ;;  %v832_v15 = vrot.slane %v16293_v21, 1 }
 0x1c0   :  { %v16626_v0 = vsel %vm747_vm1, %v826_v25, %v827_v18 }
 0x1c1   :  { %2497 = vmatmul.mubr.bf16.gmra.mrb[64].mxu0 %v798_v1  ;;  %v16598_v1 = vsel %vm747_vm1, %v814_v32, %v815_v14  ;;  %v823_v32 = vrot.slane %v19563_v56, 1  ;;  %v824_v14 = vrot.slane %v19566_v59, 1  ;;  %v829_v59 = vrot.slane %v19567_v61, 1 }
 0x1c2   :  { %2504 = vmatprep.mubr.bf16.mxu0 %v16078_v58 }
 0x1c3   :  { %v16619_v4 = vsel %vm747_vm1, %v823_v32, %v824_v14 }
 0x1c9   :  { %2505 = vmatmul.mubr.bf16.gmra.mrb[68].mxu0 %v16563_v12 }
 0x1ca   :  { %2512 = vmatprep.mubr.bf16.mxu0 %v16098_v42  ;;  %v15124_v42 = vld [vmem:[%s19402_s1 + $0x210] sm:$0xff]  }
 0x1d1   :  { %2513 = vmatmul.mubr.bf16.gmra.mrb[72].mxu0 %v16570_v10 }
 0x1d2   :  { %2520 = vmatprep.mubr.bf16.mxu0 %v16114_v23  ;;  %v15122_v23 = vld [vmem:[%s19402_s1 + $0x1f0] sm:$0xff]  }
 0x1d9   :  { %2521 = vmatmul.mubr.bf16.gmra.mrb[76].mxu0 %v16577_v6 }
 0x1da   :  { %2528 = vmatprep.mubr.bf16.mxu0 %v16146_v57  ;;  %v19585_v57 = vld [vmem:[#allocation24_spill] sm:$0xff] }
 0x1e1   :  { %2529 = vmatmul.mubr.bf16.gmra.mrb[80].mxu0 %v16584_v38 }
 0x1e2   :  { %2536 = vmatprep.mubr.bf16.mxu0 %v16167_v30  ;;  %v19584_v30 = vld [vmem:[#allocation23_spill] sm:$0xff] }
 0x1e9   :  { %2537 = vmatmul.mubr.bf16.gmra.mrb[84].mxu0 %v16591_v40 }
 0x1ea   :  { %2544 = vmatprep.mubr.bf16.mxu0 %v16183_v13  ;;  %v15120_v13 = vld [vmem:[%s19402_s1 + $0x1e8] sm:$0xff]  }
 0x1f1   :  { %2545 = vmatmul.mubr.bf16.gmra.mrb[88].mxu0 %v16598_v1 }
 0x1f2   :  { %2552 = vmatprep.mubr.bf16.mxu0 %v19561_v62  ;;  %v19582_v62 = vld [vmem:[#allocation19_spill] sm:$0xff] }
 0x1f9   :  { %2553 = vmatmul.mubr.bf16.gmra.mrb[92].mxu0 %v16605_v39 }
 0x1fa   :  { %2560 = vmatprep.mubr.bf16.mxu0 %v19563_v56  ;;  %v19569_v56 = vld [vmem:[#allocation52_spill] sm:$0xff] }
 0x1fb   :  { %v830_v32 = vrot.slane %v19569_v56, 1  ;;  %v835_v56 = vrot.slane %v16309_v2, 1 }
 0x1fd   :  { %v16633_v14 = vsel %vm747_vm1, %v829_v59, %v830_v32 }
 0x201   :  { %2561 = vmatmul.mubr.bf16.gmra.mrb[96].mxu0 %v16612_v46 }
 0x202   :  { %2568 = vmatprep.mubr.bf16.mxu0 %v19565_v24  ;;  %v19570_v24 = vld [vmem:[#allocation55_spill] sm:$0xff] }
 0x203   :  { %v833_v25 = vrot.slane %v19570_v24, 1  ;;  %v838_v24 = vrot.slane %v16335_v5, 1 }
 0x205   :  { %v16640_v18 = vsel %vm747_vm1, %v832_v15, %v833_v25  ;;  %v124_v25 = vld [vmem:[%s19401_s0 + $0x330] sm:$0xff] }
 0x209   :  { %2569 = vmatmul.mubr.bf16.gmra.mrb[100].mxu0 %v16619_v4 }
 0x20a   :  { %2576 = vmatprep.mubr.bf16.mxu0 %v19567_v61  ;;  %v19571_v61 = vld [vmem:[#allocation58_spill] sm:$0xff] }
 0x20b   :  { %v836_v59 = vrot.slane %v19571_v61, 1 }
 0x20d   :  { %v16647_v32 = vsel %vm747_vm1, %v835_v56, %v836_v59  ;;  %v841_v59 = vrot.slane %v16356_v52, 1 }
 0x211   :  { %2577 = vmatmul.mubr.bf16.gmra.mrb[104].mxu0 %v16626_v0 }
 0x212   :  { %2584 = vmatprep.mubr.bf16.mxu0 %v16293_v21  ;;  %v19572_v21 = vld [vmem:[#allocation61_spill] sm:$0xff] }
 0x213   :  { %v839_v15 = vrot.slane %v19572_v21, 1  ;;  %v842_v21 = vrot.slane %v16363_v47, 1  ;;  %v15108_v47 = vld [vmem:[%s19402_s1 + $0x188] sm:$0xff]  }
 0x215   :  { %v16660_v61 = vsel %vm747_vm1, %v838_v24, %v839_v15  ;;  %v19573_v24 = vld [vmem:[#allocation7_spill] sm:$0xff]  ;;  %v19574_v15 = vld [vmem:[#allocation8_spill] sm:$0xff] }
 0x219   :  { %2585 = vmatmul.mubr.bf16.gmra.mrb[108].mxu0 %v16633_v14 }
 0x21a   :  { %2592 = vmatprep.mubr.bf16.mxu0 %v16309_v2  ;;  %v125_v2 = vld [vmem:[%s19401_s0 + $0x338] sm:$0xff] }
 0x21b   :  { %v16662_v56 = vpack.c.bf16 %v125_v2, %v124_v25  ;;  %v15107_v2 = vld [vmem:[%s19402_s1 + $0x180] sm:$0xff]  }
 0x21c   :  { %v15111_v25 = vld [vmem:[%s19402_s1 + $0x1a0] sm:$0xff]  }
 0x221   :  { %2593 = vmatmul.mubr.bf16.gmra.mrb[112].mxu0 %v16640_v18 }
 0x222   :  { %2600 = vmatprep.mubr.bf16.mxu0 %v16335_v5  ;;  %v16669_v5 = vsel %vm747_vm1, %v841_v59, %v842_v21  ;;  %v19575_v59 = vld [vmem:[#allocation9_spill] sm:$0xff]  ;;  %v15112_v21 = vld [vmem:[%s19402_s1 + $0x1a8] sm:$0xff]  }
 0x229   :  { %2601 = vmatmul.mubr.bf16.gmra.mrb[116].mxu0 %v16647_v32 }
 0x22a   :  { %2608 = vmatprep.mubr.bf16.mxu0 %v16356_v52  ;;  %v19581_v52 = vld [vmem:[#allocation17_spill] sm:$0xff] }
 0x231   :  { %2609 = vmatmul.mubr.bf16.gmra.mrb[120].mxu0 %v16660_v61 }
 0x232   :  { %2616 = vmatprep.mubr.bf16.mxu0 %v16662_v56 }
 0x239   :  { %2617 = vmatmul.mubr.bf16.gmra.mrb[124].mxu0 %v16669_v5 }
 0x23a   :  { %2657 = vmatprep.mubr.bf16.mxu0 %v16394_v9  ;;  %v15109_v9 = vld [vmem:[%s19402_s1 + $0x190] sm:$0xff]  }
 0x241   :  { %2658 = vmatmul.mubr.bf16.vlgmr.msra.gmra.mrb[0].mxu0 %v19573_v24  ;;  %v19576_v24 = vld [vmem:[#allocation10_spill] sm:$0xff] }
 0x242   :  { %2915 = vmatpush1.bf16.msra.mxu0 %v15107_v2  ;;  %2665 = vmatprep.mubr.bf16.mxu0 %v16138_v51  ;;  %v15110_v51 = vld [vmem:[%s19402_s1 + $0x198] sm:$0xff]   ;;  %v15113_v2 = vld [vmem:[%s19402_s1 + $0x1b0] sm:$0xff]  }
 0x243   :  { %2916 = vmatprep.subr.bf16.mxu0 %v19559_v11 }
 0x246   :  { %2917 = vmatpush1.bf16.msra.mxu0 %v15108_v47  ;;  %v15114_v47 = vld [vmem:[%s19402_s1 + $0x1b8] sm:$0xff]  }
 0x247   :  { %2918 = vmatprep.subr.bf16.mxu0 %v19559_v11 }
 0x249   :  { %2666 = vmatmul.mubr.bf16.gmra.mrb[4].mxu0 %v19574_v15 }
 0x24a   :  { %2673 = vmatprep.mubr.bf16.mxu0 %v16419_v34  ;;  %2919 = vmatpush1.bf16.msra.mxu0 %v15109_v9  ;;  %v15115_v9 = vld [vmem:[%s19402_s1 + $0x1c0] sm:$0xff]  }
 0x24b   :  { %2920 = vmatprep.subr.bf16.mxu0 %v19559_v11 }
 0x24e   :  { %2921 = vmatpush1.bf16.msra.mxu0 %v15110_v51  ;;  %v19577_v51 = vld [vmem:[#allocation11_spill] sm:$0xff] }
 0x24f   :  { %2922 = vmatprep.subr.bf16.mxu0 %v19559_v11 }
 0x251   :  { %2674 = vmatmul.mubr.bf16.gmra.mrb[8].mxu0 %v19575_v59 }
 0x252   :  { %2681 = vmatprep.mubr.bf16.mxu0 %v16434_v55  ;;  %2923 = vmatpush1.bf16.msra.mxu0 %v15111_v25  ;;  %v15116_v25 = vld [vmem:[%s19402_s1 + $0x1c8] sm:$0xff]  }
 0x253   :  { %2924 = vmatprep.subr.bf16.mxu0 %v19559_v11 }
 0x256   :  { %2925 = vmatpush1.bf16.msra.mxu0 %v15112_v21  ;;  %v15117_v21 = vld [vmem:[%s19402_s1 + $0x1d0] sm:$0xff]  }
 0x257   :  { %2926 = vmatprep.subr.bf16.mxu0 %v19559_v11 }
 0x259   :  { %2682 = vmatmul.mubr.bf16.gmra.mrb[12].mxu0 %v19576_v24 }
 0x25a   :  { %2689 = vmatprep.mubr.bf16.mxu0 %v16449_v28  ;;  %2927 = vmatpush1.bf16.msra.mxu0 %v15113_v2  ;;  %v19578_v2 = vld [vmem:[#allocation12_spill] sm:$0xff] }
 0x25b   :  { %2928 = vmatprep.subr.bf16.mxu0 %v19559_v11 }
 0x25e   :  { %2929 = vmatpush1.bf16.msra.mxu0 %v15114_v47  ;;  %v19579_v47 = vld [vmem:[#allocation13_spill] sm:$0xff] }
 0x25f   :  { %2930 = vmatprep.subr.bf16.mxu0 %v19559_v11 }
 0x261   :  { %2690 = vmatmul.mubr.bf16.gmra.mrb[16].mxu0 %v19577_v51 }
 0x262   :  { %2697 = vmatprep.mubr.bf16.mxu0 %v16461_v29  ;;  %2931 = vmatpush1.bf16.msra.mxu0 %v15115_v9  ;;  %v15118_v9 = vld [vmem:[%s19402_s1 + $0x1d8] sm:$0xff]  }
 0x263   :  { %2932 = vmatprep.subr.bf16.mxu0 %v19559_v11 }
 0x266   :  { %2933 = vmatpush1.bf16.msra.mxu0 %v15116_v25  ;;  %v19580_v25 = vld [vmem:[#allocation15_spill] sm:$0xff] }
 0x267   :  { %2934 = vmatprep.subr.bf16.mxu0 %v19559_v11 }
 0x269   :  { %2698 = vmatmul.mubr.bf16.gmra.mrb[20].mxu0 %v19578_v2 }
 0x26a   :  { %2705 = vmatprep.mubr.bf16.mxu0 %v16472_v43  ;;  %2935 = vmatpush1.bf16.msra.mxu0 %v15117_v21  ;;  %v15119_v21 = vld [vmem:[%s19402_s1 + $0x1e0] sm:$0xff]  }
 0x26b   :  { %2936 = vmatprep.subr.bf16.mxu0 %v19559_v11 }
 0x26e   :  { %2937 = vmatpush1.bf16.msra.mxu0 %v15118_v9  ;;  %v19583_v9 = vld [vmem:[#allocation21_spill] sm:$0xff] }
 0x26f   :  { %2938 = vmatprep.subr.bf16.mxu0 %v19559_v11 }
 0x271   :  { %2706 = vmatmul.mubr.bf16.gmra.mrb[24].mxu0 %v19579_v47 }
 0x272   :  { %2713 = vmatprep.mubr.bf16.mxu0 %v16479_v45  ;;  %2939 = vmatpush1.bf16.msra.mxu0 %v15119_v21  ;;  %v15121_v21 = vld [vmem:[%s19402_s1 + $0x200] sm:$0xff]  }
 0x273   :  { %2940 = vmatprep.subr.bf16.mxu0 %v19559_v11  ;;  %13983 = vmatprep.subr.bf16.mxu1 %v15121_v21 }
 0x274   :  { %13984 = vmatpush3.bf16.msra.mxu1 %v15121_v21  ;;  %v72_v21 = vld [vmem:[%s19401_s0 + $0x190] sm:$0x3] }
 0x275   :  { %v163_v58 = vpack.c.bf16 %v72_v21, %v72_v21 }
 0x276   :  { %2941 = vmatpush1.bf16.msra.mxu0 %v15120_v13  ;;  %v15123_v13 = vld [vmem:[%s19402_s1 + $0x208] sm:$0xff]  }
 0x277   :  { %2942 = vmatprep.subr.bf16.mxu0 %v19559_v11  ;;  %13985 = vmatprep.subr.bf16.mxu1 %v15123_v13 }
 0x278   :  { %13986 = vmatpush3.bf16.msra.mxu1 %v15123_v13  ;;  %v1002_v13 = vrot.slane %v16541_v36, 1 }
 0x279   :  { %2714 = vmatmul.mubr.bf16.gmra.mrb[28].mxu0 %v19580_v25  ;;  %13987 = vmatprep.subr.bf16.mxu1 %v15124_v42 }
 0x27a   :  { %2721 = vmatprep.mubr.bf16.mxu0 %v16490_v17  ;;  %2943 = vmatpush1.bf16.msra.mxu0 %v15122_v23  ;;  %v943_v23 = vshll.u32 %v16541_v36, 16 }
 0x27b   :  { %2944 = vmatprep.subr.bf16.mxu0 %v19559_v11 }
 0x27c   :  { %13988 = vmatpush3.bf16.msra.mxu1 %v15124_v42  ;;  %v941_v42 = vshrl.u32 %v16541_v36, 16  ;;  %v945_v21 = vrot.slane %v943_v23, 1 }
 0x27d   :  { %13989 = vmatprep.subr.bf16.mxu1 %v15125_v8 }
 0x27e   :  { %2945 = vmatpush1.bf16.msra.mxu0 %v15127_v60  ;;  %v19588_v60 = vld [vmem:[#allocation29_spill] sm:$0xff] }
 0x280   :  { %13990 = vmatpush3.bf16.msra.mxu1 %v15125_v8  ;;  %v946_v8 = vor.u32 %v945_v21, %v941_v42  ;;  %v1005_v42 = vrot.slane %v16662_v56, 1 }
 0x281   :  { %2722 = vmatmul.mubr.bf16.gmra.mrb[32].mxu0 %v19581_v52  ;;  %13991 = vmatprep.subr.bf16.mxu1 %v15126_v44 }
 0x282   :  { %2729 = vmatprep.mubr.bf16.mxu0 %v16497_v26 }
 0x284   :  { %13992 = vmatpush3.bf16.msra.mxu1 %v15126_v44 }
 0x289   :  { %2730 = vmatmul.mubr.bf16.gmra.mrb[36].mxu0 %v19582_v62 }
 0x28a   :  { %2737 = vmatprep.mubr.bf16.mxu0 %v16508_v53 }
 0x291   :  { %2738 = vmatmul.mubr.bf16.gmra.mrb[40].mxu0 %v19583_v9  ;;  %v15128_v9 = vld [vmem:[%s19402_s1 + $0x228] sm:$0xff]  }
 0x292   :  { %2745 = vmatprep.mubr.bf16.mxu0 %v16515_v27  ;;  %13993 = vmatprep.subr.bf16.mxu1 %v15128_v9 }
 0x293   :  { %13994 = vmatpush3.bf16.msra.mxu1 %v15128_v9  ;;  %v955_v9 = vshll.u32 %v16662_v56, 16 }
 0x299   :  { %2746 = vmatmul.mubr.bf16.gmra.mrb[44].mxu0 %v19584_v30  ;;  %v19587_v30 = vld [vmem:[#allocation27_spill] sm:$0xff] }
 0x29a   :  { %2753 = vmatprep.mubr.bf16.mxu0 %v16526_v37 }
 0x2a1   :  { %2754 = vmatmul.mubr.bf16.gmra.mrb[48].mxu0 %v19585_v57  ;;  %v1003_v57 = vrot.slane %v163_v58, 1 }
 0x2a2   :  { %2761 = vmatprep.mubr.bf16.mxu0 %v16539_v33 }
 0x2a3   :  { %v1004_v20 = vsel %vm747_vm1, %v1002_v13, %v1003_v57  ;;  %v15130_v57 = vld [vmem:[%s19402_s1 + $0x238] sm:$0xff]  }
 0x2a9   :  { %2762 = vmatmul.mubr.bf16.gmra.mrb[52].mxu0 %v19586_v49  ;;  %v948_v49 = vshll.u32 %v163_v58, 16  ;;  %v15129_v58 = vld [vmem:[%s19402_s1 + $0x230] sm:$0xff]  }
 0x2aa   :  { %2769 = vmatprep.mubr.bf16.mxu0 %v16552_v7  ;;  %13995 = vmatprep.subr.bf16.mxu1 %v15129_v58 }
 0x2ab   :  { %v950_v41 = vrot.slane %v948_v49, 1  ;;  %13996 = vmatpush3.bf16.msra.mxu1 %v15129_v58  ;;  %v19590_v49 = vld [vmem:[#allocation33_spill] sm:$0xff] }
 0x2ac   :  { %13997 = vmatprep.subr.bf16.mxu1 %v15130_v57 }
 0x2ad   :  { %v16794_v44 = vsel %vm234_vm0, %v946_v8, %v950_v41  ;;  %v19589_v41 = vld [vmem:[#allocation32_spill] sm:$0xff] }
 0x2af   :  { %13998 = vmatpush3.bf16.msra.mxu1 %v15130_v57  ;;  %v953_v57 = vshrl.u32 %v16662_v56, 16 }
 0x2b0   :  { %11592 = vmatprep.subr.bf16.mxu1 %v19559_v11 }
 0x2b1   :  { %2770 = vmatmul.mubr.bf16.gmra.mrb[56].mxu0 %v19587_v30 }
 0x2b2   :  { %2777 = vmatprep.mubr.bf16.mxu0 %v1004_v20  ;;  %14000 = vmatmul.mubr.bf16.vlgmr.msra.gmra.mrb[0].mxu1 %v16419_v34  ;;  %v19591_v34 = vld [vmem:[#allocation35_spill] sm:$0xff] }
 0x2b3   :  { %14003 = vmatprep.mubr.bf16.mxu1 %v16434_v55  ;;  %v19592_v55 = vld [vmem:[#allocation39_spill] sm:$0xff] }
 0x2b9   :  { %2778 = vmatmul.mubr.bf16.gmra.mrb[60].mxu0 %v16794_v44 }
 0x2ba   :  { %2785 = vmatprep.mubr.bf16.mxu0 %v16563_v12  ;;  %14004 = vmatmul.mubr.bf16.gmra.mrb[4].mxu1 %v16449_v28  ;;  %v19593_v28 = vld [vmem:[#allocation41_spill] sm:$0xff]  ;;  %v75_v12 = vld [vmem:[%s19401_s0 + $0x1a8] sm:$0x3] }
 0x2bb   :  { %14007 = vmatprep.mubr.bf16.mxu1 %v16461_v29  ;;  %v19594_v29 = vld [vmem:[#allocation44_spill] sm:$0xff]  ;;  %v16858_v13 = vpack.c.bf16 %v75_v12, %v75_v12 }
 0x2bd   :  { %v1137_v58 = vrot.slane %v16858_v13, 1 }
 0x2c1   :  { %2786 = vmatmul.mubr.bf16.gmra.mrb[64].mxu0 %v19588_v60  ;;  %v957_v60 = vrot.slane %v955_v9, 1  ;;  %v1082_v9 = vshll.u32 %v16858_v13, 16 }
 0x2c2   :  { %2793 = vmatprep.mubr.bf16.mxu0 %v16570_v10  ;;  %14008 = vmatmul.mubr.bf16.gmra.mrb[8].mxu1 %v16472_v43  ;;  %v19595_v43 = vld [vmem:[#allocation48_spill] sm:$0xff] }
 0x2c3   :  { %14011 = vmatprep.mubr.bf16.mxu1 %v16479_v45  ;;  %v19596_v45 = vld [vmem:[#allocation50_spill] sm:$0xff] }
 0x2c9   :  { %2794 = vmatmul.mubr.bf16.gmra.mrb[68].mxu0 %v19589_v41 }
 0x2ca   :  { %2801 = vmatprep.mubr.bf16.mxu0 %v16577_v6  ;;  %14012 = vmatmul.mubr.bf16.gmra.mrb[12].mxu1 %v16490_v17  ;;  %v19597_v17 = vld [vmem:[#allocation53_spill] sm:$0xff] }
 0x2cb   :  { %14015 = vmatprep.mubr.bf16.mxu1 %v16497_v26  ;;  %v19598_v26 = vld [vmem:[#allocation57_spill] sm:$0xff] }
 0x2d1   :  { %2802 = vmatmul.mubr.bf16.gmra.mrb[72].mxu0 %v19590_v49 }
 0x2d2   :  { %2809 = vmatprep.mubr.bf16.mxu0 %v16584_v38  ;;  %14016 = vmatmul.mubr.bf16.gmra.mrb[16].mxu1 %v16508_v53  ;;  %v19600_v53 = vld [vmem:[#allocation62_spill] sm:$0xff] }
 0x2d3   :  { %14019 = vmatprep.mubr.bf16.mxu1 %v16515_v27  ;;  %v126_v27 = vld [vmem:[%s19401_s0 + $0x340] sm:$0x3] }
 0x2d9   :  { %2810 = vmatmul.mubr.bf16.gmra.mrb[76].mxu0 %v19591_v34 }
 0x2da   :  { %2817 = vmatprep.mubr.bf16.mxu0 %v16591_v40  ;;  %14020 = vmatmul.mubr.bf16.gmra.mrb[20].mxu1 %v16526_v37  ;;  %v199_v37 = vpack.c.bf16 %v126_v27, %v126_v27 }
 0x2db   :  { %14023 = vmatprep.mubr.bf16.mxu1 %v16539_v33  ;;  %v73_v33 = vld [vmem:[%s19401_s0 + $0x198] sm:$0xff] }
 0x2dc   :  { %v1006_v21 = vrot.slane %v199_v37, 1  ;;  %v960_v27 = vshll.u32 %v199_v37, 16 }
 0x2de   :  { %v962_v12 = vrot.slane %v960_v27, 1  ;;  %v5017_v27 = vld [vmem:[#allocation2] sm:$0xf] }
 0x2df   :  { %v5117_v13 = vshrl.u32 %v5017_v27, 16 }
 0x2e1   :  { %2818 = vmatmul.mubr.bf16.gmra.mrb[80].mxu0 %v19592_v55 }
 0x2e2   :  { %2825 = vmatprep.mubr.bf16.mxu0 %v16598_v1  ;;  %14024 = vmatmul.mubr.bf16.gmra.mrb[24].mxu1 %v16552_v7  ;;  %v74_v7 = vld [vmem:[%s19401_s0 + $0x1a0] sm:$0xff] }
 0x2e3   :  { %14027 = vmatprep.mubr.bf16.mxu1 %v1004_v20  ;;  %v19599_v20 = vld [vmem:[#allocation59_spill] sm:$0xff]  ;;  %v16856_v23 = vpack.c.bf16 %v74_v7, %v73_v33  ;;  %v15131_v33 = vld [vmem:[%s19404_s3] sm:$0xff]   ;;  %v958_v7 = vor.u32 %v957_v60, %v953_v57 }
 0x2e4   :  { %11593 = vmatpush1.bf16.msra.mxu1 %v15131_v33  ;;  %v5018_v33 = vld [vmem:[#allocation2 + $0x4] sm:$0xf] }
 0x2e5   :  { %v1136_v8 = vrot.slane %v16856_v23, 1  ;;  %11594 = vmatprep.subr.bf16.mxu1 %v19559_v11  ;;  %v16873_v37 = vsel %vm234_vm0, %v958_v7, %v962_v12  ;;  %v5120_v7 = vshll.u32 %v5017_v27, 16  ;;  %v5126_v12 = vshll.u32 %v5018_v33, 16  ;;  %v15154_v27 = vld [vmem:[%s19404_s3 + $0x228] sm:$0xff]  }
 0x2e9   :  { %2826 = vmatmul.mubr.bf16.gmra.mrb[84].mxu0 %v19593_v28 }
 0x2ea   :  { %2833 = vmatprep.mubr.bf16.mxu0 %v16605_v39 }
 0x2f1   :  { %2834 = vmatmul.mubr.bf16.gmra.mrb[88].mxu0 %v19594_v29 }
 0x2f2   :  { %2841 = vmatprep.mubr.bf16.mxu0 %v16612_v46 }
 0x2f9   :  { %2842 = vmatmul.mubr.bf16.gmra.mrb[92].mxu0 %v19595_v43 }
 0x2fa   :  { %2849 = vmatprep.mubr.bf16.mxu0 %v16619_v4 }
 0x301   :  { %2850 = vmatmul.mubr.bf16.gmra.mrb[96].mxu0 %v19596_v45 }
 0x302   :  { %2857 = vmatprep.mubr.bf16.mxu0 %v16626_v0 }
 0x309   :  { %2858 = vmatmul.mubr.bf16.gmra.mrb[100].mxu0 %v19597_v17 }
 0x30a   :  { %2865 = vmatprep.mubr.bf16.mxu0 %v16633_v14 }
 0x311   :  { %2866 = vmatmul.mubr.bf16.gmra.mrb[104].mxu0 %v19598_v26 }
 0x312   :  { %2873 = vmatprep.mubr.bf16.mxu0 %v16640_v18 }
 0x319   :  { %2874 = vmatmul.mubr.bf16.gmra.mrb[108].mxu0 %v19599_v20 }
 0x31a   :  { %2881 = vmatprep.mubr.bf16.mxu0 %v16647_v32 }
 0x321   :  { %2882 = vmatmul.mubr.bf16.gmra.mrb[112].mxu0 %v19600_v53  ;;  %v1007_v53 = vsel %vm747_vm1, %v1005_v42, %v1006_v21  ;;  %v15144_v42 = vld [vmem:[%s19404_s3 + $0x68] sm:$0xff]  }
 0x322   :  { %2889 = vmatprep.mubr.bf16.mxu0 %v16660_v61 }
 0x329   :  { %2890 = vmatmul.mubr.bf16.gmra.mrb[116].mxu0 %v16367_v54  ;;  %v1138_v54 = vsel %vm747_vm1, %v1136_v8, %v1137_v58  ;;  %v129_v8 = vld [vmem:[%s19401_s0 + $0x358] sm:$0x3] }
 0x32a   :  { %2897 = vmatprep.mubr.bf16.mxu0 %v16669_v5  ;;  %14028 = vmatmul.mubr.bf16.gmra.mrb[28].mxu1 %v1138_v54  ;;  %v15132_v54 = vld [vmem:[%s19404_s3 + $0x8] sm:$0xff]   ;;  %v17000_v57 = vpack.c.bf16 %v129_v8, %v129_v8  ;;  %v15153_v8 = vld [vmem:[%s19404_s3 + $0x220] sm:$0xff]  }
 0x32b   :  { %14031 = vmatprep.mubr.bf16.mxu1 %v16570_v10  ;;  %11595 = vmatpush1.bf16.msra.mxu1 %v15132_v54  ;;  %v15133_v10 = vld [vmem:[%s19404_s3 + $0x10] sm:$0xff]   ;;  %v5130_v54 = vshrl.u32 %v5018_v33, 16  ;;  %v15152_v33 = vld [vmem:[%s19404_s3 + $0x80] sm:$0xff]  }
 0x32c   :  { %11596 = vmatprep.subr.bf16.mxu1 %v19559_v11 }
 0x32f   :  { %11597 = vmatpush1.bf16.msra.mxu1 %v15133_v10  ;;  %v1140_v10 = vrot.slane %v17000_v57, 1 }
 0x330   :  { %11598 = vmatprep.subr.bf16.mxu1 %v19559_v11 }
 0x331   :  { %2898 = vmatmul.mubr.bf16.gmra.mrb[120].mxu0 %v16374_v19 }
 0x332   :  { %2905 = vmatprep.mubr.bf16.mxu0 %v1007_v53  ;;  %14032 = vmatmul.mubr.bf16.gmra.mrb[32].mxu1 %v16577_v6  ;;  %v15134_v6 = vld [vmem:[%s19404_s3 + $0x18] sm:$0xff]  }
 0x333   :  { %14035 = vmatprep.mubr.bf16.mxu1 %v16584_v38  ;;  %11599 = vmatpush1.bf16.msra.mxu1 %v15134_v6  ;;  %v15142_v38 = vld [vmem:[%s19404_s3 + $0x58] sm:$0xff]   ;;  %v15147_v6 = vld [vmem:[%s19404_s3 + $0x208] sm:$0xff]  }
 0x334   :  { %11600 = vmatprep.subr.bf16.mxu1 %v19559_v11 }
 0x339   :  { %2906 = vmatmul.mubr.bf16.gmra.mrb[124].mxu0 %v16873_v37 }
 0x33a   :  { %2946 = vmatprep.mubr.bf16.mxu0 %v19574_v15  ;;  %14036 = vmatmul.mubr.bf16.gmra.mrb[36].mxu1 %v16591_v40  ;;  %v19604_v40 = vld [vmem:[#allocation23_spill] sm:$0xff]  ;;  %v1077_v15 = vshll.u32 %v16856_v23, 16 }
 0x33b   :  { %14039 = vmatprep.mubr.bf16.mxu1 %v16598_v1  ;;  %v19605_v1 = vld [vmem:[#allocation18_spill] sm:$0xff] }
 0x341   :  { %2947 = vmatmul.mubr.bf16.vlgmr.msra.gmra.mrb[0].mxu0 %v15671_v35  ;;  %v15135_v35 = vld [vmem:[%s19404_s3 + $0x20] sm:$0xff]  }
 0x342   :  { %2954 = vmatprep.mubr.bf16.mxu0 %v19575_v59  ;;  %14040 = vmatmul.mubr.bf16.gmra.mrb[40].mxu1 %v16605_v39  ;;  %v19606_v39 = vld [vmem:[#allocation24_spill] sm:$0xff]  ;;  %v127_v59 = vld [vmem:[%s19401_s0 + $0x348] sm:$0xff] }
 0x343   :  { %14043 = vmatprep.mubr.bf16.mxu1 %v16612_v46  ;;  %11601 = vmatpush1.bf16.msra.mxu1 %v15135_v35  ;;  %v19610_v35 = vld [vmem:[#allocation25_spill] sm:$0xff] }
 0x344   :  { %11602 = vmatprep.subr.bf16.mxu1 %v19559_v11 }
 0x349   :  { %2955 = vmatmul.mubr.bf16.gmra.mrb[4].mxu0 %v15699_v50  ;;  %v15136_v50 = vld [vmem:[%s19404_s3 + $0x28] sm:$0xff]  }
 0x34a   :  { %2962 = vmatprep.mubr.bf16.mxu0 %v19576_v24  ;;  %14044 = vmatmul.mubr.bf16.gmra.mrb[44].mxu1 %v16619_v4  ;;  %v128_v24 = vld [vmem:[%s19401_s0 + $0x350] sm:$0xff] }
 0x34b   :  { %14047 = vmatprep.mubr.bf16.mxu1 %v16626_v0  ;;  %11603 = vmatpush1.bf16.msra.mxu1 %v15136_v50  ;;  %v5119_v50 = vrot.slane %v5117_v13, 4  ;;  %v19613_v13 = vld [vmem:[#allocation28_spill] sm:$0xff] }
 0x34c   :  { %11604 = vmatprep.subr.bf16.mxu1 %v19559_v11 }
 0x351   :  { %2963 = vmatmul.mubr.bf16.gmra.mrb[8].mxu0 %v15727_v63  ;;  %v15137_v63 = vld [vmem:[%s19404_s3 + $0x30] sm:$0xff]  }
 0x352   :  { %2970 = vmatprep.mubr.bf16.mxu0 %v19577_v51  ;;  %14048 = vmatmul.mubr.bf16.gmra.mrb[48].mxu1 %v16633_v14 }
 0x353   :  { %14051 = vmatprep.mubr.bf16.mxu1 %v16640_v18  ;;  %11605 = vmatpush1.bf16.msra.mxu1 %v15137_v63  ;;  %v19607_v18 = vld [vmem:[#allocation20_spill] sm:$0xff]  ;;  %v5122_v63 = vrot.slane %v5120_v7, 5 }
 0x354   :  { %11606 = vmatprep.subr.bf16.mxu1 %v19559_v11  ;;  %v15157_v7 = vld [vmem:[%s19404_s3 + $0x238] sm:$0xff]  }
 0x359   :  { %2971 = vmatmul.mubr.bf16.gmra.mrb[12].mxu0 %v15756_v16  ;;  %v15138_v16 = vld [vmem:[%s19404_s3 + $0x38] sm:$0xff]  }
 0x35a   :  { %2978 = vmatprep.mubr.bf16.mxu0 %v19578_v2  ;;  %14052 = vmatmul.mubr.bf16.gmra.mrb[52].mxu1 %v16647_v32  ;;  %v19608_v32 = vld [vmem:[#allocation26_spill] sm:$0xff]  ;;  %v16981_v2 = vpack.c.bf16 %v128_v24, %v127_v59 }
 0x35b   :  { %14055 = vmatprep.mubr.bf16.mxu1 %v16660_v61  ;;  %11607 = vmatpush1.bf16.msra.mxu1 %v15138_v16  ;;  %v19609_v61 = vld [vmem:[#allocation22_spill] sm:$0xff]  ;;  %v5128_v16 = vrot.slane %v5126_v12, 5 }
 0x35c   :  { %11608 = vmatprep.subr.bf16.mxu1 %v19559_v11  ;;  %v1139_v60 = vrot.slane %v16981_v2, 1 }
 0x361   :  { %2979 = vmatmul.mubr.bf16.gmra.mrb[16].mxu0 %v15785_v31  ;;  %v15139_v31 = vld [vmem:[%s19404_s3 + $0x40] sm:$0xff]  }
 0x362   :  { %2986 = vmatprep.mubr.bf16.mxu0 %v19579_v47  ;;  %14056 = vmatmul.mubr.bf16.gmra.mrb[56].mxu1 %v16669_v5  ;;  %v15141_v5 = vld [vmem:[%s19404_s3 + $0x50] sm:$0xff]   ;;  %v1075_v47 = vshrl.u32 %v16856_v23, 16 }
 0x363   :  { %14059 = vmatprep.mubr.bf16.mxu1 %v1007_v53  ;;  %11609 = vmatpush1.bf16.msra.mxu1 %v15139_v31  ;;  %v1079_v53 = vrot.slane %v1077_v15, 1  ;;  %v5132_v31 = vrot.slane %v5130_v54, 4 }
 0x364   :  { %11610 = vmatprep.subr.bf16.mxu1 %v19559_v11 }
 0x369   :  { %2987 = vmatmul.mubr.bf16.gmra.mrb[20].mxu0 %v15814_v48  ;;  %v15140_v48 = vld [vmem:[%s19404_s3 + $0x48] sm:$0xff]  }
 0x36a   :  { %2994 = vmatprep.mubr.bf16.mxu0 %v19580_v25  ;;  %11611 = vmatpush1.bf16.msra.mxu1 %v15140_v48  ;;  %v1084_v48 = vrot.slane %v1082_v9, 1 }
 0x36b   :  { %11612 = vmatprep.subr.bf16.mxu1 %v19559_v11 }
 0x36e   :  { %11613 = vmatpush1.bf16.msra.mxu1 %v15141_v5  ;;  %v1141_v5 = vsel %vm747_vm1, %v1139_v60, %v1140_v10  ;;  %v19615_v10 = vld [vmem:[#allocation31_spill] sm:$0xff] }
 0x36f   :  { %11614 = vmatprep.subr.bf16.mxu1 %v19559_v11  ;;  %14060 = vmatmul.mubr.bf16.gmra.mrb[60].mxu1 %v1141_v5 }
 0x371   :  { %2995 = vmatmul.mubr.bf16.gmra.mrb[24].mxu0 %v15843_v3  ;;  %v19601_v3 = vld [vmem:[#allocation14_spill] sm:$0xff] }
 0x372   :  { %3002 = vmatprep.mubr.bf16.mxu0 %v19581_v52  ;;  %v19602_v52 = vld [vmem:[#allocation21_spill] sm:$0xff]  ;;  %11615 = vmatpush1.bf16.msra.mxu1 %v15142_v38  ;;  %v5123_v38 = vor.u32 %v5122_v63, %v5119_v50  ;;  %v19617_v50 = vld [vmem:[#allocation36_spill] sm:$0xff] }
 0x373   :  { %11616 = vmatprep.subr.bf16.mxu1 %v19559_v11 }
 0x379   :  { %3003 = vmatmul.mubr.bf16.gmra.mrb[28].mxu0 %v15869_v22  ;;  %v19603_v22 = vld [vmem:[#allocation16_spill] sm:$0xff] }
 0x37a   :  { %3010 = vmatprep.mubr.bf16.mxu0 %v19582_v62  ;;  %v15143_v62 = vld [vmem:[%s19404_s3 + $0x60] sm:$0xff]  }
 0x37b   :  { %11617 = vmatpush1.bf16.msra.mxu1 %v15143_v62  ;;  %v15148_v62 = vld [vmem:[%s19404_s3 + $0x78] sm:$0xff]  }
 0x37c   :  { %11618 = vmatprep.subr.bf16.mxu1 %v19559_v11 }
 0x37f   :  { %11619 = vmatpush1.bf16.msra.mxu1 %v15144_v42 }
 0x380   :  { %11620 = vmatprep.subr.bf16.mxu1 %v19559_v11 }
 0x381   :  { %3011 = vmatmul.mubr.bf16.gmra.mrb[32].mxu0 %v19601_v3  ;;  %v15145_v3 = vld [vmem:[%s19404_s3 + $0x70] sm:$0xff]  }
 0x382   :  { %3018 = vmatprep.mubr.bf16.mxu0 %v19602_v52  ;;  %v5019_v52 = vld [vmem:[#allocation2 + $0x8] sm:$0x1] }
 0x383   :  { %11621 = vmatpush1.bf16.msra.mxu1 %v15145_v3  ;;  %v19620_v3 = vld [vmem:[#allocation45_spill] sm:$0xff] }
 0x384   :  { %11622 = vmatprep.subr.bf16.mxu1 %v19559_v11 }
 0x385   :  { %v16959_v46 = vpop.f32.mrb[0].mxu1 }
 0x386   :  { %v16961_v4 = vpop.f32.mrb[1].mxu1 }
 0x387   :  { %v16963_v0 = vpop.f32.mrb[2].mxu1  ;;  %11623 = vmatpush1.bf16.msra.mxu1 %v15148_v62 }
 0x388   :  { %v16966_v14 = vpop.f32.mrb[3].mxu1  ;;  %11881 = vmatprep.subr.bf16.mxu1 %v19559_v11 }
 0x389   :  { %3019 = vmatmul.mubr.bf16.gmra.mrb[36].mxu0 %v19603_v22  ;;  %v1080_v22 = vor.u32 %v1079_v53, %v1075_v47  ;;  %v15150_v47 = vld [vmem:[%s19404_s3 + $0x218] sm:$0xff]   ;;  %v15151_v53 = vld [vmem:[#allocation2] sm:$0xff]  }
 0x38a   :  { %3026 = vmatprep.mubr.bf16.mxu0 %v19604_v40  ;;  %v5133_v40 = vor.u32 %v5132_v31, %v5128_v16  ;;  %v19618_v31 = vld [vmem:[#allocation38_spill] sm:$0xff] }
 0x38b   :  { %v1085_v15 = vsel %vm234_vm0, %v1080_v22, %v1084_v48 }
 0x38d   :  { %v16979_v51 = vpop.f32.mrb[4].mxu1 }
 0x38e   :  { %v16984_v25 = vpop.f32.mrb[5].mxu1 }
 0x38f   :  { %v16993_v21 = vpop.f32.mrb[6].mxu1 }
 0x390   :  { %v16998_v58 = vpop.f32.mrb[7].mxu1 }
 0x391   :  { %3027 = vmatmul.mubr.bf16.gmra.mrb[40].mxu0 %v19605_v1  ;;  %v5136_v1 = vshll.u32 %v5019_v52, 16 }
 0x392   :  { %3034 = vmatprep.mubr.bf16.mxu0 %v19606_v39 }
 0x395   :  { %v17035_v9 = vpop.f32.mrb[8].mxu1 }
 0x396   :  { %v17037_v42 = vpop.f32.mrb[9].mxu1 }
 0x397   :  { %v17042_v60 = vpop.f32.mrb[10].mxu1 }
 0x399   :  { %3035 = vmatmul.mubr.bf16.gmra.mrb[44].mxu0 %v19607_v18  ;;  %v5124_v18 = vrot.slane %v5123_v38, 4  ;;  %v19621_v38 = vld [vmem:[#allocation47_spill] sm:$0xff] }
 0x39a   :  { %3042 = vmatprep.mubr.bf16.mxu0 %v19608_v32  ;;  %v5134_v32 = vrot.slane %v5133_v40, 4  ;;  %v19623_v40 = vld [vmem:[#allocation54_spill] sm:$0xff] }
 0x39b   :  { %v5129_v59 = vsel %vm17021_vm4, %v5124_v18, %v5128_v16 }
 0x3a1   :  { %3043 = vmatmul.mubr.bf16.gmra.mrb[48].mxu0 %v19609_v61  ;;  %v5138_v61 = vrot.slane %v5136_v1, 5  ;;  %v17121_v1 = vld [vmem:[%s19403_s2] ss:$0 sm:$0xff] }
 0x3a2   :  { %3050 = vmatprep.mubr.bf16.mxu0 %v19587_v30  ;;  %v15146_v30 = vld [vmem:[%s19404_s3 + $0x200] sm:$0xff]  }
 0x3a3   :  { %14063 = vmatprep.subr.bf16.mxu0 %v15146_v30  ;;  %v5139_v24 = vsel %vm17021_vm4, %v5134_v32, %v5138_v61 }
 0x3a4   :  { %14064 = vmatpush3.bf16.msra.mxu0 %v15146_v30  ;;  %v13414_v30 = vcombine.low %v5129_v59, %v5139_v24 }
 0x3a5   :  { %14065 = vmatprep.subr.bf16.mxu0 %v15147_v6 }
 0x3a6   :  { %11624 = vmatprep.mubr.bf16.mxu1 %v13414_v30 }
 0x3a7   :  { %11625 = vmatmul.mubr.bf16.vlgmr.msra.gmra.mrb[64].mxu1 %v15151_v53 }
 0x3a8   :  { %14066 = vmatpush3.bf16.msra.mxu0 %v15147_v6  ;;  %11882 = vmatpush1.bf16.msra.mxu1 %v15152_v33  ;;  %v19625_v33 = vld [vmem:[#allocation56_spill] sm:$0xff] }
 0x3a9   :  { %3051 = vmatmul.mubr.bf16.gmra.mrb[52].mxu0 %v19610_v35  ;;  %11883 = vmatprep.subr.bf16.mxu1 %v19559_v11  ;;  %v19616_v35 = vld [vmem:[#allocation34_spill] sm:$0xff] }
 0x3aa   :  { %3058 = vmatprep.mubr.bf16.mxu0 %v16794_v44  ;;  %v15149_v44 = vld [vmem:[%s19404_s3 + $0x210] sm:$0xff]  }
 0x3ab   :  { %14067 = vmatprep.subr.bf16.mxu0 %v15149_v44 }
 0x3ac   :  { %14068 = vmatpush3.bf16.msra.mxu0 %v15149_v44  ;;  %v19624_v44 = vld [vmem:[#allocation62_spill] sm:$0xff] }
 0x3ad   :  { %14069 = vmatprep.subr.bf16.mxu0 %v15150_v47 }
 0x3b0   :  { %14070 = vmatpush3.bf16.msra.mxu0 %v15150_v47 }
 0x3b1   :  { %3059 = vmatmul.mubr.bf16.gmra.mrb[56].mxu0 %v16541_v36  ;;  %14071 = vmatprep.subr.bf16.mxu0 %v15153_v8  ;;  %v17044_v36 = vpop.f32.mrb[11].mxu1 }
 0x3b2   :  { %3066 = vmatprep.mubr.bf16.mxu0 %v1085_v15  ;;  %v17065_v12 = vpop.f32.mrb[12].mxu1 }
 0x3b3   :  { %v17070_v54 = vpop.f32.mrb[13].mxu1 }
 0x3b4   :  { %14072 = vmatpush3.bf16.msra.mxu0 %v15153_v8 }
 0x3b5   :  { %14073 = vmatprep.subr.bf16.mxu0 %v15154_v27 }
 0x3b8   :  { %14074 = vmatpush3.bf16.msra.mxu0 %v15154_v27 }
 0x3b9   :  { %3067 = vmatmul.mubr.bf16.gmra.mrb[60].mxu0 %v16856_v23  ;;  %v15156_v23 = vld [vmem:[%s19404_s3 + $0x230] sm:$0xff]  }
 0x3ba   :  { %3074 = vmatprep.mubr.bf16.mxu0 %v19589_v41  ;;  %14075 = vmatprep.subr.bf16.mxu0 %v15156_v23  ;;  %v19614_v41 = vld [vmem:[#allocation30_spill] sm:$0xff] }
 0x3bc   :  { %14076 = vmatpush3.bf16.msra.mxu0 %v15156_v23 }
 0x3bd   :  { %14077 = vmatprep.subr.bf16.mxu0 %v15157_v7 }
 0x3c0   :  { %14078 = vmatpush3.bf16.msra.mxu0 %v15157_v7 }
 0x3c1   :  { %3075 = vmatmul.mubr.bf16.gmra.mrb[64].mxu0 %v19613_v13  ;;  %v19626_v13 = vld [vmem:[#allocation64_spill] sm:$0xff] }
 0x3c2   :  { %3082 = vmatprep.mubr.bf16.mxu0 %v19590_v49  ;;  %v15159_v49 = vld [vmem:[%s19404_s3 + $0x88] sm:$0xff]  }
 0x3c3   :  { %11884 = vmatpush1.bf16.msra.mxu1 %v15159_v49 }
 0x3c4   :  { %11885 = vmatprep.subr.bf16.mxu1 %v19559_v11 }
 0x3c9   :  { %3083 = vmatmul.mubr.bf16.gmra.mrb[68].mxu0 %v19614_v41 }
 0x3ca   :  { %3090 = vmatprep.mubr.bf16.mxu0 %v19591_v34  ;;  %v17075_v34 = vpop.f32.mrb[14].mxu1 }
 0x3cb   :  { %v17077_v6 = vpop.f32.mrb[15].mxu1 }
 0x3cc   :  { %v17083_v63 = vpop.f32.mrb[16].mxu1 }
 0x3cd   :  { %v17088_v16 = vpop.f32.mrb[17].mxu1 }
 0x3ce   :  { %v17092_v48 = vpop.f32.mrb[18].mxu1 }
 0x3d1   :  { %3091 = vmatmul.mubr.bf16.gmra.mrb[72].mxu0 %v19615_v10 }
 0x3d2   :  { %3098 = vmatprep.mubr.bf16.mxu0 %v19592_v55  ;;  %v15162_v55 = vld [vmem:[%s19404_s3 + $0x90] sm:$0xff]  }
 0x3d3   :  { %11886 = vmatpush1.bf16.msra.mxu1 %v15162_v55 }
 0x3d4   :  { %11887 = vmatprep.subr.bf16.mxu1 %v19559_v11 }
 0x3d9   :  { %3099 = vmatmul.mubr.bf16.gmra.mrb[76].mxu0 %v19616_v35 }
 0x3da   :  { %3106 = vmatprep.mubr.bf16.mxu0 %v19593_v28  ;;  %v17095_v28 = vpop.f32.mrb[19].mxu1 }
 0x3db   :  { %v17101_v5 = vpop.f32.mrb[20].mxu1 }
 0x3dc   :  { %v17106_v52 = vpop.f32.mrb[21].mxu1 }
 0x3dd   :  { %v17108_v22 = vpop.f32.mrb[22].mxu1 }
 0x3e1   :  { %3107 = vmatmul.mubr.bf16.gmra.mrb[80].mxu0 %v19617_v50 }
 0x3e2   :  { %3114 = vmatprep.mubr.bf16.mxu0 %v19594_v29  ;;  %v19619_v29 = vld [vmem:[#allocation42_spill] sm:$0xff] }
 0x3e9   :  { %3115 = vmatmul.mubr.bf16.gmra.mrb[84].mxu0 %v19618_v31 }
 0x3ea   :  { %3122 = vmatprep.mubr.bf16.mxu0 %v19595_v43  ;;  %v15165_v43 = vld [vmem:[%s19404_s3 + $0x98] sm:$0xff]  }
 0x3eb   :  { %11888 = vmatpush1.bf16.msra.mxu1 %v15165_v43 }
 0x3ec   :  { %11889 = vmatprep.subr.bf16.mxu1 %v19559_v11 }
 0x3f1   :  { %3123 = vmatmul.mubr.bf16.gmra.mrb[88].mxu0 %v19619_v29 }
 0x3f2   :  { %3130 = vmatprep.mubr.bf16.mxu0 %v19596_v45  ;;  %v17112_v45 = vpop.f32.mrb[23].mxu1 }
 0x3f3   :  { %v17124_v18 = vpop.f32.mrb[24].mxu1 }
 0x3f9   :  { %3131 = vmatmul.mubr.bf16.gmra.mrb[92].mxu0 %v19620_v3 }
 0x3fa   :  { %3138 = vmatprep.mubr.bf16.mxu0 %v19597_v17  ;;  %v19622_v17 = vld [vmem:[#allocation51_spill] sm:$0xff] }
 0x401   :  { %3139 = vmatmul.mubr.bf16.gmra.mrb[96].mxu0 %v19621_v38  ;;  %v4503_v38 = vld [vmem:[#allocation2 + $0xc] sm:$0xf] }
 0x402   :  { %3146 = vmatprep.mubr.bf16.mxu0 %v19598_v26  ;;  %v15168_v26 = vld [vmem:[%s19404_s3 + $0xa0] sm:$0xff]  }
 0x403   :  { %11890 = vmatpush1.bf16.msra.mxu1 %v15168_v26 }
 0x404   :  { %11891 = vmatprep.subr.bf16.mxu1 %v19559_v11 }
 0x409   :  { %3147 = vmatmul.mubr.bf16.gmra.mrb[100].mxu0 %v19622_v17 }
 0x40a   :  { %3154 = vmatprep.mubr.bf16.mxu0 %v19599_v20  ;;  %v17130_v20 = vpop.f32.mrb[25].mxu1 }
 0x40b   :  { %v17134_v30 = vpop.f32.mrb[26].mxu1 }
 0x40c   :  { %v17137_v53 = vpop.f32.mrb[27].mxu1 }
 0x411   :  { %3155 = vmatmul.mubr.bf16.gmra.mrb[104].mxu0 %v19623_v40  ;;  %v1089_v40 = vshll.u32 %v16981_v2, 16 }
 0x412   :  { %3162 = vmatprep.mubr.bf16.mxu0 %v19624_v44 }
 0x414   :  { %v2948_v62 = vpop.f32.mrb[0].mxu0 }
 0x415   :  { %v14159_v32 = vadd.f32 %v17121_v1, %v2948_v62  ;;  %v2950_v61 = vpop.f32.mrb[1].mxu0 }
 0x416   :  { %v2951_v15 = vpop.f32.mrb[2].mxu0  ;;  %v19631_v61 = vld [vmem:[#allocation60_spill] sm:$0xff] }
 0x417   :  { %v3238_v59 = vadd.f32 %v14159_v32, %v16961_v4  ;;  %v14160_v24 = vadd.f32 %v17121_v1, %v2951_v15  ;;  %v2953_v47 = vpop.f32.mrb[3].mxu0 }
 0x419   :  { %v3492_v8 = vmax.f32 %v3238_v59, 0.0  ;;  %v3241_v27 = vadd.f32 %v14160_v24, %v16966_v14  ;;  %3163 = vmatmul.mubr.bf16.gmra.mrb[108].mxu0 %v19625_v33  ;;  %v4509_v24 = vld [vmem:[#allocation2 + $0x14] sm:$0x1] }
 0x41a   :  { %3170 = vmatprep.mubr.bf16.mxu0 %v19626_v13 }
 0x41b   :  { %v13839_v23 = vpack.c.bf16 %v3492_v8, %v3492_v8  ;;  %v3493_v41 = vmax.f32 %v3241_v27, 0.0 }
 0x41c   :  { %v2956_v4 = vpop.f32.mrb[4].mxu0 }
 0x41d   :  { %v3860_v7 = vshrl.u32 %v13839_v23, 16  ;;  %v13840_v49 = vpack.c.bf16 %v3493_v41, %v3493_v41  ;;  %v14161_v10 = vadd.f32 %v17121_v1, %v2956_v4  ;;  %v2958_v35 = vpop.f32.mrb[5].mxu0  ;;  %v3863_v14 = vshll.u32 %v13839_v23, 16 }
 0x41e   :  { %v2959_v50 = vpop.f32.mrb[6].mxu0  ;;  %v1087_v4 = vshrl.u32 %v16981_v2, 16  ;;  %v1094_v35 = vshll.u32 %v17000_v57, 16  ;;  %v19634_v57 = vld [vmem:[#allocation63_spill] sm:$0xff] }
 0x41f   :  { %v3862_v55 = vrot.slane %v3860_v7, 7  ;;  %v3868_v31 = vshrl.u32 %v13840_v49, 16  ;;  %v3246_v29 = vadd.f32 %v14161_v10, %v16959_v46  ;;  %v2961_v3 = vpop.f32.mrb[7].mxu0  ;;  %v14162_v17 = vadd.f32 %v17121_v1, %v2959_v50 }
 0x420   :  { %v3871_v32 = vshll.u32 %v13840_v49, 16  ;;  %v1091_v7 = vrot.slane %v1089_v40, 1 }
 0x421   :  { %v3865_v44 = vor.u32 %v3863_v14, %v3862_v55  ;;  %v3870_v26 = vrot.slane %v3868_v31, 7  ;;  %v3494_v46 = vmax.f32 %v3246_v29, 0.0  ;;  %3171 = vmatmul.mubr.bf16.gmra.mrb[112].mxu0 %v19631_v61  ;;  %v3866_v15 = vrot.slane %v3862_v55, 4 }
 0x422   :  { %v3249_v47 = vadd.f32 %v14162_v17, %v16963_v0  ;;  %3178 = vmatprep.mubr.bf16.mxu0 %v16374_v19  ;;  %v4512_v17 = vld [vmem:[#allocation2 + $0x18] sm:$0xf]  ;;  %v1092_v61 = vor.u32 %v1091_v7, %v1087_v4 }
 0x423   :  { %v4504_v8 = vsel %vm17145_vm10, %v3865_v44, %v4503_v38  ;;  %v3873_v27 = vor.u32 %v3871_v32, %v3870_v26  ;;  %v3875_v33 = vrot.slane %v3870_v26, 4  ;;  %v13841_v13 = vpack.c.bf16 %v3494_v46, %v3494_v46  ;;  %v4516_v32 = vld [vmem:[#allocation2 + $0x20] sm:$0x1] }
 0x424   :  { %4505 = vst [vmem:[#allocation2 + $0xc] sm:$0xf] %v4504_v8  ;;  %v3495_v23 = vmax.f32 %v3249_v47, 0.0  ;;  %v2964_v41 = vpop.f32.mrb[8].mxu0 }
 0x425   :  { %v3874_v49 = vsel %vm17152_vm11, %v3866_v15, %v3873_v27  ;;  %v4510_v0 = vsel %vm17159_vm12, %v3875_v33, %v4509_v24  ;;  %v3877_v10 = vshrl.u32 %v13841_v13, 16  ;;  %v2966_v19 = vpop.f32.mrb[9].mxu0  ;;  %v14163_v55 = vadd.f32 %v17121_v1, %v2964_v41  ;;  %v17179_v33 = vpop.f32.mrb[28].mxu1 }
 0x426   :  { %4506 = vst [vmem:[#allocation2 + $0x10] sm:$0xf] %v3874_v49  ;;  %4511 = vst [vmem:[#allocation2 + $0x14] sm:$0x1] %v4510_v0  ;;  %v13842_v50 = vpack.c.bf16 %v3495_v23, %v3495_v23  ;;  %v2967_v14 = vpop.f32.mrb[10].mxu0  ;;  %v3880_v29 = vshll.u32 %v13841_v13, 16 }
 0x427   :  { %v3879_v31 = vrot.slane %v3877_v10, 7  ;;  %v14164_v3 = vadd.f32 %v17121_v1, %v2967_v14  ;;  %v2969_v38 = vpop.f32.mrb[11].mxu0  ;;  %v3254_v44 = vadd.f32 %v14163_v55, %v16984_v25  ;;  %v1096_v15 = vrot.slane %v1094_v35, 1  ;;  %v15171_v25 = vld [vmem:[%s19404_s3 + $0xa8] sm:$0xff]   ;;  %v17186_v41 = vpop.f32.mrb[29].mxu1 }
 0x428   :  { %v3885_v40 = vshrl.u32 %v13842_v50, 16  ;;  %v3888_v8 = vshll.u32 %v13842_v50, 16  ;;  %11892 = vmatpush1.bf16.msra.mxu1 %v15171_v25 }
 0x429   :  { %v3882_v26 = vor.u32 %v3880_v29, %v3879_v31  ;;  %v3257_v46 = vadd.f32 %v14164_v3, %v16998_v58  ;;  %3179 = vmatmul.mubr.bf16.gmra.mrb[116].mxu0 %v19634_v57  ;;  %v3883_v24 = vrot.slane %v3879_v31, 4  ;;  %v3496_v27 = vmax.f32 %v3254_v44, 0.0  ;;  %11893 = vmatprep.subr.bf16.mxu1 %v19559_v11 }
 0x42a   :  { %v3887_v47 = vrot.slane %v3885_v40, 7  ;;  %3186 = vmatprep.mubr.bf16.mxu0 %v16873_v37  ;;  %v1097_v50 = vsel %vm234_vm0, %v1092_v61, %v1096_v15  ;;  %v4519_v40 = vld [vmem:[#allocation2 + $0x24] sm:$0xf] }
 0x42b   :  { %v4513_v13 = vsel %vm17145_vm10, %v3882_v26, %v4512_v17  ;;  %v3497_v58 = vmax.f32 %v3257_v46, 0.0  ;;  %v5020_v23 = vld [vmem:[#allocation2 + $0xc] sm:$0xf]  ;;  %v13843_v49 = vpack.c.bf16 %v3496_v27, %v3496_v27 }
 0x42c   :  { %4514 = vst [vmem:[#allocation2 + $0x18] sm:$0xf] %v4513_v13  ;;  %v3890_v4 = vor.u32 %v3888_v8, %v3887_v47  ;;  %v3892_v7 = vrot.slane %v3887_v47, 4  ;;  %v2972_v0 = vpop.f32.mrb[12].mxu0  ;;  %v5141_v10 = vshrl.u32 %v5020_v23, 16  ;;  %v5144_v14 = vshll.u32 %v5020_v23, 16 }
 0x42d   :  { %v13844_v37 = vpack.c.bf16 %v3497_v58, %v3497_v58  ;;  %v14165_v19 = vadd.f32 %v17121_v1, %v2972_v0  ;;  %v2974_v35 = vpop.f32.mrb[13].mxu0  ;;  %v5021_v55 = vld [vmem:[#allocation2 + $0x10] sm:$0xf]  ;;  %v3894_v3 = vshrl.u32 %v13843_v49, 16  ;;  %v3897_v38 = vshll.u32 %v13843_v49, 16 }
 0x42e   :  { %v3891_v31 = vsel %vm17152_vm11, %v3883_v24, %v3890_v4  ;;  %v4517_v29 = vsel %vm17159_vm12, %v3892_v7, %v4516_v32  ;;  %v2975_v17 = vpop.f32.mrb[14].mxu0  ;;  %v5022_v15 = vld [vmem:[#allocation2 + $0x14] sm:$0x1]  ;;  %v17197_v24 = vpop.f32.mrb[30].mxu1  ;;  %v5143_v32 = vrot.slane %v5141_v10, 4  ;;  %v5146_v8 = vrot.slane %v5144_v14, 5 }
 0x42f   :  { %4515 = vst [vmem:[#allocation2 + $0x1c] sm:$0xf] %v3891_v31  ;;  %4518 = vst [vmem:[#allocation2 + $0x20] sm:$0x1] %v4517_v29  ;;  %v3902_v44 = vshrl.u32 %v13844_v37, 16  ;;  %v3905_v26 = vshll.u32 %v13844_v37, 16  ;;  %v3262_v46 = vadd.f32 %v14165_v19, %v16979_v51  ;;  %v14166_v57 = vadd.f32 %v17121_v1, %v2975_v17 }
 0x430   :  { %v2977_v61 = vpop.f32.mrb[15].mxu0  ;;  %v3896_v47 = vrot.slane %v3894_v3, 7  ;;  %v5150_v27 = vshll.u32 %v5021_v55, 16  ;;  %v17199_v25 = vpop.f32.mrb[31].mxu1  ;;  %v5154_v51 = vshrl.u32 %v5021_v55, 16  ;;  %v5147_v0 = vor.u32 %v5146_v8, %v5143_v32 }
 0x431   :  { %v3904_v13 = vrot.slane %v3902_v44, 7  ;;  %v3498_v58 = vmax.f32 %v3262_v46, 0.0  ;;  %v3265_v23 = vadd.f32 %v14166_v57, %v16993_v21  ;;  %3187 = vmatmul.mubr.bf16.gmra.mrb[120].mxu0 %v16662_v56  ;;  %v4523_v49 = vld [vmem:[#allocation2 + $0x2c] sm:$0x1]  ;;  %v5160_v44 = vshll.u32 %v5022_v15, 16 }
 0x432   :  { %v3899_v4 = vor.u32 %v3897_v38, %v3896_v47  ;;  %v3900_v7 = vrot.slane %v3896_v47, 4  ;;  %3194 = vmatprep.mubr.bf16.mxu0 %v1097_v50  ;;  %v5152_v37 = vrot.slane %v5150_v27, 5  ;;  %v5148_v17 = vrot.slane %v5147_v0, 4 }
 0x433   :  { %v3907_v19 = vor.u32 %v3905_v26, %v3904_v13  ;;  %v3909_v35 = vrot.slane %v3904_v13, 4  ;;  %v13845_v10 = vpack.c.bf16 %v3498_v58, %v3498_v58  ;;  %v3499_v14 = vmax.f32 %v3265_v23, 0.0  ;;  %v9824_v31 = vld [vmem:[#allocation2 + $0x18] sm:$0xe] }
 0x434   :  { %v4520_v29 = vsel %vm17145_vm10, %v3899_v4, %v4519_v40  ;;  %v2980_v3 = vpop.f32.mrb[16].mxu0  ;;  %v5156_v21 = vrot.slane %v5154_v51, 4  ;;  %v5153_v61 = vsel %vm17021_vm4, %v5148_v17, %v5152_v37  ;;  %v5162_v13 = vrot.slane %v5160_v44, 5  ;;  %v4526_v51 = vld [vmem:[#allocation2 + $0x30] sm:$0xf] }
 0x435   :  { %4521 = vst [vmem:[#allocation2 + $0x24] sm:$0xf] %v4520_v29  ;;  %v3908_v56 = vsel %vm17152_vm11, %v3900_v7, %v3907_v19  ;;  %v4524_v50 = vsel %vm17159_vm12, %v3909_v35, %v4523_v49  ;;  %v3911_v55 = vshrl.u32 %v13845_v10, 16  ;;  %v3914_v38 = vshll.u32 %v13845_v10, 16  ;;  %v2982_v26 = vpop.f32.mrb[17].mxu0 }
 0x436   :  { %4522 = vst [vmem:[#allocation2 + $0x28] sm:$0xf] %v3908_v56  ;;  %4525 = vst [vmem:[#allocation2 + $0x2c] sm:$0x1] %v4524_v50  ;;  %v13846_v46 = vpack.c.bf16 %v3499_v14, %v3499_v14  ;;  %v14167_v57 = vadd.f32 %v17121_v1, %v2980_v3  ;;  %v2983_v40 = vpop.f32.mrb[18].mxu0  ;;  %v5157_v15 = vor.u32 %v5156_v21, %v5152_v37  ;;  %v13702_v23 = vrot.slane %v9824_v31, 9 }
 0x437   :  { %v9825_v47 = vld [vmem:[#allocation2 + $0x1c] sm:$0xf]  ;;  %v3913_v32 = vrot.slane %v3911_v55, 7  ;;  %v14168_v8 = vadd.f32 %v17121_v1, %v2983_v40  ;;  %v2985_v27 = vpop.f32.mrb[19].mxu0  ;;  %v9826_v58 = vld [vmem:[#allocation2 + $0x20] sm:$0x1] }
 0x438   :  { %v3919_v4 = vshrl.u32 %v13846_v46, 16  ;;  %v3922_v7 = vshll.u32 %v13846_v46, 16  ;;  %v3270_v49 = vadd.f32 %v14167_v57, %v17037_v42  ;;  %v5158_v0 = vrot.slane %v5157_v15, 4  ;;  %v5023_v14 = vld [vmem:[#allocation2 + $0x18] sm:$0xf]  ;;  %v15155_v26 = vld [vmem:[#allocation2 + $0xc] sm:$0xff]  }
 0x439   :  { %v3916_v19 = vor.u32 %v3914_v38, %v3913_v32  ;;  %v3917_v35 = vrot.slane %v3913_v32, 4  ;;  %v3273_v10 = vadd.f32 %v14168_v8, %v17044_v36  ;;  %3195 = vmatmul.mubr.bf16.gmra.mrb[124].mxu0 %v16981_v2  ;;  %v10018_v37 = vrot.slane %v9825_v47, 5  ;;  %v4530_v36 = vld [vmem:[#allocation2 + $0x38] sm:$0x1] }
 0x43a   :  { %v3921_v29 = vrot.slane %v3919_v4, 7  ;;  %v3500_v3 = vmax.f32 %v3270_v49, 0.0  ;;  %v5163_v17 = vsel %vm17021_vm4, %v5158_v0, %v5162_v13  ;;  %v10021_v42 = vrot.slane %v9826_v58, 5 }
 0x43b   :  { %v4527_v21 = vsel %vm17145_vm10, %v3916_v19, %v4526_v51  ;;  %v3501_v44 = vmax.f32 %v3273_v10, 0.0  ;;  %v13415_v2 = vcombine.low %v5153_v61, %v5163_v17  ;;  %v10019_v56 = vsel %vm17220_vm15, %v13702_v23, %v10018_v37  ;;  %v5024_v51 = vld [vmem:[#allocation2 + $0x1c] sm:$0xf] }
 0x43c   :  { %4528 = vst [vmem:[#allocation2 + $0x30] sm:$0xf] %v4527_v21  ;;  %v3924_v50 = vor.u32 %v3922_v7, %v3921_v29  ;;  %v3926_v55 = vrot.slane %v3921_v29, 4  ;;  %v13847_v38 = vpack.c.bf16 %v3500_v3, %v3500_v3  ;;  %v2988_v46 = vpop.f32.mrb[20].mxu0  ;;  %v10020_v57 = vrot.slane %v10018_v37, 4 }
 0x43d   :  { %v13848_v40 = vpack.c.bf16 %v3501_v44, %v3501_v44  ;;  %11632 = vmatprep.mubr.bf16.mxu1 %v13415_v2  ;;  %v14169_v15 = vadd.f32 %v17121_v1, %v2988_v46  ;;  %v2990_v47 = vpop.f32.mrb[21].mxu0  ;;  %v5165_v32 = vshrl.u32 %v5023_v14, 16  ;;  %v5168_v8 = vshll.u32 %v5023_v14, 16  ;;  %v4537_v37 = vld [vmem:[#allocation2 + $0x44] sm:$0x1] }
 0x43e   :  { %v3925_v61 = vsel %vm17152_vm11, %v3917_v35, %v3924_v50  ;;  %v4531_v27 = vsel %vm17159_vm12, %v3926_v55, %v4530_v36  ;;  %v3928_v13 = vshrl.u32 %v13847_v38, 16  ;;  %v3931_v58 = vshll.u32 %v13847_v38, 16  ;;  %11633 = vmatmul.mubr.bf16.gmra.mrb[68].mxu1 %v15155_v26  ;;  %v2991_v23 = vpop.f32.mrb[22].mxu0  ;;  %v4533_v35 = vld [vmem:[#allocation2 + $0x3c] sm:$0xf] }
 0x43f   :  { %4529 = vst [vmem:[#allocation2 + $0x34] sm:$0xf] %v3925_v61  ;;  %4532 = vst [vmem:[#allocation2 + $0x38] sm:$0x1] %v4531_v27  ;;  %v3936_v4 = vshrl.u32 %v13848_v40, 16  ;;  %v3939_v7 = vshll.u32 %v13848_v40, 16  ;;  %v3278_v49 = vadd.f32 %v14169_v15, %v17035_v9  ;;  %v10022_v0 = vsel %vm17220_vm15, %v10020_v57, %v10021_v42 }
 0x440   :  { %v2993_v19 = vpop.f32.mrb[23].mxu0  ;;  %v3930_v10 = vrot.slane %v3928_v13, 7  ;;  %v13734_v14 = vcombine.low %v10019_v56, %v10022_v0  ;;  %v14170_v29 = vadd.f32 %v17121_v1, %v2991_v23  ;;  %v5167_v3 = vrot.slane %v5165_v32, 4  ;;  %v5025_v55 = vld [vmem:[#allocation2 + $0x20] sm:$0x1]  ;;  %v17238_v15 = vpop.f32.mrb[32].mxu1 }
 0x441   :  { %v3938_v17 = vrot.slane %v3936_v4, 7  ;;  %v3502_v21 = vmax.f32 %v3278_v49, 0.0  ;;  %v5170_v36 = vrot.slane %v5168_v8, 5  ;;  %v5174_v44 = vshll.u32 %v5024_v51, 16  ;;  %v9827_v40 = vld [vmem:[#allocation2 + $0x24] sm:$0xe] }
 0x442   :  { %v3933_v2 = vor.u32 %v3931_v58, %v3930_v10  ;;  %v3934_v50 = vrot.slane %v3930_v10, 4  ;;  %14079 = vmatprep.mubr.bf16.mxu0 %v13734_v14  ;;  %v3281_v9 = vadd.f32 %v14170_v29, %v17042_v60  ;;  %v5178_v38 = vshrl.u32 %v5024_v51, 16  ;;  %v9828_v56 = vld [vmem:[#allocation2 + $0x28] sm:$0xf]  ;;  %v15174_v4 = vld [vmem:[%s19404_s3 + $0xb0] sm:$0xff]  }
 0x443   :  { %v3941_v42 = vor.u32 %v3939_v7, %v3938_v17  ;;  %v3943_v26 = vrot.slane %v3938_v17, 4  ;;  %v13849_v46 = vpack.c.bf16 %v3502_v21, %v3502_v21  ;;  %v5171_v57 = vor.u32 %v5170_v36, %v5167_v3  ;;  %v17249_v7 = vpop.f32.mrb[33].mxu1  ;;  %11894 = vmatpush1.bf16.msra.mxu1 %v15174_v4  ;;  %v4540_v36 = vld [vmem:[#allocation2 + $0x48] sm:$0xf] }
 0x444   :  { %v4534_v47 = vsel %vm17145_vm10, %v3933_v2, %v4533_v35  ;;  %v3503_v32 = vmax.f32 %v3281_v9, 0.0  ;;  %v5176_v8 = vrot.slane %v5174_v44, 5  ;;  %v5180_v61 = vrot.slane %v5178_v38, 4  ;;  %v2996_v27 = vpop.f32.mrb[24].mxu0  ;;  %v17254_v38 = vpop.f32.mrb[34].mxu1  ;;  %11895 = vmatprep.subr.bf16.mxu1 %v19559_v11 }
 0x445   :  { %4535 = vst [vmem:[#allocation2 + $0x3c] sm:$0xf] %v4534_v47  ;;  %v3942_v60 = vsel %vm17152_vm11, %v3934_v50, %v3941_v42  ;;  %v4538_v13 = vsel %vm17159_vm12, %v3943_v26, %v4537_v37  ;;  %v3945_v58 = vshrl.u32 %v13849_v46, 16  ;;  %v3948_v23 = vshll.u32 %v13849_v46, 16  ;;  %v2998_v51 = vpop.f32.mrb[25].mxu0 }
 0x446   :  { %4536 = vst [vmem:[#allocation2 + $0x40] sm:$0xf] %v3942_v60  ;;  %4539 = vst [vmem:[#allocation2 + $0x44] sm:$0x1] %v4538_v13  ;;  %v13850_v49 = vpack.c.bf16 %v3503_v32, %v3503_v32  ;;  %v5172_v0 = vrot.slane %v5171_v57, 4  ;;  %v5181_v19 = vor.u32 %v5180_v61, %v5176_v8  ;;  %v5184_v10 = vshll.u32 %v5025_v55, 16 }
 0x447   :  { %v2999_v35 = vpop.f32.mrb[26].mxu0  ;;  %v3947_v14 = vrot.slane %v3945_v58, 7  ;;  %v14171_v29 = vadd.f32 %v17121_v1, %v2996_v27  ;;  %v9829_v37 = vld [vmem:[#allocation2 + $0x2c] sm:$0x1]  ;;  %v13703_v3 = vrot.slane %v9827_v40, 9  ;;  %v10025_v17 = vrot.slane %v9828_v56, 5 }
 0x448   :  { %v3001_v21 = vpop.f32.mrb[27].mxu0  ;;  %v3953_v44 = vshrl.u32 %v13850_v49, 16  ;;  %v3956_v2 = vshll.u32 %v13850_v49, 16  ;;  %v5177_v50 = vsel %vm17021_vm4, %v5172_v0, %v5176_v8  ;;  %v5182_v9 = vrot.slane %v5181_v19, 4  ;;  %v4544_v26 = vld [vmem:[#allocation2 + $0x50] sm:$0x1] }
 0x449   :  { %v3950_v55 = vor.u32 %v3948_v23, %v3947_v14  ;;  %v3951_v42 = vrot.slane %v3947_v14, 4  ;;  %v5186_v46 = vrot.slane %v5184_v10, 5  ;;  %v3286_v57 = vadd.f32 %v14171_v29, %v17070_v54  ;;  %v5026_v61 = vld [vmem:[#allocation2 + $0x24] sm:$0xf]  ;;  %v17260_v27 = vpop.f32.mrb[35].mxu1  ;;  %v15158_v49 = vld [vmem:[#allocation2 + $0x18] sm:$0xff]  }
 0x44a   :  { %v3955_v40 = vrot.slane %v3953_v44, 7  ;;  %v10026_v56 = vsel %vm17220_vm15, %v13703_v3, %v10025_v17  ;;  %v10027_v47 = vrot.slane %v10025_v17, 4  ;;  %v10028_v32 = vrot.slane %v9829_v37, 5  ;;  %v5027_v23 = vld [vmem:[#allocation2 + $0x28] sm:$0xf] }
 0x44b   :  { %v4541_v8 = vsel %vm17145_vm10, %v3950_v55, %v4540_v36  ;;  %v5187_v60 = vsel %vm17021_vm4, %v5182_v9, %v5186_v46  ;;  %v3504_v13 = vmax.f32 %v3286_v57, 0.0  ;;  %v14172_v58 = vadd.f32 %v17121_v1, %v2999_v35  ;;  %v5028_v37 = vld [vmem:[#allocation2 + $0x2c] sm:$0x1]  ;;  %v9830_v21 = vld [vmem:[#allocation2 + $0x30] sm:$0xe] }
 0x44c   :  { %4542 = vst [vmem:[#allocation2 + $0x48] sm:$0xf] %v4541_v8  ;;  %v3958_v54 = vor.u32 %v3956_v2, %v3955_v40  ;;  %v3960_v51 = vrot.slane %v3955_v40, 4  ;;  %v13416_v4 = vcombine.low %v5177_v50, %v5187_v60  ;;  %v10029_v0 = vsel %vm17220_vm15, %v10027_v47, %v10028_v32  ;;  %v3004_v19 = vpop.f32.mrb[28].mxu0  ;;  %v9831_v50 = vld [vmem:[#allocation2 + $0x34] sm:$0xf] }
 0x44d   :  { %v13851_v10 = vpack.c.bf16 %v3504_v13, %v3504_v13  ;;  %v13735_v14 = vcombine.low %v10026_v56, %v10029_v0  ;;  %v3289_v29 = vadd.f32 %v14172_v58, %v17077_v6  ;;  %v5189_v3 = vshrl.u32 %v5026_v61, 16  ;;  %v3006_v17 = vpop.f32.mrb[29].mxu0  ;;  %v4547_v56 = vld [vmem:[#allocation2 + $0x54] sm:$0xf] }
 0x44e   :  { %v3959_v35 = vsel %vm17152_vm11, %v3951_v42, %v3958_v54  ;;  %v4545_v36 = vsel %vm17159_vm12, %v3960_v51, %v4544_v26  ;;  %11640 = vmatprep.mubr.bf16.mxu1 %v13416_v4  ;;  %v5192_v44 = vshll.u32 %v5026_v61, 16  ;;  %v5198_v2 = vshll.u32 %v5027_v23, 16  ;;  %v3007_v9 = vpop.f32.mrb[30].mxu0  ;;  %v9832_v4 = vld [vmem:[#allocation2 + $0x38] sm:$0x1] }
 0x44f   :  { %4543 = vst [vmem:[#allocation2 + $0x4c] sm:$0xf] %v3959_v35  ;;  %4546 = vst [vmem:[#allocation2 + $0x50] sm:$0x1] %v4545_v36  ;;  %11641 = vmatmul.mubr.bf16.gmra.mrb[72].mxu1 %v15158_v49  ;;  %v3962_v55 = vshrl.u32 %v13851_v10, 16  ;;  %v3965_v6 = vshll.u32 %v13851_v10, 16  ;;  %14080 = vmatmul.mubr.bf16.vlgmr.msra.gmra.mrb[128].mxu0 %v13735_v14  ;;  %v14173_v61 = vadd.f32 %v17121_v1, %v3004_v19 }
 0x450   :  { %v3505_v46 = vmax.f32 %v3289_v29, 0.0  ;;  %v5191_v57 = vrot.slane %v5189_v3, 4  ;;  %v3009_v40 = vpop.f32.mrb[31].mxu0  ;;  %v5194_v47 = vrot.slane %v5192_v44, 5  ;;  %v5200_v42 = vrot.slane %v5198_v2, 5 }
 0x451   :  { %v5202_v32 = vshrl.u32 %v5027_v23, 16  ;;  %v5208_v8 = vshll.u32 %v5028_v37, 16  ;;  %v3964_v26 = vrot.slane %v3962_v55, 7  ;;  %v13704_v13 = vrot.slane %v9830_v21, 9  ;;  %v5029_v37 = vld [vmem:[#allocation2 + $0x30] sm:$0xf] }
 0x452   :  { %v13852_v60 = vpack.c.bf16 %v3505_v46, %v3505_v46  ;;  %v5195_v58 = vor.u32 %v5194_v47, %v5191_v57  ;;  %v10032_v49 = vrot.slane %v9831_v50, 5  ;;  %v3294_v35 = vadd.f32 %v14173_v61, %v17065_v12  ;;  %v4551_v55 = vld [vmem:[#allocation2 + $0x5c] sm:$0x1] }
 0x453   :  { %v5204_v54 = vrot.slane %v5202_v32, 4  ;;  %v5210_v51 = vrot.slane %v5208_v8, 5  ;;  %v3967_v0 = vor.u32 %v3965_v6, %v3964_v26  ;;  %v3968_v10 = vrot.slane %v3964_v26, 4 }
 0x454   :  { %v3970_v14 = vshrl.u32 %v13852_v60, 16  ;;  %v3973_v29 = vshll.u32 %v13852_v60, 16  ;;  %v5196_v3 = vrot.slane %v5195_v58, 4  ;;  %v10033_v23 = vsel %vm17220_vm15, %v13704_v13, %v10032_v49  ;;  %v3012_v36 = vpop.f32.mrb[32].mxu0  ;;  %v5030_v58 = vld [vmem:[#allocation2 + $0x34] sm:$0xf] }
 0x455   :  { %v5205_v17 = vor.u32 %v5204_v54, %v5200_v42  ;;  %v4548_v19 = vsel %vm17145_vm10, %v3967_v0, %v4547_v56  ;;  %v10034_v44 = vrot.slane %v10032_v49, 4  ;;  %v10035_v2 = vrot.slane %v9832_v4, 5  ;;  %v3014_v50 = vpop.f32.mrb[33].mxu0  ;;  %v5031_v54 = vld [vmem:[#allocation2 + $0x38] sm:$0x1] }
 0x456   :  { %v3972_v21 = vrot.slane %v3970_v14, 7  ;;  %4549 = vst [vmem:[#allocation2 + $0x54] sm:$0xf] %v4548_v19  ;;  %v5201_v6 = vsel %vm17021_vm4, %v5196_v3, %v5200_v42  ;;  %v3506_v57 = vmax.f32 %v3294_v35, 0.0  ;;  %v14174_v12 = vadd.f32 %v17121_v1, %v3007_v9  ;;  %v17283_v40 = vpop.f32.mrb[34].mxu0 }
 0x457   :  { %v5206_v46 = vrot.slane %v5205_v17, 4  ;;  %v10036_v56 = vsel %vm17220_vm15, %v10034_v44, %v10035_v2  ;;  %v5213_v8 = vshrl.u32 %v5029_v37, 16  ;;  %v3017_v26 = vpop.f32.mrb[35].mxu0  ;;  %v9833_v14 = vld [vmem:[#allocation2 + $0x3c] sm:$0xe]  ;;  %v5222_v44 = vshll.u32 %v5030_v58, 16 }
 0x458   :  { %v3975_v47 = vor.u32 %v3973_v29, %v3972_v21  ;;  %v3977_v32 = vrot.slane %v3972_v21, 4  ;;  %v13853_v61 = vpack.c.bf16 %v3506_v57, %v3506_v57  ;;  %v13736_v13 = vcombine.low %v10033_v23, %v10036_v56  ;;  %v17294_v29 = vpop.f32.mrb[36].mxu1  ;;  %v9834_v23 = vld [vmem:[#allocation2 + $0x40] sm:$0xf] }
 0x459   :  { %v5211_v60 = vsel %vm17021_vm4, %v5206_v46, %v5210_v51  ;;  %v3297_v42 = vadd.f32 %v14174_v12, %v17075_v34  ;;  %v5215_v0 = vrot.slane %v5213_v8, 4  ;;  %v15177_v51 = vld [vmem:[%s19404_s3 + $0xb8] sm:$0xff]   ;;  %v15160_v34 = vld [vmem:[#allocation2 + $0x24] sm:$0xff]   ;;  %v17299_v19 = vpop.f32.mrb[37].mxu1  ;;  %v4554_v21 = vld [vmem:[#allocation2 + $0x60] sm:$0xf] }
 0x45a   :  { %v3976_v9 = vsel %vm17152_vm11, %v3968_v10, %v3975_v47  ;;  %v4552_v4 = vsel %vm17159_vm12, %v3977_v32, %v4551_v55  ;;  %v13417_v49 = vcombine.low %v5201_v6, %v5211_v60  ;;  %v3979_v3 = vshrl.u32 %v13853_v61, 16  ;;  %14083 = vmatprep.mubr.bf16.mxu0 %v13736_v13  ;;  %11896 = vmatpush1.bf16.msra.mxu1 %v15177_v51  ;;  %v17302_v6 = vpop.f32.mrb[38].mxu1 }
 0x45b   :  { %4550 = vst [vmem:[#allocation2 + $0x58] sm:$0xf] %v3976_v9  ;;  %4553 = vst [vmem:[#allocation2 + $0x5c] sm:$0x1] %v4552_v4  ;;  %v3982_v17 = vshll.u32 %v13853_v61, 16  ;;  %v3507_v35 = vmax.f32 %v3297_v42, 0.0  ;;  %v14175_v55 = vadd.f32 %v17121_v1, %v3012_v36  ;;  %11897 = vmatprep.subr.bf16.mxu1 %v19559_v11 }
 0x45c   :  { %v5216_v10 = vshll.u32 %v5029_v37, 16  ;;  %11648 = vmatprep.mubr.bf16.mxu1 %v13417_v49  ;;  %v5226_v2 = vshrl.u32 %v5030_v58, 16  ;;  %v5232_v50 = vshll.u32 %v5031_v54, 16  ;;  %v3981_v46 = vrot.slane %v3979_v3, 7  ;;  %v17304_v32 = vpop.f32.mrb[36].mxu0  ;;  %v17306_v37 = vpop.f32.mrb[39].mxu1 }
 0x45d   :  { %11649 = vmatmul.mubr.bf16.gmra.mrb[76].mxu1 %v15160_v34  ;;  %v13854_v57 = vpack.c.bf16 %v3507_v35, %v3507_v35  ;;  %v13705_v47 = vrot.slane %v9833_v14, 9  ;;  %v5224_v56 = vrot.slane %v5222_v44, 5  ;;  %v3302_v60 = vadd.f32 %v14175_v55, %v17088_v16  ;;  %v9835_v36 = vld [vmem:[#allocation2 + $0x44] sm:$0x1]  ;;  %v3022_v61 = vpop.f32.mrb[37].mxu0 }
 0x45e   :  { %v5218_v12 = vrot.slane %v5216_v10, 5  ;;  %v5228_v8 = vrot.slane %v5226_v2, 4  ;;  %v5234_v26 = vrot.slane %v5232_v50, 5  ;;  %v3984_v13 = vor.u32 %v3982_v17, %v3981_v46  ;;  %v17310_v9 = vpop.f32.mrb[38].mxu0  ;;  %v4558_v17 = vld [vmem:[#allocation2 + $0x68] sm:$0x1] }
 0x45f   :  { %v3985_v42 = vrot.slane %v3981_v46, 4  ;;  %v3987_v58 = vshrl.u32 %v13854_v57, 16  ;;  %v3990_v54 = vshll.u32 %v13854_v57, 16  ;;  %v3508_v14 = vmax.f32 %v3302_v60, 0.0  ;;  %v3025_v34 = vpop.f32.mrb[39].mxu0 }
 0x460   :  { %v5219_v4 = vor.u32 %v5218_v12, %v5215_v0  ;;  %v5229_v49 = vor.u32 %v5228_v8, %v5224_v56  ;;  %v10039_v51 = vrot.slane %v9834_v23, 5  ;;  %v4555_v3 = vsel %vm17145_vm10, %v3984_v13, %v4554_v21  ;;  %v5032_v12 = vld [vmem:[#allocation2 + $0x3c] sm:$0xf]  ;;  %v5033_v21 = vld [vmem:[#allocation2 + $0x40] sm:$0xf] }
 0x461   :  { %v3989_v35 = vrot.slane %v3987_v58, 7  ;;  %v10042_v10 = vrot.slane %v9835_v36, 5  ;;  %v14176_v16 = vadd.f32 %v17121_v1, %v17283_v40  ;;  %4556 = vst [vmem:[#allocation2 + $0x60] sm:$0xf] %v4555_v3  ;;  %v13855_v50 = vpack.c.bf16 %v3508_v14, %v3508_v14  ;;  %v5034_v61 = vld [vmem:[#allocation2 + $0x44] sm:$0x1] }
 0x462   :  { %v5220_v44 = vrot.slane %v5219_v4, 4  ;;  %v5230_v2 = vrot.slane %v5229_v49, 4  ;;  %v10040_v0 = vsel %vm17220_vm15, %v13705_v47, %v10039_v51  ;;  %v10041_v23 = vrot.slane %v10039_v51, 4  ;;  %v9836_v34 = vld [vmem:[#allocation2 + $0x48] sm:$0xe] }
 0x463   :  { %v3992_v55 = vor.u32 %v3990_v54, %v3989_v35  ;;  %v3994_v46 = vrot.slane %v3989_v35, 4  ;;  %v3305_v57 = vadd.f32 %v14176_v16, %v17095_v28  ;;  %v3996_v60 = vshrl.u32 %v13855_v50, 16  ;;  %v15161_v54 = vld [vmem:[#allocation2 + $0x30] sm:$0xff]   ;;  %v4561_v28 = vld [vmem:[#allocation2 + $0x6c] sm:$0xf] }
 0x464   :  { %v5225_v8 = vsel %vm17021_vm4, %v5220_v44, %v5224_v56  ;;  %v5235_v40 = vsel %vm17021_vm4, %v5230_v2, %v5234_v26  ;;  %v3999_v36 = vshll.u32 %v13855_v50, 16  ;;  %v10043_v4 = vsel %vm17220_vm15, %v10041_v23, %v10042_v10  ;;  %v17329_v49 = vpop.f32.mrb[40].mxu0  ;;  %v9837_v3 = vld [vmem:[#allocation2 + $0x4c] sm:$0xf] }
 0x465   :  { %v3993_v13 = vsel %vm17152_vm11, %v3985_v42, %v3992_v55  ;;  %v4559_v47 = vsel %vm17159_vm12, %v3994_v46, %v4558_v17  ;;  %v13418_v58 = vcombine.low %v5225_v8, %v5235_v40  ;;  %v3998_v56 = vrot.slane %v3996_v60, 7  ;;  %v3030_v42 = vpop.f32.mrb[41].mxu0  ;;  %v9838_v60 = vld [vmem:[#allocation2 + $0x50] sm:$0x1] }
 0x466   :  { %4557 = vst [vmem:[#allocation2 + $0x64] sm:$0xf] %v3993_v13  ;;  %4560 = vst [vmem:[#allocation2 + $0x68] sm:$0x1] %v4559_v47  ;;  %v13737_v26 = vcombine.low %v10040_v0, %v10043_v4  ;;  %v3509_v14 = vmax.f32 %v3305_v57, 0.0  ;;  %v5237_v51 = vshrl.u32 %v5032_v12, 16 }
 0x467   :  { %11656 = vmatprep.mubr.bf16.mxu1 %v13418_v58  ;;  %v5240_v35 = vshll.u32 %v5032_v12, 16  ;;  %v5246_v16 = vshll.u32 %v5033_v21, 16  ;;  %v5250_v17 = vshrl.u32 %v5033_v21, 16  ;;  %v5256_v44 = vshll.u32 %v5034_v61, 16  ;;  %v17331_v2 = vpop.f32.mrb[42].mxu0 }
 0x468   :  { %11657 = vmatmul.mubr.bf16.gmra.mrb[80].mxu1 %v15161_v54  ;;  %v4001_v10 = vor.u32 %v3999_v36, %v3998_v56  ;;  %v4002_v50 = vrot.slane %v3998_v56, 4  ;;  %14084 = vmatmul.mubr.bf16.gmra.mrb[132].mxu0 %v13737_v26  ;;  %v13856_v55 = vpack.c.bf16 %v3509_v14, %v3509_v14  ;;  %v5239_v46 = vrot.slane %v5237_v51, 4  ;;  %v3033_v23 = vpop.f32.mrb[43].mxu0  ;;  %v5035_v47 = vld [vmem:[#allocation2 + $0x48] sm:$0xf] }
 0x469   :  { %v5242_v0 = vrot.slane %v5240_v35, 5  ;;  %v5248_v57 = vrot.slane %v5246_v16, 5  ;;  %v5252_v8 = vrot.slane %v5250_v17, 4  ;;  %v5258_v40 = vrot.slane %v5256_v44, 5  ;;  %v17341_v51 = vld [vmem:[%s19403_s2] ss:$0 sm:$0xff] }
 0x46a   :  { %v4562_v12 = vsel %vm17145_vm10, %v4001_v10, %v4561_v28  ;;  %v4004_v13 = vshrl.u32 %v13856_v55, 16  ;;  %v4007_v21 = vshll.u32 %v13856_v55, 16  ;;  %v14177_v61 = vadd.f32 %v17121_v1, %v17304_v32  ;;  %v4565_v42 = vld [vmem:[#allocation2 + $0x74] sm:$0x1]  ;;  %v5036_v23 = vld [vmem:[#allocation2 + $0x4c] sm:$0xf] }
 0x46b   :  { %4563 = vst [vmem:[#allocation2 + $0x6c] sm:$0xf] %v4562_v12  ;;  %v5243_v36 = vor.u32 %v5242_v0, %v5239_v46  ;;  %v5253_v58 = vor.u32 %v5252_v8, %v5248_v57  ;;  %v13706_v54 = vrot.slane %v9836_v34, 9  ;;  %v10046_v4 = vrot.slane %v9837_v3, 5  ;;  %v5037_v0 = vld [vmem:[#allocation2 + $0x50] sm:$0x1] }
 0x46c   :  { %v4006_v56 = vrot.slane %v4004_v13, 7  ;;  %v3310_v26 = vadd.f32 %v14177_v61, %v17083_v63  ;;  %v10049_v14 = vrot.slane %v9838_v60, 5  ;;  %v14178_v28 = vadd.f32 %v17341_v51, %v17310_v9  ;;  %v17347_v3 = vpop.f32.mrb[44].mxu0 }
 0x46d   :  { %v5244_v1 = vrot.slane %v5243_v36, 4  ;;  %v5254_v32 = vrot.slane %v5253_v58, 4  ;;  %v10047_v35 = vsel %vm17220_vm15, %v13706_v54, %v10046_v4  ;;  %v10048_v34 = vrot.slane %v10046_v4, 4  ;;  %v3038_v10 = vpop.f32.mrb[45].mxu0 }
 0x46e   :  { %v4009_v16 = vor.u32 %v4007_v21, %v4006_v56  ;;  %v4011_v63 = vrot.slane %v4006_v56, 4  ;;  %v3510_v17 = vmax.f32 %v3310_v26, 0.0  ;;  %v3313_v44 = vadd.f32 %v14178_v28, %v17092_v48  ;;  %v17356_v60 = vpop.f32.mrb[46].mxu0  ;;  %v17362_v56 = vpop.f32.mrb[40].mxu1 }
 0x46f   :  { %v5249_v55 = vsel %vm17021_vm4, %v5244_v1, %v5248_v57  ;;  %v5259_v9 = vsel %vm17021_vm4, %v5254_v32, %v5258_v40  ;;  %v10050_v46 = vsel %vm17220_vm15, %v10048_v34, %v10049_v14  ;;  %v5261_v8 = vshrl.u32 %v5035_v47, 16  ;;  %v9839_v57 = vld [vmem:[#allocation2 + $0x54] sm:$0xe]  ;;  %v3041_v61 = vpop.f32.mrb[47].mxu0  ;;  %v15163_v40 = vld [vmem:[#allocation2 + $0x3c] sm:$0xff]  }
 0x470   :  { %v4010_v12 = vsel %vm17152_vm11, %v4002_v50, %v4009_v16  ;;  %v4566_v48 = vsel %vm17159_vm12, %v4011_v63, %v4565_v42  ;;  %v13419_v13 = vcombine.low %v5249_v55, %v5259_v9  ;;  %v13857_v21 = vpack.c.bf16 %v3510_v17, %v3510_v17  ;;  %v15180_v50 = vld [vmem:[%s19404_s3 + $0xc0] sm:$0xff]   ;;  %v9840_v1 = vld [vmem:[#allocation2 + $0x58] sm:$0xf]  ;;  %v9841_v16 = vld [vmem:[#allocation2 + $0x5c] sm:$0x1]  ;;  %v17369_v55 = vpop.f32.mrb[41].mxu1 }
 0x471   :  { %4564 = vst [vmem:[#allocation2 + $0x70] sm:$0xf] %v4010_v12  ;;  %4567 = vst [vmem:[#allocation2 + $0x74] sm:$0x1] %v4566_v48  ;;  %v13738_v36 = vcombine.low %v10047_v35, %v10050_v46  ;;  %v3511_v58 = vmax.f32 %v3313_v44, 0.0  ;;  %v5263_v54 = vrot.slane %v5261_v8, 4  ;;  %11898 = vmatpush1.bf16.msra.mxu1 %v15180_v50 }
 0x472   :  { %v5264_v4 = vshll.u32 %v5035_v47, 16  ;;  %11664 = vmatprep.mubr.bf16.mxu1 %v13419_v13  ;;  %v4013_v26 = vshrl.u32 %v13857_v21, 16  ;;  %v4016_v14 = vshll.u32 %v13857_v21, 16  ;;  %v5270_v28 = vshll.u32 %v5036_v23, 16  ;;  %v4568_v9 = vld [vmem:[#allocation2 + $0x78] sm:$0xf]  ;;  %11899 = vmatprep.subr.bf16.mxu1 %v19559_v11 }
 0x473   :  { %v5274_v42 = vshrl.u32 %v5036_v23, 16  ;;  %11665 = vmatmul.mubr.bf16.gmra.mrb[84].mxu1 %v15163_v40  ;;  %14087 = vmatprep.mubr.bf16.mxu0 %v13738_v36  ;;  %v13858_v32 = vpack.c.bf16 %v3511_v58, %v3511_v58  ;;  %v5280_v35 = vshll.u32 %v5037_v0, 16  ;;  %v14179_v47 = vadd.f32 %v17341_v51, %v17329_v49  ;;  %v17375_v40 = vpop.f32.mrb[42].mxu1 }
 0x474   :  { %v5266_v34 = vrot.slane %v5264_v4, 5  ;;  %v4015_v63 = vrot.slane %v4013_v26, 7  ;;  %v5272_v17 = vrot.slane %v5270_v28, 5  ;;  %v13707_v10 = vrot.slane %v9839_v57, 9  ;;  %v17371_v48 = vpop.f32.mrb[48].mxu0 }
 0x475   :  { %v5276_v44 = vrot.slane %v5274_v42, 4  ;;  %v4021_v46 = vshrl.u32 %v13858_v32, 16  ;;  %v4024_v23 = vshll.u32 %v13858_v32, 16  ;;  %v5282_v12 = vrot.slane %v5280_v35, 5  ;;  %v3046_v61 = vpop.f32.mrb[49].mxu0 }
 0x476   :  { %v5267_v8 = vor.u32 %v5266_v34, %v5263_v54  ;;  %v4018_v0 = vor.u32 %v4016_v14, %v4015_v63  ;;  %v4019_v13 = vrot.slane %v4015_v63, 4  ;;  %v3318_v21 = vadd.f32 %v14179_v47, %v17106_v52  ;;  %v17377_v50 = vpop.f32.mrb[50].mxu0  ;;  %v17379_v54 = vpop.f32.mrb[43].mxu1  ;;  %v4572_v28 = vld [vmem:[#allocation2 + $0x80] sm:$0x1] }
 0x477   :  { %v5277_v49 = vor.u32 %v5276_v44, %v5272_v17  ;;  %v4023_v57 = vrot.slane %v4021_v46, 7  ;;  %v10053_v58 = vrot.slane %v9840_v1, 5  ;;  %v10056_v4 = vrot.slane %v9841_v16, 5  ;;  %v5038_v32 = vld [vmem:[#allocation2 + $0x54] sm:$0xf]  ;;  %v3049_v16 = vpop.f32.mrb[51].mxu0 }
 0x478   :  { %v5268_v36 = vrot.slane %v5267_v8, 4  ;;  %v4569_v26 = vsel %vm17145_vm10, %v4018_v0, %v4568_v9  ;;  %v3512_v42 = vmax.f32 %v3318_v21, 0.0  ;;  %v14180_v52 = vadd.f32 %v17341_v51, %v17331_v2  ;;  %v5039_v8 = vld [vmem:[#allocation2 + $0x58] sm:$0xf] }
 0x479   :  { %v5278_v14 = vrot.slane %v5277_v49, 4  ;;  %4570 = vst [vmem:[#allocation2 + $0x78] sm:$0xf] %v4569_v26  ;;  %v4026_v34 = vor.u32 %v4024_v23, %v4023_v57  ;;  %v4028_v35 = vrot.slane %v4023_v57, 4  ;;  %v10054_v47 = vsel %vm17220_vm15, %v13707_v10, %v10053_v58  ;;  %v15164_v10 = vld [vmem:[#allocation2 + $0x48] sm:$0xff]  }
 0x47a   :  { %v5273_v1 = vsel %vm17021_vm4, %v5268_v36, %v5272_v17  ;;  %v13859_v44 = vpack.c.bf16 %v3512_v42, %v3512_v42  ;;  %v10055_v9 = vrot.slane %v10053_v58, 4  ;;  %v3321_v46 = vadd.f32 %v14180_v52, %v17112_v45  ;;  %v5040_v17 = vld [vmem:[#allocation2 + $0x5c] sm:$0x1]  ;;  %v9842_v45 = vld [vmem:[#allocation2 + $0x60] sm:$0xe] }
 0x47b   :  { %v5283_v63 = vsel %vm17021_vm4, %v5278_v14, %v5282_v12  ;;  %v4027_v2 = vsel %vm17152_vm11, %v4019_v13, %v4026_v34  ;;  %v4573_v23 = vsel %vm17159_vm12, %v4028_v35, %v4572_v28  ;;  %v5285_v49 = vshrl.u32 %v5038_v32, 16  ;;  %v4575_v36 = vld [vmem:[#allocation2 + $0x84] sm:$0xf]  ;;  %v9844_v42 = vld [vmem:[#allocation2 + $0x68] sm:$0x1] }
 0x47c   :  { %v13420_v0 = vcombine.low %v5273_v1, %v5283_v63  ;;  %4571 = vst [vmem:[#allocation2 + $0x7c] sm:$0xf] %v4027_v2  ;;  %4574 = vst [vmem:[#allocation2 + $0x80] sm:$0x1] %v4573_v23  ;;  %v4030_v21 = vshrl.u32 %v13859_v44, 16  ;;  %v4033_v61 = vshll.u32 %v13859_v44, 16  ;;  %v10057_v12 = vsel %vm17220_vm15, %v10055_v9, %v10056_v4 }
 0x47d   :  { %v3513_v57 = vmax.f32 %v3321_v46, 0.0  ;;  %v13739_v58 = vcombine.low %v10054_v47, %v10057_v12  ;;  %v5287_v13 = vrot.slane %v5285_v49, 4  ;;  %v5288_v26 = vshll.u32 %v5038_v32, 16  ;;  %v9843_v28 = vld [vmem:[#allocation2 + $0x64] sm:$0xf]  ;;  %v17398_v52 = vpop.f32.mrb[52].mxu0 }
 0x47e   :  { %11672 = vmatprep.mubr.bf16.mxu1 %v13420_v0  ;;  %v5294_v14 = vshll.u32 %v5039_v8, 16  ;;  %v4032_v34 = vrot.slane %v4030_v21, 7  ;;  %v5298_v1 = vshrl.u32 %v5039_v8, 16  ;;  %v5304_v16 = vshll.u32 %v5040_v17, 16  ;;  %v3054_v63 = vpop.f32.mrb[53].mxu0 }
 0x47f   :  { %11673 = vmatmul.mubr.bf16.gmra.mrb[88].mxu1 %v15164_v10  ;;  %v13860_v35 = vpack.c.bf16 %v3513_v57, %v3513_v57  ;;  %14088 = vmatmul.mubr.bf16.gmra.mrb[136].mxu0 %v13739_v58  ;;  %v5290_v4 = vrot.slane %v5288_v26, 5  ;;  %v14181_v9 = vadd.f32 %v17341_v51, %v17347_v3  ;;  %v13708_v47 = vrot.slane %v9842_v45, 9  ;;  %v17402_v46 = vpop.f32.mrb[54].mxu0  ;;  %v4579_v3 = vld [vmem:[#allocation2 + $0x8c] sm:$0x1] }
 0x480   :  { %v5296_v44 = vrot.slane %v5294_v14, 5  ;;  %v4035_v32 = vor.u32 %v4033_v61, %v4032_v34  ;;  %v4036_v2 = vrot.slane %v4032_v34, 4  ;;  %v3057_v49 = vpop.f32.mrb[55].mxu0  ;;  %v5300_v21 = vrot.slane %v5298_v1, 4  ;;  %v5042_v63 = vld [vmem:[#allocation2 + $0x64] sm:$0xf] }
 0x481   :  { %v4038_v23 = vshrl.u32 %v13860_v35, 16  ;;  %v4041_v0 = vshll.u32 %v13860_v35, 16  ;;  %v5291_v10 = vor.u32 %v5290_v4, %v5287_v13  ;;  %v5306_v12 = vrot.slane %v5304_v16, 5  ;;  %v5041_v35 = vld [vmem:[#allocation2 + $0x60] sm:$0xf] }
 0x482   :  { %v3326_v8 = vadd.f32 %v14181_v9, %v17101_v5  ;;  %v4576_v17 = vsel %vm17145_vm10, %v4035_v32, %v4575_v36  ;;  %v10060_v58 = vrot.slane %v9843_v28, 5  ;;  %v10063_v26 = vrot.slane %v9844_v42, 5  ;;  %v5043_v36 = vld [vmem:[#allocation2 + $0x68] sm:$0x1] }
 0x483   :  { %v4040_v57 = vrot.slane %v4038_v23, 7  ;;  %4577 = vst [vmem:[#allocation2 + $0x84] sm:$0xf] %v4576_v17  ;;  %v5292_v45 = vrot.slane %v5291_v10, 4  ;;  %v5301_v14 = vor.u32 %v5300_v21, %v5296_v44  ;;  %v14182_v34 = vadd.f32 %v17341_v51, %v17356_v60  ;;  %v17416_v23 = vpop.f32.mrb[44].mxu1 }
 0x484   :  { %v3514_v61 = vmax.f32 %v3326_v8, 0.0  ;;  %v10061_v5 = vsel %vm17220_vm15, %v13708_v47, %v10060_v58  ;;  %v10062_v16 = vrot.slane %v10060_v58, 4  ;;  %v17414_v32 = vpop.f32.mrb[56].mxu0  ;;  %v5309_v49 = vshrl.u32 %v5041_v35, 16  ;;  %v9845_v10 = vld [vmem:[#allocation2 + $0x6c] sm:$0xe] }
 0x485   :  { %v4043_v13 = vor.u32 %v4041_v0, %v4040_v57  ;;  %v4045_v1 = vrot.slane %v4040_v57, 4  ;;  %v5297_v28 = vsel %vm17021_vm4, %v5292_v45, %v5296_v44  ;;  %v5302_v42 = vrot.slane %v5301_v14, 4  ;;  %v3062_v44 = vpop.f32.mrb[57].mxu0  ;;  %v17427_v21 = vpop.f32.mrb[45].mxu1 }
 0x486   :  { %v13861_v4 = vpack.c.bf16 %v3514_v61, %v3514_v61  ;;  %v3329_v9 = vadd.f32 %v14182_v34, %v17108_v22  ;;  %v10064_v0 = vsel %vm17220_vm15, %v10062_v16, %v10063_v26  ;;  %v15183_v22 = vld [vmem:[%s19404_s3 + $0xc8] sm:$0xff]   ;;  %v17431_v58 = vpop.f32.mrb[58].mxu0  ;;  %v5311_v14 = vrot.slane %v5309_v49, 4  ;;  %v17433_v44 = vpop.f32.mrb[46].mxu1 }
 0x487   :  { %v4044_v60 = vsel %vm17152_vm11, %v4036_v2, %v4043_v13  ;;  %v4580_v47 = vsel %vm17159_vm12, %v4045_v1, %v4579_v3  ;;  %v5307_v2 = vsel %vm17021_vm4, %v5302_v42, %v5306_v12  ;;  %v13740_v57 = vcombine.low %v10061_v5, %v10064_v0  ;;  %v4582_v3 = vld [vmem:[#allocation2 + $0x90] sm:$0xf]  ;;  %v3065_v34 = vpop.f32.mrb[59].mxu0  ;;  %11900 = vmatpush1.bf16.msra.mxu1 %v15183_v22  ;;  %v15166_v13 = vld [vmem:[#allocation2 + $0x54] sm:$0xff]  }
 0x488   :  { %4578 = vst [vmem:[#allocation2 + $0x88] sm:$0xf] %v4044_v60  ;;  %4581 = vst [vmem:[#allocation2 + $0x8c] sm:$0x1] %v4580_v47  ;;  %v4047_v8 = vshrl.u32 %v13861_v4, 16  ;;  %v4050_v17 = vshll.u32 %v13861_v4, 16  ;;  %v13421_v26 = vcombine.low %v5297_v28, %v5307_v2  ;;  %11901 = vmatprep.subr.bf16.mxu1 %v19559_v11  ;;  %v14183_v28 = vadd.f32 %v17341_v51, %v17371_v48 }
 0x489   :  { %v3515_v45 = vmax.f32 %v3329_v9, 0.0  ;;  %v5312_v61 = vshll.u32 %v5041_v35, 16  ;;  %14091 = vmatprep.mubr.bf16.mxu0 %v13740_v57  ;;  %v5318_v16 = vshll.u32 %v5042_v63, 16  ;;  %v5322_v60 = vshrl.u32 %v5042_v63, 16  ;;  %v9846_v42 = vld [vmem:[#allocation2 + $0x70] sm:$0xf] }
 0x48a   :  { %v4049_v1 = vrot.slane %v4047_v8, 7  ;;  %v5328_v47 = vshll.u32 %v5043_v36, 16  ;;  %11680 = vmatprep.mubr.bf16.mxu1 %v13421_v26  ;;  %v9847_v35 = vld [vmem:[#allocation2 + $0x74] sm:$0x1]  ;;  %v13709_v4 = vrot.slane %v9845_v10, 9  ;;  %v17438_v63 = vpop.f32.mrb[47].mxu1  ;;  %v3334_v48 = vadd.f32 %v14183_v28, %v17130_v20 }
 0x48b   :  { %v13862_v12 = vpack.c.bf16 %v3515_v45, %v3515_v45  ;;  %v5314_v5 = vrot.slane %v5312_v61, 5  ;;  %11681 = vmatmul.mubr.bf16.gmra.mrb[92].mxu1 %v15166_v13  ;;  %v5320_v49 = vrot.slane %v5318_v16, 5  ;;  %v5324_v22 = vrot.slane %v5322_v60, 4  ;;  %v5044_v16 = vld [vmem:[#allocation2 + $0x6c] sm:$0xf] }
 0x48c   :  { %v4052_v9 = vor.u32 %v4050_v17, %v4049_v1  ;;  %v4053_v0 = vrot.slane %v4049_v1, 4  ;;  %v5330_v57 = vrot.slane %v5328_v47, 5  ;;  %v10067_v61 = vrot.slane %v9846_v42, 5  ;;  %v17443_v34 = vpop.f32.mrb[60].mxu0  ;;  %v4586_v60 = vld [vmem:[#allocation2 + $0x98] sm:$0x1] }
 0x48d   :  { %v4055_v36 = vshrl.u32 %v13862_v12, 16  ;;  %v4058_v2 = vshll.u32 %v13862_v12, 16  ;;  %v5315_v8 = vor.u32 %v5314_v5, %v5311_v14  ;;  %v5325_v45 = vor.u32 %v5324_v22, %v5320_v49  ;;  %v3070_v5 = vpop.f32.mrb[61].mxu0  ;;  %v5046_v22 = vld [vmem:[#allocation2 + $0x74] sm:$0x1] }
 0x48e   :  { %v4583_v26 = vsel %vm17145_vm10, %v4052_v9, %v4582_v3  ;;  %v10070_v13 = vrot.slane %v9847_v35, 5  ;;  %v14184_v1 = vadd.f32 %v17341_v51, %v17377_v50  ;;  %v3516_v47 = vmax.f32 %v3334_v48, 0.0  ;;  %v5045_v35 = vld [vmem:[#allocation2 + $0x70] sm:$0xf] }
 0x48f   :  { %4584 = vst [vmem:[#allocation2 + $0x90] sm:$0xf] %v4583_v26  ;;  %v4057_v10 = vrot.slane %v4055_v36, 7  ;;  %v5316_v17 = vrot.slane %v5315_v8, 4  ;;  %v5326_v14 = vrot.slane %v5325_v45, 4  ;;  %v10068_v3 = vsel %vm17220_vm15, %v13709_v4, %v10067_v61  ;;  %v17452_v36 = vpop.f32.mrb[62].mxu0 }
 0x490   :  { %v10069_v12 = vrot.slane %v10067_v61, 4  ;;  %v3337_v9 = vadd.f32 %v14184_v1, %v17137_v53  ;;  %v13863_v8 = vpack.c.bf16 %v3516_v47, %v3516_v47  ;;  %v5333_v26 = vshrl.u32 %v5044_v16, 16  ;;  %v9848_v45 = vld [vmem:[#allocation2 + $0x78] sm:$0xe] }
 0x491   :  { %v4060_v20 = vor.u32 %v4058_v2, %v4057_v10  ;;  %v4062_v28 = vrot.slane %v4057_v10, 4  ;;  %v5321_v42 = vsel %vm17021_vm4, %v5316_v17, %v5320_v49  ;;  %v5331_v50 = vsel %vm17021_vm4, %v5326_v14, %v5330_v57  ;;  %v3073_v2 = vpop.f32.mrb[63].mxu0  ;;  %v15167_v10 = vld [vmem:[#allocation2 + $0x60] sm:$0xff]  }
 0x492   :  { %v10071_v4 = vsel %vm17220_vm15, %v10069_v12, %v10070_v13  ;;  %v13422_v49 = vcombine.low %v5321_v42, %v5331_v50  ;;  %v4064_v17 = vshrl.u32 %v13863_v8, 16  ;;  %v4067_v57 = vshll.u32 %v13863_v8, 16  ;;  %v4589_v13 = vld [vmem:[#allocation2 + $0x9c] sm:$0xf] }
 0x493   :  { %v4061_v48 = vsel %vm17152_vm11, %v4053_v0, %v4060_v20  ;;  %v4587_v53 = vsel %vm17159_vm12, %v4062_v28, %v4586_v60  ;;  %v13741_v61 = vcombine.low %v10068_v3, %v10071_v4  ;;  %v3517_v1 = vmax.f32 %v3337_v9, 0.0  ;;  %v9849_v3 = vld [vmem:[#allocation2 + $0x7c] sm:$0xf]  ;;  %v9850_v28 = vld [vmem:[#allocation2 + $0x80] sm:$0x1] }
 0x494   :  { %4585 = vst [vmem:[#allocation2 + $0x94] sm:$0xf] %v4061_v48  ;;  %4588 = vst [vmem:[#allocation2 + $0x98] sm:$0x1] %v4587_v53  ;;  %v5335_v14 = vrot.slane %v5333_v26, 4  ;;  %11688 = vmatprep.mubr.bf16.mxu1 %v13422_v49  ;;  %v5336_v47 = vshll.u32 %v5044_v16, 16  ;;  %v14185_v60 = vadd.f32 %v17341_v51, %v17398_v52 }
 0x495   :  { %14092 = vmatmul.mubr.bf16.gmra.mrb[140].mxu0 %v13741_v61  ;;  %v5342_v12 = vshll.u32 %v5045_v35, 16  ;;  %v5346_v5 = vshrl.u32 %v5045_v35, 16  ;;  %v5352_v2 = vshll.u32 %v5046_v22, 16  ;;  %11689 = vmatmul.mubr.bf16.gmra.mrb[96].mxu1 %v15167_v10  ;;  %v4066_v0 = vrot.slane %v4064_v17, 7  ;;  %v17464_v49 = vpop.f32.mrb[64].mxu0 }
 0x496   :  { %v13864_v20 = vpack.c.bf16 %v3517_v1, %v3517_v1  ;;  %v13710_v42 = vrot.slane %v9848_v45, 9  ;;  %v5338_v50 = vrot.slane %v5336_v47, 5  ;;  %v3342_v61 = vadd.f32 %v14185_v60, %v17124_v18  ;;  %v3078_v17 = vpop.f32.mrb[65].mxu0 }
 0x497   :  { %v5344_v8 = vrot.slane %v5342_v12, 5  ;;  %v5348_v9 = vrot.slane %v5346_v5, 4  ;;  %v5354_v4 = vrot.slane %v5352_v2, 5  ;;  %v4069_v26 = vor.u32 %v4067_v57, %v4066_v0  ;;  %v5047_v57 = vld [vmem:[#allocation2 + $0x78] sm:$0xf]  ;;  %v17471_v12 = vpop.f32.mrb[66].mxu0 }
 0x498   :  { %v4070_v48 = vrot.slane %v4066_v0, 4  ;;  %v4072_v53 = vshrl.u32 %v13864_v20, 16  ;;  %v4075_v16 = vshll.u32 %v13864_v20, 16  ;;  %v5339_v35 = vor.u32 %v5338_v50, %v5335_v14  ;;  %v4593_v5 = vld [vmem:[#allocation2 + $0xa4] sm:$0x1]  ;;  %v15169_v17 = vld [vmem:[#allocation2 + $0x6c] sm:$0xff]  }
 0x499   :  { %v5349_v22 = vor.u32 %v5348_v9, %v5344_v8  ;;  %v10074_v10 = vrot.slane %v9849_v3, 5  ;;  %v4590_v52 = vsel %vm17145_vm10, %v4069_v26, %v4589_v13  ;;  %v10077_v1 = vrot.slane %v9850_v28, 5  ;;  %v5048_v28 = vld [vmem:[#allocation2 + $0x7c] sm:$0xf]  ;;  %v5049_v50 = vld [vmem:[#allocation2 + $0x80] sm:$0x1] }
 0x49a   :  { %v4074_v45 = vrot.slane %v4072_v53, 7  ;;  %v14186_v47 = vadd.f32 %v17341_v51, %v17402_v46  ;;  %4591 = vst [vmem:[#allocation2 + $0x9c] sm:$0xf] %v4590_v52  ;;  %v5340_v2 = vrot.slane %v5339_v35, 4  ;;  %v3518_v0 = vmax.f32 %v3342_v61, 0.0 }
 0x49b   :  { %v5350_v14 = vrot.slane %v5349_v22, 4  ;;  %v10075_v18 = vsel %vm17220_vm15, %v13710_v42, %v10074_v10  ;;  %v10076_v3 = vrot.slane %v10074_v10, 4  ;;  %v5357_v53 = vshrl.u32 %v5047_v57, 16  ;;  %v17480_v35 = vld [vmem:[#allocation2 + $0x84] sm:$0xe]  ;;  %v3081_v22 = vpop.f32.mrb[67].mxu0 }
 0x49c   :  { %v4077_v20 = vor.u32 %v4075_v16, %v4074_v45  ;;  %v4079_v60 = vrot.slane %v4074_v45, 4  ;;  %v3345_v13 = vadd.f32 %v14186_v47, %v17134_v30  ;;  %v5345_v46 = vsel %vm17021_vm4, %v5340_v2, %v5344_v8  ;;  %v17488_v10 = vpop.f32.mrb[68].mxu0  ;;  %v17490_v8 = vpop.f32.mrb[48].mxu1  ;;  %v9852_v22 = vld [vmem:[#allocation2 + $0x88] sm:$0xf] }
 0x49d   :  { %v5355_v9 = vsel %vm17021_vm4, %v5350_v14, %v5354_v4  ;;  %v13865_v26 = vpack.c.bf16 %v3518_v0, %v3518_v0  ;;  %v10078_v61 = vsel %vm17220_vm15, %v10076_v3, %v10077_v1  ;;  %19637 = vst [vmem:[#allocation37_spill] sm:$0xff] %v17490_v8  ;;  %v15186_v4 = vld [vmem:[%s19404_s3 + $0xd0] sm:$0xff]   ;;  %v17495_v2 = vpop.f32.mrb[49].mxu1  ;;  %v4596_v1 = vld [vmem:[#allocation2 + $0xa8] sm:$0xf]  ;;  %v5359_v14 = vrot.slane %v5357_v53, 4 }
 0x49e   :  { %v4078_v42 = vsel %vm17152_vm11, %v4070_v48, %v4077_v20  ;;  %v4594_v16 = vsel %vm17159_vm12, %v4079_v60, %v4593_v5  ;;  %v13423_v30 = vcombine.low %v5345_v46, %v5355_v9  ;;  %v13742_v45 = vcombine.low %v10075_v18, %v10078_v61  ;;  %v3086_v5 = vpop.f32.mrb[69].mxu0  ;;  %11902 = vmatpush1.bf16.msra.mxu1 %v15186_v4  ;;  %v17499_v46 = vpop.f32.mrb[50].mxu1 }
 0x49f   :  { %4592 = vst [vmem:[#allocation2 + $0xa0] sm:$0xf] %v4078_v42  ;;  %4595 = vst [vmem:[#allocation2 + $0xa4] sm:$0x1] %v4594_v16  ;;  %v4081_v52 = vshrl.u32 %v13865_v26, 16  ;;  %v4084_v48 = vshll.u32 %v13865_v26, 16  ;;  %11903 = vmatprep.subr.bf16.mxu1 %v19559_v11 }
 0x4a0   :  { %v3519_v47 = vmax.f32 %v3345_v13, 0.0  ;;  %11696 = vmatprep.mubr.bf16.mxu1 %v13423_v30  ;;  %v5360_v0 = vshll.u32 %v5047_v57, 16  ;;  %v5366_v20 = vshll.u32 %v5048_v28, 16  ;;  %v5370_v60 = vshrl.u32 %v5048_v28, 16  ;;  %v17497_v3 = vpop.f32.mrb[70].mxu0  ;;  %19638 = vst [vmem:[#allocation40_spill] sm:$0xff] %v17499_v46  ;;  %14095 = vmatprep.mubr.bf16.mxu0 %v13742_v45 }
 0x4a1   :  { %11697 = vmatmul.mubr.bf16.gmra.mrb[100].mxu1 %v15169_v17  ;;  %v4083_v9 = vrot.slane %v4081_v52, 7  ;;  %v5376_v18 = vshll.u32 %v5049_v50, 16  ;;  %v14187_v13 = vadd.f32 %v17341_v51, %v17414_v32  ;;  %v3089_v42 = vpop.f32.mrb[71].mxu0  ;;  %v17503_v16 = vpop.f32.mrb[51].mxu1  ;;  %v9853_v30 = vld [vmem:[#allocation2 + $0x8c] sm:$0x1] }
 0x4a2   :  { %v13866_v26 = vpack.c.bf16 %v3519_v47, %v3519_v47  ;;  %19639 = vst [vmem:[#allocation43_spill] sm:$0xff] %v17503_v16  ;;  %v5362_v57 = vrot.slane %v5360_v0, 5  ;;  %v5368_v53 = vrot.slane %v5366_v20, 5  ;;  %v5372_v28 = vrot.slane %v5370_v60, 4  ;;  %v4600_v46 = vld [vmem:[#allocation2 + $0xb0] sm:$0x1] }
 0x4a3   :  { %v13711_v61 = vrot.slane %v17480_v35, 9  ;;  %v4086_v4 = vor.u32 %v4084_v48, %v4083_v9  ;;  %v4087_v17 = vrot.slane %v4083_v9, 4  ;;  %v5378_v5 = vrot.slane %v5376_v18, 5  ;;  %v5050_v18 = vld [vmem:[#allocation2 + $0x84] sm:$0xf] }
 0x4a4   :  { %v4089_v52 = vshrl.u32 %v13866_v26, 16  ;;  %v4092_v45 = vshll.u32 %v13866_v26, 16  ;;  %v5363_v50 = vor.u32 %v5362_v57, %v5359_v14  ;;  %v5373_v47 = vor.u32 %v5372_v28, %v5368_v53 }
 0x4a5   :  { %v3350_v32 = vadd.f32 %v14187_v13, %v17186_v41  ;;  %v4597_v42 = vsel %vm17145_vm10, %v4086_v4, %v4596_v1  ;;  %v10081_v20 = vrot.slane %v9852_v22, 5  ;;  %v10084_v60 = vrot.slane %v9853_v30, 5  ;;  %v5051_v13 = vld [vmem:[#allocation2 + $0x88] sm:$0xf]  ;;  %v5052_v30 = vld [vmem:[#allocation2 + $0x8c] sm:$0x1] }
 0x4a6   :  { %v4091_v0 = vrot.slane %v4089_v52, 7  ;;  %4598 = vst [vmem:[#allocation2 + $0xa8] sm:$0xf] %v4597_v42  ;;  %v5364_v35 = vrot.slane %v5363_v50, 4  ;;  %v5374_v8 = vrot.slane %v5373_v47, 4  ;;  %v14188_v48 = vadd.f32 %v17341_v51, %v17431_v58  ;;  %v17519_v4 = vpop.f32.mrb[72].mxu0 }
 0x4a7   :  { %v3520_v16 = vmax.f32 %v3350_v32, 0.0  ;;  %v10082_v26 = vsel %vm17220_vm15, %v13711_v61, %v10081_v20  ;;  %v10083_v41 = vrot.slane %v10081_v20, 4  ;;  %v4603_v32 = vld [vmem:[#allocation2 + $0xb4] sm:$0xf]  ;;  %v5384_v42 = vshll.u32 %v5050_v18, 16 }
 0x4a8   :  { %v4094_v9 = vor.u32 %v4092_v45, %v4091_v0  ;;  %v4096_v14 = vrot.slane %v4091_v0, 4  ;;  %v5369_v1 = vsel %vm17021_vm4, %v5364_v35, %v5368_v53  ;;  %v5379_v22 = vsel %vm17021_vm4, %v5374_v8, %v5378_v5  ;;  %v3094_v53 = vpop.f32.mrb[73].mxu0  ;;  %v15170_v8 = vld [vmem:[#allocation2 + $0x78] sm:$0xff]   ;;  %v9854_v20 = vld [vmem:[#allocation2 + $0x90] sm:$0xe] }
 0x4a9   :  { %v13867_v57 = vpack.c.bf16 %v3520_v16, %v3520_v16  ;;  %v3353_v28 = vadd.f32 %v14188_v48, %v17199_v25  ;;  %v13424_v52 = vcombine.low %v5369_v1, %v5379_v22  ;;  %v10085_v45 = vsel %vm17220_vm15, %v10083_v41, %v10084_v60  ;;  %v17527_v5 = vpop.f32.mrb[74].mxu0 }
 0x4aa   :  { %v4095_v58 = vsel %vm17152_vm11, %v4087_v17, %v4094_v9  ;;  %v4601_v61 = vsel %vm17159_vm12, %v4096_v14, %v4600_v46  ;;  %v13743_v25 = vcombine.low %v10082_v26, %v10085_v45  ;;  %v5381_v17 = vshrl.u32 %v5050_v18, 16  ;;  %v3097_v35 = vpop.f32.mrb[75].mxu0 }
 0x4ab   :  { %4599 = vst [vmem:[#allocation2 + $0xac] sm:$0xf] %v4095_v58  ;;  %4602 = vst [vmem:[#allocation2 + $0xb0] sm:$0x1] %v4601_v61  ;;  %v4098_v16 = vshrl.u32 %v13867_v57, 16  ;;  %v4101_v50 = vshll.u32 %v13867_v57, 16  ;;  %11704 = vmatprep.mubr.bf16.mxu1 %v13424_v52  ;;  %v14189_v14 = vadd.f32 %v17341_v51, %v17443_v34 }
 0x4ac   :  { %v3521_v47 = vmax.f32 %v3353_v28, 0.0  ;;  %v5390_v0 = vshll.u32 %v5051_v13, 16  ;;  %v5394_v46 = vshrl.u32 %v5051_v13, 16  ;;  %11705 = vmatmul.mubr.bf16.gmra.mrb[104].mxu1 %v15170_v8  ;;  %14096 = vmatmul.mubr.bf16.gmra.mrb[144].mxu0 %v13743_v25  ;;  %v5400_v9 = vshll.u32 %v5052_v30, 16  ;;  %v9855_v57 = vld [vmem:[#allocation2 + $0x94] sm:$0xf] }
 0x4ad   :  { %v4100_v60 = vrot.slane %v4098_v16, 7  ;;  %v5383_v26 = vrot.slane %v5381_v17, 4  ;;  %v5386_v41 = vrot.slane %v5384_v42, 5  ;;  %v9856_v13 = vld [vmem:[#allocation2 + $0x98] sm:$0x1]  ;;  %v17531_v52 = vpop.f32.mrb[76].mxu0  ;;  %v3358_v30 = vadd.f32 %v14189_v14, %v17179_v33 }
 0x4ae   :  { %v13868_v48 = vpack.c.bf16 %v3521_v47, %v3521_v47  ;;  %v5392_v1 = vrot.slane %v5390_v0, 5  ;;  %v5396_v22 = vrot.slane %v5394_v46, 4  ;;  %v5402_v8 = vrot.slane %v5400_v9, 5  ;;  %v3102_v16 = vpop.f32.mrb[77].mxu0  ;;  %v5053_v14 = vld [vmem:[#allocation2 + $0x90] sm:$0xf] }
 0x4af   :  { %v4103_v28 = vor.u32 %v4101_v50, %v4100_v60  ;;  %v4104_v58 = vrot.slane %v4100_v60, 4  ;;  %v5387_v45 = vor.u32 %v5386_v41, %v5383_v26  ;;  %v13712_v47 = vrot.slane %v9854_v20, 9  ;;  %v17536_v42 = vpop.f32.mrb[78].mxu0  ;;  %v4607_v50 = vld [vmem:[#allocation2 + $0xbc] sm:$0x1] }
 0x4b0   :  { %v4106_v18 = vshrl.u32 %v13868_v48, 16  ;;  %v4109_v61 = vshll.u32 %v13868_v48, 16  ;;  %v5397_v53 = vor.u32 %v5396_v22, %v5392_v1  ;;  %v10088_v17 = vrot.slane %v9855_v57, 5  ;;  %v5054_v57 = vld [vmem:[#allocation2 + $0x94] sm:$0xf] }
 0x4b1   :  { %v4604_v34 = vsel %vm17145_vm10, %v4103_v28, %v4603_v32  ;;  %v5388_v0 = vrot.slane %v5387_v45, 4  ;;  %v3522_v35 = vmax.f32 %v3358_v30, 0.0  ;;  %v10091_v60 = vrot.slane %v9856_v13, 5  ;;  %v3105_v28 = vpop.f32.mrb[79].mxu0 }
 0x4b2   :  { %v4108_v25 = vrot.slane %v4106_v18, 7  ;;  %4605 = vst [vmem:[#allocation2 + $0xb4] sm:$0xf] %v4604_v34  ;;  %v5398_v46 = vrot.slane %v5397_v53, 4  ;;  %v10089_v33 = vsel %vm17220_vm15, %v13712_v47, %v10088_v17  ;;  %v10090_v9 = vrot.slane %v10088_v17, 4  ;;  %v17552_v53 = vpop.f32.mrb[52].mxu1 }
 0x4b3   :  { %v5393_v32 = vsel %vm17021_vm4, %v5388_v0, %v5392_v1  ;;  %v13869_v41 = vpack.c.bf16 %v3522_v35, %v3522_v35  ;;  %v14190_v22 = vadd.f32 %v17341_v51, %v17452_v36  ;;  %v5055_v1 = vld [vmem:[#allocation2 + $0x98] sm:$0x1]  ;;  %v15172_v36 = vld [vmem:[#allocation2 + $0x84] sm:$0xff]   ;;  %v17558_v47 = vpop.f32.mrb[53].mxu1  ;;  %v4610_v17 = vld [vmem:[#allocation2 + $0xc0] sm:$0xf] }
 0x4b4   :  { %v4111_v48 = vor.u32 %v4109_v61, %v4108_v25  ;;  %v4113_v26 = vrot.slane %v4108_v25, 4  ;;  %v5403_v20 = vsel %vm17021_vm4, %v5398_v46, %v5402_v8  ;;  %v10092_v45 = vsel %vm17220_vm15, %v10090_v9, %v10091_v60  ;;  %v15189_v8 = vld [vmem:[%s19404_s3 + $0xd8] sm:$0xff]   ;;  %v17560_v60 = vpop.f32.mrb[80].mxu0  ;;  %v9858_v28 = vld [vmem:[#allocation2 + $0xa0] sm:$0xf] }
 0x4b5   :  { %v13425_v13 = vcombine.low %v5393_v32, %v5403_v20  ;;  %v4115_v30 = vshrl.u32 %v13869_v41, 16  ;;  %v4118_v16 = vshll.u32 %v13869_v41, 16  ;;  %v3361_v34 = vadd.f32 %v14190_v22, %v17197_v24  ;;  %v9857_v25 = vld [vmem:[#allocation2 + $0x9c] sm:$0xe]  ;;  %11904 = vmatpush1.bf16.msra.mxu1 %v15189_v8  ;;  %v3110_v32 = vpop.f32.mrb[81].mxu0 }
 0x4b6   :  { %v4112_v18 = vsel %vm17152_vm11, %v4104_v58, %v4111_v48  ;;  %v4608_v61 = vsel %vm17159_vm12, %v4113_v26, %v4607_v50  ;;  %v13744_v58 = vcombine.low %v10089_v33, %v10092_v45  ;;  %v5405_v50 = vshrl.u32 %v5053_v14, 16  ;;  %v17562_v48 = vpop.f32.mrb[54].mxu1  ;;  %11905 = vmatprep.subr.bf16.mxu1 %v19559_v11  ;;  %v9859_v8 = vld [vmem:[#allocation2 + $0xa4] sm:$0x1] }
 0x4b7   :  { %4606 = vst [vmem:[#allocation2 + $0xb8] sm:$0xf] %v4112_v18  ;;  %4609 = vst [vmem:[#allocation2 + $0xbc] sm:$0x1] %v4608_v61  ;;  %11712 = vmatprep.mubr.bf16.mxu1 %v13425_v13  ;;  %v5408_v0 = vshll.u32 %v5053_v14, 16  ;;  %v5414_v46 = vshll.u32 %v5054_v57, 16  ;;  %v14191_v24 = vadd.f32 %v17341_v51, %v17464_v49 }
 0x4b8   :  { %v5418_v35 = vshrl.u32 %v5054_v57, 16  ;;  %19640 = vst [vmem:[#allocation46_spill] sm:$0xff] %v17562_v48  ;;  %11713 = vmatmul.mubr.bf16.gmra.mrb[108].mxu1 %v15172_v36  ;;  %v4117_v26 = vrot.slane %v4115_v30, 7  ;;  %14099 = vmatprep.mubr.bf16.mxu0 %v13744_v58  ;;  %v3523_v33 = vmax.f32 %v3361_v34, 0.0  ;;  %v5424_v9 = vshll.u32 %v5055_v1, 16  ;;  %v17566_v20 = vpop.f32.mrb[55].mxu1 }
 0x4b9   :  { %v5407_v41 = vrot.slane %v5405_v50, 4  ;;  %v5410_v14 = vrot.slane %v5408_v0, 5  ;;  %v5416_v22 = vrot.slane %v5414_v46, 5  ;;  %v5056_v36 = vld [vmem:[#allocation2 + $0x9c] sm:$0xf]  ;;  %v3366_v51 = vadd.f32 %v14191_v24, %v17249_v7  ;;  %v17570_v58 = vpop.f32.mrb[82].mxu0 }
 0x4ba   :  { %v5420_v57 = vrot.slane %v5418_v35, 4  ;;  %v4120_v18 = vor.u32 %v4118_v16, %v4117_v26  ;;  %v4121_v61 = vrot.slane %v4117_v26, 4  ;;  %v13870_v13 = vpack.c.bf16 %v3523_v33, %v3523_v33  ;;  %v3113_v35 = vpop.f32.mrb[83].mxu0  ;;  %v17579_v24 = vld [vmem:[%s19403_s2] ss:$0 sm:$0xff] }
 0x4bb   :  { %v5426_v45 = vrot.slane %v5424_v9, 5  ;;  %v5411_v1 = vor.u32 %v5410_v14, %v5407_v41  ;;  %v13713_v49 = vrot.slane %v9857_v25, 9  ;;  %v10095_v46 = vrot.slane %v9858_v28, 5  ;;  %v4614_v41 = vld [vmem:[#allocation2 + $0xc8] sm:$0x1] }
 0x4bc   :  { %v5421_v30 = vor.u32 %v5420_v57, %v5416_v22  ;;  %v4611_v34 = vsel %vm17145_vm10, %v4120_v18, %v4610_v17  ;;  %v4123_v50 = vshrl.u32 %v13870_v13, 16  ;;  %v4126_v0 = vshll.u32 %v13870_v13, 16  ;;  %v5057_v14 = vld [vmem:[#allocation2 + $0xa0] sm:$0xf]  ;;  %v5058_v13 = vld [vmem:[#allocation2 + $0xa4] sm:$0x1] }
 0x4bd   :  { %4612 = vst [vmem:[#allocation2 + $0xc0] sm:$0xf] %v4611_v34  ;;  %v5412_v16 = vrot.slane %v5411_v1, 4  ;;  %v3524_v33 = vmax.f32 %v3366_v51, 0.0  ;;  %v10098_v9 = vrot.slane %v9859_v8, 5  ;;  %v10096_v7 = vsel %vm17220_vm15, %v13713_v49, %v10095_v46 }
 0x4be   :  { %v5422_v26 = vrot.slane %v5421_v30, 4  ;;  %v4125_v32 = vrot.slane %v4123_v50, 7  ;;  %v10097_v25 = vrot.slane %v10095_v46, 4  ;;  %v14192_v17 = vadd.f32 %v17579_v24, %v17471_v12  ;;  %v9860_v34 = vld [vmem:[#allocation2 + $0xa8] sm:$0xe]  ;;  %v17589_v50 = vpop.f32.mrb[84].mxu0 }
 0x4bf   :  { %v5417_v57 = vsel %vm17021_vm4, %v5412_v16, %v5416_v22  ;;  %v13871_v18 = vpack.c.bf16 %v3524_v33, %v3524_v33  ;;  %v5429_v8 = vshrl.u32 %v5056_v36, 16  ;;  %v15173_v12 = vld [vmem:[#allocation2 + $0x90] sm:$0xff]   ;;  %v3118_v16 = vpop.f32.mrb[85].mxu0 }
 0x4c0   :  { %v5427_v28 = vsel %vm17021_vm4, %v5422_v26, %v5426_v45  ;;  %v4128_v1 = vor.u32 %v4126_v0, %v4125_v32  ;;  %v4130_v30 = vrot.slane %v4125_v32, 4  ;;  %v10099_v49 = vsel %vm17220_vm15, %v10097_v25, %v10098_v9  ;;  %v4617_v26 = vld [vmem:[#allocation2 + $0xe4] sm:$0xf]  ;;  %v9861_v32 = vld [vmem:[#allocation2 + $0xac] sm:$0xf]  ;;  %v17596_v25 = vpop.f32.mrb[86].mxu0 }
 0x4c1   :  { %v13426_v51 = vcombine.low %v5417_v57, %v5427_v28  ;;  %v4132_v46 = vshrl.u32 %v13871_v18, 16  ;;  %v4135_v35 = vshll.u32 %v13871_v18, 16  ;;  %v13745_v48 = vcombine.low %v10096_v7, %v10099_v49  ;;  %v3121_v28 = vpop.f32.mrb[87].mxu0  ;;  %v17600_v16 = vld [vmem:[#allocation2 + $0xa8] sm:$0xf] }
 0x4c2   :  { %v3369_v22 = vadd.f32 %v14192_v17, %v17260_v27  ;;  %v4129_v45 = vsel %vm17152_vm11, %v4121_v61, %v4128_v1  ;;  %v4615_v0 = vsel %vm17159_vm12, %v4130_v30, %v4614_v41  ;;  %v5431_v33 = vrot.slane %v5429_v8, 4  ;;  %v9862_v1 = vld [vmem:[#allocation2 + $0xb0] sm:$0x1] }
 0x4c3   :  { %11720 = vmatprep.mubr.bf16.mxu1 %v13426_v51  ;;  %v5432_v9 = vshll.u32 %v5056_v36, 16  ;;  %4613 = vst [vmem:[#allocation2 + $0xc4] sm:$0xf] %v4129_v45  ;;  %4616 = vst [vmem:[#allocation2 + $0xc8] sm:$0x1] %v4615_v0  ;;  %v4134_v7 = vrot.slane %v4132_v46, 7  ;;  %14100 = vmatmul.mubr.bf16.gmra.mrb[148].mxu0 %v13745_v48  ;;  %v14193_v41 = vadd.f32 %v17579_v24, %v17488_v10 }
 0x4c4   :  { %11721 = vmatmul.mubr.bf16.gmra.mrb[112].mxu1 %v15173_v12  ;;  %v3525_v27 = vmax.f32 %v3369_v22, 0.0  ;;  %v5438_v17 = vshll.u32 %v5057_v14, 16  ;;  %v5442_v57 = vshrl.u32 %v5057_v14, 16  ;;  %v5448_v18 = vshll.u32 %v5058_v13, 16  ;;  %v17605_v10 = vpop.f32.mrb[88].mxu0 }
 0x4c5   :  { %v5434_v61 = vrot.slane %v5432_v9, 5  ;;  %v13714_v8 = vrot.slane %v9860_v34, 9  ;;  %v4137_v36 = vor.u32 %v4135_v35, %v4134_v7  ;;  %v4138_v30 = vrot.slane %v4134_v7, 4 }
 0x4c6   :  { %v13872_v51 = vpack.c.bf16 %v3525_v27, %v3525_v27  ;;  %v5440_v49 = vrot.slane %v5438_v17, 5  ;;  %v5444_v46 = vrot.slane %v5442_v57, 4  ;;  %v5450_v48 = vrot.slane %v5448_v18, 5  ;;  %v3126_v27 = vpop.f32.mrb[89].mxu0 }
 0x4c7   :  { %v5435_v12 = vor.u32 %v5434_v61, %v5431_v33  ;;  %v3374_v22 = vadd.f32 %v14193_v41, %v17238_v15  ;;  %v4618_v14 = vsel %vm17145_vm10, %v4137_v36, %v4617_v26  ;;  %v10102_v0 = vrot.slane %v9861_v32, 5  ;;  %v4621_v33 = vld [vmem:[#allocation2 + $0xec] sm:$0x1]  ;;  %v17611_v28 = vpop.f32.mrb[90].mxu0  ;;  %v5061_v36 = vld [vmem:[#allocation2 + $0xb0] sm:$0x1] }
 0x4c8   :  { %v4140_v13 = vshrl.u32 %v13872_v51, 16  ;;  %v4143_v45 = vshll.u32 %v13872_v51, 16  ;;  %4619 = vst [vmem:[#allocation2 + $0xe4] sm:$0xf] %v4618_v14  ;;  %v5445_v35 = vor.u32 %v5444_v46, %v5440_v49  ;;  %v10105_v7 = vrot.slane %v9862_v1, 5 }
 0x4c9   :  { %v5436_v34 = vrot.slane %v5435_v12, 4  ;;  %v3526_v9 = vmax.f32 %v3374_v22, 0.0  ;;  %v10103_v57 = vsel %vm17220_vm15, %v13714_v8, %v10102_v0  ;;  %v10104_v15 = vrot.slane %v10102_v0, 4  ;;  %v5060_v41 = vld [vmem:[#allocation2 + $0xac] sm:$0xf]  ;;  %v3129_v22 = vpop.f32.mrb[91].mxu0 }
 0x4ca   :  { %v4142_v17 = vrot.slane %v4140_v13, 7  ;;  %v14194_v26 = vadd.f32 %v17579_v24, %v17497_v3  ;;  %v5446_v61 = vrot.slane %v5445_v35, 4  ;;  %v5453_v1 = vshrl.u32 %v17600_v16, 16  ;;  %v17619_v3 = vpop.f32.mrb[56].mxu1  ;;  %v17640_v22 = vld [vmem:[#allocation2 + $0xb4] sm:$0xf] }
 0x4cb   :  { %v5441_v32 = vsel %vm17021_vm4, %v5436_v34, %v5440_v49  ;;  %v13873_v18 = vpack.c.bf16 %v3526_v9, %v3526_v9  ;;  %v10106_v8 = vsel %vm17220_vm15, %v10104_v15, %v10105_v7  ;;  %19641 = vst [vmem:[#allocation49_spill] sm:$0xff] %v17619_v3  ;;  %v15192_v49 = vld [vmem:[%s19404_s3 + $0xe0] sm:$0xff]   ;;  %v4624_v7 = vld [vmem:[#allocation2 + $0xf0] sm:$0xf] }
 0x4cc   :  { %v4145_v51 = vor.u32 %v4143_v45, %v4142_v17  ;;  %v4147_v12 = vrot.slane %v4142_v17, 4  ;;  %v3377_v46 = vadd.f32 %v14194_v26, %v17254_v38  ;;  %v5451_v14 = vsel %vm17021_vm4, %v5446_v61, %v5450_v48  ;;  %v17626_v45 = vpop.f32.mrb[57].mxu1  ;;  %v9863_v17 = vld [vmem:[#allocation2 + $0xb4] sm:$0xe]  ;;  %11906 = vmatpush1.bf16.msra.mxu1 %v15192_v49  ;;  %v15175_v48 = vld [vmem:[#allocation2 + $0x9c] sm:$0xff]  }
 0x4cd   :  { %v4149_v13 = vshrl.u32 %v13873_v18, 16  ;;  %v4152_v0 = vshll.u32 %v13873_v18, 16  ;;  %v13746_v34 = vcombine.low %v10103_v57, %v10106_v8  ;;  %v13427_v9 = vcombine.low %v5441_v32, %v5451_v14  ;;  %v17632_v15 = vpop.f32.mrb[58].mxu1  ;;  %11907 = vmatprep.subr.bf16.mxu1 %v19559_v11 }
 0x4ce   :  { %v4146_v35 = vsel %vm17152_vm11, %v4138_v30, %v4145_v51  ;;  %v4622_v38 = vsel %vm17159_vm12, %v4147_v12, %v4621_v33  ;;  %v3527_v27 = vmax.f32 %v3377_v46, 0.0  ;;  %19642 = vst [vmem:[#allocation52_spill] sm:$0xff] %v17632_v15  ;;  %v5455_v57 = vrot.slane %v5453_v1, 4  ;;  %v9864_v30 = vld [vmem:[#allocation2 + $0xb8] sm:$0xf]  ;;  %v17635_v51 = vpop.f32.mrb[59].mxu1 }
 0x4cf   :  { %4620 = vst [vmem:[#allocation2 + $0xe8] sm:$0xf] %v4146_v35  ;;  %4623 = vst [vmem:[#allocation2 + $0xec] sm:$0x1] %v4622_v38  ;;  %v4151_v26 = vrot.slane %v4149_v13, 7  ;;  %14103 = vmatprep.mubr.bf16.mxu0 %v13746_v34  ;;  %v5456_v61 = vshll.u32 %v17600_v16, 16  ;;  %11728 = vmatprep.mubr.bf16.mxu1 %v13427_v9  ;;  %v14195_v8 = vadd.f32 %v17579_v24, %v17519_v4 }
 0x4d0   :  { %v5462_v18 = vshll.u32 %v5060_v41, 16  ;;  %19643 = vst [vmem:[#allocation55_spill] sm:$0xff] %v17635_v51  ;;  %v13874_v33 = vpack.c.bf16 %v3527_v27, %v3527_v27  ;;  %v5466_v32 = vshrl.u32 %v5060_v41, 16  ;;  %v5472_v12 = vshll.u32 %v5061_v36, 16  ;;  %v9865_v46 = vld [vmem:[#allocation2 + $0xbc] sm:$0x1]  ;;  %11729 = vmatmul.mubr.bf16.gmra.mrb[116].mxu1 %v15175_v48 }
 0x4d1   :  { %v4154_v1 = vor.u32 %v4152_v0, %v4151_v26  ;;  %v4155_v49 = vrot.slane %v4151_v26, 4  ;;  %v5458_v16 = vrot.slane %v5456_v61, 5  ;;  %v17642_v13 = vpop.f32.mrb[92].mxu0  ;;  %v3382_v4 = vadd.f32 %v14195_v8, %v17299_v19  ;;  %v4628_v51 = vld [vmem:[#allocation2 + $0xf8] sm:$0x1] }
 0x4d2   :  { %v5464_v14 = vrot.slane %v5462_v18, 5  ;;  %v4157_v34 = vshrl.u32 %v13874_v33, 16  ;;  %v4160_v35 = vshll.u32 %v13874_v33, 16  ;;  %v5468_v38 = vrot.slane %v5466_v32, 4  ;;  %v3134_v27 = vpop.f32.mrb[93].mxu0 }
 0x4d3   :  { %v5474_v9 = vrot.slane %v5472_v12, 5  ;;  %v4625_v41 = vsel %vm17145_vm10, %v4154_v1, %v4624_v7  ;;  %v5459_v36 = vor.u32 %v5458_v16, %v5455_v57  ;;  %v13715_v15 = vrot.slane %v9863_v17, 9  ;;  %v17647_v3 = vpop.f32.mrb[94].mxu0  ;;  %v5063_v8 = vld [vmem:[#allocation2 + $0xb8] sm:$0xf]  ;;  %v17657_v27 = vpop.f32.mrb[60].mxu1 }
 0x4d4   :  { %4626 = vst [vmem:[#allocation2 + $0xf0] sm:$0xf] %v4625_v41  ;;  %v4159_v0 = vrot.slane %v4157_v34, 7  ;;  %v5469_v48 = vor.u32 %v5468_v38, %v5464_v14  ;;  %v10109_v26 = vrot.slane %v9864_v30, 5  ;;  %v10112_v61 = vrot.slane %v9865_v46, 5  ;;  %v3137_v18 = vpop.f32.mrb[95].mxu0 }
 0x4d5   :  { %v5460_v33 = vrot.slane %v5459_v36, 4  ;;  %v3528_v32 = vmax.f32 %v3382_v4, 0.0  ;;  %v14196_v12 = vadd.f32 %v17579_v24, %v17527_v5  ;;  %v5477_v7 = vshrl.u32 %v17640_v22, 16  ;;  %v5064_v38 = vld [vmem:[#allocation2 + $0xbc] sm:$0x1]  ;;  %19644 = vst [vmem:[#allocation58_spill] sm:$0xff] %v17657_v27 }
 0x4d6   :  { %v4162_v57 = vor.u32 %v4160_v35, %v4159_v0  ;;  %v4164_v1 = vrot.slane %v4159_v0, 4  ;;  %v5470_v19 = vrot.slane %v5469_v48, 4  ;;  %v10110_v17 = vsel %vm17220_vm15, %v13715_v15, %v10109_v26  ;;  %v17665_v36 = vpop.f32.mrb[96].mxu0  ;;  %v9866_v48 = vld [vmem:[#allocation2 + $0xc0] sm:$0xe] }
 0x4d7   :  { %v5465_v30 = vsel %vm17021_vm4, %v5460_v33, %v5464_v14  ;;  %v13875_v46 = vpack.c.bf16 %v3528_v32, %v3528_v32  ;;  %v10111_v16 = vrot.slane %v10109_v26, 4  ;;  %v3385_v34 = vadd.f32 %v14196_v12, %v17306_v37  ;;  %v3142_v26 = vpop.f32.mrb[97].mxu0  ;;  %v4631_v18 = vld [vmem:[#allocation2 + $0xfc] sm:$0xf] }
 0x4d8   :  { %v4163_v5 = vsel %vm17152_vm11, %v4155_v49, %v4162_v57  ;;  %v4629_v35 = vsel %vm17159_vm12, %v4164_v1, %v4628_v51  ;;  %v5475_v15 = vsel %vm17021_vm4, %v5470_v19, %v5474_v9  ;;  %v5479_v41 = vrot.slane %v5477_v7, 4  ;;  %v15176_v49 = vld [vmem:[#allocation2 + $0xa8] sm:$0xff]   ;;  %v17670_v12 = vpop.f32.mrb[98].mxu0  ;;  %v17672_v7 = vpop.f32.mrb[61].mxu1 }
 0x4d9   :  { %4627 = vst [vmem:[#allocation2 + $0xf4] sm:$0xf] %v4163_v5  ;;  %4630 = vst [vmem:[#allocation2 + $0xf8] sm:$0x1] %v4629_v35  ;;  %v13428_v14 = vcombine.low %v5465_v30, %v5475_v15  ;;  %v4166_v4 = vshrl.u32 %v13875_v46, 16  ;;  %v4169_v37 = vshll.u32 %v13875_v46, 16  ;;  %v10113_v0 = vsel %vm17220_vm15, %v10111_v16, %v10112_v61 }
 0x4da   :  { %v13747_v33 = vcombine.low %v10110_v17, %v10113_v0  ;;  %v3529_v51 = vmax.f32 %v3385_v34, 0.0  ;;  %v5480_v32 = vshll.u32 %v17640_v22, 16  ;;  %v5486_v9 = vshll.u32 %v5063_v8, 16  ;;  %v9867_v30 = vld [vmem:[#allocation2 + $0xc4] sm:$0xf]  ;;  %v3145_v46 = vpop.f32.mrb[99].mxu0 }
 0x4db   :  { %11736 = vmatprep.mubr.bf16.mxu1 %v13428_v14  ;;  %v4168_v57 = vrot.slane %v4166_v4, 7  ;;  %v5490_v1 = vshrl.u32 %v5063_v8, 16  ;;  %v5496_v19 = vshll.u32 %v5064_v38, 16  ;;  %v14197_v61 = vadd.f32 %v17579_v24, %v17531_v52  ;;  %v9868_v22 = vld [vmem:[#allocation2 + $0xc8] sm:$0x1]  ;;  %v17676_v15 = vpop.f32.mrb[62].mxu1 }
 0x4dc   :  { %11737 = vmatmul.mubr.bf16.gmra.mrb[120].mxu1 %v15176_v49  ;;  %14104 = vmatmul.mubr.bf16.gmra.mrb[152].mxu0 %v13747_v33  ;;  %v13876_v17 = vpack.c.bf16 %v3529_v51, %v3529_v51  ;;  %v5482_v16 = vrot.slane %v5480_v32, 5  ;;  %v5488_v34 = vrot.slane %v5486_v9, 5  ;;  %v13716_v5 = vrot.slane %v9866_v48, 9  ;;  %v5065_v35 = vld [vmem:[#allocation2 + $0xd8] sm:$0xf]  ;;  %v17678_v38 = vpop.f32.mrb[63].mxu1 }
 0x4dd   :  { %v4171_v0 = vor.u32 %v4169_v37, %v4168_v57  ;;  %v4172_v14 = vrot.slane %v4168_v57, 4  ;;  %v5492_v4 = vrot.slane %v5490_v1, 4  ;;  %v5498_v8 = vrot.slane %v5496_v19, 5  ;;  %v4635_v1 = vld [vmem:[#allocation2 + $0x104] sm:$0x1] }
 0x4de   :  { %v4174_v26 = vshrl.u32 %v13876_v17, 16  ;;  %v4177_v52 = vshll.u32 %v13876_v17, 16  ;;  %v5483_v27 = vor.u32 %v5482_v16, %v5479_v41  ;;  %v3390_v49 = vadd.f32 %v14197_v61, %v17294_v29  ;;  %v17687_v61 = vpop.f32.mrb[100].mxu0 }
 0x4df   :  { %v4632_v33 = vsel %vm17145_vm10, %v4171_v0, %v4631_v18  ;;  %v5493_v51 = vor.u32 %v5492_v4, %v5488_v34  ;;  %v10116_v32 = vrot.slane %v9867_v30, 5  ;;  %v10119_v48 = vrot.slane %v9868_v22, 5  ;;  %v3150_v0 = vpop.f32.mrb[101].mxu0 }
 0x4e0   :  { %4633 = vst [vmem:[#allocation2 + $0xfc] sm:$0xf] %v4632_v33  ;;  %v4176_v9 = vrot.slane %v4174_v26, 7  ;;  %v5484_v46 = vrot.slane %v5483_v27, 4  ;;  %v3530_v37 = vmax.f32 %v3390_v49, 0.0  ;;  %v14198_v57 = vadd.f32 %v17579_v24, %v17536_v42  ;;  %v17696_v33 = vpop.f32.mrb[102].mxu0 }
 0x4e1   :  { %v5494_v19 = vrot.slane %v5493_v51, 4  ;;  %v10117_v41 = vsel %vm17220_vm15, %v13716_v5, %v10116_v32  ;;  %v10118_v17 = vrot.slane %v10116_v32, 4  ;;  %v5501_v29 = vshrl.u32 %v5065_v35, 16  ;;  %v5066_v27 = vld [vmem:[#allocation2 + $0xdc] sm:$0xf] }
 0x4e2   :  { %v4179_v18 = vor.u32 %v4177_v52, %v4176_v9  ;;  %v4181_v16 = vrot.slane %v4176_v9, 4  ;;  %v5489_v30 = vsel %vm17021_vm4, %v5484_v46, %v5488_v34  ;;  %v13877_v22 = vpack.c.bf16 %v3530_v37, %v3530_v37  ;;  %v5067_v26 = vld [vmem:[#allocation2 + $0xe0] sm:$0x1]  ;;  %v3153_v9 = vpop.f32.mrb[103].mxu0  ;;  %v4638_v46 = vld [vmem:[#allocation2 + $0x108] sm:$0xf] }
 0x4e3   :  { %v5499_v42 = vsel %vm17021_vm4, %v5494_v19, %v5498_v8  ;;  %v10120_v4 = vsel %vm17220_vm15, %v10118_v17, %v10119_v48  ;;  %v3393_v5 = vadd.f32 %v14198_v57, %v17302_v6  ;;  %v5503_v49 = vrot.slane %v5501_v29, 4  ;;  %v15195_v8 = vld [vmem:[%s19404_s3 + $0xe8] sm:$0xff]   ;;  %v15178_v6 = vld [vmem:[#allocation2 + $0xb4] sm:$0xff]   ;;  %v5068_v0 = vld [vmem:[#allocation2 + $0xe4] sm:$0xf] }
 0x4e4   :  { %v4180_v52 = vsel %vm17152_vm11, %v4172_v14, %v4179_v18  ;;  %v4636_v34 = vsel %vm17159_vm12, %v4181_v16, %v4635_v1  ;;  %v13429_v51 = vcombine.low %v5489_v30, %v5499_v42  ;;  %v4183_v32 = vshrl.u32 %v13877_v22, 16  ;;  %11908 = vmatpush1.bf16.msra.mxu1 %v15195_v8 }
 0x4e5   :  { %4634 = vst [vmem:[#allocation2 + $0x100] sm:$0xf] %v4180_v52  ;;  %4637 = vst [vmem:[#allocation2 + $0x104] sm:$0x1] %v4636_v34  ;;  %v4186_v48 = vshll.u32 %v13877_v22, 16  ;;  %v13748_v37 = vcombine.low %v10117_v41, %v10120_v4  ;;  %v3531_v57 = vmax.f32 %v3393_v5, 0.0  ;;  %v14199_v30 = vadd.f32 %v17579_v24, %v17560_v60  ;;  %11909 = vmatprep.subr.bf16.mxu1 %v19559_v11 }
 0x4e6   :  { %v5504_v19 = vshll.u32 %v5065_v35, 16  ;;  %11744 = vmatprep.mubr.bf16.mxu1 %v13429_v51  ;;  %v4185_v14 = vrot.slane %v4183_v32, 7  ;;  %v5510_v17 = vshll.u32 %v5066_v27, 16  ;;  %v5514_v29 = vshrl.u32 %v5066_v27, 16  ;;  %v17709_v41 = vld [vmem:[#allocation2 + $0xe8] sm:$0xf] }
 0x4e7   :  { %v5520_v1 = vshll.u32 %v5067_v26, 16  ;;  %11745 = vmatmul.mubr.bf16.gmra.mrb[124].mxu1 %v15178_v6  ;;  %14107 = vmatprep.mubr.bf16.mxu0 %v13748_v37  ;;  %v13878_v18 = vpack.c.bf16 %v3531_v57, %v3531_v57  ;;  %v14200_v22 = vadd.f32 %v17579_v24, %v17570_v58  ;;  %v17711_v27 = vpop.f32.mrb[104].mxu0  ;;  %v3398_v9 = vadd.f32 %v14199_v30, %v17369_v55 }
 0x4e8   :  { %v5506_v16 = vrot.slane %v5504_v19, 5  ;;  %v4188_v35 = vor.u32 %v4186_v48, %v4185_v14  ;;  %v4189_v42 = vrot.slane %v4185_v14, 4  ;;  %v5512_v4 = vrot.slane %v5510_v17, 5  ;;  %v3158_v32 = vpop.f32.mrb[105].mxu0  ;;  %v4642_v17 = vld [vmem:[#allocation2 + $0x110] sm:$0x1] }
 0x4e9   :  { %v5516_v5 = vrot.slane %v5514_v29, 4  ;;  %v4191_v26 = vshrl.u32 %v13878_v18, 16  ;;  %v4194_v52 = vshll.u32 %v13878_v18, 16  ;;  %v5522_v51 = vrot.slane %v5520_v1, 5  ;;  %v17718_v6 = vpop.f32.mrb[106].mxu0 }
 0x4ea   :  { %v5507_v34 = vor.u32 %v5506_v16, %v5503_v49  ;;  %v4639_v60 = vsel %vm17145_vm10, %v4188_v35, %v4638_v46  ;;  %v3401_v8 = vadd.f32 %v14200_v22, %v17379_v54  ;;  %v5525_v57 = vshrl.u32 %v5068_v0, 16  ;;  %v3161_v14 = vpop.f32.mrb[107].mxu0  ;;  %v15179_v22 = vld [vmem:[#allocation2 + $0xd8] sm:$0xff]  }
 0x4eb   :  { %v5517_v58 = vor.u32 %v5516_v5, %v5512_v4  ;;  %4640 = vst [vmem:[#allocation2 + $0x108] sm:$0xf] %v4639_v60  ;;  %v4193_v48 = vrot.slane %v4191_v26, 7  ;;  %v5528_v19 = vshll.u32 %v5068_v0, 16  ;;  %v3532_v29 = vmax.f32 %v3398_v9, 0.0 }
 0x4ec   :  { %v5508_v37 = vrot.slane %v5507_v34, 4  ;;  %v3533_v1 = vmax.f32 %v3401_v8, 0.0  ;;  %v5534_v18 = vshll.u32 %v17709_v41, 16  ;;  %v5527_v54 = vrot.slane %v5525_v57, 4  ;;  %v5070_v0 = vld [vmem:[#allocation2 + $0xec] sm:$0x1] }
 0x4ed   :  { %v5518_v49 = vrot.slane %v5517_v58, 4  ;;  %v4196_v46 = vor.u32 %v4194_v52, %v4193_v48  ;;  %v4198_v16 = vrot.slane %v4193_v48, 4  ;;  %v13879_v35 = vpack.c.bf16 %v3532_v29, %v3532_v29  ;;  %v9869_v58 = vld [vmem:[#allocation2 + $0xcc] sm:$0xe]  ;;  %v4645_v57 = vld [vmem:[#allocation2 + $0x114] sm:$0xf] }
 0x4ee   :  { %v5513_v55 = vsel %vm17021_vm4, %v5508_v37, %v5512_v4  ;;  %v13880_v5 = vpack.c.bf16 %v3533_v1, %v3533_v1  ;;  %v5530_v26 = vrot.slane %v5528_v19, 5  ;;  %v17729_v60 = vrot.slane %v5534_v18, 5  ;;  %v9870_v4 = vld [vmem:[#allocation2 + $0xd0] sm:$0xf]  ;;  %v17731_v37 = vpop.f32.mrb[108].mxu0 }
 0x4ef   :  { %v5523_v30 = vsel %vm17021_vm4, %v5518_v49, %v5522_v51  ;;  %v4197_v34 = vsel %vm17152_vm11, %v4189_v42, %v4196_v46  ;;  %v4643_v32 = vsel %vm17159_vm12, %v4198_v16, %v4642_v17  ;;  %v4200_v9 = vshrl.u32 %v13879_v35, 16  ;;  %v4649_v19 = vld [vmem:[#allocation2 + $0x11c] sm:$0x1]  ;;  %v3166_v29 = vpop.f32.mrb[109].mxu0  ;;  %v9871_v46 = vld [vmem:[#allocation2 + $0xd4] sm:$0x1] }
 0x4f0   :  { %v13430_v52 = vcombine.low %v5513_v55, %v5523_v30  ;;  %4641 = vst [vmem:[#allocation2 + $0x10c] sm:$0xf] %v4197_v34  ;;  %4644 = vst [vmem:[#allocation2 + $0x110] sm:$0x1] %v4643_v32  ;;  %v4203_v51 = vshll.u32 %v13879_v35, 16  ;;  %v4208_v8 = vshrl.u32 %v13880_v5, 16  ;;  %v5531_v42 = vor.u32 %v5530_v26, %v5527_v54 }
 0x4f1   :  { %v4211_v48 = vshll.u32 %v13880_v5, 16  ;;  %v5538_v14 = vshrl.u32 %v17709_v41, 16  ;;  %v5544_v17 = vshll.u32 %v5070_v0, 16  ;;  %v14201_v49 = vadd.f32 %v17579_v24, %v17589_v50  ;;  %v9872_v30 = vld [vmem:[#allocation2 + $0xf0] sm:$0xe]  ;;  %v17737_v0 = vpop.f32.mrb[110].mxu0 }
 0x4f2   :  { %11752 = vmatprep.mubr.bf16.mxu1 %v13430_v52  ;;  %v4202_v1 = vrot.slane %v4200_v9, 7  ;;  %v4210_v18 = vrot.slane %v4208_v8, 7  ;;  %v13717_v16 = vrot.slane %v9869_v58, 9  ;;  %v10123_v55 = vrot.slane %v9870_v4, 5  ;;  %v9873_v54 = vld [vmem:[#allocation2 + $0xf4] sm:$0xf] }
 0x4f3   :  { %11753 = vmatmul.mubr.bf16.gmra.mrb[128].mxu1 %v15179_v22  ;;  %v5532_v35 = vrot.slane %v5531_v42, 4  ;;  %v5540_v5 = vrot.slane %v5538_v14, 4  ;;  %v5546_v34 = vrot.slane %v5544_v17, 5  ;;  %v3406_v32 = vadd.f32 %v14201_v49, %v17362_v56  ;;  %v9874_v26 = vld [vmem:[#allocation2 + $0xf8] sm:$0x1]  ;;  %v3169_v9 = vpop.f32.mrb[111].mxu0 }
 0x4f4   :  { %v5071_v41 = vld [vmem:[#allocation2 + $0xf0] sm:$0xf]  ;;  %v4205_v52 = vor.u32 %v4203_v51, %v4202_v1  ;;  %v4206_v50 = vrot.slane %v4202_v1, 4  ;;  %v4213_v29 = vor.u32 %v4211_v48, %v4210_v18  ;;  %v4215_v22 = vrot.slane %v4210_v18, 4 }
 0x4f5   :  { %v5537_v58 = vsel %vm17021_vm4, %v5532_v35, %v17729_v60  ;;  %v5541_v4 = vor.u32 %v5540_v5, %v17729_v60  ;;  %v3534_v8 = vmax.f32 %v3406_v32, 0.0  ;;  %v10124_v56 = vsel %vm17220_vm15, %v13717_v16, %v10123_v55  ;;  %v17753_v5 = vpop.f32.mrb[112].mxu0 }
 0x4f6   :  { %v4646_v42 = vsel %vm17145_vm10, %v4205_v52, %v4645_v57  ;;  %v4214_v51 = vsel %vm17152_vm11, %v4206_v50, %v4213_v29  ;;  %v4650_v48 = vsel %vm17159_vm12, %v4215_v22, %v4649_v19  ;;  %v10125_v14 = vrot.slane %v10123_v55, 4  ;;  %v5072_v50 = vld [vmem:[#allocation2 + $0xf4] sm:$0xf]  ;;  %v5073_v29 = vld [vmem:[#allocation2 + $0xf8] sm:$0x1]  ;;  %v3174_v9 = vpop.f32.mrb[113].mxu0 }
 0x4f7   :  { %4647 = vst [vmem:[#allocation2 + $0x114] sm:$0xf] %v4646_v42  ;;  %4648 = vst [vmem:[#allocation2 + $0x118] sm:$0xf] %v4214_v51  ;;  %v5542_v17 = vrot.slane %v5541_v4, 4  ;;  %v13881_v49 = vpack.c.bf16 %v3534_v8, %v3534_v8  ;;  %v10126_v60 = vrot.slane %v9871_v46, 5  ;;  %v14202_v16 = vadd.f32 %v17579_v24, %v17596_v25 }
 0x4f8   :  { %4651 = vst [vmem:[#allocation2 + $0x11c] sm:$0x1] %v4650_v48  ;;  %v13718_v1 = vrot.slane %v9872_v30, 9  ;;  %v10130_v18 = vrot.slane %v9873_v54, 5  ;;  %v10133_v35 = vrot.slane %v9874_v26, 5  ;;  %v5549_v57 = vshrl.u32 %v5071_v41, 16 }
 0x4f9   :  { %v5547_v32 = vsel %vm17021_vm4, %v5542_v17, %v5546_v34  ;;  %v4217_v19 = vshrl.u32 %v13881_v49, 16  ;;  %v4220_v55 = vshll.u32 %v13881_v49, 16  ;;  %v10127_v52 = vsel %vm17220_vm15, %v10125_v14, %v10126_v60  ;;  %v4652_v30 = vld [vmem:[#allocation2 + $0x120] sm:$0xf]  ;;  %v9875_v22 = vld [vmem:[#allocation2 + $0xfc] sm:$0xe] }
 0x4fa   :  { %v13431_v46 = vcombine.low %v5537_v58, %v5547_v32  ;;  %v13749_v54 = vcombine.low %v10124_v56, %v10127_v52  ;;  %v10131_v26 = vsel %vm17220_vm15, %v13718_v1, %v10130_v18  ;;  %v10132_v25 = vrot.slane %v10130_v18, 4  ;;  %v15181_v4 = vld [vmem:[#allocation2 + $0xe4] sm:$0xff]   ;;  %v9876_v48 = vld [vmem:[#allocation2 + $0x100] sm:$0xf]  ;;  %v17764_v17 = vpop.f32.mrb[114].mxu0  ;;  %v15198_v58 = vld [vmem:[%s19404_s3 + $0xf0] sm:$0xff]  }
 0x4fb   :  { %v17761_v8 = vrot.slane %v4217_v19, 7  ;;  %v3409_v34 = vadd.f32 %v14202_v16, %v17375_v40  ;;  %v5551_v42 = vrot.slane %v5549_v57, 4  ;;  %v5552_v51 = vshll.u32 %v5071_v41, 16  ;;  %v9877_v14 = vld [vmem:[#allocation2 + $0x104] sm:$0x1]  ;;  %v3177_v18 = vpop.f32.mrb[115].mxu0  ;;  %11910 = vmatpush1.bf16.msra.mxu1 %v15198_v58 }
 0x4fc   :  { %11760 = vmatprep.mubr.bf16.mxu1 %v13431_v46  ;;  %14108 = vmatmul.mubr.bf16.gmra.mrb[156].mxu0 %v13749_v54  ;;  %v10134_v56 = vsel %vm17220_vm15, %v10132_v25, %v10133_v35  ;;  %v5558_v49 = vshll.u32 %v5072_v50, 16  ;;  %v5562_v60 = vshrl.u32 %v5072_v50, 16  ;;  %v5568_v1 = vshll.u32 %v5073_v29, 16  ;;  %v4656_v58 = vld [vmem:[#allocation2 + $0x128] sm:$0x1] }
 0x4fd   :  { %11761 = vmatmul.mubr.bf16.gmra.mrb[132].mxu1 %v15181_v4  ;;  %v4222_v40 = vor.u32 %v4220_v55, %v17761_v8  ;;  %v4223_v41 = vrot.slane %v17761_v8, 4  ;;  %v13750_v16 = vcombine.low %v10131_v26, %v10134_v56  ;;  %v3535_v57 = vmax.f32 %v3409_v34, 0.0  ;;  %11911 = vmatprep.subr.bf16.mxu1 %v19559_v11  ;;  %v5074_v4 = vld [vmem:[#allocation2 + $0xfc] sm:$0xf] }
 0x4fe   :  { %v5554_v32 = vrot.slane %v5552_v51, 5  ;;  %v5560_v19 = vrot.slane %v5558_v49, 5  ;;  %v5564_v52 = vrot.slane %v5562_v60, 4  ;;  %v5570_v9 = vrot.slane %v5568_v1, 5  ;;  %v17783_v60 = vpop.f32.mrb[116].mxu0 }
 0x4ff   :  { %v4653_v46 = vsel %vm17145_vm10, %v4222_v40, %v4652_v30  ;;  %14111 = vmatprep.mubr.bf16.mxu0 %v13750_v16  ;;  %v13882_v35 = vpack.c.bf16 %v3535_v57, %v3535_v57  ;;  %v14203_v50 = vadd.f32 %v17579_v24, %v17605_v10  ;;  %v13719_v29 = vrot.slane %v9875_v22, 9  ;;  %v3182_v18 = vpop.f32.mrb[117].mxu0  ;;  %v5075_v16 = vld [vmem:[#allocation2 + $0x100] sm:$0xf] }
 0x500   :  { %4654 = vst [vmem:[#allocation2 + $0x120] sm:$0xf] %v4653_v46  ;;  %v5555_v55 = vor.u32 %v5554_v32, %v5551_v42  ;;  %v5565_v54 = vor.u32 %v5564_v52, %v5560_v19  ;;  %v10137_v26 = vrot.slane %v9876_v48, 5  ;;  %v10140_v25 = vrot.slane %v9877_v14, 5  ;;  %v17792_v32 = vpop.f32.mrb[118].mxu0 }
 0x501   :  { %v4225_v8 = vshrl.u32 %v13882_v35, 16  ;;  %v4228_v34 = vshll.u32 %v13882_v35, 16  ;;  %v3414_v51 = vadd.f32 %v14203_v50, %v17427_v21  ;;  %v14204_v30 = vadd.f32 %v17579_v24, %v17611_v28  ;;  %v9880_v18 = vld [vmem:[#allocation2 + $0x110] sm:$0x1] }
 0x502   :  { %v5556_v56 = vrot.slane %v5555_v55, 4  ;;  %v5566_v49 = vrot.slane %v5565_v54, 4  ;;  %v10138_v10 = vsel %vm17220_vm15, %v13719_v29, %v10137_v26  ;;  %v10139_v22 = vrot.slane %v10137_v26, 4  ;;  %v9878_v29 = vld [vmem:[#allocation2 + $0x108] sm:$0xe]  ;;  %v3185_v55 = vpop.f32.mrb[119].mxu0 }
 0x503   :  { %v4227_v42 = vrot.slane %v4225_v8, 7  ;;  %v3536_v48 = vmax.f32 %v3414_v51, 0.0  ;;  %v3417_v14 = vadd.f32 %v14204_v30, %v17438_v63  ;;  %v5573_v1 = vshrl.u32 %v5074_v4, 16  ;;  %v5076_v63 = vld [vmem:[#allocation2 + $0x104] sm:$0x1]  ;;  %v15182_v54 = vld [vmem:[#allocation2 + $0xf0] sm:$0xff]  }
 0x504   :  { %v5561_v21 = vsel %vm17021_vm4, %v5556_v56, %v5560_v19  ;;  %v5571_v28 = vsel %vm17021_vm4, %v5566_v49, %v5570_v9  ;;  %v10141_v40 = vsel %vm17220_vm15, %v10139_v22, %v10140_v25  ;;  %v5576_v57 = vshll.u32 %v5074_v4, 16  ;;  %v9879_v30 = vld [vmem:[#allocation2 + $0x10c] sm:$0xf]  ;;  %v4663_v55 = vld [vmem:[#allocation2 + $0x134] sm:$0x1] }
 0x505   :  { %v4230_v52 = vor.u32 %v4228_v34, %v4227_v42  ;;  %v4232_v46 = vrot.slane %v4227_v42, 4  ;;  %v13432_v35 = vcombine.low %v5561_v21, %v5571_v28  ;;  %v13883_v50 = vpack.c.bf16 %v3536_v48, %v3536_v48  ;;  %v4659_v56 = vld [vmem:[#allocation2 + $0x12c] sm:$0xf]  ;;  %v17798_v48 = vpop.f32.mrb[120].mxu0 }
 0x506   :  { %v13751_v26 = vcombine.low %v10138_v10, %v10141_v40  ;;  %v3537_v19 = vmax.f32 %v3417_v14, 0.0  ;;  %v5575_v8 = vrot.slane %v5573_v1, 4  ;;  %v5578_v51 = vrot.slane %v5576_v57, 5  ;;  %v3190_v28 = vpop.f32.mrb[121].mxu0 }
 0x507   :  { %v4231_v9 = vsel %vm17152_vm11, %v4223_v41, %v4230_v52  ;;  %v4657_v25 = vsel %vm17159_vm12, %v4232_v46, %v4656_v58  ;;  %11768 = vmatprep.mubr.bf16.mxu1 %v13432_v35  ;;  %v4234_v4 = vshrl.u32 %v13883_v50, 16  ;;  %v4237_v34 = vshll.u32 %v13883_v50, 16  ;;  %v15201_v41 = vld [vmem:[%s19404_s3 + $0xf8] sm:$0xff]   ;;  %v17805_v35 = vpop.f32.mrb[122].mxu0 }
 0x508   :  { %4655 = vst [vmem:[#allocation2 + $0x124] sm:$0xf] %v4231_v9  ;;  %4658 = vst [vmem:[#allocation2 + $0x128] sm:$0x1] %v4657_v25  ;;  %11769 = vmatmul.mubr.bf16.gmra.mrb[136].mxu1 %v15182_v54  ;;  %14112 = vmatmul.mubr.bf16.gmra.mrb[160].mxu0 %v13751_v26  ;;  %v13884_v49 = vpack.c.bf16 %v3537_v19, %v3537_v19  ;;  %v5579_v10 = vor.u32 %v5578_v51, %v5575_v8  ;;  %v5582_v22 = vshll.u32 %v5075_v16, 16  ;;  %v3193_v19 = vpop.f32.mrb[123].mxu0 }
 0x509   :  { %v5586_v42 = vshrl.u32 %v5075_v16, 16  ;;  %v4236_v58 = vrot.slane %v4234_v4, 7  ;;  %v5592_v14 = vshll.u32 %v5076_v63, 16  ;;  %v14205_v1 = vadd.f32 %v17579_v24, %v17642_v13  ;;  %11912 = vmatpush1.bf16.msra.mxu1 %v15201_v41  ;;  %v5077_v8 = vld [vmem:[#allocation2 + $0x108] sm:$0xf] }
 0x50a   :  { %v13720_v21 = vrot.slane %v9878_v29, 9  ;;  %v4242_v40 = vshrl.u32 %v13884_v49, 16  ;;  %v4245_v57 = vshll.u32 %v13884_v49, 16  ;;  %v5580_v52 = vrot.slane %v5579_v10, 4  ;;  %12170 = vmatprep.subr.bf16.mxu1 %v19559_v11  ;;  %v17816_v4 = vld [vmem:[%s19403_s2] ss:$0 sm:$0xff] }
 0x50b   :  { %v5584_v46 = vrot.slane %v5582_v22, 5  ;;  %v4239_v16 = vor.u32 %v4237_v34, %v4236_v58  ;;  %v4240_v50 = vrot.slane %v4236_v58, 4  ;;  %v5588_v54 = vrot.slane %v5586_v42, 4 }
 0x50c   :  { %v5594_v26 = vrot.slane %v5592_v14, 5  ;;  %v4244_v63 = vrot.slane %v4242_v40, 7  ;;  %v3422_v13 = vadd.f32 %v14205_v1, %v17416_v23  ;;  %v10144_v29 = vrot.slane %v9879_v30, 5  ;;  %v17827_v40 = vpop.f32.mrb[124].mxu0 }
 0x50d   :  { %v5585_v24 = vsel %vm17021_vm4, %v5580_v52, %v5584_v46  ;;  %v4660_v51 = vsel %vm17145_vm10, %v4239_v16, %v4659_v56  ;;  %v5589_v9 = vor.u32 %v5588_v54, %v5584_v46  ;;  %v10147_v25 = vrot.slane %v9880_v18, 5  ;;  %v5079_v18 = vld [vmem:[#allocation2 + $0x110] sm:$0x1]  ;;  %v9881_v46 = vld [vmem:[#allocation2 + $0x114] sm:$0xe]  ;;  %v3198_v19 = vpop.f32.mrb[125].mxu0 }
 0x50e   :  { %v14206_v34 = vadd.f32 %v17816_v4, %v17647_v3  ;;  %4661 = vst [vmem:[#allocation2 + $0x12c] sm:$0xf] %v4660_v51  ;;  %v4247_v49 = vor.u32 %v4245_v57, %v4244_v63  ;;  %v4249_v10 = vrot.slane %v4244_v63, 4  ;;  %v3538_v22 = vmax.f32 %v3422_v13, 0.0  ;;  %v5078_v3 = vld [vmem:[#allocation2 + $0x10c] sm:$0xf] }
 0x50f   :  { %v10145_v23 = vsel %vm17220_vm15, %v13720_v21, %v10144_v29  ;;  %v5590_v30 = vrot.slane %v5589_v9, 4  ;;  %v10146_v42 = vrot.slane %v10144_v29, 4  ;;  %v5597_v41 = vshrl.u32 %v5077_v8, 16  ;;  %v15184_v63 = vld [vmem:[#allocation2 + $0xfc] sm:$0xff]   ;;  %v4666_v13 = vld [vmem:[#allocation2 + $0x138] sm:$0xf] }
 0x510   :  { %v3425_v56 = vadd.f32 %v14206_v34, %v17433_v44  ;;  %v4248_v58 = vsel %vm17152_vm11, %v4240_v50, %v4247_v49  ;;  %v4664_v14 = vsel %vm17159_vm12, %v4249_v10, %v4663_v55  ;;  %v13885_v1 = vpack.c.bf16 %v3538_v22, %v3538_v22  ;;  %v17833_v34 = vpop.f32.mrb[126].mxu0 }
 0x511   :  { %v5600_v28 = vshll.u32 %v5077_v8, 16  ;;  %4662 = vst [vmem:[#allocation2 + $0x130] sm:$0xf] %v4248_v58  ;;  %4665 = vst [vmem:[#allocation2 + $0x134] sm:$0x1] %v4664_v14  ;;  %v5595_v21 = vsel %vm17021_vm4, %v5590_v30, %v5594_v26  ;;  %v10148_v44 = vsel %vm17220_vm15, %v10146_v42, %v10147_v25  ;;  %v5599_v52 = vrot.slane %v5597_v41, 4 }
 0x512   :  { %v3539_v57 = vmax.f32 %v3425_v56, 0.0  ;;  %v13433_v16 = vcombine.low %v5585_v24, %v5595_v21  ;;  %v4251_v50 = vshrl.u32 %v13885_v1, 16  ;;  %v4254_v55 = vshll.u32 %v13885_v1, 16  ;;  %v9882_v24 = vld [vmem:[#allocation2 + $0x118] sm:$0xf]  ;;  %v3201_v22 = vpop.f32.mrb[127].mxu0 }
 0x513   :  { %v13752_v54 = vcombine.low %v10145_v23, %v10148_v44  ;;  %v5602_v8 = vrot.slane %v5600_v28, 5  ;;  %v5606_v51 = vshll.u32 %v5078_v3, 16  ;;  %v5610_v9 = vshrl.u32 %v5078_v3, 16  ;;  %v9883_v41 = vld [vmem:[#allocation2 + $0x11c] sm:$0x1] }
 0x514   :  { %v13886_v29 = vpack.c.bf16 %v3539_v57, %v3539_v57  ;;  %11776 = vmatprep.mubr.bf16.mxu1 %v13433_v16  ;;  %v4253_v26 = vrot.slane %v4251_v50, 7  ;;  %v5616_v25 = vshll.u32 %v5079_v18, 16  ;;  %v14207_v49 = vadd.f32 %v17816_v4, %v17665_v36  ;;  %v4670_v57 = vld [vmem:[#allocation2 + $0x140] sm:$0x1]  ;;  %v5080_v50 = vld [vmem:[#allocation2 + $0x114] sm:$0xf] }
 0x515   :  { %14115 = vmatprep.mubr.bf16.mxu0 %v13752_v54  ;;  %v13721_v10 = vrot.slane %v9881_v46, 9  ;;  %11777 = vmatmul.mubr.bf16.gmra.mrb[140].mxu1 %v15184_v63  ;;  %v5603_v42 = vor.u32 %v5602_v8, %v5599_v52  ;;  %v5608_v56 = vrot.slane %v5606_v51, 5  ;;  %v5612_v1 = vrot.slane %v5610_v9, 4 }
 0x516   :  { %v4259_v23 = vshrl.u32 %v13886_v29, 16  ;;  %v4262_v30 = vshll.u32 %v13886_v29, 16  ;;  %v4256_v58 = vor.u32 %v4254_v55, %v4253_v26  ;;  %v4257_v14 = vrot.slane %v4253_v26, 4 }
 0x517   :  { %v5618_v3 = vrot.slane %v5616_v25, 5  ;;  %v5604_v21 = vrot.slane %v5603_v42, 4  ;;  %v3430_v18 = vadd.f32 %v14207_v49, %v17495_v2  ;;  %v10151_v44 = vrot.slane %v9882_v24, 5  ;;  %v5081_v25 = vld [vmem:[#allocation2 + $0x118] sm:$0xf] }
 0x518   :  { %v4261_v28 = vrot.slane %v4259_v23, 7  ;;  %v4667_v36 = vsel %vm17145_vm10, %v4256_v58, %v4666_v13  ;;  %v5613_v46 = vor.u32 %v5612_v1, %v5608_v56  ;;  %v10154_v16 = vrot.slane %v9883_v41, 5  ;;  %v19645_v13 = vld [vmem:[#allocation43_spill] sm:$0xff]  ;;  %v5082_v23 = vld [vmem:[#allocation2 + $0x11c] sm:$0x1]  ;;  %v15185_v1 = vld [vmem:[#allocation2 + $0x108] sm:$0xff]  }
 0x519   :  { %v14208_v52 = vadd.f32 %v17816_v4, %v17670_v12  ;;  %4668 = vst [vmem:[#allocation2 + $0x138] sm:$0xf] %v4667_v36  ;;  %v5609_v19 = vsel %vm17021_vm4, %v5604_v21, %v5608_v56  ;;  %v3540_v63 = vmax.f32 %v3430_v18, 0.0  ;;  %v10152_v2 = vsel %vm17220_vm15, %v13721_v10, %v10151_v44 }
 0x51a   :  { %v4264_v55 = vor.u32 %v4262_v30, %v4261_v28  ;;  %v4266_v54 = vrot.slane %v4261_v28, 4  ;;  %v5614_v29 = vrot.slane %v5613_v46, 4  ;;  %v10153_v8 = vrot.slane %v10151_v44, 4  ;;  %v4673_v28 = vld [vmem:[#allocation2 + $0x144] sm:$0xf] }
 0x51b   :  { %v3433_v51 = vadd.f32 %v14208_v52, %v19645_v13  ;;  %v13887_v26 = vpack.c.bf16 %v3540_v63, %v3540_v63  ;;  %v5621_v49 = vshrl.u32 %v5080_v50, 16  ;;  %v5624_v30 = vshll.u32 %v5080_v50, 16  ;;  %v9885_v52 = vld [vmem:[#allocation2 + $0x124] sm:$0xf]  ;;  %v9886_v63 = vld [vmem:[#allocation2 + $0x128] sm:$0x1] }
 0x51c   :  { %v4265_v9 = vsel %vm17152_vm11, %v4257_v14, %v4264_v55  ;;  %v4671_v12 = vsel %vm17159_vm12, %v4266_v54, %v4670_v57  ;;  %v5619_v24 = vsel %vm17021_vm4, %v5614_v29, %v5618_v3  ;;  %v10155_v10 = vsel %vm17220_vm15, %v10153_v8, %v10154_v16  ;;  %v9884_v14 = vld [vmem:[#allocation2 + $0x120] sm:$0xe] }
 0x51d   :  { %4669 = vst [vmem:[#allocation2 + $0x13c] sm:$0xf] %v4265_v9  ;;  %4672 = vst [vmem:[#allocation2 + $0x140] sm:$0x1] %v4671_v12  ;;  %v3541_v22 = vmax.f32 %v3433_v51, 0.0  ;;  %v13434_v42 = vcombine.low %v5609_v19, %v5619_v24  ;;  %v4268_v56 = vshrl.u32 %v13887_v26, 16  ;;  %v13753_v58 = vcombine.low %v10152_v2, %v10155_v10 }
 0x51e   :  { %v4271_v41 = vshll.u32 %v13887_v26, 16  ;;  %v5623_v18 = vrot.slane %v5621_v49, 4  ;;  %v5626_v44 = vrot.slane %v5624_v30, 5  ;;  %v5630_v36 = vshll.u32 %v5081_v25, 16  ;;  %v19646_v12 = vld [vmem:[#allocation37_spill] sm:$0xff] }
 0x51f   :  { %v13888_v21 = vpack.c.bf16 %v3541_v22, %v3541_v22  ;;  %11784 = vmatprep.mubr.bf16.mxu1 %v13434_v42  ;;  %v4270_v57 = vrot.slane %v4268_v56, 7  ;;  %14116 = vmatmul.mubr.bf16.gmra.mrb[164].mxu0 %v13753_v58  ;;  %v5634_v3 = vshrl.u32 %v5081_v25, 16  ;;  %v5640_v46 = vshll.u32 %v5082_v23, 16  ;;  %v5083_v23 = vld [vmem:[#allocation2 + $0x120] sm:$0xf] }
 0x520   :  { %v14209_v16 = vadd.f32 %v17816_v4, %v17687_v61  ;;  %11785 = vmatmul.mubr.bf16.gmra.mrb[144].mxu1 %v15185_v1  ;;  %v5627_v54 = vor.u32 %v5626_v44, %v5623_v18  ;;  %v5632_v19 = vrot.slane %v5630_v36, 5  ;;  %v13722_v25 = vrot.slane %v9884_v14, 9  ;;  %v4677_v61 = vld [vmem:[#allocation2 + $0x14c] sm:$0x1]  ;;  %v5084_v36 = vld [vmem:[#allocation2 + $0x124] sm:$0xf] }
 0x521   :  { %v4276_v50 = vshrl.u32 %v13888_v21, 16  ;;  %v4279_v55 = vshll.u32 %v13888_v21, 16  ;;  %v4273_v29 = vor.u32 %v4271_v41, %v4270_v57  ;;  %v4274_v2 = vrot.slane %v4270_v57, 4  ;;  %v5085_v57 = vld [vmem:[#allocation2 + $0x128] sm:$0x1] }
 0x522   :  { %v5636_v8 = vrot.slane %v5634_v3, 4  ;;  %v5642_v13 = vrot.slane %v5640_v46, 5  ;;  %v5628_v9 = vrot.slane %v5627_v54, 4  ;;  %v3438_v26 = vadd.f32 %v14209_v16, %v19646_v12  ;;  %v17870_v46 = vpop.f32.mrb[128].mxu0  ;;  %v9887_v54 = vld [vmem:[#allocation2 + $0x12c] sm:$0xe] }
 0x523   :  { %v4278_v51 = vrot.slane %v4276_v50, 7  ;;  %v4674_v49 = vsel %vm17145_vm10, %v4273_v29, %v4673_v28  ;;  %v10158_v10 = vrot.slane %v9885_v52, 5  ;;  %v10161_v22 = vrot.slane %v9886_v63, 5  ;;  %v19647_v52 = vld [vmem:[#allocation40_spill] sm:$0xff] }
 0x524   :  { %v5637_v24 = vor.u32 %v5636_v8, %v5632_v19  ;;  %4675 = vst [vmem:[#allocation2 + $0x144] sm:$0xf] %v4674_v49  ;;  %v5633_v56 = vsel %vm17021_vm4, %v5628_v9, %v5632_v19  ;;  %v3542_v41 = vmax.f32 %v3438_v26, 0.0  ;;  %v14210_v28 = vadd.f32 %v17816_v4, %v17696_v33  ;;  %v17877_v19 = vpop.f32.mrb[129].mxu0  ;;  %v15187_v9 = vld [vmem:[#allocation2 + $0x114] sm:$0xff]  }
 0x525   :  { %v4281_v30 = vor.u32 %v4279_v55, %v4278_v51  ;;  %v4283_v42 = vrot.slane %v4278_v51, 4  ;;  %v10159_v1 = vsel %vm17220_vm15, %v13722_v25, %v10158_v10  ;;  %v10160_v14 = vrot.slane %v10158_v10, 4  ;;  %v17879_v51 = vpop.f32.mrb[130].mxu0 }
 0x526   :  { %v5638_v58 = vrot.slane %v5637_v24, 4  ;;  %v13889_v44 = vpack.c.bf16 %v3542_v41, %v3542_v41  ;;  %v5645_v3 = vshrl.u32 %v5083_v23, 16  ;;  %v3441_v50 = vadd.f32 %v14210_v28, %v19647_v52  ;;  %v17881_v49 = vpop.f32.mrb[131].mxu0  ;;  %v4680_v24 = vld [vmem:[#allocation2 + $0x150] sm:$0xf] }
 0x527   :  { %v4282_v21 = vsel %vm17152_vm11, %v4274_v2, %v4281_v30  ;;  %v4678_v18 = vsel %vm17159_vm12, %v4283_v42, %v4677_v61  ;;  %v10162_v33 = vsel %vm17220_vm15, %v10160_v14, %v10161_v22  ;;  %v5648_v55 = vshll.u32 %v5083_v23, 16  ;;  %v9888_v41 = vld [vmem:[#allocation2 + $0x130] sm:$0xf] }
 0x528   :  { %4676 = vst [vmem:[#allocation2 + $0x148] sm:$0xf] %v4282_v21  ;;  %4679 = vst [vmem:[#allocation2 + $0x14c] sm:$0x1] %v4678_v18  ;;  %v5643_v16 = vsel %vm17021_vm4, %v5638_v58, %v5642_v13  ;;  %v4285_v29 = vshrl.u32 %v13889_v44, 16  ;;  %v4288_v2 = vshll.u32 %v13889_v44, 16  ;;  %v13754_v8 = vcombine.low %v10159_v1, %v10162_v33 }
 0x529   :  { %v13435_v63 = vcombine.low %v5633_v56, %v5643_v16  ;;  %v3543_v12 = vmax.f32 %v3441_v50, 0.0  ;;  %v5647_v26 = vrot.slane %v5645_v3, 4  ;;  %v5650_v25 = vrot.slane %v5648_v55, 5  ;;  %v9889_v58 = vld [vmem:[#allocation2 + $0x134] sm:$0x1] }
 0x52a   :  { %v5654_v13 = vshll.u32 %v5084_v36, 16  ;;  %v4287_v61 = vrot.slane %v4285_v29, 7  ;;  %14119 = vmatprep.mubr.bf16.mxu0 %v13754_v8  ;;  %v5658_v10 = vshrl.u32 %v5084_v36, 16  ;;  %v5664_v22 = vshll.u32 %v5085_v57, 16  ;;  %v5086_v57 = vld [vmem:[#allocation2 + $0x12c] sm:$0xf] }
 0x52b   :  { %11792 = vmatprep.mubr.bf16.mxu1 %v13435_v63  ;;  %v14211_v23 = vadd.f32 %v17816_v4, %v17711_v27  ;;  %v13890_v30 = vpack.c.bf16 %v3543_v12, %v3543_v12  ;;  %v5651_v42 = vor.u32 %v5650_v25, %v5647_v26  ;;  %v13723_v1 = vrot.slane %v9887_v54, 9  ;;  %v4684_v63 = vld [vmem:[#allocation2 + $0x158] sm:$0x1] }
 0x52c   :  { %11793 = vmatmul.mubr.bf16.gmra.mrb[148].mxu1 %v15187_v9  ;;  %v5656_v56 = vrot.slane %v5654_v13, 5  ;;  %v4290_v14 = vor.u32 %v4288_v2, %v4287_v61  ;;  %v4291_v28 = vrot.slane %v4287_v61, 4  ;;  %v5660_v21 = vrot.slane %v5658_v10, 4  ;;  %v5088_v10 = vld [vmem:[#allocation2 + $0x134] sm:$0x1] }
 0x52d   :  { %v5666_v18 = vrot.slane %v5664_v22, 5  ;;  %v4293_v44 = vshrl.u32 %v13890_v30, 16  ;;  %v4296_v3 = vshll.u32 %v13890_v30, 16  ;;  %v5652_v16 = vrot.slane %v5651_v42, 4  ;;  %v9890_v42 = vld [vmem:[#allocation2 + $0x138] sm:$0xe] }
 0x52e   :  { %v3446_v36 = vadd.f32 %v14211_v23, %v17558_v47  ;;  %v4681_v27 = vsel %vm17145_vm10, %v4290_v14, %v4680_v24  ;;  %v5661_v33 = vor.u32 %v5660_v21, %v5656_v56  ;;  %v10165_v52 = vrot.slane %v9888_v41, 5  ;;  %v5087_v24 = vld [vmem:[#allocation2 + $0x130] sm:$0xf] }
 0x52f   :  { %v10168_v50 = vrot.slane %v9889_v58, 5  ;;  %4682 = vst [vmem:[#allocation2 + $0x150] sm:$0xf] %v4681_v27  ;;  %v4295_v55 = vrot.slane %v4293_v44, 7  ;;  %v5657_v54 = vsel %vm17021_vm4, %v5652_v16, %v5656_v56  ;;  %v14212_v2 = vadd.f32 %v17816_v4, %v17718_v6  ;;  %v4687_v16 = vld [vmem:[#allocation2 + $0x15c] sm:$0xf] }
 0x530   :  { %v3544_v29 = vmax.f32 %v3446_v36, 0.0  ;;  %v5662_v8 = vrot.slane %v5661_v33, 4  ;;  %v10166_v47 = vsel %vm17220_vm15, %v13723_v1, %v10165_v52  ;;  %v10167_v9 = vrot.slane %v10165_v52, 4 }
 0x531   :  { %v5669_v12 = vshrl.u32 %v5086_v57, 16  ;;  %v4298_v26 = vor.u32 %v4296_v3, %v4295_v55  ;;  %v4300_v25 = vrot.slane %v4295_v55, 4  ;;  %v3449_v61 = vadd.f32 %v14212_v2, %v17566_v20  ;;  %v15188_v20 = vld [vmem:[#allocation2 + $0x120] sm:$0xff]  }
 0x532   :  { %v13891_v13 = vpack.c.bf16 %v3544_v29, %v3544_v29  ;;  %v5667_v22 = vsel %vm17021_vm4, %v5662_v8, %v5666_v18  ;;  %v10169_v23 = vsel %vm17220_vm15, %v10167_v9, %v10168_v50  ;;  %v5672_v30 = vshll.u32 %v5086_v57, 16  ;;  %v9891_v50 = vld [vmem:[#allocation2 + $0x13c] sm:$0xf]  ;;  %v9892_v55 = vld [vmem:[#allocation2 + $0x140] sm:$0x1] }
 0x533   :  { %v5671_v6 = vrot.slane %v5669_v12, 4  ;;  %v4299_v56 = vsel %vm17152_vm11, %v4291_v28, %v4298_v26  ;;  %v4685_v41 = vsel %vm17159_vm12, %v4300_v25, %v4684_v63  ;;  %v13436_v58 = vcombine.low %v5657_v54, %v5667_v22 }
 0x534   :  { %v4302_v1 = vshrl.u32 %v13891_v13, 16  ;;  %4683 = vst [vmem:[#allocation2 + $0x154] sm:$0xf] %v4299_v56  ;;  %4686 = vst [vmem:[#allocation2 + $0x158] sm:$0x1] %v4685_v41  ;;  %v4305_v14 = vshll.u32 %v13891_v13, 16  ;;  %v13755_v21 = vcombine.low %v10166_v47, %v10169_v23  ;;  %v14213_v52 = vadd.f32 %v17816_v4, %v17731_v37 }
 0x535   :  { %v3545_v18 = vmax.f32 %v3449_v61, 0.0  ;;  %v5674_v44 = vrot.slane %v5672_v30, 5  ;;  %11800 = vmatprep.mubr.bf16.mxu1 %v13436_v58  ;;  %v5678_v36 = vshll.u32 %v5087_v24, 16  ;;  %v5682_v57 = vshrl.u32 %v5087_v24, 16  ;;  %v4691_v30 = vld [vmem:[#allocation2 + $0x164] sm:$0x1] }
 0x536   :  { %v4304_v3 = vrot.slane %v4302_v1, 7  ;;  %v5688_v27 = vshll.u32 %v5088_v10, 16  ;;  %11801 = vmatmul.mubr.bf16.gmra.mrb[152].mxu1 %v15188_v20  ;;  %14120 = vmatmul.mubr.bf16.gmra.mrb[168].mxu0 %v13755_v21  ;;  %v13724_v63 = vrot.slane %v9890_v42, 9  ;;  %v3454_v61 = vadd.f32 %v14213_v52, %v17552_v53  ;;  %v5089_v10 = vld [vmem:[#allocation2 + $0x138] sm:$0xf]  ;;  %v19648_v20 = vld [vmem:[#allocation46_spill] sm:$0xff] }
 0x537   :  { %v13892_v28 = vpack.c.bf16 %v3545_v18, %v3545_v18  ;;  %v5675_v33 = vor.u32 %v5674_v44, %v5671_v6  ;;  %v5680_v2 = vrot.slane %v5678_v36, 5  ;;  %v5684_v8 = vrot.slane %v5682_v57, 4  ;;  %v5090_v21 = vld [vmem:[#allocation2 + $0x13c] sm:$0xf]  ;;  %v9893_v52 = vld [vmem:[#allocation2 + $0x144] sm:$0xe] }
 0x538   :  { %v4307_v54 = vor.u32 %v4305_v14, %v4304_v3  ;;  %v4308_v29 = vrot.slane %v4304_v3, 4  ;;  %v5690_v26 = vrot.slane %v5688_v27, 5  ;;  %v10172_v24 = vrot.slane %v9891_v50, 5 }
 0x539   :  { %v4310_v47 = vshrl.u32 %v13892_v28, 16  ;;  %v4313_v9 = vshll.u32 %v13892_v28, 16  ;;  %v5676_v12 = vrot.slane %v5675_v33, 4  ;;  %v5685_v13 = vor.u32 %v5684_v8, %v5680_v2 }
 0x53a   :  { %v4688_v25 = vsel %vm17145_vm10, %v4307_v54, %v4687_v16  ;;  %v10175_v23 = vrot.slane %v9892_v55, 5  ;;  %v14214_v6 = vadd.f32 %v17816_v4, %v17737_v0  ;;  %v3546_v56 = vmax.f32 %v3454_v61, 0.0  ;;  %v5091_v16 = vld [vmem:[#allocation2 + $0x140] sm:$0x1]  ;;  %v15190_v55 = vld [vmem:[#allocation2 + $0x12c] sm:$0xff]  }
 0x53b   :  { %4689 = vst [vmem:[#allocation2 + $0x15c] sm:$0xf] %v4688_v25  ;;  %v4312_v37 = vrot.slane %v4310_v47, 7  ;;  %v5681_v22 = vsel %vm17021_vm4, %v5676_v12, %v5680_v2  ;;  %v5686_v42 = vrot.slane %v5685_v13, 4  ;;  %v10173_v41 = vsel %vm17220_vm15, %v13724_v63, %v10172_v24  ;;  %v17923_v50 = vpop.f32.mrb[132].mxu0 }
 0x53c   :  { %v10174_v58 = vrot.slane %v10172_v24, 4  ;;  %v3457_v14 = vadd.f32 %v14214_v6, %v19648_v20  ;;  %v5693_v18 = vshrl.u32 %v5089_v10, 16  ;;  %v13893_v3 = vpack.c.bf16 %v3546_v56, %v3546_v56  ;;  %v17925_v47 = vpop.f32.mrb[133].mxu0 }
 0x53d   :  { %v4315_v1 = vor.u32 %v4313_v9, %v4312_v37  ;;  %v4317_v53 = vrot.slane %v4312_v37, 4  ;;  %v5691_v44 = vsel %vm17021_vm4, %v5686_v42, %v5690_v26  ;;  %v5696_v36 = vshll.u32 %v5089_v10, 16  ;;  %v4694_v9 = vld [vmem:[#allocation2 + $0x168] sm:$0xf]  ;;  %v17927_v13 = vpop.f32.mrb[134].mxu0 }
 0x53e   :  { %v10176_v0 = vsel %vm17220_vm15, %v10174_v58, %v10175_v23  ;;  %v13437_v28 = vcombine.low %v5681_v22, %v5691_v44  ;;  %v4319_v63 = vshrl.u32 %v13893_v3, 16  ;;  %v4322_v54 = vshll.u32 %v13893_v3, 16  ;;  %v9894_v37 = vld [vmem:[#allocation2 + $0x148] sm:$0xf]  ;;  %v9895_v22 = vld [vmem:[#allocation2 + $0x14c] sm:$0x1] }
 0x53f   :  { %v4316_v57 = vsel %vm17152_vm11, %v4308_v29, %v4315_v1  ;;  %v4692_v27 = vsel %vm17159_vm12, %v4317_v53, %v4691_v30  ;;  %v13756_v33 = vcombine.low %v10173_v41, %v10176_v0  ;;  %v3547_v2 = vmax.f32 %v3457_v14, 0.0  ;;  %v17931_v41 = vpop.f32.mrb[135].mxu0 }
 0x540   :  { %4690 = vst [vmem:[#allocation2 + $0x160] sm:$0xf] %v4316_v57  ;;  %4693 = vst [vmem:[#allocation2 + $0x164] sm:$0x1] %v4692_v27  ;;  %v5695_v8 = vrot.slane %v5693_v18, 4  ;;  %11808 = vmatprep.mubr.bf16.mxu1 %v13437_v28  ;;  %v5698_v29 = vrot.slane %v5696_v36, 5  ;;  %v14215_v10 = vadd.f32 %v17816_v4, %v17753_v5 }
 0x541   :  { %14123 = vmatprep.mubr.bf16.mxu0 %v13756_v33  ;;  %v5702_v12 = vshll.u32 %v5090_v21, 16  ;;  %v5706_v26 = vshrl.u32 %v5090_v21, 16  ;;  %v5712_v25 = vshll.u32 %v5091_v16, 16  ;;  %11809 = vmatmul.mubr.bf16.gmra.mrb[156].mxu1 %v15190_v55  ;;  %v4321_v61 = vrot.slane %v4319_v63, 7  ;;  %v5092_v36 = vld [vmem:[#allocation2 + $0x144] sm:$0xf] }
 0x542   :  { %v13894_v24 = vpack.c.bf16 %v3547_v2, %v3547_v2  ;;  %v13725_v23 = vrot.slane %v9893_v52, 9  ;;  %v5699_v6 = vor.u32 %v5698_v29, %v5695_v8  ;;  %v3462_v18 = vadd.f32 %v14215_v10, %v17626_v45  ;;  %v4698_v57 = vld [vmem:[#allocation2 + $0x170] sm:$0x1]  ;;  %v5094_v10 = vld [vmem:[#allocation2 + $0x14c] sm:$0x1] }
 0x543   :  { %v5704_v30 = vrot.slane %v5702_v12, 5  ;;  %v5708_v42 = vrot.slane %v5706_v26, 4  ;;  %v5714_v56 = vrot.slane %v5712_v25, 5  ;;  %v4324_v58 = vor.u32 %v4322_v54, %v4321_v61  ;;  %v19649_v54 = vld [vmem:[#allocation55_spill] sm:$0xff] }
 0x544   :  { %v4325_v1 = vrot.slane %v4321_v61, 4  ;;  %v4327_v53 = vshrl.u32 %v13894_v24, 16  ;;  %v4330_v20 = vshll.u32 %v13894_v24, 16  ;;  %v5700_v14 = vrot.slane %v5699_v6, 4 }
 0x545   :  { %v5709_v21 = vor.u32 %v5708_v42, %v5704_v30  ;;  %v10179_v44 = vrot.slane %v9894_v37, 5  ;;  %v4695_v5 = vsel %vm17145_vm10, %v4324_v58, %v4694_v9  ;;  %v10182_v0 = vrot.slane %v9895_v22, 5  ;;  %v5093_v9 = vld [vmem:[#allocation2 + $0x148] sm:$0xf]  ;;  %v15191_v37 = vld [vmem:[#allocation2 + $0x138] sm:$0xff]  }
 0x546   :  { %v4329_v3 = vrot.slane %v4327_v53, 7  ;;  %v14216_v16 = vadd.f32 %v17816_v4, %v17764_v17  ;;  %4696 = vst [vmem:[#allocation2 + $0x168] sm:$0xf] %v4695_v5  ;;  %v5705_v27 = vsel %vm17021_vm4, %v5700_v14, %v5704_v30  ;;  %v3548_v33 = vmax.f32 %v3462_v18, 0.0  ;;  %v9896_v42 = vld [vmem:[#allocation2 + $0x150] sm:$0xe] }
 0x547   :  { %v5710_v28 = vrot.slane %v5709_v21, 4  ;;  %v10180_v45 = vsel %vm17220_vm15, %v13725_v23, %v10179_v44  ;;  %v10181_v63 = vrot.slane %v10179_v44, 4  ;;  %v5717_v29 = vshrl.u32 %v5092_v36, 16  ;;  %v9897_v5 = vld [vmem:[#allocation2 + $0x154] sm:$0xf] }
 0x548   :  { %v4332_v52 = vor.u32 %v4330_v20, %v4329_v3  ;;  %v4334_v55 = vrot.slane %v4329_v3, 4  ;;  %v3465_v2 = vadd.f32 %v14216_v16, %v19649_v54  ;;  %v13895_v17 = vpack.c.bf16 %v3548_v33, %v3548_v33  ;;  %v19650_v54 = vld [vmem:[#allocation49_spill] sm:$0xff] }
 0x549   :  { %v5715_v8 = vsel %vm17021_vm4, %v5710_v28, %v5714_v56  ;;  %v5720_v12 = vshll.u32 %v5092_v36, 16  ;;  %v10183_v24 = vsel %vm17220_vm15, %v10181_v63, %v10182_v0  ;;  %v4701_v56 = vld [vmem:[#allocation2 + $0x174] sm:$0xf]  ;;  %v5719_v58 = vrot.slane %v5717_v29, 4  ;;  %v9898_v36 = vld [vmem:[#allocation2 + $0x158] sm:$0x1] }
 0x54a   :  { %v4333_v26 = vsel %vm17152_vm11, %v4325_v1, %v4332_v52  ;;  %v4699_v25 = vsel %vm17159_vm12, %v4334_v55, %v4698_v57  ;;  %v13438_v61 = vcombine.low %v5705_v27, %v5715_v8  ;;  %v4336_v22 = vshrl.u32 %v13895_v17, 16  ;;  %v5095_v8 = vld [vmem:[#allocation2 + $0x150] sm:$0xf] }
 0x54b   :  { %4697 = vst [vmem:[#allocation2 + $0x16c] sm:$0xf] %v4333_v26  ;;  %4700 = vst [vmem:[#allocation2 + $0x170] sm:$0x1] %v4699_v25  ;;  %v4339_v23 = vshll.u32 %v13895_v17, 16  ;;  %v13757_v6 = vcombine.low %v10180_v45, %v10183_v24  ;;  %v3549_v30 = vmax.f32 %v3465_v2, 0.0  ;;  %v14217_v44 = vadd.f32 %v17816_v4, %v17783_v60 }
 0x54c   :  { %11816 = vmatprep.mubr.bf16.mxu1 %v13438_v61  ;;  %v5722_v1 = vrot.slane %v5720_v12, 5  ;;  %v5726_v53 = vshll.u32 %v5093_v9, 16  ;;  %v5730_v20 = vshrl.u32 %v5093_v9, 16  ;;  %v4338_v14 = vrot.slane %v4336_v22, 7  ;;  %v4705_v12 = vld [vmem:[#allocation2 + $0x17c] sm:$0x1] }
 0x54d   :  { %11817 = vmatmul.mubr.bf16.gmra.mrb[160].mxu1 %v15191_v37  ;;  %14124 = vmatmul.mubr.bf16.gmra.mrb[172].mxu0 %v13757_v6  ;;  %v13896_v21 = vpack.c.bf16 %v3549_v30, %v3549_v30  ;;  %v5736_v18 = vshll.u32 %v5094_v10, 16  ;;  %v13726_v57 = vrot.slane %v9896_v42, 9  ;;  %v3470_v2 = vadd.f32 %v14217_v44, %v19650_v54  ;;  %v19651_v42 = vld [vmem:[#allocation52_spill] sm:$0xff] }
 0x54e   :  { %v5723_v3 = vor.u32 %v5722_v1, %v5719_v58  ;;  %v5728_v0 = vrot.slane %v5726_v53, 5  ;;  %v5732_v16 = vrot.slane %v5730_v20, 4  ;;  %v4341_v27 = vor.u32 %v4339_v23, %v4338_v14  ;;  %v5096_v58 = vld [vmem:[#allocation2 + $0x154] sm:$0xf] }
 0x54f   :  { %v4342_v28 = vrot.slane %v4338_v14, 4  ;;  %v4344_v33 = vshrl.u32 %v13896_v21, 16  ;;  %v4347_v45 = vshll.u32 %v13896_v21, 16  ;;  %v5738_v63 = vrot.slane %v5736_v18, 5  ;;  %v15193_v14 = vld [vmem:[#allocation2 + $0x144] sm:$0xff]  }
 0x550   :  { %v5724_v52 = vrot.slane %v5723_v3, 4  ;;  %v5733_v55 = vor.u32 %v5732_v16, %v5728_v0  ;;  %v4702_v17 = vsel %vm17145_vm10, %v4341_v27, %v4701_v56  ;;  %v10186_v9 = vrot.slane %v9897_v5, 5  ;;  %v5097_v18 = vld [vmem:[#allocation2 + $0x158] sm:$0x1]  ;;  %v9899_v16 = vld [vmem:[#allocation2 + $0x15c] sm:$0xe] }
 0x551   :  { %v4346_v60 = vrot.slane %v4344_v33, 7  ;;  %v10189_v29 = vrot.slane %v9898_v36, 5  ;;  %4703 = vst [vmem:[#allocation2 + $0x174] sm:$0xf] %v4702_v17  ;;  %v3550_v61 = vmax.f32 %v3470_v2, 0.0  ;;  %v14218_v24 = vadd.f32 %v17816_v4, %v17792_v32 }
 0x552   :  { %v5729_v26 = vsel %vm17021_vm4, %v5724_v52, %v5728_v0  ;;  %v5734_v25 = vrot.slane %v5733_v55, 4  ;;  %v10187_v22 = vsel %vm17220_vm15, %v13726_v57, %v10186_v9  ;;  %v10188_v23 = vrot.slane %v10186_v9, 4  ;;  %v17971_v36 = vpop.f32.mrb[136].mxu0  ;;  %v4708_v57 = vld [vmem:[#allocation2 + $0x180] sm:$0xf] }
 0x553   :  { %v4349_v10 = vor.u32 %v4347_v45, %v4346_v60  ;;  %v4351_v37 = vrot.slane %v4346_v60, 4  ;;  %v13897_v30 = vpack.c.bf16 %v3550_v61, %v3550_v61  ;;  %v3473_v56 = vadd.f32 %v14218_v24, %v19651_v42  ;;  %v17973_v52 = vpop.f32.mrb[137].mxu0  ;;  %v9900_v17 = vld [vmem:[#allocation2 + $0x160] sm:$0xf] }
 0x554   :  { %v5739_v6 = vsel %vm17021_vm4, %v5734_v25, %v5738_v63  ;;  %v5741_v1 = vshrl.u32 %v5095_v8, 16  ;;  %v10190_v21 = vsel %vm17220_vm15, %v10188_v23, %v10189_v29  ;;  %v5750_v33 = vshll.u32 %v5096_v58, 16  ;;  %v17977_v60 = vpop.f32.mrb[138].mxu0 }
 0x555   :  { %v4350_v53 = vsel %vm17152_vm11, %v4342_v28, %v4349_v10  ;;  %v4706_v32 = vsel %vm17159_vm12, %v4351_v37, %v4705_v12  ;;  %v13439_v20 = vcombine.low %v5729_v26, %v5739_v6  ;;  %v4353_v44 = vshrl.u32 %v13897_v30, 16  ;;  %v9901_v26 = vld [vmem:[#allocation2 + $0x164] sm:$0x1]  ;;  %v17979_v37 = vpop.f32.mrb[139].mxu0 }
 0x556   :  { %4704 = vst [vmem:[#allocation2 + $0x178] sm:$0xf] %v4350_v53  ;;  %4707 = vst [vmem:[#allocation2 + $0x17c] sm:$0x1] %v4706_v32  ;;  %v4356_v5 = vshll.u32 %v13897_v30, 16  ;;  %v13758_v3 = vcombine.low %v10187_v22, %v10190_v21  ;;  %v3551_v0 = vmax.f32 %v3473_v56, 0.0  ;;  %v14219_v2 = vadd.f32 %v17816_v4, %v17798_v48 }
 0x557   :  { %11824 = vmatprep.mubr.bf16.mxu1 %v13439_v20  ;;  %v5743_v27 = vrot.slane %v5741_v1, 4  ;;  %v5744_v28 = vshll.u32 %v5095_v8, 16  ;;  %v5754_v45 = vshrl.u32 %v5096_v58, 16  ;;  %v4355_v55 = vrot.slane %v4353_v44, 7  ;;  %v4712_v1 = vld [vmem:[#allocation2 + $0x188] sm:$0x1] }
 0x558   :  { %11825 = vmatmul.mubr.bf16.gmra.mrb[164].mxu1 %v15193_v14  ;;  %14127 = vmatprep.mubr.bf16.mxu0 %v13758_v3  ;;  %v13898_v63 = vpack.c.bf16 %v3551_v0, %v3551_v0  ;;  %v5760_v54 = vshll.u32 %v5097_v18, 16  ;;  %v5752_v29 = vrot.slane %v5750_v33, 5  ;;  %v13727_v8 = vrot.slane %v9899_v16, 9 }
 0x559   :  { %v5746_v9 = vrot.slane %v5744_v28, 5  ;;  %v5756_v12 = vrot.slane %v5754_v45, 4  ;;  %v4358_v25 = vor.u32 %v4356_v5, %v4355_v55  ;;  %v4359_v61 = vrot.slane %v4355_v55, 4  ;;  %v5100_v55 = vld [vmem:[#allocation2 + $0x164] sm:$0x1] }
 0x55a   :  { %v4361_v24 = vshrl.u32 %v13898_v63, 16  ;;  %v4364_v10 = vshll.u32 %v13898_v63, 16  ;;  %v5762_v6 = vrot.slane %v5760_v54, 5  ;;  %v3478_v30 = vadd.f32 %v14219_v2, %v17672_v7  ;;  %v15194_v63 = vld [vmem:[#allocation2 + $0x150] sm:$0xff]  }
 0x55b   :  { %v5747_v22 = vor.u32 %v5746_v9, %v5743_v27  ;;  %v5757_v23 = vor.u32 %v5756_v12, %v5752_v29  ;;  %v4709_v48 = vsel %vm17145_vm10, %v4358_v25, %v4708_v57  ;;  %v10193_v56 = vrot.slane %v9900_v17, 5  ;;  %v5098_v57 = vld [vmem:[#allocation2 + $0x15c] sm:$0xf]  ;;  %v5099_v27 = vld [vmem:[#allocation2 + $0x160] sm:$0xf] }
 0x55c   :  { %v4363_v42 = vrot.slane %v4361_v24, 7  ;;  %v10196_v58 = vrot.slane %v9901_v26, 5  ;;  %4710 = vst [vmem:[#allocation2 + $0x180] sm:$0xf] %v4709_v48  ;;  %v3552_v20 = vmax.f32 %v3478_v30, 0.0  ;;  %v14220_v14 = vadd.f32 %v17816_v4, %v17805_v35 }
 0x55d   :  { %v5748_v53 = vrot.slane %v5747_v22, 4  ;;  %v5758_v32 = vrot.slane %v5757_v23, 4  ;;  %v10194_v44 = vsel %vm17220_vm15, %v13727_v8, %v10193_v56  ;;  %v10195_v7 = vrot.slane %v10193_v56, 4  ;;  %v4715_v9 = vld [vmem:[#allocation2 + $0x18c] sm:$0xf] }
 0x55e   :  { %v4366_v21 = vor.u32 %v4364_v10, %v4363_v42  ;;  %v4368_v18 = vrot.slane %v4363_v42, 4  ;;  %v13899_v0 = vpack.c.bf16 %v3552_v20, %v3552_v20  ;;  %v3481_v16 = vadd.f32 %v14220_v14, %v17678_v38  ;;  %v9902_v22 = vld [vmem:[#allocation2 + $0x168] sm:$0xe]  ;;  %v9903_v23 = vld [vmem:[#allocation2 + $0x16c] sm:$0xf] }
 0x55f   :  { %v5753_v5 = vsel %vm17021_vm4, %v5748_v53, %v5752_v29  ;;  %v5763_v3 = vsel %vm17021_vm4, %v5758_v32, %v5762_v6  ;;  %v10197_v45 = vsel %vm17220_vm15, %v10195_v7, %v10196_v58  ;;  %v5765_v29 = vshrl.u32 %v5098_v57, 16  ;;  %v9904_v56 = vld [vmem:[#allocation2 + $0x170] sm:$0x1] }
 0x560   :  { %v4367_v35 = vsel %vm17152_vm11, %v4359_v61, %v4366_v21  ;;  %v4713_v28 = vsel %vm17159_vm12, %v4368_v18, %v4712_v1  ;;  %v13440_v33 = vcombine.low %v5753_v5, %v5763_v3  ;;  %v4370_v54 = vshrl.u32 %v13899_v0, 16  ;;  %v19652_v18 = vld [vmem:[#allocation58_spill] sm:$0xff]  ;;  %v4719_v3 = vld [vmem:[#allocation2 + $0x194] sm:$0x1] }
 0x561   :  { %4711 = vst [vmem:[#allocation2 + $0x184] sm:$0xf] %v4367_v35  ;;  %4714 = vst [vmem:[#allocation2 + $0x188] sm:$0x1] %v4713_v28  ;;  %v4373_v2 = vshll.u32 %v13899_v0, 16  ;;  %v13759_v17 = vcombine.low %v10194_v44, %v10197_v45  ;;  %v3553_v38 = vmax.f32 %v3481_v16, 0.0  ;;  %v14221_v10 = vadd.f32 %v17816_v4, %v17827_v40 }
 0x562   :  { %11832 = vmatprep.mubr.bf16.mxu1 %v13440_v33  ;;  %v5768_v12 = vshll.u32 %v5098_v57, 16  ;;  %v5774_v26 = vshll.u32 %v5099_v27, 16  ;;  %v5778_v8 = vshrl.u32 %v5099_v27, 16  ;;  %v4372_v25 = vrot.slane %v4370_v54, 7 }
 0x563   :  { %11833 = vmatmul.mubr.bf16.gmra.mrb[168].mxu1 %v15194_v63  ;;  %14128 = vmatmul.mubr.bf16.gmra.mrb[176].mxu0 %v13759_v17  ;;  %v13900_v61 = vpack.c.bf16 %v3553_v38, %v3553_v38  ;;  %v5784_v24 = vshll.u32 %v5100_v55, 16  ;;  %v5767_v6 = vrot.slane %v5765_v29, 4  ;;  %v3486_v44 = vadd.f32 %v14221_v10, %v19652_v18  ;;  %v5101_v38 = vld [vmem:[#allocation2 + $0x168] sm:$0xf]  ;;  %v15196_v10 = vld [vmem:[#allocation2 + $0x15c] sm:$0xff]  }
 0x564   :  { %v5770_v30 = vrot.slane %v5768_v12, 5  ;;  %v5776_v48 = vrot.slane %v5774_v26, 5  ;;  %v5780_v42 = vrot.slane %v5778_v8, 4  ;;  %v4375_v58 = vor.u32 %v4373_v2, %v4372_v25  ;;  %v15302_v2 = vld [vmem:[%s19403_s2] ss:$0 sm:$0xff] }
 0x565   :  { %v4376_v1 = vrot.slane %v4372_v25, 4  ;;  %v4378_v53 = vshrl.u32 %v13900_v61, 16  ;;  %v4381_v32 = vshll.u32 %v13900_v61, 16  ;;  %v5786_v21 = vrot.slane %v5784_v24, 5  ;;  %v5103_v25 = vld [vmem:[#allocation2 + $0x170] sm:$0x1] }
 0x566   :  { %v5771_v20 = vor.u32 %v5770_v30, %v5767_v6  ;;  %v5781_v14 = vor.u32 %v5780_v42, %v5776_v48  ;;  %v4716_v7 = vsel %vm17145_vm10, %v4375_v58, %v4715_v9  ;;  %v13728_v40 = vrot.slane %v9902_v22, 9  ;;  %v5102_v9 = vld [vmem:[#allocation2 + $0x16c] sm:$0xf]  ;;  %v9905_v61 = vld [vmem:[#allocation2 + $0x174] sm:$0xe] }
 0x567   :  { %v4380_v4 = vrot.slane %v4378_v53, 7  ;;  %v10200_v5 = vrot.slane %v9903_v23, 5  ;;  %4717 = vst [vmem:[#allocation2 + $0x18c] sm:$0xf] %v4716_v7  ;;  %v3554_v57 = vmax.f32 %v3486_v44, 0.0  ;;  %v10203_v27 = vrot.slane %v9904_v56, 5 }
 0x568   :  { %v5772_v0 = vrot.slane %v5771_v20, 4  ;;  %v5782_v16 = vrot.slane %v5781_v14, 4  ;;  %v14222_v17 = vadd.f32 %v15302_v2, %v17833_v34  ;;  %v18020_v24 = vpop.f32.mrb[140].mxu0  ;;  %v9906_v30 = vld [vmem:[#allocation2 + $0x178] sm:$0xf]  ;;  %v5789_v58 = vshrl.u32 %v5101_v38, 16 }
 0x569   :  { %v4383_v35 = vor.u32 %v4381_v32, %v4380_v4  ;;  %v4385_v28 = vrot.slane %v4380_v4, 4  ;;  %v10201_v33 = vsel %vm17220_vm15, %v13728_v40, %v10200_v5  ;;  %v10202_v45 = vrot.slane %v10200_v5, 4  ;;  %v18023_v42 = vpop.f32.mrb[141].mxu0  ;;  %v4722_v56 = vld [vmem:[#allocation2 + $0x198] sm:$0xf] }
 0x56a   :  { %v5777_v55 = vsel %vm17021_vm4, %v5772_v0, %v5776_v48  ;;  %v5787_v63 = vsel %vm17021_vm4, %v5782_v16, %v5786_v21  ;;  %v13901_v54 = vpack.c.bf16 %v3554_v57, %v3554_v57  ;;  %v3489_v6 = vadd.f32 %v14222_v17, %v17676_v15  ;;  %v9907_v48 = vld [vmem:[#allocation2 + $0x17c] sm:$0x1]  ;;  %v18025_v20 = vpop.f32.mrb[142].mxu0 }
 0x56b   :  { %v4384_v29 = vsel %vm17152_vm11, %v4376_v1, %v4383_v35  ;;  %v4720_v12 = vsel %vm17159_vm12, %v4385_v28, %v4719_v3  ;;  %v13441_v26 = vcombine.low %v5777_v55, %v5787_v63  ;;  %v10204_v8 = vsel %vm17220_vm15, %v10202_v45, %v10203_v27  ;;  %v18027_v7 = vpop.f32.mrb[143].mxu0  ;;  %v5104_v3 = vld [vmem:[#allocation2 + $0x174] sm:$0xf]  ;;  %v5105_v35 = vld [vmem:[#allocation2 + $0x178] sm:$0xf] }
 0x56c   :  { %4718 = vst [vmem:[#allocation2 + $0x190] sm:$0xf] %v4384_v29  ;;  %4721 = vst [vmem:[#allocation2 + $0x194] sm:$0x1] %v4720_v12  ;;  %v4387_v34 = vshrl.u32 %v13901_v54, 16  ;;  %v4390_v22 = vshll.u32 %v13901_v54, 16  ;;  %v13760_v23 = vcombine.low %v10201_v33, %v10204_v8 }
 0x56d   :  { %11840 = vmatprep.mubr.bf16.mxu1 %v13441_v26  ;;  %v5792_v1 = vshll.u32 %v5101_v38, 16  ;;  %v5798_v53 = vshll.u32 %v5102_v9, 16  ;;  %v5802_v32 = vshrl.u32 %v5102_v9, 16  ;;  %v3555_v21 = vmax.f32 %v3489_v6, 0.0  ;;  %v4726_v38 = vld [vmem:[#allocation2 + $0x1a0] sm:$0x1] }
 0x56e   :  { %11841 = vmatmul.mubr.bf16.gmra.mrb[172].mxu1 %v15196_v10  ;;  %v4389_v14 = vrot.slane %v4387_v34, 7  ;;  %14131 = vmatprep.mubr.bf16.mxu0 %v13760_v23  ;;  %v5808_v18 = vshll.u32 %v5103_v25, 16  ;;  %v13729_v44 = vrot.slane %v9905_v61, 9  ;;  %v5791_v15 = vrot.slane %v5789_v58, 4  ;;  %v5106_v25 = vld [vmem:[#allocation2 + $0x17c] sm:$0x1] }
 0x56f   :  { %v5794_v4 = vrot.slane %v5792_v1, 5  ;;  %v5800_v40 = vrot.slane %v5798_v53, 5  ;;  %v5804_v5 = vrot.slane %v5802_v32, 4  ;;  %v13902_v57 = vpack.c.bf16 %v3555_v21, %v3555_v21  ;;  %v5108_v53 = vld [vmem:[#allocation2 + $0x184] sm:$0xf]  ;;  %v15197_v32 = vld [vmem:[#allocation2 + $0x168] sm:$0xff]  }
 0x570   :  { %v4392_v0 = vor.u32 %v4390_v22, %v4389_v14  ;;  %v4393_v16 = vrot.slane %v4389_v14, 4  ;;  %v5810_v27 = vrot.slane %v5808_v18, 5  ;;  %v10207_v45 = vrot.slane %v9906_v30, 5  ;;  %v5107_v30 = vld [vmem:[#allocation2 + $0x180] sm:$0xf] }
 0x571   :  { %v5795_v28 = vor.u32 %v5794_v4, %v5791_v15  ;;  %v5805_v33 = vor.u32 %v5804_v5, %v5800_v40  ;;  %v10210_v55 = vrot.slane %v9907_v48, 5  ;;  %v4395_v54 = vshrl.u32 %v13902_v57, 16 }
 0x572   :  { %v4723_v63 = vsel %vm17145_vm10, %v4392_v0, %v4722_v56  ;;  %v4398_v2 = vshll.u32 %v13902_v57, 16  ;;  %v5813_v17 = vshrl.u32 %v5104_v3, 16  ;;  %v10208_v12 = vsel %vm17220_vm15, %v13729_v44, %v10207_v45 }
 0x573   :  { %4724 = vst [vmem:[#allocation2 + $0x198] sm:$0xf] %v4723_v63  ;;  %v5796_v9 = vrot.slane %v5795_v28, 4  ;;  %v5806_v29 = vrot.slane %v5805_v33, 4  ;;  %v10209_v26 = vrot.slane %v10207_v45, 4  ;;  %v4397_v8 = vrot.slane %v4395_v54, 7 }
 0x574   :  { %v5815_v61 = vrot.slane %v5813_v17, 4  ;;  %v5816_v10 = vshll.u32 %v5104_v3, 16  ;;  %v5822_v34 = vshll.u32 %v5105_v35, 16  ;;  %v5826_v6 = vshrl.u32 %v5105_v35, 16  ;;  %v5110_v3 = vld [vmem:[#allocation2 + $0x18c] sm:$0xf] }
 0x575   :  { %v5801_v43 = vsel %vm17021_vm4, %v5796_v9, %v5800_v40  ;;  %v5811_v22 = vsel %vm17021_vm4, %v5806_v29, %v5810_v27  ;;  %v10211_v23 = vsel %vm17220_vm15, %v10209_v26, %v10210_v55  ;;  %v4400_v48 = vor.u32 %v4398_v2, %v4397_v8  ;;  %v5109_v27 = vld [vmem:[#allocation2 + $0x188] sm:$0x1] }
 0x576   :  { %v4402_v56 = vrot.slane %v4397_v8, 4  ;;  %v13442_v58 = vcombine.low %v5801_v43, %v5811_v22  ;;  %v13761_v1 = vcombine.low %v10208_v12, %v10211_v23  ;;  %v5818_v14 = vrot.slane %v5816_v10, 5  ;;  %v15199_v22 = vld [vmem:[#allocation2 + $0x174] sm:$0xff]  }
 0x577   :  { %v5824_v21 = vrot.slane %v5822_v34, 5  ;;  %v5828_v18 = vrot.slane %v5826_v6, 4  ;;  %v5832_v44 = vshll.u32 %v5106_v25, 16  ;;  %v4401_v15 = vsel %vm17152_vm11, %v4393_v16, %v4400_v48  ;;  %v5111_v16 = vld [vmem:[#allocation2 + $0x190] sm:$0xf] }
 0x578   :  { %v4727_v4 = vsel %vm17159_vm12, %v4402_v56, %v4726_v38  ;;  %11848 = vmatprep.mubr.bf16.mxu1 %v13442_v58  ;;  %14132 = vmatmul.mubr.bf16.gmra.mrb[180].mxu0 %v13761_v1  ;;  %v5837_v40 = vshrl.u32 %v5107_v30, 16  ;;  %v5840_v5 = vshll.u32 %v5107_v30, 16  ;;  %4725 = vst [vmem:[#allocation2 + $0x19c] sm:$0xf] %v4401_v15  ;;  %v5819_v0 = vor.u32 %v5818_v14, %v5815_v61  ;;  %v5112_v34 = vld [vmem:[#allocation2 + $0x194] sm:$0x1] }
 0x579   :  { %4728 = vst [vmem:[#allocation2 + $0x1a0] sm:$0x1] %v4727_v4  ;;  %11849 = vmatmul.mubr.bf16.gmra.mrb[176].mxu1 %v15197_v32  ;;  %v5829_v57 = vor.u32 %v5828_v18, %v5824_v21  ;;  %v5846_v35 = vshll.u32 %v5108_v53, 16  ;;  %v5834_v28 = vrot.slane %v5832_v44, 5  ;;  %v5850_v62 = vshrl.u32 %v5108_v53, 16 }
 0x57a   :  { %v5839_v33 = vrot.slane %v5837_v40, 4  ;;  %v5842_v45 = vrot.slane %v5840_v5, 5  ;;  %v5820_v55 = vrot.slane %v5819_v0, 4  ;;  %v5861_v54 = vshrl.u32 %v5110_v3, 16  ;;  %v15200_v0 = vld [vmem:[#allocation2 + $0x180] sm:$0xff]  }
 0x57b   :  { %v5830_v59 = vrot.slane %v5829_v57, 4  ;;  %v5848_v63 = vrot.slane %v5846_v35, 5  ;;  %v5852_v17 = vrot.slane %v5850_v62, 4  ;;  %v5856_v38 = vshll.u32 %v5109_v27, 16  ;;  %v6045_v35 = vld [vmem:[#allocation2 + $0x4] sm:$0xf] }
 0x57c   :  { %v5843_v2 = vor.u32 %v5842_v45, %v5839_v33  ;;  %v5864_v9 = vshll.u32 %v5110_v3, 16  ;;  %v5825_v29 = vsel %vm17021_vm4, %v5820_v55, %v5824_v21  ;;  %v5863_v26 = vrot.slane %v5861_v54, 4  ;;  %v6044_v45 = vld [vmem:[#allocation2] sm:$0xe]  ;;  %v6046_v62 = vld [vmem:[#allocation2 + $0x8] sm:$0x1] }
 0x57d   :  { %v5835_v12 = vsel %vm17021_vm4, %v5830_v59, %v5834_v28  ;;  %v5870_v8 = vshll.u32 %v5111_v16, 16  ;;  %v5853_v10 = vor.u32 %v5852_v17, %v5848_v63  ;;  %v5874_v6 = vshrl.u32 %v5111_v16, 16  ;;  %v15203_v54 = vld [vmem:[#allocation2 + $0xc] sm:$0xff]  }
 0x57e   :  { %v13443_v25 = vcombine.low %v5825_v29, %v5835_v12  ;;  %v5844_v61 = vrot.slane %v5843_v2, 4  ;;  %v5866_v43 = vrot.slane %v5864_v9, 5  ;;  %v5858_v48 = vrot.slane %v5856_v38, 5  ;;  %v6048_v2 = vld [vmem:[#allocation2 + $0x10] sm:$0xf]  ;;  %v15205_v12 = vld [vmem:[%s19404_s3 + $0x100] sm:$0xff]  }
 0x57f   :  { %v5872_v23 = vrot.slane %v5870_v8, 5  ;;  %v5854_v30 = vrot.slane %v5853_v10, 4  ;;  %v5876_v58 = vrot.slane %v5874_v6, 4  ;;  %v5880_v1 = vshll.u32 %v5112_v34, 16  ;;  %v18051_v14 = vpop.f32.mrb[144].mxu0  ;;  %v15204_v8 = vld [vmem:[#allocation2 + $0x18] sm:$0xff]  }
 0x580   :  { %11856 = vmatprep.mubr.bf16.mxu1 %v13443_v25  ;;  %v5867_v56 = vor.u32 %v5866_v43, %v5863_v26  ;;  %v5849_v53 = vsel %vm17021_vm4, %v5844_v61, %v5848_v63  ;;  %v18053_v15 = vpop.f32.mrb[145].mxu0  ;;  %v6241_v33 = vrot.slane %v6045_v35, 5  ;;  %v13446_v16 = vrot.slane %v6044_v45, 9  ;;  %v15202_v63 = vld [vmem:[#allocation2 + $0x18c] sm:$0xff]   ;;  %v6049_v26 = vld [vmem:[#allocation2 + $0x14] sm:$0x1] }
 0x581   :  { %11857 = vmatmul.mubr.bf16.gmra.mrb[180].mxu1 %v15199_v22  ;;  %v5859_v32 = vsel %vm17021_vm4, %v5854_v30, %v5858_v48  ;;  %v5877_v44 = vor.u32 %v5876_v58, %v5872_v23  ;;  %v18055_v4 = vpop.f32.mrb[146].mxu0  ;;  %v5882_v5 = vrot.slane %v5880_v1, 5  ;;  %v6244_v59 = vrot.slane %v6046_v62, 5  ;;  %v6047_v10 = vld [vmem:[#allocation2 + $0xc] sm:$0xe]  ;;  %v15217_v45 = vld [vmem:[%s19404_s3 + $0x120] sm:$0xff]  }
 0x582   :  { %v13444_v21 = vcombine.low %v5849_v53, %v5859_v32  ;;  %v5868_v18 = vrot.slane %v5867_v56, 4  ;;  %v18057_v3 = vpop.f32.mrb[147].mxu0  ;;  %v6243_v55 = vrot.slane %v6241_v33, 4  ;;  %v6242_v17 = vsel %vm17220_vm15, %v13446_v16, %v6241_v33  ;;  %v6051_v34 = vld [vmem:[#allocation2 + $0x1c] sm:$0xf]  ;;  %v15211_v53 = vld [vmem:[%s19404_s3 + $0x110] sm:$0xff]  }
 0x583   :  { %v5878_v40 = vrot.slane %v5877_v44, 4  ;;  %v6248_v9 = vrot.slane %v6048_v2, 5  ;;  %v6251_v22 = vrot.slane %v6049_v26, 5  ;;  %v13447_v48 = vrot.slane %v6047_v10, 9  ;;  %v6055_v16 = vld [vmem:[#allocation2 + $0x2c] sm:$0x1] }
 0x584   :  { %11864 = vmatprep.mubr.bf16.mxu1 %v13444_v21  ;;  %v5873_v57 = vsel %vm17021_vm4, %v5868_v18, %v5872_v23  ;;  %v6245_v38 = vsel %vm17220_vm15, %v6243_v55, %v6244_v59  ;;  %v15208_v23 = vld [vmem:[%s19404_s3 + $0x108] sm:$0xff]   ;;  %v6255_v58 = vrot.slane %v6051_v34, 5  ;;  %v6052_v21 = vld [vmem:[#allocation2 + $0x20] sm:$0x1]  ;;  %v15207_v55 = vld [vmem:[#allocation2 + $0x30] sm:$0xff]   ;;  %v6265_v2 = vrot.slane %v6055_v16, 5 }
 0x585   :  { %v5883_v27 = vsel %vm17021_vm4, %v5878_v40, %v5882_v5  ;;  %v13478_v29 = vcombine.low %v6242_v17, %v6245_v38  ;;  %v6250_v25 = vrot.slane %v6248_v9, 4  ;;  %v6249_v1 = vsel %vm17220_vm15, %v13447_v48, %v6248_v9  ;;  %v15206_v18 = vld [vmem:[#allocation2 + $0x24] sm:$0xff]   ;;  %v6050_v40 = vld [vmem:[#allocation2 + $0x18] sm:$0xe]  ;;  %v15223_v26 = vld [vmem:[%s19404_s3 + $0x130] sm:$0xff]  }
 0x586   :  { %v13445_v28 = vcombine.low %v5873_v57, %v5883_v27  ;;  %v6257_v44 = vrot.slane %v6255_v58, 4  ;;  %v6054_v5 = vld [vmem:[#allocation2 + $0x28] sm:$0xf]  ;;  %v15214_v57 = vld [vmem:[%s19404_s3 + $0x118] sm:$0xff]   ;;  %v13448_v27 = vrot.slane %v6050_v40, 9 }
 0x587   :  { %v6252_v56 = vsel %vm17220_vm15, %v6250_v25, %v6251_v22  ;;  %v15220_v17 = vld [vmem:[%s19404_s3 + $0x128] sm:$0xff]   ;;  %v6058_v25 = vld [vmem:[#allocation2 + $0x38] sm:$0x1]  ;;  %v15209_v10 = vld [vmem:[#allocation2 + $0x3c] sm:$0xff]  }
 0x588   :  { %v13479_v32 = vcombine.low %v6249_v1, %v6252_v56  ;;  %v6256_v33 = vsel %vm17220_vm15, %v13448_v27, %v6255_v58  ;;  %v6060_v48 = vld [vmem:[#allocation2 + $0x40] sm:$0xf]  ;;  %v6272_v58 = vrot.slane %v6058_v25, 5  ;;  %v15210_v27 = vld [vmem:[#allocation2 + $0x48] sm:$0xff]  }
 0x589   :  { %11865 = vmatmul.mubr.bf16.gmra.mrb[184].mxu1 %v15200_v0  ;;  %v6258_v0 = vrot.slane %v6052_v21, 5 }
 0x58a   :  { %11872 = vmatprep.mubr.bf16.mxu1 %v13445_v28  ;;  %v6262_v28 = vrot.slane %v6054_v5, 5  ;;  %v15229_v5 = vld [vmem:[%s19404_s3 + $0x140] sm:$0xff]  }
 0x58b   :  { %v6259_v35 = vsel %vm17220_vm15, %v6257_v44, %v6258_v0  ;;  %v6276_v44 = vrot.slane %v6060_v48, 5  ;;  %v6067_v48 = vld [vmem:[#allocation2 + $0x5c] sm:$0x1] }
 0x58c   :  { %v13480_v62 = vcombine.low %v6256_v33, %v6259_v35  ;;  %v6264_v59 = vrot.slane %v6262_v28, 4  ;;  %v6063_v33 = vld [vmem:[#allocation2 + $0x4c] sm:$0xf] }
 0x58d   :  { %v6278_v35 = vrot.slane %v6276_v44, 4 }
 0x58e   :  { %v6266_v9 = vsel %vm17220_vm15, %v6264_v59, %v6265_v2  ;;  %v6283_v59 = vrot.slane %v6063_v33, 5  ;;  %v15215_v33 = vld [vmem:[#allocation2 + $0x6c] sm:$0xff]  }
 0x591   :  { %11873 = vmatmul.mubr.bf16.gmra.mrb[188].mxu1 %v15202_v63  ;;  %v6053_v63 = vld [vmem:[#allocation2 + $0x24] sm:$0xe] }
 0x592   :  { %11913 = vmatprep.mubr.bf16.mxu1 %v15203_v54  ;;  %v6057_v54 = vld [vmem:[#allocation2 + $0x34] sm:$0xf]  ;;  %v13449_v38 = vrot.slane %v6053_v63, 9 }
 0x596   :  { %v18070_v61 = vpop.f32.mrb[148].mxu0 }
 0x597   :  { %v18072_v43 = vpop.f32.mrb[149].mxu0 }
 0x598   :  { %v18077_v6 = vpop.f32.mrb[150].mxu0 }
 0x599   :  { %11914 = vmatmul.mubr.bf16.vlgmr.msra.gmra.mrb[64].mxu1 %v13478_v29  ;;  %v18080_v30 = vpop.f32.mrb[151].mxu0  ;;  %v6269_v29 = vrot.slane %v6057_v54, 5  ;;  %v15235_v54 = vld [vmem:[%s19404_s3 + $0x150] sm:$0xff]  }
 0x59a   :  { %11921 = vmatprep.mubr.bf16.mxu1 %v15204_v8  ;;  %12171 = vmatpush1.bf16.msra.mxu1 %v15205_v12  ;;  %v6263_v12 = vsel %vm17220_vm15, %v13449_v38, %v6262_v28  ;;  %v6059_v28 = vld [vmem:[#allocation2 + $0x3c] sm:$0xe]  ;;  %v15212_v38 = vld [vmem:[#allocation2 + $0x54] sm:$0xff]  }
 0x59b   :  { %12172 = vmatprep.subr.bf16.mxu1 %v19559_v11  ;;  %v13481_v8 = vcombine.low %v6263_v12, %v6266_v9  ;;  %v6271_v34 = vrot.slane %v6269_v29, 4  ;;  %v13451_v16 = vrot.slane %v6059_v28, 9  ;;  %v6285_v9 = vrot.slane %v6283_v59, 4  ;;  %v6066_v12 = vld [vmem:[#allocation2 + $0x58] sm:$0xf] }
 0x59c   :  { %v6070_v28 = vld [vmem:[#allocation2 + $0x68] sm:$0x1] }
 0x59d   :  { %v6277_v63 = vsel %vm17220_vm15, %v13451_v16, %v6276_v44  ;;  %v6293_v44 = vrot.slane %v6067_v48, 5  ;;  %v6068_v16 = vld [vmem:[#allocation2 + $0x60] sm:$0xe] }
 0x59e   :  { %12173 = vmatpush1.bf16.msra.mxu1 %v15208_v23  ;;  %v6056_v23 = vld [vmem:[#allocation2 + $0x30] sm:$0xe]  ;;  %v15241_v48 = vld [vmem:[%s19404_s3 + $0x160] sm:$0xff]  }
 0x59f   :  { %12174 = vmatprep.subr.bf16.mxu1 %v19559_v11  ;;  %v13450_v21 = vrot.slane %v6056_v23, 9 }
 0x5a1   :  { %11922 = vmatmul.mubr.bf16.gmra.mrb[68].mxu1 %v13479_v32  ;;  %v6270_v40 = vsel %vm17220_vm15, %v13450_v21, %v6269_v29  ;;  %v6062_v29 = vld [vmem:[#allocation2 + $0x48] sm:$0xe]  ;;  %v6065_v21 = vld [vmem:[#allocation2 + $0x54] sm:$0xe] }
 0x5a2   :  { %11929 = vmatprep.mubr.bf16.mxu1 %v15206_v18  ;;  %12175 = vmatpush1.bf16.msra.mxu1 %v15211_v53  ;;  %v15226_v53 = vld [vmem:[%s19404_s3 + $0x138] sm:$0xff]   ;;  %v6273_v18 = vsel %vm17220_vm15, %v6271_v34, %v6272_v58  ;;  %v15213_v58 = vld [vmem:[#allocation2 + $0x60] sm:$0xff]  }
 0x5a3   :  { %12176 = vmatprep.subr.bf16.mxu1 %v19559_v11  ;;  %v13482_v0 = vcombine.low %v6270_v40, %v6273_v18  ;;  %v6069_v18 = vld [vmem:[#allocation2 + $0x64] sm:$0xf]  ;;  %v15238_v40 = vld [vmem:[%s19404_s3 + $0x158] sm:$0xff]  }
 0x5a6   :  { %12177 = vmatpush1.bf16.msra.mxu1 %v15214_v57  ;;  %v6061_v57 = vld [vmem:[#allocation2 + $0x44] sm:$0x1] }
 0x5a7   :  { %12178 = vmatprep.subr.bf16.mxu1 %v19559_v11 }
 0x5a9   :  { %11930 = vmatmul.mubr.bf16.gmra.mrb[72].mxu1 %v13480_v62  ;;  %v15232_v62 = vld [vmem:[%s19404_s3 + $0x148] sm:$0xff]  }
 0x5aa   :  { %11937 = vmatprep.mubr.bf16.mxu1 %v15207_v55  ;;  %12179 = vmatpush1.bf16.msra.mxu1 %v15217_v45  ;;  %v6279_v45 = vrot.slane %v6061_v57, 5  ;;  %v6297_v57 = vrot.slane %v6069_v18, 5 }
 0x5ab   :  { %12180 = vmatprep.subr.bf16.mxu1 %v19559_v11 }
 0x5ac   :  { %v6280_v55 = vsel %vm17220_vm15, %v6278_v35, %v6279_v45  ;;  %v6299_v45 = vrot.slane %v6297_v57, 4 }
 0x5ad   :  { %v13483_v2 = vcombine.low %v6277_v63, %v6280_v55  ;;  %v6072_v55 = vld [vmem:[#allocation2 + $0x70] sm:$0xf]  ;;  %v6300_v63 = vrot.slane %v6070_v28, 5 }
 0x5ae   :  { %12181 = vmatpush1.bf16.msra.mxu1 %v15220_v17  ;;  %v6064_v17 = vld [vmem:[#allocation2 + $0x50] sm:$0x1] }
 0x5af   :  { %12182 = vmatprep.subr.bf16.mxu1 %v19559_v11  ;;  %v18114_v22 = vpop.f32.mrb[152].mxu0 }
 0x5b0   :  { %v18116_v56 = vpop.f32.mrb[153].mxu0 }
 0x5b1   :  { %11938 = vmatmul.mubr.bf16.gmra.mrb[76].mxu1 %v13481_v8  ;;  %v18118_v1 = vpop.f32.mrb[154].mxu0  ;;  %v13452_v8 = vrot.slane %v6062_v29, 9 }
 0x5b2   :  { %11945 = vmatprep.mubr.bf16.mxu1 %v15209_v10  ;;  %19653 = vst [vmem:[#allocation61_spill] sm:$0xff] %v18118_v1  ;;  %12183 = vmatpush1.bf16.msra.mxu1 %v15223_v26  ;;  %v18123_v32 = vpop.f32.mrb[155].mxu0  ;;  %v6286_v26 = vrot.slane %v6064_v17, 5  ;;  %v6290_v10 = vrot.slane %v6066_v12, 5  ;;  %v13454_v17 = vrot.slane %v6068_v16, 9 }
 0x5b3   :  { %12184 = vmatprep.subr.bf16.mxu1 %v19559_v11  ;;  %v6284_v34 = vsel %vm17220_vm15, %v13452_v8, %v6283_v59  ;;  %v15216_v8 = vld [vmem:[#allocation2 + $0x78] sm:$0xff]  }
 0x5b4   :  { %v6287_v25 = vsel %vm17220_vm15, %v6285_v9, %v6286_v26  ;;  %v6304_v9 = vrot.slane %v6072_v55, 5  ;;  %v6298_v29 = vsel %vm17220_vm15, %v13454_v17, %v6297_v57  ;;  %v6073_v26 = vld [vmem:[#allocation2 + $0x74] sm:$0x1]  ;;  %v6076_v57 = vld [vmem:[#allocation2 + $0x80] sm:$0x1] }
 0x5b5   :  { %v13484_v23 = vcombine.low %v6284_v34, %v6287_v25  ;;  %v6075_v34 = vld [vmem:[#allocation2 + $0x7c] sm:$0xf]  ;;  %v6314_v16 = vrot.slane %v6076_v57, 5 }
 0x5b6   :  { %12185 = vmatpush1.bf16.msra.mxu1 %v15226_v53  ;;  %v6292_v53 = vrot.slane %v6290_v10, 4  ;;  %v6306_v25 = vrot.slane %v6304_v9, 4 }
 0x5b7   :  { %12186 = vmatprep.subr.bf16.mxu1 %v19559_v11 }
 0x5b9   :  { %11946 = vmatmul.mubr.bf16.gmra.mrb[80].mxu1 %v13482_v0  ;;  %v6294_v0 = vsel %vm17220_vm15, %v6292_v53, %v6293_v44 }
 0x5ba   :  { %11953 = vmatprep.mubr.bf16.mxu1 %v15210_v27  ;;  %12187 = vmatpush1.bf16.msra.mxu1 %v15229_v5  ;;  %v13453_v5 = vrot.slane %v6065_v21, 9  ;;  %v6311_v21 = vrot.slane %v6075_v34, 5  ;;  %v15244_v34 = vld [vmem:[%s19404_s3 + $0x168] sm:$0xff]  }
 0x5bb   :  { %12188 = vmatprep.subr.bf16.mxu1 %v19559_v11 }
 0x5bc   :  { %v6291_v27 = vsel %vm17220_vm15, %v13453_v5, %v6290_v10  ;;  %v6071_v10 = vld [vmem:[#allocation2 + $0x6c] sm:$0xe]  ;;  %v6313_v28 = vrot.slane %v6311_v21, 4 }
 0x5bd   :  { %v13485_v35 = vcombine.low %v6291_v27, %v6294_v0 }
 0x5be   :  { %12189 = vmatpush1.bf16.msra.mxu1 %v15232_v62 }
 0x5bf   :  { %12190 = vmatprep.subr.bf16.mxu1 %v19559_v11 }
 0x5c1   :  { %11954 = vmatmul.mubr.bf16.gmra.mrb[84].mxu1 %v13483_v2 }
 0x5c2   :  { %11961 = vmatprep.mubr.bf16.mxu1 %v15212_v38  ;;  %12191 = vmatpush1.bf16.msra.mxu1 %v15235_v54  ;;  %v6301_v38 = vsel %vm17220_vm15, %v6299_v45, %v6300_v63  ;;  %v6078_v45 = vld [vmem:[#allocation2 + $0x88] sm:$0xf]  ;;  %v6315_v63 = vsel %vm17220_vm15, %v6313_v28, %v6314_v16  ;;  %v6084_v28 = vld [vmem:[#allocation2 + $0xa0] sm:$0xf] }
 0x5c3   :  { %12192 = vmatprep.subr.bf16.mxu1 %v19559_v11  ;;  %v13486_v12 = vcombine.low %v6298_v29, %v6301_v38  ;;  %v6318_v17 = vrot.slane %v6078_v45, 5  ;;  %v6079_v29 = vld [vmem:[#allocation2 + $0x8c] sm:$0x1] }
 0x5c6   :  { %12193 = vmatpush1.bf16.msra.mxu1 %v15238_v40 }
 0x5c7   :  { %12194 = vmatprep.subr.bf16.mxu1 %v19559_v11 }
 0x5c9   :  { %11962 = vmatmul.mubr.bf16.gmra.mrb[88].mxu1 %v13484_v23  ;;  %v6307_v23 = vrot.slane %v6073_v26, 5  ;;  %v6320_v26 = vrot.slane %v6318_v17, 4 }
 0x5ca   :  { %11969 = vmatprep.mubr.bf16.mxu1 %v15213_v58  ;;  %v13455_v58 = vrot.slane %v6071_v10, 9  ;;  %12195 = vmatpush1.bf16.msra.mxu1 %v15241_v48  ;;  %v6321_v10 = vrot.slane %v6079_v29, 5 }
 0x5cb   :  { %v6308_v53 = vsel %vm17220_vm15, %v6306_v25, %v6307_v23  ;;  %12196 = vmatprep.subr.bf16.mxu1 %v19559_v11  ;;  %v6081_v25 = vld [vmem:[#allocation2 + $0x94] sm:$0xf] }
 0x5cc   :  { %v6305_v40 = vsel %vm17220_vm15, %v13455_v58, %v6304_v9  ;;  %v6322_v48 = vsel %vm17220_vm15, %v6320_v26, %v6321_v10  ;;  %v6325_v58 = vrot.slane %v6081_v25, 5  ;;  %v6085_v26 = vld [vmem:[#allocation2 + $0xa4] sm:$0x1]  ;;  %v6083_v10 = vld [vmem:[#allocation2 + $0x9c] sm:$0xe] }
 0x5cd   :  { %v13487_v0 = vcombine.low %v6305_v40, %v6308_v53  ;;  %v6082_v40 = vld [vmem:[#allocation2 + $0x98] sm:$0x1] }
 0x5ce   :  { %12197 = vmatpush1.bf16.msra.mxu1 %v15244_v34  ;;  %v6327_v57 = vrot.slane %v6325_v58, 4  ;;  %v6087_v34 = vld [vmem:[#allocation2 + $0xac] sm:$0xf] }
 0x5cf   :  { %v18159_v62 = vpop.f32.mrb[156].mxu0  ;;  %12198 = vmatprep.subr.bf16.mxu1 %v19559_v11 }
 0x5d0   :  { %19654 = vst [vmem:[#allocation7_spill] sm:$0xff] %v18159_v62  ;;  %v18161_v59 = vpop.f32.mrb[157].mxu0 }
 0x5d1   :  { %11970 = vmatmul.mubr.bf16.gmra.mrb[92].mxu1 %v13485_v35  ;;  %19655 = vst [vmem:[#allocation8_spill] sm:$0xff] %v18161_v59  ;;  %v18163_v54 = vpop.f32.mrb[158].mxu0  ;;  %v15218_v35 = vld [vmem:[#allocation2 + $0x84] sm:$0xff]   ;;  %v8028_v59 = vld [vmem:[#allocation2 + $0x198] sm:$0xe] }
 0x5d2   :  { %11977 = vmatprep.mubr.bf16.mxu1 %v15215_v33  ;;  %19656 = vst [vmem:[#allocation9_spill] sm:$0xff] %v18163_v54  ;;  %v18165_v2 = vpop.f32.mrb[159].mxu0  ;;  %v6074_v33 = vld [vmem:[#allocation2 + $0x78] sm:$0xe] }
 0x5d3   :  { %19657 = vst [vmem:[#allocation10_spill] sm:$0xff] %v18165_v2  ;;  %v13456_v55 = vrot.slane %v6074_v33, 9  ;;  %v6328_v33 = vrot.slane %v6082_v40, 5 }
 0x5d5   :  { %v6312_v38 = vsel %vm17220_vm15, %v13456_v55, %v6311_v21  ;;  %v6329_v55 = vsel %vm17220_vm15, %v6327_v57, %v6328_v33  ;;  %v6088_v57 = vld [vmem:[#allocation2 + $0xb0] sm:$0x1]  ;;  %v6086_v33 = vld [vmem:[#allocation2 + $0xa8] sm:$0xe] }
 0x5d6   :  { %v13488_v9 = vcombine.low %v6312_v38, %v6315_v63  ;;  %v6332_v63 = vrot.slane %v6084_v28, 5 }
 0x5d8   :  { %v6334_v25 = vrot.slane %v6332_v63, 4 }
 0x5d9   :  { %11978 = vmatmul.mubr.bf16.gmra.mrb[96].mxu1 %v13486_v12  ;;  %v15219_v12 = vld [vmem:[#allocation2 + $0x90] sm:$0xff]  }
 0x5da   :  { %11985 = vmatprep.mubr.bf16.mxu1 %v15216_v8  ;;  %v6077_v8 = vld [vmem:[#allocation2 + $0x84] sm:$0xe] }
 0x5db   :  { %v18176_v18 = vpop.f32.mrb[160].mxu0  ;;  %v13457_v23 = vrot.slane %v6077_v8, 9  ;;  %v15222_v8 = vld [vmem:[#allocation2 + $0xa8] sm:$0xff]  }
 0x5dc   :  { %19658 = vst [vmem:[#allocation11_spill] sm:$0xff] %v18176_v18  ;;  %v18178_v44 = vpop.f32.mrb[161].mxu0 }
 0x5dd   :  { %19659 = vst [vmem:[#allocation12_spill] sm:$0xff] %v18178_v44  ;;  %v18183_v5 = vpop.f32.mrb[162].mxu0  ;;  %v6319_v53 = vsel %vm17220_vm15, %v13457_v23, %v6318_v17  ;;  %v6335_v23 = vrot.slane %v6085_v26, 5 }
 0x5de   :  { %19660 = vst [vmem:[#allocation13_spill] sm:$0xff] %v18183_v5  ;;  %v18185_v27 = vpop.f32.mrb[163].mxu0  ;;  %v13489_v21 = vcombine.low %v6319_v53, %v6322_v48  ;;  %v15247_v48 = vld [vmem:[%s19404_s3 + $0x170] sm:$0xff]   ;;  %v13459_v53 = vrot.slane %v6083_v10, 9  ;;  %v6091_v10 = vld [vmem:[#allocation2 + $0xbc] sm:$0x1] }
 0x5df   :  { %19661 = vst [vmem:[#allocation15_spill] sm:$0xff] %v18185_v27  ;;  %12199 = vmatpush1.bf16.msra.mxu1 %v15247_v48  ;;  %v6089_v48 = vld [vmem:[#allocation2 + $0xb4] sm:$0xe] }
 0x5e0   :  { %12200 = vmatprep.subr.bf16.mxu1 %v19559_v11  ;;  %v6333_v40 = vsel %vm17220_vm15, %v13459_v53, %v6332_v63  ;;  %v6093_v63 = vld [vmem:[#allocation2 + $0xdc] sm:$0xf]  ;;  %v6349_v53 = vrot.slane %v6091_v10, 5 }
 0x5e1   :  { %11986 = vmatmul.mubr.bf16.gmra.mrb[100].mxu1 %v13487_v0  ;;  %v15221_v0 = vld [vmem:[#allocation2 + $0x9c] sm:$0xff]  }
 0x5e2   :  { %11993 = vmatprep.mubr.bf16.mxu1 %v15218_v35  ;;  %v6080_v35 = vld [vmem:[#allocation2 + $0x90] sm:$0xe] }
 0x5e3   :  { %v13458_v16 = vrot.slane %v6080_v35, 9  ;;  %v15224_v35 = vld [vmem:[#allocation2 + $0xb4] sm:$0xff]  }
 0x5e5   :  { %v6326_v17 = vsel %vm17220_vm15, %v13458_v16, %v6325_v58  ;;  %v6339_v58 = vrot.slane %v6087_v34, 5  ;;  %v6090_v16 = vld [vmem:[#allocation2 + $0xb8] sm:$0xf]  ;;  %v15225_v34 = vld [vmem:[#allocation2 + $0xc0] sm:$0xff]  }
 0x5e6   :  { %v6346_v26 = vrot.slane %v6090_v16, 5 }
 0x5e7   :  { %v6341_v28 = vrot.slane %v6339_v58, 4 }
 0x5e9   :  { %11994 = vmatmul.mubr.bf16.gmra.mrb[104].mxu1 %v13488_v9 }
 0x5ea   :  { %12001 = vmatprep.mubr.bf16.mxu1 %v15219_v12  ;;  %v13490_v12 = vcombine.low %v6326_v17, %v6329_v55  ;;  %v6342_v55 = vrot.slane %v6088_v57, 5  ;;  %v13460_v17 = vrot.slane %v6086_v33, 9  ;;  %v6092_v57 = vld [vmem:[#allocation2 + $0xd8] sm:$0xe] }
 0x5f1   :  { %12002 = vmatmul.mubr.bf16.gmra.mrb[108].mxu1 %v13489_v21  ;;  %v6336_v21 = vsel %vm17220_vm15, %v6334_v25, %v6335_v23  ;;  %v6348_v23 = vrot.slane %v6346_v26, 4 }
 0x5f2   :  { %12009 = vmatprep.mubr.bf16.mxu1 %v15221_v0  ;;  %v18199_v45 = vpop.f32.mrb[164].mxu0  ;;  %v13491_v0 = vcombine.low %v6333_v40, %v6336_v21  ;;  %v6353_v21 = vrot.slane %v6093_v63, 5  ;;  %v15227_v63 = vld [vmem:[#allocation2 + $0xe4] sm:$0xff]  }
 0x5f3   :  { %19662 = vst [vmem:[#allocation17_spill] sm:$0xff] %v18199_v45  ;;  %v18203_v38 = vpop.f32.mrb[165].mxu0  ;;  %v6350_v33 = vsel %vm17220_vm15, %v6348_v23, %v6349_v53  ;;  %v15249_v45 = vld [vmem:[#allocation2 + $0x198] sm:$0xff]  }
 0x5f4   :  { %19663 = vst [vmem:[#allocation19_spill] sm:$0xff] %v18203_v38  ;;  %v18205_v9 = vpop.f32.mrb[166].mxu0  ;;  %v6137_v38 = vld [vmem:[#allocation2 + $0x18c] sm:$0xe] }
 0x5f5   :  { %19664 = vst [vmem:[#allocation27_spill] sm:$0xff] %v18205_v9  ;;  %v18209_v29 = vpop.f32.mrb[167].mxu0  ;;  %v7935_v9 = vld [vmem:[#allocation2 + $0xc] sm:$0xe]  ;;  %v13477_v5 = vrot.slane %v6137_v38, 9 }
 0x5f6   :  { %19665 = vst [vmem:[#allocation29_spill] sm:$0xff] %v18209_v29 }
 0x5f9   :  { %12010 = vmatmul.mubr.bf16.gmra.mrb[112].mxu1 %v13490_v12  ;;  %v6343_v12 = vsel %vm17220_vm15, %v6341_v28, %v6342_v55 }
 0x5fa   :  { %12017 = vmatprep.mubr.bf16.mxu1 %v15222_v8  ;;  %v6340_v8 = vsel %vm17220_vm15, %v13460_v17, %v6339_v58  ;;  %v13461_v58 = vrot.slane %v6089_v48, 9 }
 0x5fb   :  { %v13492_v25 = vcombine.low %v6340_v8, %v6343_v12  ;;  %v13462_v12 = vrot.slane %v6092_v57, 9  ;;  %v6355_v8 = vrot.slane %v6353_v21, 4  ;;  %v6099_v57 = vld [vmem:[#allocation2 + $0xf4] sm:$0xf] }
 0x5fc   :  { %v6347_v17 = vsel %vm17220_vm15, %v13461_v58, %v6346_v26  ;;  %v6095_v26 = vld [vmem:[#allocation2 + $0xe4] sm:$0xe] }
 0x5fd   :  { %v13493_v10 = vcombine.low %v6347_v17, %v6350_v33  ;;  %v6354_v23 = vsel %vm17220_vm15, %v13462_v12, %v6353_v21  ;;  %v13463_v58 = vrot.slane %v6095_v26, 9  ;;  %v6367_v17 = vrot.slane %v6099_v57, 5 }
 0x601   :  { %12018 = vmatmul.mubr.bf16.gmra.mrb[116].mxu1 %v13491_v0  ;;  %v15250_v0 = vld [vmem:[%s19404_s3 + $0x178] sm:$0xff]  }
 0x602   :  { %12025 = vmatprep.mubr.bf16.mxu1 %v15224_v35  ;;  %v6094_v35 = vld [vmem:[#allocation2 + $0xe0] sm:$0x1]  ;;  %12201 = vmatpush1.bf16.msra.mxu1 %v15250_v0 }
 0x603   :  { %12459 = vmatprep.subr.bf16.mxu1 %v19559_v11 }
 0x609   :  { %12026 = vmatmul.mubr.bf16.gmra.mrb[120].mxu1 %v13492_v25  ;;  %v18223_v40 = vpop.f32.mrb[168].mxu0  ;;  %v6356_v25 = vrot.slane %v6094_v35, 5 }
 0x60a   :  { %12033 = vmatprep.mubr.bf16.mxu1 %v15225_v34  ;;  %19666 = vst [vmem:[#allocation32_spill] sm:$0xff] %v18223_v40  ;;  %v18228_v28 = vpop.f32.mrb[169].mxu0  ;;  %v6096_v34 = vld [vmem:[#allocation2 + $0xe8] sm:$0xf]  ;;  %v15228_v40 = vld [vmem:[#allocation2 + $0xf0] sm:$0xff]  }
 0x60b   :  { %19667 = vst [vmem:[#allocation33_spill] sm:$0xff] %v18228_v28  ;;  %v18232_v16 = vpop.f32.mrb[170].mxu0  ;;  %v6357_v48 = vsel %vm17220_vm15, %v6355_v8, %v6356_v25  ;;  %v6360_v53 = vrot.slane %v6096_v34, 5  ;;  %v6100_v8 = vld [vmem:[#allocation2 + $0xf8] sm:$0x1]  ;;  %v15230_v25 = vld [vmem:[#allocation2 + $0xfc] sm:$0xff]  }
 0x60c   :  { %19668 = vst [vmem:[#allocation35_spill] sm:$0xff] %v18232_v16  ;;  %v18234_v55 = vpop.f32.mrb[171].mxu0  ;;  %v13494_v0 = vcombine.low %v6354_v23, %v6357_v48  ;;  %v6097_v16 = vld [vmem:[#allocation2 + $0xec] sm:$0x1]  ;;  %v6098_v34 = vld [vmem:[#allocation2 + $0xf0] sm:$0xe] }
 0x60d   :  { %19669 = vst [vmem:[#allocation39_spill] sm:$0xff] %v18234_v55  ;;  %v6362_v55 = vrot.slane %v6360_v53, 4  ;;  %v6363_v35 = vrot.slane %v6097_v16, 5  ;;  %v6361_v21 = vsel %vm17220_vm15, %v13463_v58, %v6360_v53  ;;  %v6370_v16 = vrot.slane %v6100_v8, 5  ;;  %v6103_v58 = vld [vmem:[#allocation2 + $0x104] sm:$0x1] }
 0x60e   :  { %v6377_v8 = vrot.slane %v6103_v58, 5 }
 0x60f   :  { %v6364_v33 = vsel %vm17220_vm15, %v6362_v55, %v6363_v35 }
 0x610   :  { %v13495_v12 = vcombine.low %v6361_v21, %v6364_v33  ;;  %v15231_v33 = vld [vmem:[#allocation2 + $0x108] sm:$0xff]  }
 0x611   :  { %12034 = vmatmul.mubr.bf16.gmra.mrb[124].mxu1 %v13493_v10  ;;  %v6369_v10 = vrot.slane %v6367_v17, 4 }
 0x612   :  { %12041 = vmatprep.mubr.bf16.mxu1 %v15227_v63 }
 0x613   :  { %v6371_v53 = vsel %vm17220_vm15, %v6369_v10, %v6370_v16  ;;  %v6106_v16 = vld [vmem:[#allocation2 + $0x110] sm:$0x1] }
 0x619   :  { %12042 = vmatmul.mubr.bf16.gmra.mrb[128].mxu1 %v13494_v0  ;;  %v13464_v0 = vrot.slane %v6098_v34, 9 }
 0x61a   :  { %12049 = vmatprep.mubr.bf16.mxu1 %v15228_v40  ;;  %v6102_v40 = vld [vmem:[#allocation2 + $0x100] sm:$0xf] }
 0x61b   :  { %v6374_v26 = vrot.slane %v6102_v40, 5  ;;  %v6368_v57 = vsel %vm17220_vm15, %v13464_v0, %v6367_v17  ;;  %v15233_v17 = vld [vmem:[#allocation2 + $0x114] sm:$0xff]  }
 0x61c   :  { %v13496_v35 = vcombine.low %v6368_v57, %v6371_v53  ;;  %v6104_v53 = vld [vmem:[#allocation2 + $0x108] sm:$0xe]  ;;  %v6108_v57 = vld [vmem:[#allocation2 + $0x118] sm:$0xf] }
 0x61d   :  { %v6376_v21 = vrot.slane %v6374_v26, 4 }
 0x61f   :  { %v6378_v34 = vsel %vm17220_vm15, %v6376_v21, %v6377_v8  ;;  %v15234_v8 = vld [vmem:[#allocation2 + $0x120] sm:$0xff]  }
 0x620   :  { %v18247_v63 = vpop.f32.mrb[172].mxu0 }
 0x621   :  { %19670 = vst [vmem:[#allocation41_spill] sm:$0xff] %v18247_v63  ;;  %12050 = vmatmul.mubr.bf16.gmra.mrb[132].mxu1 %v13495_v12  ;;  %v18249_v23 = vpop.f32.mrb[173].mxu0  ;;  %v6101_v12 = vld [vmem:[#allocation2 + $0xfc] sm:$0xe] }
 0x622   :  { %19671 = vst [vmem:[#allocation44_spill] sm:$0xff] %v18249_v23  ;;  %12057 = vmatprep.mubr.bf16.mxu1 %v15230_v25  ;;  %v18251_v48 = vpop.f32.mrb[174].mxu0  ;;  %v6105_v25 = vld [vmem:[#allocation2 + $0x10c] sm:$0xf] }
 0x623   :  { %19672 = vst [vmem:[#allocation48_spill] sm:$0xff] %v18251_v48  ;;  %v18253_v55 = vpop.f32.mrb[175].mxu0  ;;  %v13465_v48 = vrot.slane %v6101_v12, 9  ;;  %v6381_v63 = vrot.slane %v6105_v25, 5  ;;  %v6109_v25 = vld [vmem:[#allocation2 + $0x11c] sm:$0x1] }
 0x624   :  { %19673 = vst [vmem:[#allocation50_spill] sm:$0xff] %v18253_v55  ;;  %v13466_v55 = vrot.slane %v6104_v53, 9 }
 0x625   :  { %v6375_v10 = vsel %vm17220_vm15, %v13465_v48, %v6374_v26  ;;  %v6383_v0 = vrot.slane %v6381_v63, 4 }
 0x626   :  { %v13497_v40 = vcombine.low %v6375_v10, %v6378_v34  ;;  %v6382_v21 = vsel %vm17220_vm15, %v13466_v55, %v6381_v63 }
 0x629   :  { %12058 = vmatmul.mubr.bf16.gmra.mrb[136].mxu1 %v13496_v35  ;;  %v6384_v35 = vrot.slane %v6106_v16, 5  ;;  %v6107_v16 = vld [vmem:[#allocation2 + $0x114] sm:$0xe] }
 0x62a   :  { %12065 = vmatprep.mubr.bf16.mxu1 %v15231_v33  ;;  %v6388_v33 = vrot.slane %v6108_v57, 5  ;;  %v13467_v57 = vrot.slane %v6107_v16, 9  ;;  %v6115_v16 = vld [vmem:[#allocation2 + $0x134] sm:$0x1] }
 0x62b   :  { %v6385_v58 = vsel %vm17220_vm15, %v6383_v0, %v6384_v35  ;;  %v6391_v0 = vrot.slane %v6109_v25, 5 }
 0x62c   :  { %v13498_v48 = vcombine.low %v6382_v21, %v6385_v58  ;;  %v6390_v34 = vrot.slane %v6388_v33, 4  ;;  %v6389_v55 = vsel %vm17220_vm15, %v13467_v57, %v6388_v33  ;;  %v15236_v58 = vld [vmem:[#allocation2 + $0x12c] sm:$0xff]   ;;  %v6110_v21 = vld [vmem:[#allocation2 + $0x120] sm:$0xe]  ;;  %v15237_v33 = vld [vmem:[#allocation2 + $0x138] sm:$0xff]  }
 0x62d   :  { %v6113_v57 = vld [vmem:[#allocation2 + $0x12c] sm:$0xe] }
 0x62e   :  { %v6392_v63 = vsel %vm17220_vm15, %v6390_v34, %v6391_v0 }
 0x62f   :  { %v13499_v35 = vcombine.low %v6389_v55, %v6392_v63  ;;  %v6117_v63 = vld [vmem:[#allocation2 + $0x13c] sm:$0xf]  ;;  %v6405_v55 = vrot.slane %v6115_v16, 5  ;;  %v6116_v16 = vld [vmem:[#allocation2 + $0x138] sm:$0xe] }
 0x631   :  { %12066 = vmatmul.mubr.bf16.gmra.mrb[140].mxu1 %v13497_v40  ;;  %v6111_v40 = vld [vmem:[#allocation2 + $0x124] sm:$0xf] }
 0x632   :  { %12073 = vmatprep.mubr.bf16.mxu1 %v15233_v17  ;;  %v6395_v53 = vrot.slane %v6111_v40, 5 }
 0x636   :  { %v18267_v12 = vpop.f32.mrb[176].mxu0 }
 0x637   :  { %19674 = vst [vmem:[#allocation53_spill] sm:$0xff] %v18267_v12  ;;  %v18269_v26 = vpop.f32.mrb[177].mxu0  ;;  %v6112_v12 = vld [vmem:[#allocation2 + $0x128] sm:$0x1] }
 0x638   :  { %19675 = vst [vmem:[#allocation57_spill] sm:$0xff] %v18269_v26  ;;  %v18271_v10 = vpop.f32.mrb[178].mxu0  ;;  %v6114_v26 = vld [vmem:[#allocation2 + $0x130] sm:$0xf] }
 0x639   :  { %19676 = vst [vmem:[#allocation59_spill] sm:$0xff] %v18271_v10  ;;  %12074 = vmatmul.mubr.bf16.gmra.mrb[144].mxu1 %v13498_v48  ;;  %v18273_v17 = vpop.f32.mrb[179].mxu0  ;;  %v6397_v10 = vrot.slane %v6395_v53, 4  ;;  %v6398_v48 = vrot.slane %v6112_v12, 5 }
 0x63a   :  { %19677 = vst [vmem:[#allocation14_spill] sm:$0xff] %v18273_v17  ;;  %12081 = vmatprep.mubr.bf16.mxu1 %v15234_v8  ;;  %v13468_v17 = vrot.slane %v6110_v21, 9  ;;  %v6402_v8 = vrot.slane %v6114_v26, 5 }
 0x63b   :  { %v6399_v25 = vsel %vm17220_vm15, %v6397_v10, %v6398_v48  ;;  %v6409_v10 = vrot.slane %v6117_v63, 5 }
 0x63c   :  { %v6396_v34 = vsel %vm17220_vm15, %v13468_v17, %v6395_v53  ;;  %v6404_v0 = vrot.slane %v6402_v8, 4 }
 0x63d   :  { %v13500_v40 = vcombine.low %v6396_v34, %v6399_v25  ;;  %v6118_v25 = vld [vmem:[#allocation2 + $0x140] sm:$0x1]  ;;  %v15239_v34 = vld [vmem:[#allocation2 + $0x144] sm:$0xff]  }
 0x63e   :  { %v6406_v26 = vsel %vm17220_vm15, %v6404_v0, %v6405_v55 }
 0x641   :  { %12082 = vmatmul.mubr.bf16.gmra.mrb[148].mxu1 %v13499_v35 }
 0x642   :  { %12089 = vmatprep.mubr.bf16.mxu1 %v15236_v58  ;;  %v13469_v58 = vrot.slane %v6113_v57, 9  ;;  %v6412_v57 = vrot.slane %v6118_v25, 5 }
 0x644   :  { %v6403_v17 = vsel %vm17220_vm15, %v13469_v58, %v6402_v8  ;;  %v6121_v58 = vld [vmem:[#allocation2 + $0x14c] sm:$0x1] }
 0x645   :  { %v13501_v48 = vcombine.low %v6403_v17, %v6406_v26  ;;  %v6119_v17 = vld [vmem:[#allocation2 + $0x144] sm:$0xe] }
 0x649   :  { %12090 = vmatmul.mubr.bf16.gmra.mrb[152].mxu1 %v13500_v40  ;;  %v6411_v40 = vrot.slane %v6409_v10, 4 }
 0x64a   :  { %12097 = vmatprep.mubr.bf16.mxu1 %v15237_v33  ;;  %v6120_v33 = vld [vmem:[#allocation2 + $0x148] sm:$0xf] }
 0x64b   :  { %v18283_v35 = vpop.f32.mrb[180].mxu0  ;;  %v6413_v0 = vsel %vm17220_vm15, %v6411_v40, %v6412_v57  ;;  %v6416_v63 = vrot.slane %v6120_v33, 5  ;;  %v6124_v33 = vld [vmem:[#allocation2 + $0x158] sm:$0x1]  ;;  %v6122_v57 = vld [vmem:[#allocation2 + $0x150] sm:$0xe] }
 0x64c   :  { %19678 = vst [vmem:[#allocation21_spill] sm:$0xff] %v18283_v35  ;;  %v18285_v12 = vpop.f32.mrb[181].mxu0  ;;  %v13470_v35 = vrot.slane %v6116_v16, 9 }
 0x64d   :  { %19679 = vst [vmem:[#allocation16_spill] sm:$0xff] %v18285_v12  ;;  %v18289_v21 = vpop.f32.mrb[182].mxu0  ;;  %v6418_v26 = vrot.slane %v6416_v63, 4  ;;  %v13471_v12 = vrot.slane %v6119_v17, 9  ;;  %v6127_v17 = vld [vmem:[#allocation2 + $0x164] sm:$0x1] }
 0x64e   :  { %19680 = vst [vmem:[#allocation23_spill] sm:$0xff] %v18289_v21  ;;  %v18293_v53 = vpop.f32.mrb[183].mxu0  ;;  %v6410_v55 = vsel %vm17220_vm15, %v13470_v35, %v6409_v10  ;;  %v15240_v21 = vld [vmem:[#allocation2 + $0x150] sm:$0xff]   ;;  %v15242_v35 = vld [vmem:[#allocation2 + $0x15c] sm:$0xff]  }
 0x64f   :  { %19681 = vst [vmem:[#allocation18_spill] sm:$0xff] %v18293_v53  ;;  %v13502_v8 = vcombine.low %v6410_v55, %v6413_v0  ;;  %v6123_v53 = vld [vmem:[#allocation2 + $0x154] sm:$0xf]  ;;  %v6417_v40 = vsel %vm17220_vm15, %v13471_v12, %v6416_v63  ;;  %v6126_v0 = vld [vmem:[#allocation2 + $0x160] sm:$0xf]  ;;  %v6426_v55 = vrot.slane %v6124_v33, 5 }
 0x650   :  { %v15243_v12 = vld [vmem:[#allocation2 + $0x168] sm:$0xff]  }
 0x651   :  { %12098 = vmatmul.mubr.bf16.gmra.mrb[156].mxu1 %v13501_v48  ;;  %v6419_v48 = vrot.slane %v6121_v58, 5  ;;  %v6430_v58 = vrot.slane %v6126_v0, 5  ;;  %v6130_v0 = vld [vmem:[#allocation2 + $0x170] sm:$0x1] }
 0x652   :  { %12105 = vmatprep.mubr.bf16.mxu1 %v15239_v34  ;;  %v6423_v34 = vrot.slane %v6123_v53, 5 }
 0x653   :  { %v6420_v25 = vsel %vm17220_vm15, %v6418_v26, %v6419_v48  ;;  %v6432_v63 = vrot.slane %v6430_v58, 4  ;;  %v6125_v48 = vld [vmem:[#allocation2 + $0x15c] sm:$0xe] }
 0x654   :  { %v13503_v16 = vcombine.low %v6417_v40, %v6420_v25  ;;  %v6425_v10 = vrot.slane %v6423_v34, 4  ;;  %v6129_v25 = vld [vmem:[#allocation2 + $0x16c] sm:$0xf]  ;;  %v6433_v40 = vrot.slane %v6127_v17, 5 }
 0x656   :  { %v6434_v33 = vsel %vm17220_vm15, %v6432_v63, %v6433_v40 }
 0x659   :  { %12106 = vmatmul.mubr.bf16.gmra.mrb[160].mxu1 %v13502_v8  ;;  %v13472_v8 = vrot.slane %v6122_v57, 9 }
 0x65a   :  { %12113 = vmatprep.mubr.bf16.mxu1 %v15240_v21  ;;  %v6427_v21 = vsel %vm17220_vm15, %v6425_v10, %v6426_v55 }
 0x65b   :  { %v6424_v53 = vsel %vm17220_vm15, %v13472_v8, %v6423_v34  ;;  %v15245_v34 = vld [vmem:[#allocation2 + $0x174] sm:$0xff]   ;;  %v6128_v8 = vld [vmem:[#allocation2 + $0x168] sm:$0xe] }
 0x65c   :  { %v13504_v26 = vcombine.low %v6424_v53, %v6427_v21  ;;  %v6132_v21 = vld [vmem:[#allocation2 + $0x178] sm:$0xf]  ;;  %v6440_v53 = vrot.slane %v6130_v0, 5 }
 0x661   :  { %12114 = vmatmul.mubr.bf16.gmra.mrb[164].mxu1 %v13503_v16  ;;  %v13473_v16 = vrot.slane %v6125_v48, 9 }
 0x662   :  { %12121 = vmatprep.mubr.bf16.mxu1 %v15242_v35  ;;  %v6437_v35 = vrot.slane %v6129_v25, 5  ;;  %v6133_v25 = vld [vmem:[#allocation2 + $0x17c] sm:$0x1] }
 0x663   :  { %v6431_v10 = vsel %vm17220_vm15, %v13473_v16, %v6430_v58  ;;  %v15246_v58 = vld [vmem:[#allocation2 + $0x180] sm:$0xff]   ;;  %v6131_v16 = vld [vmem:[#allocation2 + $0x174] sm:$0xe] }
 0x664   :  { %v13505_v57 = vcombine.low %v6431_v10, %v6434_v33  ;;  %v6439_v55 = vrot.slane %v6437_v35, 4  ;;  %v6135_v33 = vld [vmem:[#allocation2 + $0x184] sm:$0xf]  ;;  %v6447_v10 = vrot.slane %v6133_v25, 5  ;;  %v6911_v25 = vld [vmem:[#allocation2 + $0xc] sm:$0xf] }
 0x666   :  { %v6441_v17 = vsel %vm17220_vm15, %v6439_v55, %v6440_v53 }
 0x669   :  { %12122 = vmatmul.mubr.bf16.gmra.mrb[168].mxu1 %v13504_v26  ;;  %v13474_v26 = vrot.slane %v6128_v8, 9 }
 0x66a   :  { %12129 = vmatprep.mubr.bf16.mxu1 %v15243_v12  ;;  %v6444_v12 = vrot.slane %v6132_v21, 5  ;;  %v6136_v21 = vld [vmem:[#allocation2 + $0x188] sm:$0x1] }
 0x66b   :  { %v6438_v63 = vsel %vm17220_vm15, %v13474_v26, %v6437_v35  ;;  %v15248_v35 = vld [vmem:[#allocation2 + $0x18c] sm:$0xff]  }
 0x66c   :  { %v13506_v48 = vcombine.low %v6438_v63, %v6441_v17  ;;  %v6446_v40 = vrot.slane %v6444_v12, 4  ;;  %v6912_v26 = vld [vmem:[#allocation2 + $0x10] sm:$0xf]  ;;  %v6134_v17 = vld [vmem:[#allocation2 + $0x180] sm:$0xe] }
 0x66d   :  { %v6138_v63 = vld [vmem:[#allocation2 + $0x190] sm:$0xf]  ;;  %v7021_v23 = vshrl.u32 %v6912_v26, 16  ;;  %v13476_v28 = vrot.slane %v6134_v17, 9  ;;  %v7939_v17 = vld [vmem:[#allocation2 + $0x1c] sm:$0xf] }
 0x66e   :  { %v6448_v0 = vsel %vm17220_vm15, %v6446_v40, %v6447_v10  ;;  %v8136_v44 = vrot.slane %v7939_v17, 5 }
 0x671   :  { %12130 = vmatmul.mubr.bf16.gmra.mrb[172].mxu1 %v13505_v57  ;;  %v13475_v57 = vrot.slane %v6131_v16, 9  ;;  %v7017_v16 = vshll.u32 %v6912_v26, 16  ;;  %v7937_v26 = vld [vmem:[#allocation2 + $0x14] sm:$0x1] }
 0x672   :  { %12137 = vmatprep.mubr.bf16.mxu1 %v15245_v34  ;;  %v6451_v34 = vrot.slane %v6135_v33, 5  ;;  %v6458_v33 = vrot.slane %v6138_v63, 5  ;;  %v6915_v63 = vld [vmem:[#allocation2 + $0x1c] sm:$0xf] }
 0x673   :  { %v6445_v55 = vsel %vm17220_vm15, %v13475_v57, %v6444_v12  ;;  %v7008_v57 = vshrl.u32 %v6911_v25, 16  ;;  %v7041_v18 = vshll.u32 %v6915_v63, 16  ;;  %v7045_v27 = vshrl.u32 %v6915_v63, 16 }
 0x674   :  { %v13507_v8 = vcombine.low %v6445_v55, %v6448_v0  ;;  %v6453_v53 = vrot.slane %v6451_v34, 4  ;;  %v6452_v10 = vsel %vm17220_vm15, %v13476_v28, %v6451_v34  ;;  %v7011_v0 = vshll.u32 %v6911_v25, 16  ;;  %v6914_v34 = vld [vmem:[#allocation2 + $0x18] sm:$0xf] }
 0x675   :  { %v6460_v29 = vrot.slane %v6458_v33, 4  ;;  %v13574_v25 = vrot.slane %v7935_v9, 9  ;;  %v7047_v63 = vrot.slane %v7045_v27, 4 }
 0x676   :  { %v7013_v28 = vrot.slane %v7011_v0, 5 }
 0x679   :  { %12138 = vmatmul.mubr.bf16.gmra.mrb[176].mxu1 %v13506_v48  ;;  %v6454_v48 = vrot.slane %v6136_v21, 5  ;;  %v7023_v21 = vrot.slane %v7021_v23, 4 }
 0x67a   :  { %12145 = vmatprep.mubr.bf16.mxu1 %v15246_v58  ;;  %v7936_v58 = vld [vmem:[#allocation2 + $0x10] sm:$0xf] }
 0x67b   :  { %v6455_v40 = vsel %vm17220_vm15, %v6453_v53, %v6454_v48  ;;  %v8129_v12 = vrot.slane %v7936_v58, 5  ;;  %v7010_v58 = vrot.slane %v7008_v57, 4  ;;  %v6459_v57 = vsel %vm17220_vm15, %v13477_v5, %v6458_v33  ;;  %v7938_v33 = vld [vmem:[#allocation2 + $0x18] sm:$0xe] }
 0x67c   :  { %v13508_v55 = vcombine.low %v6452_v10, %v6455_v40  ;;  %v8132_v40 = vrot.slane %v7937_v26, 5  ;;  %v6913_v10 = vld [vmem:[#allocation2 + $0x14] sm:$0x1] }
 0x67d   :  { %v8131_v53 = vrot.slane %v8129_v12, 4  ;;  %v7014_v9 = vor.u32 %v7013_v28, %v7010_v58  ;;  %v7027_v0 = vshll.u32 %v6913_v10, 16  ;;  %v8130_v38 = vsel %vm17220_vm15, %v13574_v25, %v8129_v12  ;;  %v7942_v58 = vld [vmem:[#allocation2 + $0x28] sm:$0xf]  ;;  %v6916_v10 = vld [vmem:[#allocation2 + $0x20] sm:$0x1] }
 0x67f   :  { %v7015_v62 = vrot.slane %v7014_v9, 4  ;;  %v7029_v5 = vrot.slane %v7027_v0, 5  ;;  %v15251_v9 = vld [vmem:[%s19404_s3 + $0x180] sm:$0xff]   ;;  %v7051_v0 = vshll.u32 %v6916_v10, 16  ;;  %v7945_v10 = vld [vmem:[#allocation2 + $0x34] sm:$0xf] }
 0x681   :  { %12146 = vmatmul.mubr.bf16.gmra.mrb[180].mxu1 %v13507_v8  ;;  %v6139_v8 = vld [vmem:[#allocation2 + $0x194] sm:$0x1] }
 0x682   :  { %12153 = vmatprep.mubr.bf16.mxu1 %v15248_v35  ;;  %v18323_v35 = vrot.slane %v7017_v16, 5  ;;  %v6461_v48 = vrot.slane %v6139_v8, 5  ;;  %v7035_v8 = vshll.u32 %v6914_v34, 16 }
 0x684   :  { %v7024_v16 = vor.u32 %v7023_v21, %v18323_v35  ;;  %v6462_v23 = vsel %vm17220_vm15, %v6460_v29, %v6461_v48  ;;  %v7940_v29 = vld [vmem:[#allocation2 + $0x20] sm:$0x1]  ;;  %v18334_v48 = vrot.slane %v7041_v18, 5 }
 0x685   :  { %v13509_v26 = vcombine.low %v6459_v57, %v6462_v23  ;;  %v8139_v28 = vrot.slane %v7940_v29, 5  ;;  %v6917_v23 = vld [vmem:[#allocation2 + $0x24] sm:$0xf]  ;;  %v7020_v57 = vsel %vm17021_vm4, %v7015_v62, %v18323_v35 }
 0x686   :  { %v7025_v54 = vrot.slane %v7024_v16, 4  ;;  %v7048_v18 = vor.u32 %v7047_v63, %v18334_v48  ;;  %v13575_v16 = vrot.slane %v7938_v33, 9  ;;  %v7941_v62 = vld [vmem:[#allocation2 + $0x24] sm:$0xe]  ;;  %v7053_v33 = vrot.slane %v7051_v0, 5 }
 0x687   :  { %v8150_v0 = vrot.slane %v7945_v10, 5  ;;  %v6924_v10 = vld [vmem:[#allocation2 + $0x40] sm:$0xf] }
 0x688   :  { %v7030_v12 = vsel %vm17021_vm4, %v7025_v54, %v7029_v5  ;;  %v7056_v54 = vshrl.u32 %v6917_v23, 16  ;;  %v7049_v63 = vrot.slane %v7048_v18, 4  ;;  %v6921_v5 = vld [vmem:[#allocation2 + $0x34] sm:$0xf]  ;;  %v6920_v18 = vld [vmem:[#allocation2 + $0x30] sm:$0xf] }
 0x689   :  { %12154 = vmatmul.mubr.bf16.gmra.mrb[184].mxu1 %v13508_v55  ;;  %v8133_v55 = vsel %vm17220_vm15, %v8131_v53, %v8132_v40  ;;  %v8138_v53 = vrot.slane %v8136_v44, 4  ;;  %v7037_v40 = vrot.slane %v7035_v8, 5  ;;  %v8143_v8 = vrot.slane %v7942_v58, 5 }
 0x68a   :  { %12161 = vmatprep.mubr.bf16.mxu1 %v15249_v45  ;;  %v7032_v45 = vshrl.u32 %v6914_v34, 16  ;;  %v13606_v21 = vcombine.low %v8130_v38, %v8133_v55  ;;  %v6918_v34 = vld [vmem:[#allocation2 + $0x28] sm:$0xf]  ;;  %v13542_v38 = vcombine.low %v7020_v57, %v7030_v12  ;;  %v7058_v58 = vrot.slane %v7056_v54, 4  ;;  %v6919_v12 = vld [vmem:[#allocation2 + $0x2c] sm:$0x1] }
 0x68b   :  { %v7065_v25 = vshll.u32 %v6918_v34, 16  ;;  %v7069_v27 = vshrl.u32 %v6918_v34, 16  ;;  %v8140_v55 = vsel %vm17220_vm15, %v8138_v53, %v8139_v28  ;;  %v7943_v53 = vld [vmem:[#allocation2 + $0x2c] sm:$0x1]  ;;  %v8145_v35 = vrot.slane %v8143_v8, 4 }
 0x68c   :  { %v7034_v17 = vrot.slane %v7032_v45, 4  ;;  %v13576_v57 = vrot.slane %v7941_v62, 9 }
 0x68e   :  { %v7038_v45 = vor.u32 %v7037_v40, %v7034_v17  ;;  %v18349_v17 = vrot.slane %v7065_v25, 5  ;;  %v7071_v40 = vrot.slane %v7069_v27, 4  ;;  %v7054_v25 = vsel %vm17021_vm4, %v7049_v63, %v7053_v33  ;;  %v18371_v33 = vld [vmem:[#allocation2 + $0x40] sm:$0xf] }
 0x690   :  { %v7039_v34 = vrot.slane %v7038_v45, 4  ;;  %v7072_v27 = vor.u32 %v7071_v40, %v18349_v17  ;;  %v7944_v40 = vld [vmem:[#allocation2 + $0x30] sm:$0xe] }
 0x691   :  { %12162 = vmatmul.mubr.bf16.gmra.mrb[188].mxu1 %v13509_v26  ;;  %v7059_v26 = vshll.u32 %v6917_v23, 16  ;;  %v8146_v23 = vrot.slane %v7943_v53, 5  ;;  %v8144_v53 = vsel %vm17220_vm15, %v13576_v57, %v8143_v8  ;;  %v7113_v57 = vshll.u32 %v6924_v10, 16 }
 0x692   :  { %12202 = vmatprep.mubr.bf16.mxu1 %v13606_v21  ;;  %v8137_v21 = vsel %vm17220_vm15, %v13575_v16, %v8136_v44  ;;  %v15252_v44 = vld [vmem:[%s19404_s3 + $0x188] sm:$0xff]   ;;  %v7089_v16 = vshll.u32 %v6921_v5, 16  ;;  %v7044_v45 = vsel %vm17021_vm4, %v7039_v34, %v18334_v48  ;;  %v7946_v48 = vld [vmem:[#allocation2 + $0x38] sm:$0x1]  ;;  %v7073_v62 = vrot.slane %v7072_v27, 4 }
 0x693   :  { %v13607_v29 = vcombine.low %v8137_v21, %v8140_v55  ;;  %v7061_v28 = vrot.slane %v7059_v26, 5  ;;  %v7093_v55 = vshrl.u32 %v6921_v5, 16  ;;  %v7075_v26 = vshll.u32 %v6919_v12, 16 }
 0x694   :  { %v7083_v21 = vshll.u32 %v6920_v18, 16  ;;  %v13543_v63 = vcombine.low %v7044_v45, %v7054_v25  ;;  %v13577_v25 = vrot.slane %v7944_v40, 9  ;;  %v8153_v27 = vrot.slane %v7946_v48, 5  ;;  %v15255_v40 = vld [vmem:[%s19404_s3 + $0x1a0] sm:$0xff]  }
 0x695   :  { %v7062_v54 = vor.u32 %v7061_v28, %v7058_v58  ;;  %v7095_v5 = vrot.slane %v7093_v55, 4  ;;  %v8152_v58 = vrot.slane %v8150_v0, 4  ;;  %v6923_v28 = vld [vmem:[#allocation2 + $0x3c] sm:$0xf] }
 0x696   :  { %v7085_v8 = vrot.slane %v7083_v21, 5  ;;  %v7107_v21 = vshll.u32 %v6923_v28, 16 }
 0x699   :  { %12203 = vmatmul.mubr.bf16.vlgmr.msra.gmra.mrb[64].mxu1 %v13542_v38  ;;  %v7080_v38 = vshrl.u32 %v6920_v18, 16  ;;  %v15254_v18 = vld [vmem:[%s19404_s3 + $0x198] sm:$0xff]  }
 0x69a   :  { %12210 = vmatprep.mubr.bf16.mxu1 %v13607_v29  ;;  %12460 = vmatpush1.bf16.msra.mxu1 %v15251_v9  ;;  %v8147_v9 = vsel %vm17220_vm15, %v8145_v35, %v8146_v23  ;;  %v15253_v29 = vld [vmem:[%s19404_s3 + $0x190] sm:$0xff]   ;;  %v18369_v35 = vrot.slane %v7089_v16, 5  ;;  %v7077_v23 = vrot.slane %v7075_v26, 5  ;;  %v6922_v16 = vld [vmem:[#allocation2 + $0x38] sm:$0x1]  ;;  %v8157_v26 = vrot.slane %v18371_v33, 5 }
 0x69b   :  { %12461 = vmatprep.subr.bf16.mxu1 %v19559_v11  ;;  %v13608_v34 = vcombine.low %v8144_v53, %v8147_v9  ;;  %v7082_v12 = vrot.slane %v7080_v38, 4  ;;  %v7117_v9 = vshrl.u32 %v6924_v10, 16  ;;  %v7104_v38 = vshrl.u32 %v6923_v28, 16  ;;  %v7947_v33 = vld [vmem:[#allocation2 + $0x3c] sm:$0xe] }
 0x69c   :  { %v7078_v55 = vsel %vm17021_vm4, %v7073_v62, %v7077_v23  ;;  %v7096_v45 = vor.u32 %v7095_v5, %v18369_v35  ;;  %v7099_v53 = vshll.u32 %v6922_v16, 16  ;;  %v18392_v28 = vrot.slane %v7113_v57, 5  ;;  %v6925_v16 = vld [vmem:[#allocation2 + $0x44] sm:$0x1] }
 0x69d   :  { %v8159_v10 = vrot.slane %v8157_v26, 4  ;;  %v7109_v23 = vrot.slane %v7107_v21, 5 }
 0x69e   :  { %12462 = vmatpush1.bf16.msra.mxu1 %v15252_v44  ;;  %v7063_v44 = vrot.slane %v7062_v54, 4  ;;  %v8154_v54 = vsel %vm17220_vm15, %v8152_v58, %v8153_v27  ;;  %v7097_v5 = vrot.slane %v7096_v45, 4  ;;  %v7949_v58 = vld [vmem:[#allocation2 + $0x44] sm:$0x1]  ;;  %v7951_v27 = vld [vmem:[#allocation2 + $0x4c] sm:$0xf] }
 0x69f   :  { %12463 = vmatprep.subr.bf16.mxu1 %v19559_v11 }
 0x6a1   :  { %12211 = vmatmul.mubr.bf16.gmra.mrb[68].mxu1 %v13543_v63  ;;  %v7086_v63 = vor.u32 %v7085_v8, %v7082_v12  ;;  %v6927_v12 = vld [vmem:[#allocation2 + $0x4c] sm:$0xf] }
 0x6a2   :  { %12218 = vmatprep.mubr.bf16.mxu1 %v13608_v34  ;;  %12464 = vmatpush1.bf16.msra.mxu1 %v15253_v29  ;;  %v7068_v29 = vsel %vm17021_vm4, %v7063_v44, %v18349_v17  ;;  %v8151_v34 = vsel %vm17220_vm15, %v13577_v25, %v8150_v0  ;;  %v7119_v17 = vrot.slane %v7117_v9, 4  ;;  %v7106_v44 = vrot.slane %v7104_v38, 4  ;;  %v15256_v0 = vld [vmem:[%s19404_s3 + $0x1a8] sm:$0xff]  }
 0x6a3   :  { %12465 = vmatprep.subr.bf16.mxu1 %v19559_v11  ;;  %v13544_v48 = vcombine.low %v7068_v29, %v7078_v55  ;;  %v13609_v62 = vcombine.low %v8151_v34, %v8154_v54  ;;  %v7087_v8 = vrot.slane %v7086_v63, 4  ;;  %v8160_v25 = vrot.slane %v7949_v58, 5  ;;  %v6926_v55 = vld [vmem:[#allocation2 + $0x48] sm:$0xf] }
 0x6a4   :  { %v7120_v57 = vor.u32 %v7119_v17, %v18392_v28  ;;  %v7137_v9 = vshll.u32 %v6927_v12, 16  ;;  %v7141_v54 = vshrl.u32 %v6927_v12, 16  ;;  %v13578_v38 = vrot.slane %v7947_v33, 9  ;;  %v7950_v12 = vld [vmem:[#allocation2 + $0x48] sm:$0xe] }
 0x6a5   :  { %v8161_v21 = vsel %vm17220_vm15, %v8159_v10, %v8160_v25  ;;  %v7110_v29 = vor.u32 %v7109_v23, %v7106_v44  ;;  %v8164_v63 = vrot.slane %v7951_v27, 5  ;;  %v7131_v34 = vshll.u32 %v6926_v55, 16  ;;  %v7952_v10 = vld [vmem:[#allocation2 + $0x50] sm:$0x1] }
 0x6a6   :  { %12466 = vmatpush1.bf16.msra.mxu1 %v15254_v18  ;;  %v7101_v18 = vrot.slane %v7099_v53, 5  ;;  %v7092_v53 = vsel %vm17021_vm4, %v7087_v8, %v18369_v35  ;;  %v8158_v33 = vsel %vm17220_vm15, %v13578_v38, %v8157_v26  ;;  %v7121_v17 = vrot.slane %v7120_v57, 4  ;;  %v15258_v26 = vld [vmem:[%s19404_s3 + $0x1b8] sm:$0xff]   ;;  %v6929_v57 = vld [vmem:[#allocation2 + $0x54] sm:$0xf] }
 0x6a7   :  { %12467 = vmatprep.subr.bf16.mxu1 %v19559_v11  ;;  %v13610_v58 = vcombine.low %v8158_v33, %v8161_v21  ;;  %v18412_v44 = vrot.slane %v7137_v9, 5  ;;  %v7143_v35 = vrot.slane %v7141_v54, 4  ;;  %v7111_v23 = vrot.slane %v7110_v29, 4 }
 0x6a8   :  { %v7102_v45 = vsel %vm17021_vm4, %v7097_v5, %v7101_v18  ;;  %v8166_v8 = vrot.slane %v8164_v63, 4  ;;  %v6930_v18 = vld [vmem:[#allocation2 + $0x58] sm:$0xf]  ;;  %v7133_v25 = vrot.slane %v7131_v34, 5  ;;  %v7155_v33 = vshll.u32 %v6929_v57, 16 }
 0x6a9   :  { %12219 = vmatmul.mubr.bf16.gmra.mrb[72].mxu1 %v13544_v48  ;;  %v7128_v48 = vshrl.u32 %v6926_v55, 16  ;;  %v13545_v5 = vcombine.low %v7092_v53, %v7102_v45  ;;  %v8167_v55 = vrot.slane %v7952_v10, 5  ;;  %v6928_v45 = vld [vmem:[#allocation2 + $0x50] sm:$0x1]  ;;  %v7144_v54 = vor.u32 %v7143_v35, %v18412_v44  ;;  %v7953_v35 = vld [vmem:[#allocation2 + $0x54] sm:$0xe] }
 0x6aa   :  { %12226 = vmatprep.mubr.bf16.mxu1 %v13609_v62  ;;  %12468 = vmatpush1.bf16.msra.mxu1 %v15255_v40  ;;  %v7123_v40 = vshll.u32 %v6925_v16, 16  ;;  %v15257_v62 = vld [vmem:[%s19404_s3 + $0x1b0] sm:$0xff]   ;;  %v7954_v16 = vld [vmem:[#allocation2 + $0x58] sm:$0xf]  ;;  %v7161_v38 = vshll.u32 %v6930_v18, 16  ;;  %v7165_v21 = vshrl.u32 %v6930_v18, 16  ;;  %v7116_v29 = vsel %vm17021_vm4, %v7111_v23, %v18392_v28 }
 0x6ab   :  { %12469 = vmatprep.subr.bf16.mxu1 %v19559_v11  ;;  %v13579_v53 = vrot.slane %v7950_v12, 9  ;;  %v7955_v28 = vld [vmem:[#allocation2 + $0x5c] sm:$0x1]  ;;  %v7145_v12 = vrot.slane %v7144_v54, 4 }
 0x6ac   :  { %v7125_v27 = vrot.slane %v7123_v40, 5  ;;  %v8168_v40 = vsel %vm17220_vm15, %v8166_v8, %v8167_v55  ;;  %v18432_v8 = vrot.slane %v7161_v38, 5  ;;  %v7167_v18 = vrot.slane %v7165_v21, 4  ;;  %v6931_v38 = vld [vmem:[#allocation2 + $0x5c] sm:$0x1] }
 0x6ad   :  { %v8165_v10 = vsel %vm17220_vm15, %v13579_v53, %v8164_v63  ;;  %v7157_v63 = vrot.slane %v7155_v33, 5  ;;  %v8174_v54 = vrot.slane %v7955_v28, 5 }
 0x6ae   :  { %12470 = vmatpush1.bf16.msra.mxu1 %v15256_v0  ;;  %v7130_v0 = vrot.slane %v7128_v48, 4  ;;  %v7126_v9 = vsel %vm17021_vm4, %v7121_v17, %v7125_v27  ;;  %v8171_v48 = vrot.slane %v7954_v16, 5  ;;  %v13611_v23 = vcombine.low %v8165_v10, %v8168_v40  ;;  %v18434_v27 = vld [vmem:[#allocation2 + $0x64] sm:$0xf] }
 0x6af   :  { %12471 = vmatprep.subr.bf16.mxu1 %v19559_v11  ;;  %v13546_v17 = vcombine.low %v7116_v29, %v7126_v9  ;;  %v6933_v16 = vld [vmem:[#allocation2 + $0x64] sm:$0xf]  ;;  %v13580_v9 = vrot.slane %v7953_v35, 9  ;;  %v7168_v29 = vor.u32 %v7167_v18, %v18432_v8  ;;  %v7171_v10 = vshll.u32 %v6931_v38, 16  ;;  %v15261_v35 = vld [vmem:[%s19404_s3 + $0x1d0] sm:$0xff]  }
 0x6b0   :  { %v7134_v34 = vor.u32 %v7133_v25, %v7130_v0  ;;  %v8173_v0 = vrot.slane %v8171_v48, 4  ;;  %v6932_v25 = vld [vmem:[#allocation2 + $0x60] sm:$0xf]  ;;  %v7185_v53 = vshll.u32 %v6933_v16, 16  ;;  %v7189_v40 = vshrl.u32 %v6933_v16, 16 }
 0x6b1   :  { %12227 = vmatmul.mubr.bf16.gmra.mrb[76].mxu1 %v13545_v5  ;;  %v7152_v5 = vshrl.u32 %v6929_v57, 16  ;;  %v15260_v57 = vld [vmem:[%s19404_s3 + $0x1c8] sm:$0xff]   ;;  %v7179_v33 = vshll.u32 %v6932_v25, 16  ;;  %v7169_v18 = vrot.slane %v7168_v29, 4 }
 0x6b2   :  { %12234 = vmatprep.mubr.bf16.mxu1 %v13610_v58  ;;  %12472 = vmatpush1.bf16.msra.mxu1 %v15257_v62  ;;  %v7147_v62 = vshll.u32 %v6928_v45, 16  ;;  %v15259_v58 = vld [vmem:[%s19404_s3 + $0x1c0] sm:$0xff]   ;;  %v6935_v38 = vld [vmem:[#allocation2 + $0x6c] sm:$0xf] }
 0x6b3   :  { %12473 = vmatprep.subr.bf16.mxu1 %v19559_v11  ;;  %v7154_v45 = vrot.slane %v7152_v5, 4  ;;  %v7176_v5 = vshrl.u32 %v6932_v25, 16  ;;  %v7191_v25 = vrot.slane %v7189_v40, 4 }
 0x6b4   :  { %v7149_v55 = vrot.slane %v7147_v62, 5  ;;  %v8178_v62 = vrot.slane %v18434_v27, 5  ;;  %v7958_v27 = vld [vmem:[#allocation2 + $0x68] sm:$0x1] }
 0x6b5   :  { %v7178_v16 = vrot.slane %v7176_v5, 4 }
 0x6b6   :  { %12474 = vmatpush1.bf16.msra.mxu1 %v15258_v26  ;;  %v7135_v26 = vrot.slane %v7134_v34, 4  ;;  %v7150_v21 = vsel %vm17021_vm4, %v7145_v12, %v7149_v55  ;;  %v8175_v34 = vsel %vm17220_vm15, %v8173_v0, %v8174_v54  ;;  %v18455_v0 = vrot.slane %v7185_v53, 5  ;;  %v6936_v55 = vld [vmem:[#allocation2 + $0x70] sm:$0xf] }
 0x6b7   :  { %12475 = vmatprep.subr.bf16.mxu1 %v19559_v11  ;;  %v7960_v54 = vld [vmem:[#allocation2 + $0x70] sm:$0xf]  ;;  %v7209_v53 = vshll.u32 %v6936_v55, 16  ;;  %v7213_v40 = vshrl.u32 %v6936_v55, 16 }
 0x6b8   :  { %v7192_v29 = vor.u32 %v7191_v25, %v18455_v0  ;;  %v7961_v25 = vld [vmem:[#allocation2 + $0x74] sm:$0x1] }
 0x6b9   :  { %12235 = vmatmul.mubr.bf16.gmra.mrb[80].mxu1 %v13546_v17  ;;  %v7158_v17 = vor.u32 %v7157_v63, %v7154_v45  ;;  %v7173_v63 = vrot.slane %v7171_v10, 5  ;;  %v18468_v55 = vrot.slane %v7209_v53, 5 }
 0x6ba   :  { %12242 = vmatprep.mubr.bf16.mxu1 %v13611_v23  ;;  %12476 = vmatpush1.bf16.msra.mxu1 %v15259_v58  ;;  %v7140_v58 = vsel %vm17021_vm4, %v7135_v26, %v18412_v44  ;;  %v8172_v23 = vsel %vm17220_vm15, %v13580_v9, %v8171_v48  ;;  %v8180_v44 = vrot.slane %v8178_v62, 4  ;;  %v7181_v26 = vrot.slane %v7179_v33, 5  ;;  %v6934_v9 = vld [vmem:[#allocation2 + $0x68] sm:$0x1] }
 0x6bb   :  { %12477 = vmatprep.subr.bf16.mxu1 %v19559_v11  ;;  %v13547_v28 = vcombine.low %v7140_v58, %v7150_v21  ;;  %v13612_v12 = vcombine.low %v8172_v23, %v8175_v34  ;;  %v7159_v45 = vrot.slane %v7158_v17, 4  ;;  %v8181_v48 = vrot.slane %v7958_v27, 5 }
 0x6bc   :  { %v7174_v21 = vsel %vm17021_vm4, %v7169_v18, %v7173_v63  ;;  %v7182_v33 = vor.u32 %v7181_v26, %v7178_v16  ;;  %v8185_v58 = vrot.slane %v7960_v54, 5  ;;  %v7195_v10 = vshll.u32 %v6934_v9, 16  ;;  %v7959_v16 = vld [vmem:[#allocation2 + $0x6c] sm:$0xe] }
 0x6bd   :  { %v8182_v5 = vsel %vm17220_vm15, %v8180_v44, %v8181_v48  ;;  %v7164_v17 = vsel %vm17021_vm4, %v7159_v45, %v18432_v8  ;;  %v7193_v27 = vrot.slane %v7192_v29, 4  ;;  %v7215_v63 = vrot.slane %v7213_v40, 4  ;;  %v7963_v48 = vld [vmem:[#allocation2 + $0x7c] sm:$0xf] }
 0x6be   :  { %12478 = vmatpush1.bf16.msra.mxu1 %v15260_v57  ;;  %v7956_v57 = vld [vmem:[#allocation2 + $0x60] sm:$0xe]  ;;  %v13548_v23 = vcombine.low %v7164_v17, %v7174_v21  ;;  %v7183_v44 = vrot.slane %v7182_v33, 4  ;;  %v8187_v26 = vrot.slane %v8185_v58, 4  ;;  %v7197_v8 = vrot.slane %v7195_v10, 5 }
 0x6bf   :  { %12479 = vmatprep.subr.bf16.mxu1 %v19559_v11  ;;  %v13581_v34 = vrot.slane %v7956_v57, 9  ;;  %v6939_v57 = vld [vmem:[#allocation2 + $0x7c] sm:$0xf]  ;;  %v8188_v9 = vrot.slane %v7961_v25, 5  ;;  %v6938_v21 = vld [vmem:[#allocation2 + $0x78] sm:$0xf]  ;;  %v7216_v53 = vor.u32 %v7215_v63, %v18468_v55 }
 0x6c0   :  { %v7198_v29 = vsel %vm17021_vm4, %v7193_v27, %v7197_v8  ;;  %v7233_v40 = vshll.u32 %v6939_v57, 16  ;;  %v13582_v33 = vrot.slane %v7959_v16, 9  ;;  %v8192_v10 = vrot.slane %v7963_v48, 5  ;;  %v7962_v25 = vld [vmem:[#allocation2 + $0x78] sm:$0xe] }
 0x6c1   :  { %12243 = vmatmul.mubr.bf16.gmra.mrb[84].mxu1 %v13547_v28  ;;  %v7203_v28 = vshll.u32 %v6935_v38, 16  ;;  %v8189_v17 = vsel %vm17220_vm15, %v8187_v26, %v8188_v9  ;;  %v7964_v8 = vld [vmem:[#allocation2 + $0x80] sm:$0x1]  ;;  %v7966_v26 = vld [vmem:[#allocation2 + $0x88] sm:$0xf] }
 0x6c2   :  { %12250 = vmatprep.mubr.bf16.mxu1 %v13612_v12  ;;  %12480 = vmatpush1.bf16.msra.mxu1 %v15261_v35  ;;  %v7200_v35 = vshrl.u32 %v6935_v38, 16  ;;  %v8179_v12 = vsel %vm17220_vm15, %v13581_v34, %v8178_v62  ;;  %v15262_v62 = vld [vmem:[%s19404_s3 + $0x1d8] sm:$0xff]   ;;  %v6937_v38 = vld [vmem:[#allocation2 + $0x74] sm:$0x1]  ;;  %v7237_v34 = vshrl.u32 %v6939_v57, 16  ;;  %v8186_v27 = vsel %vm17220_vm15, %v13582_v33, %v8185_v58 }
 0x6c3   :  { %12481 = vmatprep.subr.bf16.mxu1 %v19559_v11  ;;  %v13613_v18 = vcombine.low %v8179_v12, %v8182_v5  ;;  %v7205_v54 = vrot.slane %v7203_v28, 5  ;;  %v7188_v5 = vsel %vm17021_vm4, %v7183_v44, %v18455_v0  ;;  %v7219_v28 = vshll.u32 %v6937_v38, 16  ;;  %v6942_v48 = vld [vmem:[#allocation2 + $0x88] sm:$0xf]  ;;  %v6941_v38 = vld [vmem:[#allocation2 + $0x84] sm:$0xf] }
 0x6c4   :  { %v7202_v45 = vrot.slane %v7200_v35, 4  ;;  %v7227_v12 = vshll.u32 %v6938_v21, 16  ;;  %v13614_v63 = vcombine.low %v8186_v27, %v8189_v17  ;;  %v7217_v57 = vrot.slane %v7216_v53, 4 }
 0x6c5   :  { %v7235_v0 = vrot.slane %v7233_v40, 5  ;;  %v7239_v44 = vrot.slane %v7237_v34, 4  ;;  %v8194_v16 = vrot.slane %v8192_v10, 4  ;;  %v7257_v33 = vshll.u32 %v6942_v48, 16 }
 0x6c6   :  { %12482 = vmatpush1.bf16.msra.mxu1 %v15262_v62  ;;  %v7206_v35 = vor.u32 %v7205_v54, %v7202_v45  ;;  %v7221_v45 = vrot.slane %v7219_v28, 5  ;;  %v7229_v9 = vrot.slane %v7227_v12, 5  ;;  %v7261_v40 = vshrl.u32 %v6942_v48, 16 }
 0x6c7   :  { %12483 = vmatprep.subr.bf16.mxu1 %v19559_v11  ;;  %v7240_v53 = vor.u32 %v7239_v44, %v7235_v0  ;;  %v8199_v17 = vrot.slane %v7966_v26, 5  ;;  %v7251_v27 = vshll.u32 %v6941_v38, 16  ;;  %v7967_v44 = vld [vmem:[#allocation2 + $0x8c] sm:$0x1]  ;;  %v7259_v48 = vrot.slane %v7257_v33, 5 }
 0x6c8   :  { %v7207_v62 = vrot.slane %v7206_v35, 4  ;;  %v7222_v58 = vsel %vm17021_vm4, %v7217_v57, %v7221_v45  ;;  %v7263_v45 = vrot.slane %v7261_v40, 4 }
 0x6c9   :  { %12251 = vmatmul.mubr.bf16.gmra.mrb[88].mxu1 %v13548_v23  ;;  %v7224_v23 = vshrl.u32 %v6938_v21, 16  ;;  %v13583_v21 = vrot.slane %v7962_v25, 9  ;;  %v7241_v57 = vrot.slane %v7240_v53, 4 }
 0x6ca   :  { %12258 = vmatprep.mubr.bf16.mxu1 %v13613_v18  ;;  %v13549_v18 = vcombine.low %v7188_v5, %v7198_v29  ;;  %v8195_v29 = vrot.slane %v7964_v8, 5  ;;  %v6940_v5 = vld [vmem:[#allocation2 + $0x80] sm:$0x1]  ;;  %v7212_v35 = vsel %vm17021_vm4, %v7207_v62, %v18468_v55  ;;  %v7965_v8 = vld [vmem:[#allocation2 + $0x84] sm:$0xe] }
 0x6cb   :  { %v7226_v54 = vrot.slane %v7224_v23, 4  ;;  %v7243_v23 = vshll.u32 %v6940_v5, 16  ;;  %v13550_v12 = vcombine.low %v7212_v35, %v7222_v58  ;;  %v8193_v25 = vsel %vm17220_vm15, %v13583_v21, %v8192_v10  ;;  %v7969_v62 = vld [vmem:[#allocation2 + $0x94] sm:$0xf]  ;;  %v6944_v21 = vld [vmem:[#allocation2 + $0x90] sm:$0xf] }
 0x6cc   :  { %v8196_v34 = vsel %vm17220_vm15, %v8194_v16, %v8195_v29  ;;  %v8201_v16 = vrot.slane %v8199_v17, 4  ;;  %v6945_v29 = vld [vmem:[#allocation2 + $0x94] sm:$0xf]  ;;  %v8202_v10 = vrot.slane %v7967_v44, 5  ;;  %v7264_v58 = vor.u32 %v7263_v45, %v7259_v48 }
 0x6cd   :  { %v7230_v28 = vor.u32 %v7229_v9, %v7226_v54  ;;  %v7245_v55 = vrot.slane %v7243_v23, 5  ;;  %v15263_v54 = vld [vmem:[%s19404_s3 + $0x1e0] sm:$0xff]   ;;  %v6943_v9 = vld [vmem:[#allocation2 + $0x8c] sm:$0x1]  ;;  %v7281_v53 = vshll.u32 %v6945_v29, 16  ;;  %v7285_v33 = vshrl.u32 %v6945_v29, 16 }
 0x6ce   :  { %12484 = vmatpush1.bf16.msra.mxu1 %v15263_v54  ;;  %v13584_v40 = vrot.slane %v7965_v8, 9  ;;  %v7272_v23 = vshrl.u32 %v6944_v21, 16  ;;  %v7265_v44 = vrot.slane %v7264_v58, 4  ;;  %v7970_v8 = vld [vmem:[#allocation2 + $0x98] sm:$0x1] }
 0x6cf   :  { %v7231_v2 = vrot.slane %v7230_v28, 4  ;;  %v7246_v5 = vsel %vm17021_vm4, %v7241_v57, %v7245_v55  ;;  %12485 = vmatprep.subr.bf16.mxu1 %v19559_v11  ;;  %v7267_v28 = vshll.u32 %v6943_v9, 16  ;;  %v18505_v45 = vrot.slane %v7281_v53, 5  ;;  %v6948_v55 = vld [vmem:[#allocation2 + $0xa0] sm:$0xf] }
 0x6d0   :  { %v7972_v54 = vld [vmem:[#allocation2 + $0xa0] sm:$0xf]  ;;  %v6946_v9 = vld [vmem:[#allocation2 + $0x98] sm:$0x1]  ;;  %v7305_v58 = vshll.u32 %v6948_v55, 16  ;;  %v7309_v53 = vshrl.u32 %v6948_v55, 16 }
 0x6d1   :  { %12259 = vmatmul.mubr.bf16.gmra.mrb[92].mxu1 %v13549_v18  ;;  %v7248_v18 = vshrl.u32 %v6941_v38, 16  ;;  %v7253_v38 = vrot.slane %v7251_v27, 5  ;;  %v8206_v27 = vrot.slane %v7969_v62, 5  ;;  %v7236_v35 = vsel %vm17021_vm4, %v7231_v2, %v7235_v0  ;;  %v6949_v55 = vld [vmem:[#allocation2 + $0xa4] sm:$0x1] }
 0x6d2   :  { %12266 = vmatprep.mubr.bf16.mxu1 %v13614_v63  ;;  %v13615_v63 = vcombine.low %v8193_v25, %v8196_v34  ;;  %v8203_v34 = vsel %vm17220_vm15, %v8201_v16, %v8202_v10  ;;  %v13551_v25 = vcombine.low %v7236_v35, %v7246_v5  ;;  %v7287_v16 = vrot.slane %v7285_v33, 4 }
 0x6d3   :  { %v7250_v26 = vrot.slane %v7248_v18, 4  ;;  %v8208_v29 = vrot.slane %v8206_v27, 4  ;;  %v7269_v2 = vrot.slane %v7267_v28, 5  ;;  %v7274_v0 = vrot.slane %v7272_v23, 4 }
 0x6d4   :  { %v8209_v10 = vrot.slane %v7970_v8, 5  ;;  %v7288_v5 = vor.u32 %v7287_v16, %v18505_v45  ;;  %v7291_v28 = vshll.u32 %v6946_v9, 16  ;;  %v7971_v16 = vld [vmem:[#allocation2 + $0x9c] sm:$0xe] }
 0x6d5   :  { %v7254_v18 = vor.u32 %v7253_v38, %v7250_v26  ;;  %v7968_v38 = vld [vmem:[#allocation2 + $0x90] sm:$0xe] }
 0x6d6   :  { %v7289_v8 = vrot.slane %v7288_v5, 4 }
 0x6d7   :  { %v7255_v26 = vrot.slane %v7254_v18, 4  ;;  %v8213_v18 = vrot.slane %v7972_v54, 5 }
 0x6d9   :  { %12267 = vmatmul.mubr.bf16.gmra.mrb[96].mxu1 %v13550_v12  ;;  %v7275_v12 = vshll.u32 %v6944_v21, 16  ;;  %v6947_v21 = vld [vmem:[#allocation2 + $0x9c] sm:$0xf]  ;;  %v7260_v33 = vsel %vm17021_vm4, %v7255_v26, %v7259_v48  ;;  %v7311_v48 = vrot.slane %v7309_v53, 4  ;;  %v8215_v26 = vrot.slane %v8213_v18, 4 }
 0x6da   :  { %12274 = vmatprep.mubr.bf16.mxu1 %v13615_v63  ;;  %v8200_v63 = vsel %vm17220_vm15, %v13584_v40, %v8199_v17  ;;  %v7270_v17 = vsel %vm17021_vm4, %v7265_v44, %v7269_v2  ;;  %v13585_v40 = vrot.slane %v7968_v38, 9  ;;  %v7296_v23 = vshrl.u32 %v6947_v21, 16  ;;  %v7975_v38 = vld [vmem:[#allocation2 + $0xac] sm:$0xf] }
 0x6db   :  { %v13616_v57 = vcombine.low %v8200_v63, %v8203_v34  ;;  %v7277_v62 = vrot.slane %v7275_v12, 5  ;;  %v8210_v34 = vsel %vm17220_vm15, %v8208_v29, %v8209_v10  ;;  %v7299_v12 = vshll.u32 %v6947_v21, 16  ;;  %v6951_v29 = vld [vmem:[#allocation2 + $0xac] sm:$0xf]  ;;  %v6950_v21 = vld [vmem:[#allocation2 + $0xa8] sm:$0xf] }
 0x6dc   :  { %v8207_v63 = vsel %vm17220_vm15, %v13585_v40, %v8206_v27  ;;  %v7307_v2 = vrot.slane %v7305_v58, 5  ;;  %v7298_v54 = vrot.slane %v7296_v23, 4  ;;  %v15264_v27 = vld [vmem:[%s19404_s3 + $0x1e8] sm:$0xff]   ;;  %v7329_v58 = vshll.u32 %v6951_v29, 16 }
 0x6dd   :  { %v7278_v35 = vor.u32 %v7277_v62, %v7274_v0  ;;  %v13617_v44 = vcombine.low %v8207_v63, %v8210_v34  ;;  %v7293_v62 = vrot.slane %v7291_v28, 5  ;;  %v7301_v10 = vrot.slane %v7299_v12, 5  ;;  %12486 = vmatpush1.bf16.msra.mxu1 %v15264_v27 }
 0x6de   :  { %v7312_v5 = vor.u32 %v7311_v48, %v7307_v2  ;;  %v7333_v53 = vshrl.u32 %v6951_v29, 16  ;;  %v7315_v34 = vshll.u32 %v6949_v55, 16  ;;  %12487 = vmatprep.subr.bf16.mxu1 %v19559_v11  ;;  %v7320_v12 = vshrl.u32 %v6950_v21, 16  ;;  %v7976_v48 = vld [vmem:[#allocation2 + $0xb0] sm:$0x1] }
 0x6df   :  { %v7279_v0 = vrot.slane %v7278_v35, 4  ;;  %v8220_v35 = vrot.slane %v7975_v38, 5  ;;  %v7302_v23 = vor.u32 %v7301_v10, %v7298_v54  ;;  %v7978_v29 = vld [vmem:[#allocation2 + $0xb8] sm:$0xf]  ;;  %v6953_v10 = vld [vmem:[#allocation2 + $0xb4] sm:$0xf] }
 0x6e0   :  { %v7335_v55 = vrot.slane %v7333_v53, 4 }
 0x6e1   :  { %12275 = vmatmul.mubr.bf16.gmra.mrb[100].mxu1 %v13551_v25  ;;  %v13552_v25 = vcombine.low %v7260_v33, %v7270_v17  ;;  %v7294_v17 = vsel %vm17021_vm4, %v7289_v8, %v7293_v62  ;;  %v13586_v33 = vrot.slane %v7971_v16, 9  ;;  %v7284_v28 = vsel %vm17021_vm4, %v7279_v0, %v18505_v45  ;;  %v6954_v62 = vld [vmem:[#allocation2 + $0xb8] sm:$0xf] }
 0x6e2   :  { %12282 = vmatprep.mubr.bf16.mxu1 %v13616_v57  ;;  %v7973_v57 = vld [vmem:[#allocation2 + $0xa4] sm:$0x1]  ;;  %v13553_v63 = vcombine.low %v7284_v28, %v7294_v17  ;;  %v7313_v16 = vrot.slane %v7312_v5, 4  ;;  %v8222_v38 = vrot.slane %v8220_v35, 4  ;;  %v7303_v27 = vrot.slane %v7302_v23, 4 }
 0x6e3   :  { %v8216_v9 = vrot.slane %v7973_v57, 5  ;;  %v8214_v57 = vsel %vm17220_vm15, %v13586_v33, %v8213_v18  ;;  %v7317_v45 = vrot.slane %v7315_v34, 5  ;;  %v7322_v0 = vrot.slane %v7320_v12, 4  ;;  %v6952_v17 = vld [vmem:[#allocation2 + $0xb0] sm:$0x1] }
 0x6e4   :  { %v7353_v33 = vshll.u32 %v6954_v62, 16  ;;  %v7344_v28 = vshrl.u32 %v6953_v10, 16  ;;  %v7308_v34 = vsel %vm17021_vm4, %v7303_v27, %v7307_v2  ;;  %v7339_v12 = vshll.u32 %v6952_v17, 16  ;;  %v7981_v27 = vld [vmem:[#allocation2 + $0xc4] sm:$0xf] }
 0x6e5   :  { %v8217_v40 = vsel %vm17220_vm15, %v8215_v26, %v8216_v9  ;;  %v7331_v26 = vrot.slane %v7329_v58, 5  ;;  %v7318_v18 = vsel %vm17021_vm4, %v7313_v16, %v7317_v45  ;;  %v7357_v58 = vshrl.u32 %v6954_v62, 16  ;;  %v7977_v16 = vld [vmem:[#allocation2 + $0xb4] sm:$0xe] }
 0x6e6   :  { %v13618_v8 = vcombine.low %v8214_v57, %v8217_v40  ;;  %v8227_v40 = vrot.slane %v7978_v29, 5  ;;  %v7346_v29 = vrot.slane %v7344_v28, 4  ;;  %v7341_v2 = vrot.slane %v7339_v12, 5 }
 0x6e7   :  { %v7336_v5 = vor.u32 %v7335_v55, %v7331_v26  ;;  %v7355_v55 = vrot.slane %v7353_v33, 5  ;;  %v7359_v62 = vrot.slane %v7357_v58, 4  ;;  %v13588_v58 = vrot.slane %v7977_v16, 9  ;;  %v7982_v16 = vld [vmem:[#allocation2 + $0xc8] sm:$0x1] }
 0x6e9   :  { %12283 = vmatmul.mubr.bf16.gmra.mrb[104].mxu1 %v13552_v25  ;;  %v7323_v25 = vshll.u32 %v6950_v21, 16  ;;  %v8223_v21 = vrot.slane %v7976_v48, 5  ;;  %v7979_v48 = vld [vmem:[#allocation2 + $0xbc] sm:$0x1] }
 0x6ea   :  { %12290 = vmatprep.mubr.bf16.mxu1 %v13617_v44  ;;  %v7974_v44 = vld [vmem:[#allocation2 + $0xa8] sm:$0xe] }
 0x6eb   :  { %v7325_v54 = vrot.slane %v7323_v25, 5  ;;  %v13587_v9 = vrot.slane %v7974_v44, 9  ;;  %v8224_v53 = vsel %vm17220_vm15, %v8222_v38, %v8223_v21  ;;  %v13554_v25 = vcombine.low %v7308_v34, %v7318_v18 }
 0x6ec   :  { %v8229_v38 = vrot.slane %v8227_v40, 4  ;;  %v7360_v18 = vor.u32 %v7359_v62, %v7355_v55 }
 0x6ed   :  { %v7326_v23 = vor.u32 %v7325_v54, %v7322_v0  ;;  %v8221_v57 = vsel %vm17220_vm15, %v13587_v9, %v8220_v35  ;;  %v15265_v0 = vld [vmem:[%s19404_s3 + $0x1f0] sm:$0xff]   ;;  %v8230_v35 = vrot.slane %v7979_v48, 5  ;;  %v6955_v54 = vld [vmem:[#allocation2 + $0xbc] sm:$0x1]  ;;  %v6956_v9 = vld [vmem:[#allocation2 + $0xc0] sm:$0xf] }
 0x6ee   :  { %v13619_v44 = vcombine.low %v8221_v57, %v8224_v53  ;;  %12488 = vmatpush1.bf16.msra.mxu1 %v15265_v0  ;;  %v7368_v12 = vshrl.u32 %v6956_v9, 16  ;;  %v7361_v48 = vrot.slane %v7360_v18, 4  ;;  %v8237_v0 = vrot.slane %v7982_v16, 5 }
 0x6ef   :  { %v7327_v21 = vrot.slane %v7326_v23, 4  ;;  %v8231_v53 = vsel %vm17220_vm15, %v8229_v38, %v8230_v35  ;;  %12489 = vmatprep.subr.bf16.mxu1 %v19559_v11  ;;  %v7363_v23 = vshll.u32 %v6955_v54, 16  ;;  %v6958_v35 = vld [vmem:[#allocation2 + $0xc8] sm:$0x1]  ;;  %v6959_v54 = vld [vmem:[#allocation2 + $0xe4] sm:$0xf] }
 0x6f1   :  { %12291 = vmatmul.mubr.bf16.gmra.mrb[108].mxu1 %v13553_v63  ;;  %v7347_v63 = vshll.u32 %v6953_v10, 16  ;;  %v6957_v10 = vld [vmem:[#allocation2 + $0xc4] sm:$0xf]  ;;  %v7332_v34 = vsel %vm17021_vm4, %v7327_v21, %v7331_v26  ;;  %v7365_v26 = vrot.slane %v7363_v23, 5  ;;  %v7370_v21 = vrot.slane %v7368_v12, 4 }
 0x6f2   :  { %12298 = vmatprep.mubr.bf16.mxu1 %v13618_v8  ;;  %v7337_v8 = vrot.slane %v7336_v5, 4  ;;  %v7377_v5 = vshll.u32 %v6957_v10, 16  ;;  %v7381_v33 = vshrl.u32 %v6957_v10, 16  ;;  %v6960_v10 = vld [vmem:[#allocation2 + $0xe8] sm:$0xf]  ;;  %v7392_v23 = vshrl.u32 %v6959_v54, 16 }
 0x6f3   :  { %v7349_v45 = vrot.slane %v7347_v63, 5  ;;  %v8234_v63 = vrot.slane %v7981_v27, 5  ;;  %v7984_v27 = vld [vmem:[#allocation2 + $0xe8] sm:$0xf]  ;;  %v7405_v18 = vshrl.u32 %v6960_v10, 16  ;;  %v7395_v12 = vshll.u32 %v6959_v54, 16 }
 0x6f4   :  { %v7342_v17 = vsel %vm17021_vm4, %v7337_v8, %v7341_v2  ;;  %v18549_v62 = vrot.slane %v7377_v5, 5  ;;  %v7383_v38 = vrot.slane %v7381_v33, 4  ;;  %v6961_v54 = vld [vmem:[#allocation2 + $0xec] sm:$0x1] }
 0x6f5   :  { %v7350_v28 = vor.u32 %v7349_v45, %v7346_v29  ;;  %v13555_v57 = vcombine.low %v7332_v34, %v7342_v17  ;;  %v7980_v45 = vld [vmem:[#allocation2 + $0xc0] sm:$0xe]  ;;  %v8236_v11 = vrot.slane %v8234_v63, 4  ;;  %v7401_v17 = vshll.u32 %v6960_v10, 16  ;;  %v6963_v10 = vld [vmem:[#allocation2 + $0xf4] sm:$0xf] }
 0x6f6   :  { %v13589_v33 = vrot.slane %v7980_v45, 9  ;;  %v7387_v34 = vshll.u32 %v6958_v35, 16 }
 0x6f7   :  { %v7351_v29 = vrot.slane %v7350_v28, 4 }
 0x6f9   :  { %12299 = vmatmul.mubr.bf16.gmra.mrb[112].mxu1 %v13554_v25  ;;  %v7371_v25 = vshll.u32 %v6956_v9, 16  ;;  %v7384_v9 = vor.u32 %v7383_v38, %v18549_v62  ;;  %v7356_v5 = vsel %vm17021_vm4, %v7351_v29, %v7355_v55  ;;  %v18560_v38 = vrot.slane %v7401_v17, 5  ;;  %v18562_v29 = vld [vmem:[#allocation2 + $0xf4] sm:$0xf] }
 0x6fa   :  { %12306 = vmatprep.mubr.bf16.mxu1 %v13619_v44  ;;  %v8228_v44 = vsel %vm17220_vm15, %v13588_v58, %v8227_v40  ;;  %v7366_v40 = vsel %vm17021_vm4, %v7361_v48, %v7365_v26  ;;  %v8238_v58 = vsel %vm17220_vm15, %v8236_v11, %v8237_v0  ;;  %v7407_v55 = vrot.slane %v7405_v18, 4  ;;  %v6962_v11 = vld [vmem:[#allocation2 + $0xf0] sm:$0xf] }
 0x6fb   :  { %v13620_v8 = vcombine.low %v8228_v44, %v8231_v53  ;;  %v7373_v2 = vrot.slane %v7371_v25, 5  ;;  %v8241_v53 = vrot.slane %v7984_v27, 5  ;;  %v13556_v25 = vcombine.low %v7356_v5, %v7366_v40  ;;  %v7983_v44 = vld [vmem:[#allocation2 + $0xe4] sm:$0xe] }
 0x6fc   :  { %v7385_v16 = vrot.slane %v7384_v9, 4  ;;  %v7397_v27 = vrot.slane %v7395_v12, 5  ;;  %v13590_v0 = vrot.slane %v7983_v44, 9  ;;  %v7408_v9 = vor.u32 %v7407_v55, %v18560_v38 }
 0x6fd   :  { %v7374_v28 = vor.u32 %v7373_v2, %v7370_v21  ;;  %v8243_v45 = vrot.slane %v8241_v53, 4  ;;  %v7389_v21 = vrot.slane %v7387_v34, 5  ;;  %v7394_v2 = vrot.slane %v7392_v23, 4  ;;  %v15303_v34 = vld [vmem:[%s19404_s3 + $0x200] sm:$0xff]  }
 0x6fe   :  { %v7425_v17 = vshll.u32 %v6963_v10, 16  ;;  %v7429_v18 = vshrl.u32 %v6963_v10, 16  ;;  %v8242_v44 = vsel %vm17220_vm15, %v13590_v0, %v8241_v53 }
 0x6ff   :  { %v7375_v26 = vrot.slane %v7374_v28, 4  ;;  %v7390_v40 = vsel %vm17021_vm4, %v7385_v16, %v7389_v21  ;;  %v7419_v28 = vshll.u32 %v6962_v11, 16  ;;  %v7398_v12 = vor.u32 %v7397_v27, %v7394_v2  ;;  %v7988_v16 = vld [vmem:[#allocation2 + $0xf8] sm:$0x1]  ;;  %v6966_v21 = vld [vmem:[#allocation2 + $0x100] sm:$0xf] }
 0x700   :  { %v7427_v55 = vrot.slane %v7425_v17, 5  ;;  %v8251_v2 = vrot.slane %v7988_v16, 5  ;;  %v6964_v27 = vld [vmem:[#allocation2 + $0xf8] sm:$0x1] }
 0x701   :  { %12307 = vmatmul.mubr.bf16.gmra.mrb[116].mxu1 %v13555_v57  ;;  %v8235_v57 = vsel %vm17220_vm15, %v13589_v33, %v8234_v63  ;;  %v15266_v63 = vld [vmem:[%s19404_s3 + $0x1f8] sm:$0xff]   ;;  %v8248_v33 = vrot.slane %v18562_v29, 5  ;;  %v7380_v23 = vsel %vm17021_vm4, %v7375_v26, %v18549_v62  ;;  %v7431_v29 = vrot.slane %v7429_v18, 4  ;;  %v7986_v62 = vld [vmem:[#allocation2 + $0xf0] sm:$0xe] }
 0x702   :  { %12314 = vmatprep.mubr.bf16.mxu1 %v13620_v8  ;;  %v7985_v8 = vld [vmem:[#allocation2 + $0xec] sm:$0x1]  ;;  %v13621_v48 = vcombine.low %v8235_v57, %v8238_v58  ;;  %12490 = vmatpush1.bf16.msra.mxu1 %v15266_v63  ;;  %v7416_v58 = vshrl.u32 %v6962_v11, 16  ;;  %v13557_v57 = vcombine.low %v7380_v23, %v7390_v40  ;;  %v7421_v10 = vrot.slane %v7419_v28, 5  ;;  %v7990_v26 = vld [vmem:[#allocation2 + $0x100] sm:$0xf] }
 0x703   :  { %v8244_v35 = vrot.slane %v7985_v8, 5  ;;  %14143 = vmatprep.subr.bf16.mxu1 %v15303_v34  ;;  %v7399_v63 = vrot.slane %v7398_v12, 4  ;;  %v7432_v0 = vor.u32 %v7431_v29, %v7427_v55  ;;  %v7449_v40 = vshll.u32 %v6966_v21, 16 }
 0x704   :  { %v7418_v11 = vrot.slane %v7416_v58, 4  ;;  %v13591_v17 = vrot.slane %v7986_v62, 9  ;;  %v8255_v58 = vrot.slane %v7990_v26, 5  ;;  %v7435_v34 = vshll.u32 %v6964_v27, 16  ;;  %v7993_v62 = vld [vmem:[#allocation2 + $0x10c] sm:$0xf] }
 0x705   :  { %v8245_v5 = vsel %vm17220_vm15, %v8243_v45, %v8244_v35  ;;  %v8250_v45 = vrot.slane %v8248_v33, 4  ;;  %v7404_v28 = vsel %vm17021_vm4, %v7399_v63, %v18560_v38  ;;  %v7451_v16 = vrot.slane %v7449_v40, 5  ;;  %v6968_v27 = vld [vmem:[#allocation2 + $0x108] sm:$0xf] }
 0x706   :  { %v13622_v8 = vcombine.low %v8242_v44, %v8245_v5  ;;  %v7422_v5 = vor.u32 %v7421_v10, %v7418_v11  ;;  %v7989_v11 = vld [vmem:[#allocation2 + $0xfc] sm:$0xe]  ;;  %v8257_v10 = vrot.slane %v8255_v58, 4 }
 0x707   :  { %v8252_v18 = vsel %vm17220_vm15, %v8250_v45, %v8251_v2  ;;  %v6967_v2 = vld [vmem:[#allocation2 + $0x104] sm:$0x1] }
 0x708   :  { %v7423_v45 = vrot.slane %v7422_v5, 4 }
 0x709   :  { %12315 = vmatmul.mubr.bf16.gmra.mrb[120].mxu1 %v13556_v25  ;;  %v7411_v25 = vshll.u32 %v6961_v54, 16  ;;  %v6965_v54 = vld [vmem:[#allocation2 + $0xfc] sm:$0xf] }
 0x70a   :  { %12322 = vmatprep.mubr.bf16.mxu1 %v13621_v48  ;;  %v7409_v48 = vrot.slane %v7408_v9, 4  ;;  %v7453_v9 = vshrl.u32 %v6966_v21, 16  ;;  %v7440_v23 = vshrl.u32 %v6965_v54, 16  ;;  %v7443_v12 = vshll.u32 %v6965_v54, 16  ;;  %v6969_v21 = vld [vmem:[#allocation2 + $0x10c] sm:$0xf] }
 0x70b   :  { %v7413_v35 = vrot.slane %v7411_v25, 5  ;;  %v7428_v40 = vsel %vm17021_vm4, %v7423_v45, %v7427_v55  ;;  %v7996_v45 = vld [vmem:[#allocation2 + $0x118] sm:$0xf] }
 0x70c   :  { %v7455_v29 = vrot.slane %v7453_v9, 4  ;;  %v7442_v38 = vrot.slane %v7440_v23, 4  ;;  %v7445_v63 = vrot.slane %v7443_v12, 5  ;;  %v13592_v9 = vrot.slane %v7989_v11, 9  ;;  %v6972_v11 = vld [vmem:[#allocation2 + $0x118] sm:$0xf] }
 0x70d   :  { %v7414_v53 = vsel %vm17021_vm4, %v7409_v48, %v7413_v35  ;;  %v7991_v48 = vld [vmem:[#allocation2 + $0x104] sm:$0x1]  ;;  %v7437_v35 = vrot.slane %v7435_v34, 5  ;;  %v7464_v34 = vshrl.u32 %v6968_v27, 16  ;;  %v7467_v23 = vshll.u32 %v6968_v27, 16 }
 0x70e   :  { %v13558_v25 = vcombine.low %v7404_v28, %v7414_v53  ;;  %v8258_v26 = vrot.slane %v7991_v48, 5  ;;  %v7456_v54 = vor.u32 %v7455_v29, %v7451_v16  ;;  %v7473_v53 = vshll.u32 %v6969_v21, 16  ;;  %v7994_v48 = vld [vmem:[#allocation2 + $0x110] sm:$0x1] }
 0x70f   :  { %v7446_v5 = vor.u32 %v7445_v63, %v7442_v38  ;;  %v7459_v28 = vshll.u32 %v6967_v2, 16  ;;  %v7466_v38 = vrot.slane %v7464_v34, 4  ;;  %v7469_v63 = vrot.slane %v7467_v23, 5  ;;  %v6970_v27 = vld [vmem:[#allocation2 + $0x110] sm:$0x1] }
 0x710   :  { %v7475_v29 = vrot.slane %v7473_v53, 5  ;;  %v8265_v2 = vrot.slane %v7994_v48, 5  ;;  %v7501_v53 = vshrl.u32 %v6972_v11, 16  ;;  %v7483_v34 = vshll.u32 %v6970_v27, 16 }
 0x711   :  { %12323 = vmatmul.mubr.bf16.gmra.mrb[124].mxu1 %v13557_v57  ;;  %v8249_v57 = vsel %vm17220_vm15, %v13591_v17, %v8248_v33  ;;  %v8259_v17 = vsel %vm17220_vm15, %v8257_v10, %v8258_v26  ;;  %v7447_v10 = vrot.slane %v7446_v5, 4 }
 0x712   :  { %12330 = vmatprep.mubr.bf16.mxu1 %v13622_v8  ;;  %v13623_v44 = vcombine.low %v8249_v57, %v8252_v18  ;;  %v7433_v8 = vrot.slane %v7432_v0, 4  ;;  %v7477_v0 = vshrl.u32 %v6969_v21, 16  ;;  %v8262_v18 = vrot.slane %v7993_v62, 5  ;;  %v7992_v57 = vld [vmem:[#allocation2 + $0x108] sm:$0xe] }
 0x713   :  { %v6971_v62 = vld [vmem:[#allocation2 + $0x114] sm:$0xf]  ;;  %v13593_v26 = vrot.slane %v7992_v57, 9  ;;  %v7452_v5 = vsel %vm17021_vm4, %v7447_v10, %v7451_v16  ;;  %v7503_v48 = vrot.slane %v7501_v53, 4  ;;  %v7999_v10 = vld [vmem:[#allocation2 + $0x124] sm:$0xf] }
 0x714   :  { %v7438_v33 = vsel %vm17021_vm4, %v7433_v8, %v7437_v35  ;;  %v7457_v8 = vrot.slane %v7456_v54, 4  ;;  %v7479_v21 = vrot.slane %v7477_v0, 4  ;;  %v8264_v55 = vrot.slane %v8262_v18, 4  ;;  %v7995_v16 = vld [vmem:[#allocation2 + $0x114] sm:$0xe] }
 0x715   :  { %v13559_v12 = vcombine.low %v7428_v40, %v7438_v33  ;;  %v7461_v35 = vrot.slane %v7459_v28, 5  ;;  %v7497_v54 = vshll.u32 %v6972_v11, 16  ;;  %v8269_v40 = vrot.slane %v7996_v45, 5  ;;  %v6975_v11 = vld [vmem:[#allocation2 + $0x124] sm:$0xf] }
 0x716   :  { %v7480_v33 = vor.u32 %v7479_v21, %v7475_v29  ;;  %v8266_v0 = vsel %vm17220_vm15, %v8264_v55, %v8265_v2  ;;  %v7470_v28 = vor.u32 %v7469_v63, %v7466_v38  ;;  %v6973_v63 = vld [vmem:[#allocation2 + $0x11c] sm:$0x1]  ;;  %v6974_v2 = vld [vmem:[#allocation2 + $0x120] sm:$0xf]  ;;  %v7521_v27 = vshll.u32 %v6975_v11, 16 }
 0x717   :  { %v8271_v21 = vrot.slane %v8269_v40, 4 }
 0x718   :  { %v7481_v57 = vrot.slane %v7480_v33, 4  ;;  %v13594_v33 = vrot.slane %v7995_v16, 9  ;;  %v8002_v16 = vld [vmem:[#allocation2 + $0x130] sm:$0xf] }
 0x719   :  { %12331 = vmatmul.mubr.bf16.gmra.mrb[128].mxu1 %v13558_v25  ;;  %v8256_v25 = vsel %vm17220_vm15, %v13592_v9, %v8255_v58  ;;  %v7462_v58 = vsel %vm17021_vm4, %v7457_v8, %v7461_v35  ;;  %v7488_v9 = vshrl.u32 %v6971_v62, 16  ;;  %v7499_v8 = vrot.slane %v7497_v54, 5 }
 0x71a   :  { %12338 = vmatprep.mubr.bf16.mxu1 %v13623_v44  ;;  %v13624_v44 = vcombine.low %v8256_v25, %v8259_v17  ;;  %v7491_v17 = vshll.u32 %v6971_v62, 16  ;;  %v13560_v23 = vcombine.low %v7452_v5, %v7462_v58  ;;  %v7471_v35 = vrot.slane %v7470_v28, 4 }
 0x71b   :  { %v7490_v55 = vrot.slane %v7488_v9, 4  ;;  %v7485_v62 = vrot.slane %v7483_v34, 5  ;;  %v7525_v58 = vshrl.u32 %v6975_v11, 16  ;;  %v7512_v5 = vshrl.u32 %v6974_v2, 16 }
 0x71c   :  { %v7493_v45 = vrot.slane %v7491_v17, 5  ;;  %v7476_v9 = vsel %vm17021_vm4, %v7471_v35, %v7475_v29  ;;  %v7507_v17 = vshll.u32 %v6973_v63, 16  ;;  %v7515_v28 = vshll.u32 %v6974_v2, 16  ;;  %v6977_v63 = vld [vmem:[#allocation2 + $0x12c] sm:$0xf] }
 0x71d   :  { %v7514_v29 = vrot.slane %v7512_v5, 4  ;;  %v7539_v5 = vshll.u32 %v6977_v63, 16 }
 0x71e   :  { %v7494_v53 = vor.u32 %v7493_v45, %v7490_v55  ;;  %v6978_v45 = vld [vmem:[#allocation2 + $0x130] sm:$0xf]  ;;  %v7517_v35 = vrot.slane %v7515_v28, 5 }
 0x720   :  { %v7495_v11 = vrot.slane %v7494_v53, 4  ;;  %v7518_v53 = vor.u32 %v7517_v35, %v7514_v29  ;;  %v7541_v35 = vrot.slane %v7539_v5, 5 }
 0x721   :  { %12339 = vmatmul.mubr.bf16.gmra.mrb[132].mxu1 %v13559_v12  ;;  %v8263_v12 = vsel %vm17220_vm15, %v13593_v26, %v8262_v18  ;;  %v7486_v18 = vsel %vm17021_vm4, %v7481_v57, %v7485_v62  ;;  %v7504_v26 = vor.u32 %v7503_v48, %v7499_v8  ;;  %v8000_v57 = vld [vmem:[#allocation2 + $0x128] sm:$0x1]  ;;  %v7527_v48 = vrot.slane %v7525_v58, 4 }
 0x722   :  { %12346 = vmatprep.mubr.bf16.mxu1 %v13624_v44  ;;  %v13625_v25 = vcombine.low %v8263_v12, %v8266_v0  ;;  %v7997_v44 = vld [vmem:[#allocation2 + $0x11c] sm:$0x1]  ;;  %v8276_v0 = vrot.slane %v7999_v10, 5  ;;  %v13561_v34 = vcombine.low %v7476_v9, %v7486_v18  ;;  %v7509_v62 = vrot.slane %v7507_v17, 5 }
 0x723   :  { %v8272_v38 = vrot.slane %v7997_v44, 5  ;;  %v7523_v44 = vrot.slane %v7521_v27, 5  ;;  %v8279_v10 = vrot.slane %v8000_v57, 5  ;;  %v7545_v18 = vshll.u32 %v6978_v45, 16  ;;  %v8003_v57 = vld [vmem:[#allocation2 + $0x134] sm:$0x1] }
 0x724   :  { %v8278_v55 = vrot.slane %v8276_v0, 4  ;;  %v7500_v27 = vsel %vm17021_vm4, %v7495_v11, %v7499_v8  ;;  %v7536_v17 = vshrl.u32 %v6977_v63, 16  ;;  %v8005_v11 = vld [vmem:[#allocation2 + $0x13c] sm:$0xf]  ;;  %v6979_v63 = vld [vmem:[#allocation2 + $0x134] sm:$0x1] }
 0x725   :  { %v8273_v54 = vsel %vm17220_vm15, %v8271_v21, %v8272_v38  ;;  %v7998_v21 = vld [vmem:[#allocation2 + $0x120] sm:$0xe]  ;;  %v6976_v38 = vld [vmem:[#allocation2 + $0x128] sm:$0x1]  ;;  %v7528_v2 = vor.u32 %v7527_v48, %v7523_v44  ;;  %v7547_v48 = vrot.slane %v7545_v18, 5 }
 0x726   :  { %v13595_v58 = vrot.slane %v7998_v21, 9  ;;  %v7531_v9 = vshll.u32 %v6976_v38, 16  ;;  %v6981_v21 = vld [vmem:[#allocation2 + $0x13c] sm:$0xf]  ;;  %v7538_v29 = vrot.slane %v7536_v17, 4  ;;  %v8286_v38 = vrot.slane %v8003_v57, 5 }
 0x727   :  { %v7573_v18 = vshrl.u32 %v6981_v21, 16  ;;  %v7555_v17 = vshll.u32 %v6979_v63, 16 }
 0x729   :  { %12347 = vmatmul.mubr.bf16.gmra.mrb[136].mxu1 %v13560_v23  ;;  %v8270_v23 = vsel %vm17220_vm15, %v13594_v33, %v8269_v40  ;;  %v8280_v33 = vsel %vm17220_vm15, %v8278_v55, %v8279_v10  ;;  %v7519_v55 = vrot.slane %v7518_v53, 4  ;;  %v7575_v57 = vrot.slane %v7573_v18, 4 }
 0x72a   :  { %12354 = vmatprep.mubr.bf16.mxu1 %v13625_v25  ;;  %v13626_v12 = vcombine.low %v8270_v23, %v8273_v54  ;;  %v7505_v25 = vrot.slane %v7504_v26, 4  ;;  %v7549_v26 = vshrl.u32 %v6978_v45, 16  ;;  %v8283_v54 = vrot.slane %v8002_v16, 5  ;;  %v8001_v23 = vld [vmem:[#allocation2 + $0x12c] sm:$0xe] }
 0x72b   :  { %v6980_v16 = vld [vmem:[#allocation2 + $0x138] sm:$0xf]  ;;  %v13596_v10 = vrot.slane %v8001_v23, 9  ;;  %v7524_v53 = vsel %vm17021_vm4, %v7519_v55, %v7523_v44  ;;  %v8008_v55 = vld [vmem:[#allocation2 + $0x148] sm:$0xf] }
 0x72c   :  { %v7510_v40 = vsel %vm17021_vm4, %v7505_v25, %v7509_v62  ;;  %v7529_v25 = vrot.slane %v7528_v2, 4  ;;  %v7551_v45 = vrot.slane %v7549_v26, 4  ;;  %v8285_v8 = vrot.slane %v8283_v54, 4  ;;  %v8004_v44 = vld [vmem:[#allocation2 + $0x138] sm:$0xe] }
 0x72d   :  { %v13562_v28 = vcombine.low %v7500_v27, %v7510_v40  ;;  %v7533_v62 = vrot.slane %v7531_v9, 5  ;;  %v7569_v2 = vshll.u32 %v6981_v21, 16  ;;  %v8290_v27 = vrot.slane %v8005_v11, 5  ;;  %v6984_v21 = vld [vmem:[#allocation2 + $0x148] sm:$0xf] }
 0x72e   :  { %v7552_v40 = vor.u32 %v7551_v45, %v7547_v48  ;;  %v8287_v26 = vsel %vm17220_vm15, %v8285_v8, %v8286_v38  ;;  %v7542_v9 = vor.u32 %v7541_v35, %v7538_v29  ;;  %v6982_v35 = vld [vmem:[#allocation2 + $0x140] sm:$0x1]  ;;  %v6983_v38 = vld [vmem:[#allocation2 + $0x144] sm:$0xf]  ;;  %v7593_v63 = vshll.u32 %v6984_v21, 16 }
 0x72f   :  { %v8292_v45 = vrot.slane %v8290_v27, 4 }
 0x730   :  { %v7553_v23 = vrot.slane %v7552_v40, 4  ;;  %v13597_v40 = vrot.slane %v8004_v44, 9  ;;  %v8011_v44 = vld [vmem:[#allocation2 + $0x154] sm:$0xf] }
 0x731   :  { %12355 = vmatmul.mubr.bf16.gmra.mrb[140].mxu1 %v13561_v34  ;;  %v8277_v34 = vsel %vm17220_vm15, %v13595_v58, %v8276_v0  ;;  %v7534_v0 = vsel %vm17021_vm4, %v7529_v25, %v7533_v62  ;;  %v7560_v58 = vshrl.u32 %v6980_v16, 16  ;;  %v7571_v25 = vrot.slane %v7569_v2, 5 }
 0x732   :  { %12362 = vmatprep.mubr.bf16.mxu1 %v13626_v12  ;;  %v13627_v12 = vcombine.low %v8277_v34, %v8280_v33  ;;  %v7563_v33 = vshll.u32 %v6980_v16, 16  ;;  %v13563_v5 = vcombine.low %v7524_v53, %v7534_v0  ;;  %v7543_v62 = vrot.slane %v7542_v9, 4 }
 0x733   :  { %v7562_v8 = vrot.slane %v7560_v58, 4  ;;  %v7557_v16 = vrot.slane %v7555_v17, 5  ;;  %v7597_v0 = vshrl.u32 %v6984_v21, 16  ;;  %v7584_v53 = vshrl.u32 %v6983_v38, 16 }
 0x734   :  { %v7565_v11 = vrot.slane %v7563_v33, 5  ;;  %v7548_v58 = vsel %vm17021_vm4, %v7543_v62, %v7547_v48  ;;  %v7579_v33 = vshll.u32 %v6982_v35, 16  ;;  %v7587_v9 = vshll.u32 %v6983_v38, 16  ;;  %v6986_v35 = vld [vmem:[#allocation2 + $0x150] sm:$0xf] }
 0x735   :  { %v7586_v48 = vrot.slane %v7584_v53, 4  ;;  %v7611_v53 = vshll.u32 %v6986_v35, 16 }
 0x736   :  { %v7566_v18 = vor.u32 %v7565_v11, %v7562_v8  ;;  %v6987_v11 = vld [vmem:[#allocation2 + $0x154] sm:$0xf]  ;;  %v7589_v62 = vrot.slane %v7587_v9, 5 }
 0x738   :  { %v7567_v21 = vrot.slane %v7566_v18, 4  ;;  %v7590_v18 = vor.u32 %v7589_v62, %v7586_v48  ;;  %v7613_v62 = vrot.slane %v7611_v53, 5 }
 0x739   :  { %12363 = vmatmul.mubr.bf16.gmra.mrb[144].mxu1 %v13562_v28  ;;  %v8284_v28 = vsel %vm17220_vm15, %v13596_v10, %v8283_v54  ;;  %v7558_v54 = vsel %vm17021_vm4, %v7553_v23, %v7557_v16  ;;  %v7576_v10 = vor.u32 %v7575_v57, %v7571_v25  ;;  %v8009_v23 = vld [vmem:[#allocation2 + $0x14c] sm:$0x1]  ;;  %v7599_v57 = vrot.slane %v7597_v0, 4 }
 0x73a   :  { %12370 = vmatprep.mubr.bf16.mxu1 %v13627_v12  ;;  %v13628_v34 = vcombine.low %v8284_v28, %v8287_v26  ;;  %v8006_v12 = vld [vmem:[#allocation2 + $0x140] sm:$0x1]  ;;  %v8297_v26 = vrot.slane %v8008_v55, 5  ;;  %v13564_v17 = vcombine.low %v7548_v58, %v7558_v54  ;;  %v7581_v16 = vrot.slane %v7579_v33, 5 }
 0x73b   :  { %v8293_v29 = vrot.slane %v8006_v12, 5  ;;  %v7595_v12 = vrot.slane %v7593_v63, 5  ;;  %v8300_v55 = vrot.slane %v8009_v23, 5  ;;  %v7617_v54 = vshll.u32 %v6987_v11, 16  ;;  %v8012_v23 = vld [vmem:[#allocation2 + $0x158] sm:$0x1] }
 0x73c   :  { %v8299_v8 = vrot.slane %v8297_v26, 4  ;;  %v7572_v63 = vsel %vm17021_vm4, %v7567_v21, %v7571_v25  ;;  %v7608_v33 = vshrl.u32 %v6986_v35, 16  ;;  %v8014_v21 = vld [vmem:[#allocation2 + $0x160] sm:$0xf]  ;;  %v6988_v35 = vld [vmem:[#allocation2 + $0x158] sm:$0x1] }
 0x73d   :  { %v8294_v2 = vsel %vm17220_vm15, %v8292_v45, %v8293_v29  ;;  %v8007_v45 = vld [vmem:[#allocation2 + $0x144] sm:$0xe]  ;;  %v6985_v29 = vld [vmem:[#allocation2 + $0x14c] sm:$0x1]  ;;  %v7600_v38 = vor.u32 %v7599_v57, %v7595_v12  ;;  %v7619_v57 = vrot.slane %v7617_v54, 5 }
 0x73e   :  { %v13598_v0 = vrot.slane %v8007_v45, 9  ;;  %v7603_v58 = vshll.u32 %v6985_v29, 16  ;;  %v6990_v45 = vld [vmem:[#allocation2 + $0x160] sm:$0xf]  ;;  %v7610_v48 = vrot.slane %v7608_v33, 4  ;;  %v8307_v29 = vrot.slane %v8012_v23, 5 }
 0x73f   :  { %v7645_v54 = vshrl.u32 %v6990_v45, 16  ;;  %v7627_v33 = vshll.u32 %v6988_v35, 16 }
 0x741   :  { %12371 = vmatmul.mubr.bf16.gmra.mrb[148].mxu1 %v13563_v5  ;;  %v8291_v5 = vsel %vm17220_vm15, %v13597_v40, %v8290_v27  ;;  %v8301_v40 = vsel %vm17220_vm15, %v8299_v8, %v8300_v55  ;;  %v7591_v8 = vrot.slane %v7590_v18, 4  ;;  %v7647_v23 = vrot.slane %v7645_v54, 4 }
 0x742   :  { %12378 = vmatprep.mubr.bf16.mxu1 %v13628_v34  ;;  %v13629_v28 = vcombine.low %v8291_v5, %v8294_v2  ;;  %v7577_v34 = vrot.slane %v7576_v10, 4  ;;  %v7621_v10 = vshrl.u32 %v6987_v11, 16  ;;  %v8304_v2 = vrot.slane %v8011_v44, 5  ;;  %v8010_v5 = vld [vmem:[#allocation2 + $0x150] sm:$0xe] }
 0x743   :  { %v6989_v44 = vld [vmem:[#allocation2 + $0x15c] sm:$0xf]  ;;  %v13599_v55 = vrot.slane %v8010_v5, 9  ;;  %v7596_v18 = vsel %vm17021_vm4, %v7591_v8, %v7595_v12  ;;  %v8017_v8 = vld [vmem:[#allocation2 + $0x16c] sm:$0xf] }
 0x744   :  { %v7582_v27 = vsel %vm17021_vm4, %v7577_v34, %v7581_v16  ;;  %v7601_v34 = vrot.slane %v7600_v38, 4  ;;  %v7623_v11 = vrot.slane %v7621_v10, 4  ;;  %v8306_v25 = vrot.slane %v8304_v2, 4  ;;  %v8013_v12 = vld [vmem:[#allocation2 + $0x15c] sm:$0xe] }
 0x745   :  { %v13565_v9 = vcombine.low %v7572_v63, %v7582_v27  ;;  %v7605_v16 = vrot.slane %v7603_v58, 5  ;;  %v7641_v38 = vshll.u32 %v6990_v45, 16  ;;  %v8311_v63 = vrot.slane %v8014_v21, 5  ;;  %v6993_v45 = vld [vmem:[#allocation2 + $0x16c] sm:$0xf] }
 0x746   :  { %v7624_v27 = vor.u32 %v7623_v11, %v7619_v57  ;;  %v8308_v10 = vsel %vm17220_vm15, %v8306_v25, %v8307_v29  ;;  %v7614_v58 = vor.u32 %v7613_v62, %v7610_v48  ;;  %v6991_v62 = vld [vmem:[#allocation2 + $0x164] sm:$0x1]  ;;  %v6992_v29 = vld [vmem:[#allocation2 + $0x168] sm:$0xf]  ;;  %v7665_v35 = vshll.u32 %v6993_v45, 16 }
 0x747   :  { %v8313_v11 = vrot.slane %v8311_v63, 4 }
 0x748   :  { %v7625_v5 = vrot.slane %v7624_v27, 4  ;;  %v13600_v27 = vrot.slane %v8013_v12, 9  ;;  %v8020_v12 = vld [vmem:[#allocation2 + $0x178] sm:$0xf] }
 0x749   :  { %12379 = vmatmul.mubr.bf16.gmra.mrb[152].mxu1 %v13564_v17  ;;  %v8298_v17 = vsel %vm17220_vm15, %v13598_v0, %v8297_v26  ;;  %v7606_v26 = vsel %vm17021_vm4, %v7601_v34, %v7605_v16  ;;  %v7632_v0 = vshrl.u32 %v6989_v44, 16  ;;  %v7643_v34 = vrot.slane %v7641_v38, 5 }
 0x74a   :  { %12386 = vmatprep.mubr.bf16.mxu1 %v13629_v28  ;;  %v13630_v28 = vcombine.low %v8298_v17, %v8301_v40  ;;  %v7635_v40 = vshll.u32 %v6989_v44, 16  ;;  %v13566_v53 = vcombine.low %v7596_v18, %v7606_v26  ;;  %v7615_v16 = vrot.slane %v7614_v58, 4 }
 0x74b   :  { %v7634_v25 = vrot.slane %v7632_v0, 4  ;;  %v7629_v44 = vrot.slane %v7627_v33, 5  ;;  %v7669_v26 = vshrl.u32 %v6993_v45, 16  ;;  %v7656_v18 = vshrl.u32 %v6992_v29, 16 }
 0x74c   :  { %v7637_v21 = vrot.slane %v7635_v40, 5  ;;  %v7620_v0 = vsel %vm17021_vm4, %v7615_v16, %v7619_v57  ;;  %v7651_v40 = vshll.u32 %v6991_v62, 16  ;;  %v7659_v58 = vshll.u32 %v6992_v29, 16  ;;  %v6995_v62 = vld [vmem:[#allocation2 + $0x174] sm:$0xf] }
 0x74d   :  { %v7658_v57 = vrot.slane %v7656_v18, 4  ;;  %v7683_v18 = vshll.u32 %v6995_v62, 16 }
 0x74e   :  { %v7638_v54 = vor.u32 %v7637_v21, %v7634_v25  ;;  %v6996_v21 = vld [vmem:[#allocation2 + $0x178] sm:$0xf]  ;;  %v7661_v16 = vrot.slane %v7659_v58, 5 }
 0x750   :  { %v7639_v45 = vrot.slane %v7638_v54, 4  ;;  %v7662_v54 = vor.u32 %v7661_v16, %v7658_v57  ;;  %v7685_v16 = vrot.slane %v7683_v18, 5 }
 0x751   :  { %12387 = vmatmul.mubr.bf16.gmra.mrb[156].mxu1 %v13565_v9  ;;  %v8305_v9 = vsel %vm17220_vm15, %v13599_v55, %v8304_v2  ;;  %v7630_v2 = vsel %vm17021_vm4, %v7625_v5, %v7629_v44  ;;  %v7648_v55 = vor.u32 %v7647_v23, %v7643_v34  ;;  %v8018_v5 = vld [vmem:[#allocation2 + $0x170] sm:$0x1]  ;;  %v7671_v23 = vrot.slane %v7669_v26, 4 }
 0x752   :  { %12394 = vmatprep.mubr.bf16.mxu1 %v13630_v28  ;;  %v13631_v17 = vcombine.low %v8305_v9, %v8308_v10  ;;  %v8015_v28 = vld [vmem:[#allocation2 + $0x164] sm:$0x1]  ;;  %v8318_v10 = vrot.slane %v8017_v8, 5  ;;  %v13567_v33 = vcombine.low %v7620_v0, %v7630_v2  ;;  %v7653_v44 = vrot.slane %v7651_v40, 5 }
 0x753   :  { %v8314_v48 = vrot.slane %v8015_v28, 5  ;;  %v7667_v28 = vrot.slane %v7665_v35, 5  ;;  %v8321_v8 = vrot.slane %v8018_v5, 5  ;;  %v7689_v2 = vshll.u32 %v6996_v21, 16 }
 0x754   :  { %v8320_v25 = vrot.slane %v8318_v10, 4  ;;  %v7644_v35 = vsel %vm17021_vm4, %v7639_v45, %v7643_v34  ;;  %v7680_v40 = vshrl.u32 %v6995_v62, 16  ;;  %v6999_v34 = vld [vmem:[#allocation2 + $0x184] sm:$0xf]  ;;  %v8019_v45 = vld [vmem:[#allocation2 + $0x174] sm:$0xe] }
 0x755   :  { %v8315_v38 = vsel %vm17220_vm15, %v8313_v11, %v8314_v48  ;;  %v8016_v11 = vld [vmem:[#allocation2 + $0x168] sm:$0xe]  ;;  %v6994_v48 = vld [vmem:[#allocation2 + $0x170] sm:$0x1]  ;;  %v7672_v29 = vor.u32 %v7671_v23, %v7667_v28  ;;  %v18670_v5 = vrot.slane %v7689_v2, 5  ;;  %v7717_v62 = vshrl.u32 %v6999_v34, 16 }
 0x756   :  { %v13601_v26 = vrot.slane %v8016_v11, 9  ;;  %v7675_v0 = vshll.u32 %v6994_v48, 16  ;;  %v7682_v57 = vrot.slane %v7680_v40, 4  ;;  %v6997_v48 = vld [vmem:[#allocation2 + $0x17c] sm:$0x1] }
 0x757   :  { %v7699_v40 = vshll.u32 %v6997_v48, 16 }
 0x759   :  { %12395 = vmatmul.mubr.bf16.gmra.mrb[160].mxu1 %v13566_v53  ;;  %v8312_v53 = vsel %vm17220_vm15, %v13600_v27, %v8311_v63  ;;  %v8322_v27 = vsel %vm17220_vm15, %v8320_v25, %v8321_v8  ;;  %v6998_v25 = vld [vmem:[#allocation2 + $0x180] sm:$0xf] }
 0x75a   :  { %12402 = vmatprep.mubr.bf16.mxu1 %v13631_v17  ;;  %v13632_v9 = vcombine.low %v8312_v53, %v8315_v38  ;;  %v7649_v17 = vrot.slane %v7648_v55, 4  ;;  %v7693_v55 = vshrl.u32 %v6996_v21, 16  ;;  %v8325_v38 = vrot.slane %v8020_v12, 5  ;;  %v8021_v53 = vld [vmem:[#allocation2 + $0x17c] sm:$0x1] }
 0x75b   :  { %v7663_v21 = vrot.slane %v7662_v54, 4  ;;  %v8023_v12 = vld [vmem:[#allocation2 + $0x184] sm:$0xf]  ;;  %v8328_v8 = vrot.slane %v8021_v53, 5  ;;  %v7719_v53 = vrot.slane %v7717_v62, 4 }
 0x75c   :  { %v7654_v63 = vsel %vm17021_vm4, %v7649_v17, %v7653_v44  ;;  %v7673_v17 = vrot.slane %v7672_v29, 4  ;;  %v7695_v23 = vrot.slane %v7693_v55, 4  ;;  %v8327_v11 = vrot.slane %v8325_v38, 4 }
 0x75d   :  { %v13568_v58 = vcombine.low %v7644_v35, %v7654_v63  ;;  %v7677_v44 = vrot.slane %v7675_v0, 5  ;;  %v13602_v29 = vrot.slane %v8019_v45, 9  ;;  %v8332_v35 = vrot.slane %v8023_v12, 5  ;;  %v8024_v45 = vld [vmem:[#allocation2 + $0x188] sm:$0x1] }
 0x75e   :  { %v7696_v2 = vor.u32 %v7695_v23, %v18670_v5  ;;  %v8329_v55 = vsel %vm17220_vm15, %v8327_v11, %v8328_v8  ;;  %v7668_v54 = vsel %vm17021_vm4, %v7663_v21, %v7667_v28  ;;  %v7686_v0 = vor.u32 %v7685_v16, %v7682_v57  ;;  %v8026_v11 = vld [vmem:[#allocation2 + $0x190] sm:$0xf]  ;;  %v7001_v28 = vld [vmem:[#allocation2 + $0x18c] sm:$0xf]  ;;  %v7000_v16 = vld [vmem:[#allocation2 + $0x188] sm:$0x1] }
 0x75f   :  { %v7678_v63 = vsel %vm17021_vm4, %v7673_v17, %v7677_v44  ;;  %v7701_v57 = vrot.slane %v7699_v40, 5  ;;  %v8335_v48 = vrot.slane %v8024_v45, 5  ;;  %v8339_v62 = vrot.slane %v8026_v11, 5  ;;  %v7004_v45 = vld [vmem:[#allocation2 + $0x198] sm:$0xf] }
 0x760   :  { %v13569_v18 = vcombine.low %v7668_v54, %v7678_v63  ;;  %v7697_v23 = vrot.slane %v7696_v2, 4  ;;  %v7687_v21 = vrot.slane %v7686_v0, 4  ;;  %v7731_v2 = vshll.u32 %v7001_v28, 16  ;;  %v8025_v0 = vld [vmem:[#allocation2 + $0x18c] sm:$0xe] }
 0x761   :  { %12403 = vmatmul.mubr.bf16.gmra.mrb[164].mxu1 %v13567_v33  ;;  %v8319_v33 = vsel %vm17220_vm15, %v13601_v26, %v8318_v10  ;;  %v7713_v10 = vshll.u32 %v6999_v34, 16  ;;  %v7704_v26 = vshrl.u32 %v6998_v25, 16  ;;  %v8022_v34 = vld [vmem:[#allocation2 + $0x180] sm:$0xe]  ;;  %v7723_v54 = vshll.u32 %v7000_v16, 16 }
 0x762   :  { %12410 = vmatprep.mubr.bf16.mxu1 %v13632_v9  ;;  %v13633_v9 = vcombine.low %v8319_v33, %v8322_v27  ;;  %v7707_v27 = vshll.u32 %v6998_v25, 16  ;;  %v8334_v25 = vrot.slane %v8332_v35, 4  ;;  %v7702_v63 = vsel %vm17021_vm4, %v7697_v23, %v7701_v57 }
 0x763   :  { %v18681_v33 = vrot.slane %v7713_v10, 5  ;;  %v7706_v44 = vrot.slane %v7704_v26, 4  ;;  %v7692_v40 = vsel %vm17021_vm4, %v7687_v21, %v18670_v5  ;;  %v7725_v16 = vrot.slane %v7723_v54, 5  ;;  %v8029_v21 = vld [vmem:[#allocation2 + $0x19c] sm:$0xf] }
 0x764   :  { %v7709_v12 = vrot.slane %v7707_v27, 5  ;;  %v8336_v26 = vsel %vm17220_vm15, %v8334_v25, %v8335_v48  ;;  %v13604_v25 = vrot.slane %v8025_v0, 9  ;;  %v8801_v48 = vld [vmem:[#allocation2 + $0x1c] sm:$0xf]  ;;  %v7755_v54 = vshll.u32 %v7004_v45, 16 }
 0x765   :  { %v7720_v10 = vor.u32 %v7719_v53, %v18681_v33  ;;  %v8800_v0 = vld [vmem:[#allocation2 + $0x18] sm:$0xf] }
 0x766   :  { %v7710_v27 = vor.u32 %v7709_v12, %v7706_v44  ;;  %v7733_v12 = vrot.slane %v7731_v2, 5 }
 0x767   :  { %v7721_v23 = vrot.slane %v7720_v10, 4 }
 0x768   :  { %v7711_v57 = vrot.slane %v7710_v27, 4  ;;  %v7752_v27 = vshrl.u32 %v7004_v45, 16  ;;  %v7757_v45 = vrot.slane %v7755_v54, 5 }
 0x769   :  { %12411 = vmatmul.mubr.bf16.gmra.mrb[168].mxu1 %v13568_v58  ;;  %v8326_v58 = vsel %vm17220_vm15, %v13602_v29, %v8325_v38  ;;  %v7728_v29 = vshrl.u32 %v7001_v28, 16  ;;  %v7005_v28 = vld [vmem:[#allocation2 + $0x19c] sm:$0xf]  ;;  %v7726_v10 = vsel %vm17021_vm4, %v7721_v23, %v7725_v16  ;;  %v8897_v16 = vshrl.u32 %v8800_v0, 16 }
 0x76a   :  { %12418 = vmatprep.mubr.bf16.mxu1 %v13633_v9  ;;  %v7002_v9 = vld [vmem:[#allocation2 + $0x190] sm:$0xf]  ;;  %v13634_v17 = vcombine.low %v8326_v58, %v8329_v55  ;;  %v13603_v55 = vrot.slane %v8022_v34, 9  ;;  %v8341_v34 = vrot.slane %v8339_v62, 4  ;;  %v7765_v2 = vshrl.u32 %v7005_v28, 16 }
 0x76b   :  { %v7737_v8 = vshll.u32 %v7002_v9, 16  ;;  %v7741_v38 = vshrl.u32 %v7002_v9, 16  ;;  %v13570_v9 = vcombine.low %v7692_v40, %v7702_v63  ;;  %v7730_v44 = vrot.slane %v7728_v29, 4 }
 0x76c   :  { %v7761_v29 = vshll.u32 %v7005_v28, 16  ;;  %v8900_v28 = vshll.u32 %v8800_v0, 16  ;;  %v8803_v0 = vld [vmem:[#allocation2 + $0x24] sm:$0xf] }
 0x76d   :  { %v18691_v58 = vrot.slane %v7737_v8, 5  ;;  %v7743_v53 = vrot.slane %v7741_v38, 4  ;;  %v8340_v8 = vsel %vm17220_vm15, %v13604_v25, %v8339_v62  ;;  %v7003_v38 = vld [vmem:[#allocation2 + $0x194] sm:$0x1]  ;;  %v7716_v62 = vsel %vm17021_vm4, %v7711_v57, %v18681_v33 }
 0x76e   :  { %v7747_v40 = vshll.u32 %v7003_v38, 16  ;;  %v7763_v25 = vrot.slane %v7761_v29, 5  ;;  %v7006_v38 = vld [vmem:[#allocation2 + $0x1a0] sm:$0x1]  ;;  %v8902_v29 = vrot.slane %v8900_v28, 5  ;;  %v8924_v28 = vshll.u32 %v8803_v0, 16 }
 0x771   :  { %12419 = vmatmul.mubr.bf16.gmra.mrb[172].mxu1 %v13569_v18  ;;  %v8027_v18 = vld [vmem:[#allocation2 + $0x194] sm:$0x1] }
 0x772   :  { %12426 = vmatprep.mubr.bf16.mxu1 %v13634_v17  ;;  %v8333_v17 = vsel %vm17220_vm15, %v13603_v55, %v8332_v35  ;;  %v8342_v5 = vrot.slane %v8027_v18, 5  ;;  %v7744_v35 = vor.u32 %v7743_v53, %v18691_v58  ;;  %v7734_v55 = vor.u32 %v7733_v12, %v7730_v44 }
 0x773   :  { %v13635_v11 = vcombine.low %v8333_v17, %v8336_v26  ;;  %v8346_v26 = vrot.slane %v8029_v21, 5  ;;  %v8906_v18 = vshll.u32 %v8801_v48, 16  ;;  %v8910_v53 = vshrl.u32 %v8801_v48, 16  ;;  %v8804_v48 = vld [vmem:[#allocation2 + $0x28] sm:$0xf] }
 0x774   :  { %v8343_v63 = vsel %vm17220_vm15, %v8341_v34, %v8342_v5  ;;  %v7745_v23 = vrot.slane %v7744_v35, 4  ;;  %v7767_v34 = vrot.slane %v7765_v2, 4  ;;  %v7735_v44 = vrot.slane %v7734_v55, 4 }
 0x775   :  { %v13636_v17 = vcombine.low %v8340_v8, %v8343_v63  ;;  %v8348_v12 = vrot.slane %v8346_v26, 4  ;;  %v7754_v5 = vrot.slane %v7752_v27, 4  ;;  %v7749_v21 = vrot.slane %v7747_v40, 5 }
 0x776   :  { %v8908_v1 = vrot.slane %v8906_v18, 5  ;;  %v8912_v33 = vrot.slane %v8910_v53, 4  ;;  %v7768_v35 = vor.u32 %v7767_v34, %v7763_v25  ;;  %v8899_v63 = vrot.slane %v8897_v16, 4 }
 0x777   :  { %v7750_v8 = vsel %vm17021_vm4, %v7745_v23, %v7749_v21  ;;  %v7740_v2 = vsel %vm17021_vm4, %v7735_v44, %v18691_v58  ;;  %v13605_v55 = vrot.slane %v8028_v59, 9  ;;  %v7758_v54 = vor.u32 %v7757_v45, %v7754_v5 }
 0x778   :  { %v8913_v40 = vor.u32 %v8912_v33, %v8908_v1  ;;  %v8930_v18 = vshll.u32 %v8804_v48, 16  ;;  %v8934_v53 = vshrl.u32 %v8804_v48, 16  ;;  %v8903_v34 = vor.u32 %v8902_v29, %v8899_v63  ;;  %v8807_v33 = vld [vmem:[#allocation2 + $0x34] sm:$0xf] }
 0x779   :  { %12427 = vmatmul.mubr.bf16.gmra.mrb[176].mxu1 %v13570_v9  ;;  %v13571_v9 = vcombine.low %v7716_v62, %v7726_v10  ;;  %v8802_v10 = vld [vmem:[#allocation2 + $0x20] sm:$0x1]  ;;  %v7771_v62 = vshll.u32 %v7006_v38, 16  ;;  %v8921_v16 = vshrl.u32 %v8803_v0, 16  ;;  %v7759_v59 = vrot.slane %v7758_v54, 4 }
 0x77a   :  { %12434 = vmatprep.mubr.bf16.mxu1 %v13635_v11  ;;  %v8030_v11 = vld [vmem:[#allocation2 + $0x1a0] sm:$0x1]  ;;  %v8916_v23 = vshll.u32 %v8802_v10, 16  ;;  %v8932_v5 = vrot.slane %v8930_v18, 5  ;;  %v8936_v45 = vrot.slane %v8934_v53, 4  ;;  %v8904_v38 = vrot.slane %v8903_v34, 4 }
 0x77b   :  { %v8349_v57 = vrot.slane %v8030_v11, 5  ;;  %v7769_v11 = vrot.slane %v7768_v35, 4  ;;  %v7773_v44 = vrot.slane %v7771_v62, 5  ;;  %v8923_v48 = vrot.slane %v8921_v16, 4  ;;  %v8806_v10 = vld [vmem:[#allocation2 + $0x30] sm:$0xf] }
 0x77c   :  { %v8918_v21 = vrot.slane %v8916_v23, 5  ;;  %v7764_v35 = vsel %vm17021_vm4, %v7759_v59, %v7763_v25  ;;  %v8937_v29 = vor.u32 %v8936_v45, %v8932_v5  ;;  %v8909_v0 = vsel %vm17021_vm4, %v8904_v38, %v8908_v1  ;;  %v8810_v23 = vld [vmem:[#allocation2 + $0x40] sm:$0xf]  ;;  %v8808_v16 = vld [vmem:[#allocation2 + $0x38] sm:$0x1] }
 0x77d   :  { %v8350_v27 = vsel %vm17220_vm15, %v8348_v12, %v8349_v57  ;;  %v8914_v12 = vrot.slane %v8913_v40, 4  ;;  %v7774_v57 = vsel %vm17021_vm4, %v7769_v11, %v7773_v44  ;;  %v8945_v40 = vshrl.u32 %v8806_v10, 16  ;;  %v8809_v59 = vld [vmem:[#allocation2 + $0x3c] sm:$0xf] }
 0x77e   :  { %v8948_v18 = vshll.u32 %v8806_v10, 16  ;;  %v8982_v45 = vshrl.u32 %v8810_v23, 16 }
 0x77f   :  { %v8919_v63 = vsel %vm17021_vm4, %v8914_v12, %v8918_v21  ;;  %v8978_v12 = vshll.u32 %v8810_v23, 16  ;;  %v8964_v21 = vshll.u32 %v8808_v16, 16 }
 0x780   :  { %v13670_v53 = vcombine.low %v8909_v0, %v8919_v63  ;;  %v8984_v63 = vrot.slane %v8982_v45, 4 }
 0x781   :  { %12435 = vmatmul.mubr.bf16.gmra.mrb[180].mxu1 %v13571_v9  ;;  %v13572_v9 = vcombine.low %v7740_v2, %v7750_v8  ;;  %v8926_v8 = vrot.slane %v8924_v28, 5  ;;  %v8954_v2 = vshll.u32 %v8807_v33, 16  ;;  %v8947_v28 = vrot.slane %v8945_v40, 4  ;;  %v8812_v40 = vld [vmem:[#allocation2 + $0x48] sm:$0xf] }
 0x782   :  { %12442 = vmatprep.mubr.bf16.mxu1 %v13636_v17  ;;  %v8347_v17 = vsel %vm17220_vm15, %v13605_v55, %v8346_v26  ;;  %v8805_v26 = vld [vmem:[#allocation2 + $0x2c] sm:$0x1]  ;;  %v8958_v55 = vshrl.u32 %v8807_v33, 16  ;;  %v15267_v33 = vld [vmem:[#allocation2 + $0x18] sm:$0xff]   ;;  %v8980_v10 = vrot.slane %v8978_v12, 5 }
 0x783   :  { %v13637_v58 = vcombine.low %v8347_v17, %v8350_v27  ;;  %v13573_v27 = vcombine.low %v7764_v35, %v7774_v57  ;;  %v8940_v54 = vshll.u32 %v8805_v26, 16  ;;  %v8927_v62 = vor.u32 %v8926_v8, %v8923_v48 }
 0x784   :  { %v8956_v17 = vrot.slane %v8954_v2, 5  ;;  %v8960_v25 = vrot.slane %v8958_v55, 4  ;;  %v8969_v26 = vshrl.u32 %v8809_v59, 16  ;;  %v8972_v48 = vshll.u32 %v8809_v59, 16  ;;  %v8813_v2 = vld [vmem:[#allocation2 + $0x4c] sm:$0xf] }
 0x785   :  { %v8928_v11 = vrot.slane %v8927_v62, 4  ;;  %v8942_v34 = vrot.slane %v8940_v54, 5  ;;  %v8811_v54 = vld [vmem:[#allocation2 + $0x44] sm:$0x1]  ;;  %v15305_v62 = vld [vmem:[%s19404_s3 + $0x208] sm:$0xff]   ;;  %v15306_v59 = vld [vmem:[%s19404_s3 + $0x210] sm:$0xff]  }
 0x786   :  { %v8961_v1 = vor.u32 %v8960_v25, %v8956_v17  ;;  %v8971_v0 = vrot.slane %v8969_v26, 4  ;;  %v9006_v25 = vshrl.u32 %v8813_v2, 16  ;;  %v8988_v23 = vshll.u32 %v8811_v54, 16 }
 0x787   :  { %v8933_v57 = vsel %vm17021_vm4, %v8928_v11, %v8932_v5  ;;  %v8974_v5 = vrot.slane %v8972_v48, 5  ;;  %v15268_v11 = vld [vmem:[#allocation2 + $0x24] sm:$0xff]   ;;  %v15307_v48 = vld [vmem:[%s19404_s3 + $0x218] sm:$0xff]  }
 0x788   :  { %v8962_v35 = vrot.slane %v8961_v1, 4  ;;  %v9008_v45 = vrot.slane %v9006_v25, 4 }
 0x789   :  { %12443 = vmatmul.mubr.bf16.gmra.mrb[184].mxu1 %v13572_v9  ;;  %v8938_v9 = vrot.slane %v8937_v29, 4  ;;  %v15304_v29 = vld [vmem:[%s19404_s3 + $0x200] sm:$0xff]   ;;  %v8975_v16 = vor.u32 %v8974_v5, %v8971_v0 }
 0x78a   :  { %12450 = vmatprep.mubr.bf16.mxu1 %v13637_v58  ;;  %v8950_v58 = vrot.slane %v8948_v18, 5 }
 0x78b   :  { %v8943_v44 = vsel %vm17021_vm4, %v8938_v9, %v8942_v34  ;;  %v9002_v9 = vshll.u32 %v8813_v2, 16 }
 0x78c   :  { %v8951_v38 = vor.u32 %v8950_v58, %v8947_v28  ;;  %v13671_v8 = vcombine.low %v8933_v57, %v8943_v44  ;;  %v8993_v28 = vshrl.u32 %v8812_v40, 16  ;;  %v8996_v58 = vshll.u32 %v8812_v40, 16  ;;  %v15308_v40 = vld [vmem:[%s19404_s3 + $0x220] sm:$0xff]  }
 0x78d   :  { %v9004_v12 = vrot.slane %v9002_v9, 5  ;;  %v8990_v57 = vrot.slane %v8988_v23, 5  ;;  %v8819_v23 = vld [vmem:[#allocation2 + $0x64] sm:$0xf] }
 0x78e   :  { %v8952_v55 = vrot.slane %v8951_v38, 4  ;;  %v8814_v38 = vld [vmem:[#allocation2 + $0x50] sm:$0x1]  ;;  %v8998_v26 = vrot.slane %v8996_v58, 5  ;;  %v15309_v58 = vld [vmem:[%s19404_s3 + $0x228] sm:$0xff]  }
 0x790   :  { %v8957_v34 = vsel %vm17021_vm4, %v8952_v55, %v8956_v17  ;;  %v8995_v17 = vrot.slane %v8993_v28, 4  ;;  %v9012_v55 = vshll.u32 %v8814_v38, 16 }
 0x791   :  { %12451 = vmatmul.mubr.bf16.gmra.mrb[188].mxu1 %v13573_v27  ;;  %v8966_v27 = vrot.slane %v8964_v21, 5  ;;  %v8816_v21 = vld [vmem:[#allocation2 + $0x58] sm:$0xf] }
 0x792   :  { %12491 = vmatprep.mubr.bf16.mxu1 %v13670_v53  ;;  %v8985_v53 = vor.u32 %v8984_v63, %v8980_v10  ;;  %v9009_v63 = vor.u32 %v9008_v45, %v9004_v12  ;;  %v9030_v2 = vshrl.u32 %v8816_v21, 16  ;;  %v8999_v0 = vor.u32 %v8998_v26, %v8995_v17 }
 0x793   :  { %v8967_v18 = vsel %vm17021_vm4, %v8962_v35, %v8966_v27  ;;  %v15269_v27 = vld [vmem:[#allocation2 + $0x30] sm:$0xff]   ;;  %v9050_v45 = vshll.u32 %v8819_v23, 16 }
 0x794   :  { %v13672_v44 = vcombine.low %v8957_v34, %v8967_v18  ;;  %v8986_v1 = vrot.slane %v8985_v53, 4  ;;  %v9010_v53 = vrot.slane %v9009_v63, 4  ;;  %v9032_v25 = vrot.slane %v9030_v2, 4 }
 0x795   :  { %v9014_v34 = vrot.slane %v9012_v55, 5  ;;  %v8822_v55 = vld [vmem:[#allocation2 + $0x70] sm:$0xf] }
 0x796   :  { %v8991_v35 = vsel %vm17021_vm4, %v8986_v1, %v8990_v57  ;;  %v15270_v57 = vld [vmem:[#allocation2 + $0x3c] sm:$0xff]  }
 0x799   :  { %12492 = vmatmul.mubr.bf16.vlgmr.msra.gmra.mrb[64].mxu1 %v15267_v33  ;;  %v8976_v33 = vrot.slane %v8975_v16, 4  ;;  %v8817_v16 = vld [vmem:[#allocation2 + $0x5c] sm:$0x1] }
 0x79a   :  { %12499 = vmatprep.mubr.bf16.mxu1 %v13671_v8  ;;  %14151 = vmatpush3.bf16.msra.mxu1 %v15304_v29  ;;  %v8815_v8 = vld [vmem:[#allocation2 + $0x54] sm:$0xf]  ;;  %v9026_v29 = vshll.u32 %v8816_v21, 16  ;;  %v9054_v21 = vshrl.u32 %v8819_v23, 16  ;;  %v9078_v23 = vshrl.u32 %v8822_v55, 16 }
 0x79b   :  { %14144 = vmatprep.subr.bf16.mxu1 %v15305_v62  ;;  %v8981_v54 = vsel %vm17021_vm4, %v8976_v33, %v8980_v10  ;;  %v9017_v5 = vshrl.u32 %v8815_v8, 16  ;;  %v9036_v33 = vshll.u32 %v8817_v16, 16 }
 0x79c   :  { %v13673_v18 = vcombine.low %v8981_v54, %v8991_v35  ;;  %v9028_v9 = vrot.slane %v9026_v29, 5  ;;  %v9052_v29 = vrot.slane %v9050_v45, 5  ;;  %v9056_v2 = vrot.slane %v9054_v21, 4  ;;  %v8825_v21 = vld [vmem:[#allocation2 + $0x7c] sm:$0xf] }
 0x79d   :  { %v9019_v10 = vrot.slane %v9017_v5, 4  ;;  %v9038_v54 = vrot.slane %v9036_v33, 5  ;;  %v9080_v45 = vrot.slane %v9078_v23, 4 }
 0x79e   :  { %14152 = vmatpush3.bf16.msra.mxu1 %v15305_v62  ;;  %v9020_v62 = vshll.u32 %v8815_v8, 16  ;;  %v9033_v1 = vor.u32 %v9032_v25, %v9028_v9  ;;  %v15310_v8 = vld [vmem:[%s19404_s3 + $0x230] sm:$0xff]   ;;  %v9074_v25 = vshll.u32 %v8822_v55, 16 }
 0x79f   :  { %14145 = vmatprep.subr.bf16.mxu1 %v15306_v59  ;;  %v15272_v55 = vld [vmem:[#allocation2 + $0x54] sm:$0xff]  }
 0x7a0   :  { %v9022_v28 = vrot.slane %v9020_v62, 5  ;;  %v9034_v63 = vrot.slane %v9033_v1, 4  ;;  %v15311_v62 = vld [vmem:[%s19404_s3 + $0x238] sm:$0xff]   ;;  %v9076_v1 = vrot.slane %v9074_v25, 5 }
 0x7a1   :  { %12500 = vmatmul.mubr.bf16.gmra.mrb[68].mxu1 %v15268_v11  ;;  %v9000_v11 = vrot.slane %v8999_v0, 4  ;;  %v8820_v0 = vld [vmem:[#allocation2 + $0x68] sm:$0x1] }
 0x7a2   :  { %12507 = vmatprep.mubr.bf16.mxu1 %v13672_v44  ;;  %14153 = vmatpush3.bf16.msra.mxu1 %v15306_v59  ;;  %v8818_v59 = vld [vmem:[#allocation2 + $0x60] sm:$0xf]  ;;  %v9015_v44 = vsel %vm17021_vm4, %v9010_v53, %v9014_v34  ;;  %v9023_v17 = vor.u32 %v9022_v28, %v9019_v10  ;;  %v9057_v53 = vor.u32 %v9056_v2, %v9052_v29  ;;  %v15271_v34 = vld [vmem:[#allocation2 + $0x48] sm:$0xff]  }
 0x7a3   :  { %14146 = vmatprep.subr.bf16.mxu1 %v15307_v48  ;;  %v9005_v38 = vsel %vm17021_vm4, %v9000_v11, %v9004_v12  ;;  %v9041_v26 = vshrl.u32 %v8818_v59, 16  ;;  %v9060_v11 = vshll.u32 %v8820_v0, 16 }
 0x7a4   :  { %v13674_v35 = vcombine.low %v9005_v38, %v9015_v44  ;;  %v9058_v44 = vrot.slane %v9057_v53, 4  ;;  %v8823_v38 = vld [vmem:[#allocation2 + $0x74] sm:$0x1]  ;;  %v8828_v53 = vld [vmem:[#allocation2 + $0x88] sm:$0xf] }
 0x7a5   :  { %v9043_v12 = vrot.slane %v9041_v26, 4  ;;  %v9084_v2 = vshll.u32 %v8823_v38, 16 }
 0x7a6   :  { %14154 = vmatpush3.bf16.msra.mxu1 %v15307_v48  ;;  %v9044_v48 = vshll.u32 %v8818_v59, 16 }
 0x7a7   :  { %14147 = vmatprep.subr.bf16.mxu1 %v15308_v40  ;;  %v9086_v23 = vrot.slane %v9084_v2, 5  ;;  %v8829_v2 = vld [vmem:[#allocation2 + $0x8c] sm:$0x1] }
 0x7a8   :  { %v9046_v5 = vrot.slane %v9044_v48, 5  ;;  %v8824_v48 = vld [vmem:[#allocation2 + $0x78] sm:$0xf] }
 0x7a9   :  { %12508 = vmatmul.mubr.bf16.gmra.mrb[72].mxu1 %v15269_v27  ;;  %v9024_v27 = vrot.slane %v9023_v17, 4  ;;  %v9089_v0 = vshrl.u32 %v8824_v48, 16 }
 0x7aa   :  { %12515 = vmatprep.mubr.bf16.mxu1 %v13673_v18  ;;  %14155 = vmatpush3.bf16.msra.mxu1 %v15308_v40  ;;  %v8821_v40 = vld [vmem:[#allocation2 + $0x6c] sm:$0xf]  ;;  %v9039_v18 = vsel %vm17021_vm4, %v9034_v63, %v9038_v54  ;;  %v9047_v10 = vor.u32 %v9046_v5, %v9043_v12  ;;  %v9102_v63 = vshrl.u32 %v8825_v21, 16  ;;  %v9092_v12 = vshll.u32 %v8824_v48, 16 }
 0x7ab   :  { %14148 = vmatprep.subr.bf16.mxu1 %v15309_v58  ;;  %v9029_v16 = vsel %vm17021_vm4, %v9024_v27, %v9028_v9  ;;  %v9065_v28 = vshrl.u32 %v8821_v40, 16  ;;  %v9081_v9 = vor.u32 %v9080_v45, %v9076_v1  ;;  %v15273_v45 = vld [vmem:[#allocation2 + $0x60] sm:$0xff]  }
 0x7ac   :  { %v13675_v59 = vcombine.low %v9029_v16, %v9039_v18  ;;  %v9048_v33 = vrot.slane %v9047_v10, 4  ;;  %v9104_v18 = vrot.slane %v9102_v63, 4  ;;  %v9094_v16 = vrot.slane %v9092_v12, 5  ;;  %v8827_v10 = vld [vmem:[#allocation2 + $0x84] sm:$0xf] }
 0x7ad   :  { %v9067_v17 = vrot.slane %v9065_v28, 4  ;;  %v9116_v38 = vshll.u32 %v8827_v10, 16 }
 0x7ae   :  { %14156 = vmatpush3.bf16.msra.mxu1 %v15309_v58  ;;  %v9068_v58 = vshll.u32 %v8821_v40, 16  ;;  %v9053_v27 = vsel %vm17021_vm4, %v9048_v33, %v9052_v29 }
 0x7af   :  { %14149 = vmatprep.subr.bf16.mxu1 %v15310_v8 }
 0x7b0   :  { %v9070_v26 = vrot.slane %v9068_v58, 5  ;;  %v9122_v58 = vshll.u32 %v8828_v53, 16 }
 0x7b1   :  { %12516 = vmatmul.mubr.bf16.gmra.mrb[76].mxu1 %v15270_v57  ;;  %v9062_v57 = vrot.slane %v9060_v11, 5  ;;  %v8826_v11 = vld [vmem:[#allocation2 + $0x80] sm:$0x1] }
 0x7b2   :  { %12523 = vmatprep.mubr.bf16.mxu1 %v13674_v35  ;;  %14157 = vmatpush3.bf16.msra.mxu1 %v15310_v8  ;;  %v9098_v35 = vshll.u32 %v8825_v21, 16  ;;  %v9071_v54 = vor.u32 %v9070_v26, %v9067_v17  ;;  %v9124_v48 = vrot.slane %v9122_v58, 5 }
 0x7b3   :  { %14150 = vmatprep.subr.bf16.mxu1 %v15311_v62  ;;  %v9063_v8 = vsel %vm17021_vm4, %v9058_v44, %v9062_v57  ;;  %v9108_v44 = vshll.u32 %v8826_v11, 16  ;;  %v9113_v57 = vshrl.u32 %v8827_v10, 16 }
 0x7b4   :  { %v13676_v5 = vcombine.low %v9053_v27, %v9063_v8  ;;  %v9100_v40 = vrot.slane %v9098_v35, 5  ;;  %v9072_v25 = vrot.slane %v9071_v54, 4  ;;  %v9118_v27 = vrot.slane %v9116_v38, 5  ;;  %v8830_v54 = vld [vmem:[#allocation2 + $0x90] sm:$0xf] }
 0x7b5   :  { %v9110_v63 = vrot.slane %v9108_v44, 5  ;;  %v9140_v11 = vshll.u32 %v8830_v54, 16 }
 0x7b6   :  { %14158 = vmatpush3.bf16.msra.mxu1 %v15311_v62  ;;  %v9082_v62 = vrot.slane %v9081_v9, 4  ;;  %v9105_v29 = vor.u32 %v9104_v18, %v9100_v40  ;;  %v9077_v21 = vsel %vm17021_vm4, %v9072_v25, %v9076_v1  ;;  %v8831_v9 = vld [vmem:[#allocation2 + $0x94] sm:$0xf]  ;;  %v15274_v18 = vld [vmem:[#allocation2 + $0x6c] sm:$0xff]  }
 0x7b7   :  { %v9146_v12 = vshll.u32 %v8831_v9, 16 }
 0x7b8   :  { %v9087_v28 = vsel %vm17021_vm4, %v9082_v62, %v9086_v23  ;;  %v9106_v26 = vrot.slane %v9105_v29, 4  ;;  %v9132_v62 = vshll.u32 %v8829_v2, 16  ;;  %v9137_v23 = vshrl.u32 %v8830_v54, 16  ;;  %v8834_v29 = vld [vmem:[#allocation2 + $0xa0] sm:$0xf] }
 0x7b9   :  { %12524 = vmatmul.mubr.bf16.gmra.mrb[80].mxu1 %v15271_v34  ;;  %v9091_v34 = vrot.slane %v9089_v0, 4  ;;  %v13677_v17 = vcombine.low %v9077_v21, %v9087_v28  ;;  %v9148_v10 = vrot.slane %v9146_v12, 5  ;;  %v8833_v21 = vld [vmem:[#allocation2 + $0x9c] sm:$0xf]  ;;  %v9170_v38 = vshll.u32 %v8834_v29, 16 }
 0x7ba   :  { %12531 = vmatprep.mubr.bf16.mxu1 %v13675_v59  ;;  %v9126_v59 = vshrl.u32 %v8828_v53, 16  ;;  %v9111_v0 = vsel %vm17021_vm4, %v9106_v26, %v9110_v63  ;;  %v9139_v44 = vrot.slane %v9137_v23, 4  ;;  %v9161_v26 = vshrl.u32 %v8833_v21, 16 }
 0x7bb   :  { %v9095_v33 = vor.u32 %v9094_v16, %v9091_v34  ;;  %v9172_v54 = vrot.slane %v9170_v38, 5 }
 0x7bc   :  { %v9128_v8 = vrot.slane %v9126_v59, 4  ;;  %v9134_v59 = vrot.slane %v9132_v62, 5 }
 0x7bd   :  { %v9096_v35 = vrot.slane %v9095_v33, 4  ;;  %v8832_v33 = vld [vmem:[#allocation2 + $0x98] sm:$0x1] }
 0x7be   :  { %v9129_v1 = vor.u32 %v9128_v8, %v9124_v48  ;;  %v9164_v8 = vshll.u32 %v8833_v21, 16  ;;  %v9156_v2 = vshll.u32 %v8832_v33, 16 }
 0x7bf   :  { %v9101_v53 = vsel %vm17021_vm4, %v9096_v35, %v9100_v40 }
 0x7c0   :  { %v13678_v34 = vcombine.low %v9101_v53, %v9111_v0  ;;  %v9130_v16 = vrot.slane %v9129_v1, 4  ;;  %v9163_v1 = vrot.slane %v9161_v26, 4  ;;  %v9166_v12 = vrot.slane %v9164_v8, 5  ;;  %v8835_v53 = vld [vmem:[#allocation2 + $0xa4] sm:$0x1] }
 0x7c1   :  { %12532 = vmatmul.mubr.bf16.gmra.mrb[84].mxu1 %v15272_v55  ;;  %v9115_v55 = vrot.slane %v9113_v57, 4 }
 0x7c2   :  { %12539 = vmatprep.mubr.bf16.mxu1 %v13676_v5  ;;  %v9150_v5 = vshrl.u32 %v8831_v9, 16  ;;  %v9135_v57 = vsel %vm17021_vm4, %v9130_v16, %v9134_v59  ;;  %v15275_v9 = vld [vmem:[#allocation2 + $0x78] sm:$0xff]   ;;  %v9167_v16 = vor.u32 %v9166_v12, %v9163_v1  ;;  %v15277_v1 = vld [vmem:[#allocation2 + $0x90] sm:$0xff]  }
 0x7c3   :  { %v9119_v25 = vor.u32 %v9118_v27, %v9115_v55 }
 0x7c4   :  { %v9152_v28 = vrot.slane %v9150_v5, 4  ;;  %v8837_v5 = vld [vmem:[#allocation2 + $0xac] sm:$0xf]  ;;  %v9168_v38 = vrot.slane %v9167_v16, 4 }
 0x7c5   :  { %v9120_v58 = vrot.slane %v9119_v25, 4  ;;  %v8836_v25 = vld [vmem:[#allocation2 + $0xa8] sm:$0xf] }
 0x7c6   :  { %v9153_v40 = vor.u32 %v9152_v28, %v9148_v10  ;;  %v15276_v28 = vld [vmem:[#allocation2 + $0x84] sm:$0xff]   ;;  %v9185_v59 = vshrl.u32 %v8836_v25, 16  ;;  %v9173_v12 = vsel %vm17021_vm4, %v9168_v38, %v9172_v54 }
 0x7c7   :  { %v9125_v35 = vsel %vm17021_vm4, %v9120_v58, %v9124_v48  ;;  %v9194_v48 = vshll.u32 %v8837_v5, 16  ;;  %v9180_v58 = vshll.u32 %v8835_v53, 16 }
 0x7c8   :  { %v13679_v55 = vcombine.low %v9125_v35, %v9135_v57  ;;  %v9154_v27 = vrot.slane %v9153_v40, 4  ;;  %v8840_v40 = vld [vmem:[#allocation2 + $0xb8] sm:$0xf]  ;;  %v9187_v26 = vrot.slane %v9185_v59, 4  ;;  %v8838_v35 = vld [vmem:[#allocation2 + $0xb0] sm:$0x1] }
 0x7c9   :  { %12540 = vmatmul.mubr.bf16.gmra.mrb[88].mxu1 %v15273_v45  ;;  %v9142_v45 = vrot.slane %v9140_v11, 5  ;;  %v9196_v33 = vrot.slane %v9194_v48, 5 }
 0x7ca   :  { %12547 = vmatprep.mubr.bf16.mxu1 %v13677_v17  ;;  %v9174_v17 = vshrl.u32 %v8834_v29, 16 }
 0x7cb   :  { %v9143_v63 = vor.u32 %v9142_v45, %v9139_v44  ;;  %v9188_v44 = vshll.u32 %v8836_v25, 16 }
 0x7cc   :  { %v9176_v0 = vrot.slane %v9174_v17, 4  ;;  %v9182_v17 = vrot.slane %v9180_v58, 5  ;;  %v8842_v58 = vld [vmem:[#allocation2 + $0xc0] sm:$0xf] }
 0x7cd   :  { %v9144_v62 = vrot.slane %v9143_v63, 4  ;;  %v9190_v8 = vrot.slane %v9188_v44, 5  ;;  %v9236_v38 = vshll.u32 %v8842_v58, 16 }
 0x7ce   :  { %v9177_v11 = vor.u32 %v9176_v0, %v9172_v54 }
 0x7cf   :  { %v9149_v29 = vsel %vm17021_vm4, %v9144_v62, %v9148_v10  ;;  %v9204_v62 = vshll.u32 %v8838_v35, 16  ;;  %v8846_v35 = vld [vmem:[#allocation2 + $0xd0] sm:$0xf] }
 0x7d0   :  { %v9178_v21 = vrot.slane %v9177_v11, 4 }
 0x7d1   :  { %12548 = vmatmul.mubr.bf16.gmra.mrb[92].mxu1 %v15274_v18  ;;  %v9158_v18 = vrot.slane %v9156_v2, 5  ;;  %v9218_v2 = vshll.u32 %v8840_v40, 16 }
 0x7d2   :  { %12555 = vmatprep.mubr.bf16.mxu1 %v13678_v34  ;;  %v9198_v34 = vshrl.u32 %v8837_v5, 16  ;;  %v9183_v63 = vsel %vm17021_vm4, %v9178_v21, %v9182_v17  ;;  %v9191_v5 = vor.u32 %v9190_v8, %v9187_v26  ;;  %v15278_v17 = vld [vmem:[#allocation2 + $0x9c] sm:$0xff]  }
 0x7d3   :  { %v9159_v23 = vsel %vm17021_vm4, %v9154_v27, %v9158_v18  ;;  %v13681_v18 = vcombine.low %v9173_v12, %v9183_v63  ;;  %v9220_v25 = vrot.slane %v9218_v2, 5  ;;  %v8844_v12 = vld [vmem:[#allocation2 + $0xc8] sm:$0x1] }
 0x7d4   :  { %v13680_v45 = vcombine.low %v9149_v29, %v9159_v23  ;;  %v9200_v57 = vrot.slane %v9198_v34, 4  ;;  %v8843_v34 = vld [vmem:[#allocation2 + $0xc4] sm:$0xf]  ;;  %v9192_v16 = vrot.slane %v9191_v5, 4  ;;  %v8841_v29 = vld [vmem:[#allocation2 + $0xbc] sm:$0x1] }
 0x7d5   :  { %v9242_v54 = vshll.u32 %v8843_v34, 16 }
 0x7d6   :  { %v9201_v10 = vor.u32 %v9200_v57, %v9196_v33  ;;  %v9228_v57 = vshll.u32 %v8841_v29, 16  ;;  %v9197_v26 = vsel %vm17021_vm4, %v9192_v16, %v9196_v33  ;;  %v15279_v16 = vld [vmem:[#allocation2 + $0xa8] sm:$0xff]  }
 0x7d8   :  { %v9202_v53 = vrot.slane %v9201_v10, 4  ;;  %v9244_v10 = vrot.slane %v9242_v54, 5  ;;  %v8847_v54 = vld [vmem:[#allocation2 + $0xd4] sm:$0x1] }
 0x7d9   :  { %12556 = vmatmul.mubr.bf16.gmra.mrb[96].mxu1 %v15275_v9  ;;  %v8839_v9 = vld [vmem:[#allocation2 + $0xb4] sm:$0xf] }
 0x7da   :  { %12563 = vmatprep.mubr.bf16.mxu1 %v13679_v55  ;;  %v9222_v55 = vshrl.u32 %v8840_v40, 16  ;;  %v9209_v27 = vshrl.u32 %v8839_v9, 16  ;;  %v9212_v0 = vshll.u32 %v8839_v9, 16  ;;  %v9233_v40 = vshrl.u32 %v8842_v58, 16  ;;  %v8845_v9 = vld [vmem:[#allocation2 + $0xcc] sm:$0xf] }
 0x7db   :  { %v9257_v5 = vshrl.u32 %v8845_v9, 16 }
 0x7dc   :  { %v9224_v23 = vrot.slane %v9222_v55, 4  ;;  %v9211_v11 = vrot.slane %v9209_v27, 4  ;;  %v9214_v48 = vrot.slane %v9212_v0, 5  ;;  %v9230_v27 = vrot.slane %v9228_v57, 5  ;;  %v8849_v57 = vld [vmem:[#allocation2 + $0xf4] sm:$0xf] }
 0x7dd   :  { %v9235_v0 = vrot.slane %v9233_v40, 4 }
 0x7de   :  { %v9225_v44 = vor.u32 %v9224_v23, %v9220_v25  ;;  %v9215_v21 = vor.u32 %v9214_v48, %v9211_v11 }
 0x7e0   :  { %v9226_v63 = vrot.slane %v9225_v44, 4  ;;  %v9216_v55 = vrot.slane %v9215_v21, 4 }
 0x7e1   :  { %12564 = vmatmul.mubr.bf16.gmra.mrb[100].mxu1 %v15276_v28  ;;  %v9206_v28 = vrot.slane %v9204_v62, 5  ;;  %v9260_v62 = vshll.u32 %v8845_v9, 16  ;;  %v9290_v9 = vshll.u32 %v8849_v57, 16 }
 0x7e2   :  { %12571 = vmatprep.mubr.bf16.mxu1 %v13680_v45  ;;  %v9246_v45 = vshrl.u32 %v8843_v34, 16  ;;  %v9231_v33 = vsel %vm17021_vm4, %v9226_v63, %v9230_v27  ;;  %v9221_v11 = vsel %vm17021_vm4, %v9216_v55, %v9220_v25  ;;  %v9252_v34 = vshll.u32 %v8844_v12, 16  ;;  %v15280_v55 = vld [vmem:[#allocation2 + $0xb4] sm:$0xff]  }
 0x7e3   :  { %v9207_v59 = vsel %vm17021_vm4, %v9202_v53, %v9206_v28  ;;  %v9270_v53 = vshrl.u32 %v8846_v35, 16  ;;  %v9259_v28 = vrot.slane %v9257_v5, 4  ;;  %v9262_v29 = vrot.slane %v9260_v62, 5 }
 0x7e4   :  { %v13682_v8 = vcombine.low %v9197_v26, %v9207_v59  ;;  %v9248_v2 = vrot.slane %v9246_v45, 4  ;;  %v13683_v44 = vcombine.low %v9221_v11, %v9231_v33  ;;  %v9254_v21 = vrot.slane %v9252_v34, 5  ;;  %v8851_v34 = vld [vmem:[#allocation2 + $0xfc] sm:$0xf] }
 0x7e5   :  { %v9272_v59 = vrot.slane %v9270_v53, 4  ;;  %v9276_v26 = vshll.u32 %v8847_v54, 16  ;;  %v9292_v62 = vrot.slane %v9290_v9, 5  ;;  %v8852_v53 = vld [vmem:[#allocation2 + $0x100] sm:$0xf]  ;;  %v9308_v54 = vshll.u32 %v8851_v34, 16 }
 0x7e6   :  { %v9249_v23 = vor.u32 %v9248_v2, %v9244_v10 }
 0x7e7   :  { %v9278_v12 = vrot.slane %v9276_v26, 5  ;;  %v9310_v26 = vrot.slane %v9308_v54, 5  ;;  %v8857_v54 = vld [vmem:[#allocation2 + $0x114] sm:$0xf] }
 0x7e8   :  { %v9250_v45 = vrot.slane %v9249_v23, 4 }
 0x7e9   :  { %12572 = vmatmul.mubr.bf16.gmra.mrb[104].mxu1 %v15277_v1  ;;  %v9238_v1 = vrot.slane %v9236_v38, 5  ;;  %v9263_v38 = vor.u32 %v9262_v29, %v9259_v28  ;;  %v9314_v28 = vshll.u32 %v8852_v53, 16  ;;  %v9318_v29 = vshrl.u32 %v8852_v53, 16 }
 0x7ea   :  { %12579 = vmatprep.mubr.bf16.mxu1 %v13681_v18  ;;  %v9266_v18 = vshll.u32 %v8846_v35, 16  ;;  %v9255_v25 = vsel %vm17021_vm4, %v9250_v45, %v9254_v21  ;;  %v9294_v35 = vshrl.u32 %v8849_v57, 16  ;;  %v15281_v45 = vld [vmem:[#allocation2 + $0xc0] sm:$0xff]  }
 0x7eb   :  { %v9239_v48 = vor.u32 %v9238_v1, %v9235_v0  ;;  %v9264_v0 = vrot.slane %v9263_v38, 4  ;;  %v9316_v38 = vrot.slane %v9314_v28, 5 }
 0x7ec   :  { %v9268_v58 = vrot.slane %v9266_v18, 5  ;;  %v9296_v18 = vrot.slane %v9294_v35, 4  ;;  %v8853_v35 = vld [vmem:[#allocation2 + $0x104] sm:$0x1] }
 0x7ed   :  { %v9240_v40 = vrot.slane %v9239_v48, 4 }
 0x7ee   :  { %v9269_v33 = vsel %vm17021_vm4, %v9264_v0, %v9268_v58 }
 0x7ef   :  { %v9245_v27 = vsel %vm17021_vm4, %v9240_v40, %v9244_v10  ;;  %v9297_v10 = vor.u32 %v9296_v18, %v9292_v62  ;;  %v9324_v18 = vshll.u32 %v8853_v35, 16 }
 0x7f0   :  { %v13684_v5 = vcombine.low %v9245_v27, %v9255_v25 }
 0x7f1   :  { %12580 = vmatmul.mubr.bf16.gmra.mrb[108].mxu1 %v15278_v17  ;;  %v9273_v17 = vor.u32 %v9272_v59, %v9268_v58  ;;  %v9298_v40 = vrot.slane %v9297_v10, 4  ;;  %v9320_v58 = vrot.slane %v9318_v29, 4  ;;  %v8858_v10 = vld [vmem:[#allocation2 + $0x118] sm:$0xf]  ;;  %v9326_v28 = vrot.slane %v9324_v18, 5 }
 0x7f2   :  { %12587 = vmatprep.mubr.bf16.mxu1 %v13682_v8  ;;  %v8848_v8 = vld [vmem:[#allocation2 + $0xf0] sm:$0xf]  ;;  %v8859_v18 = vld [vmem:[#allocation2 + $0x11c] sm:$0x1] }
 0x7f3   :  { %v9281_v63 = vshrl.u32 %v8848_v8, 16  ;;  %v9284_v2 = vshll.u32 %v8848_v8, 16  ;;  %v9274_v1 = vrot.slane %v9273_v17, 4  ;;  %v8855_v8 = vld [vmem:[#allocation2 + $0x10c] sm:$0xf]  ;;  %v9321_v27 = vor.u32 %v9320_v58, %v9316_v38  ;;  %v15283_v58 = vld [vmem:[#allocation2 + $0xf0] sm:$0xff]  }
 0x7f4   :  { %v9338_v0 = vshll.u32 %v8855_v8, 16 }
 0x7f5   :  { %v9279_v23 = vsel %vm17021_vm4, %v9274_v1, %v9278_v12  ;;  %v9283_v11 = vrot.slane %v9281_v63, 4  ;;  %v9286_v48 = vrot.slane %v9284_v2, 5  ;;  %v8854_v63 = vld [vmem:[#allocation2 + $0x108] sm:$0xf]  ;;  %v15282_v2 = vld [vmem:[#allocation2 + $0xcc] sm:$0xff]   ;;  %v9342_v1 = vshrl.u32 %v8855_v8, 16 }
 0x7f6   :  { %v13685_v59 = vcombine.low %v9269_v33, %v9279_v23  ;;  %v9329_v53 = vshrl.u32 %v8854_v63, 16  ;;  %v9332_v33 = vshll.u32 %v8854_v63, 16  ;;  %v9353_v8 = vshrl.u32 %v8857_v54, 16 }
 0x7f7   :  { %v9287_v21 = vor.u32 %v9286_v48, %v9283_v11  ;;  %v9322_v11 = vrot.slane %v9321_v27, 4  ;;  %v9340_v48 = vrot.slane %v9338_v0, 5 }
 0x7f8   :  { %v9331_v29 = vrot.slane %v9329_v53, 4 }
 0x7f9   :  { %12588 = vmatmul.mubr.bf16.gmra.mrb[112].mxu1 %v15279_v16  ;;  %v8850_v16 = vld [vmem:[#allocation2 + $0xf8] sm:$0x1]  ;;  %v9288_v25 = vrot.slane %v9287_v21, 4  ;;  %v9362_v21 = vshll.u32 %v8858_v10, 16 }
 0x7fa   :  { %12595 = vmatprep.mubr.bf16.mxu1 %v13683_v44  ;;  %v9305_v44 = vshrl.u32 %v8851_v34, 16  ;;  %v9300_v57 = vshll.u32 %v8850_v16, 16  ;;  %v9344_v34 = vrot.slane %v9342_v1, 4  ;;  %v9355_v1 = vrot.slane %v9353_v8, 4 }
 0x7fb   :  { %v9364_v63 = vrot.slane %v9362_v21, 5 }
 0x7fc   :  { %v9307_v17 = vrot.slane %v9305_v44, 4  ;;  %v9302_v9 = vrot.slane %v9300_v57, 5  ;;  %v8856_v44 = vld [vmem:[#allocation2 + $0x110] sm:$0x1]  ;;  %v9366_v57 = vshrl.u32 %v8858_v10, 16 }
 0x7fe   :  { %v9311_v12 = vor.u32 %v9310_v26, %v9307_v17  ;;  %v9348_v26 = vshll.u32 %v8856_v44, 16 }
 0x800   :  { %v9312_v16 = vrot.slane %v9311_v12, 4  ;;  %v9350_v0 = vrot.slane %v9348_v26, 5  ;;  %v8863_v26 = vld [vmem:[#allocation2 + $0x12c] sm:$0xf] }
 0x801   :  { %12596 = vmatmul.mubr.bf16.gmra.mrb[116].mxu1 %v15280_v55  ;;  %v9303_v55 = vsel %vm17021_vm4, %v9298_v40, %v9302_v9 }
 0x802   :  { %12603 = vmatprep.mubr.bf16.mxu1 %v13684_v5  ;;  %v9293_v5 = vsel %vm17021_vm4, %v9288_v25, %v9292_v62  ;;  %v9345_v62 = vor.u32 %v9344_v34, %v9340_v48  ;;  %v9317_v40 = vsel %vm17021_vm4, %v9312_v16, %v9316_v38  ;;  %v9356_v25 = vshll.u32 %v8857_v54, 16  ;;  %v15284_v16 = vld [vmem:[#allocation2 + $0xfc] sm:$0xff]  }
 0x803   :  { %v13686_v23 = vcombine.low %v9293_v5, %v9303_v55  ;;  %v8861_v55 = vld [vmem:[#allocation2 + $0x124] sm:$0xf]  ;;  %v8860_v5 = vld [vmem:[#allocation2 + $0x120] sm:$0xf] }
 0x804   :  { %v9346_v35 = vrot.slane %v9345_v62, 4  ;;  %v9358_v12 = vrot.slane %v9356_v25, 5  ;;  %v9380_v34 = vshll.u32 %v8860_v5, 16 }
 0x806   :  { %v9351_v38 = vsel %vm17021_vm4, %v9346_v35, %v9350_v0  ;;  %v9382_v21 = vrot.slane %v9380_v34, 5  ;;  %v9401_v0 = vshrl.u32 %v8863_v26, 16 }
 0x809   :  { %12604 = vmatmul.mubr.bf16.gmra.mrb[120].mxu1 %v15281_v45  ;;  %v9327_v45 = vsel %vm17021_vm4, %v9322_v11, %v9326_v28  ;;  %v9377_v11 = vshrl.u32 %v8860_v5, 16  ;;  %v9359_v28 = vor.u32 %v9358_v12, %v9355_v1  ;;  %v9404_v1 = vshll.u32 %v8863_v26, 16 }
 0x80a   :  { %12611 = vmatprep.mubr.bf16.mxu1 %v13685_v59  ;;  %v9334_v59 = vrot.slane %v9332_v33, 5  ;;  %v13687_v9 = vcombine.low %v9317_v40, %v9327_v45  ;;  %v9386_v33 = vshll.u32 %v8861_v55, 16 }
 0x80b   :  { %v9379_v62 = vrot.slane %v9377_v11, 4  ;;  %v9360_v40 = vrot.slane %v9359_v28, 4  ;;  %v9403_v11 = vrot.slane %v9401_v0, 4  ;;  %v9406_v34 = vrot.slane %v9404_v1, 5 }
 0x80c   :  { %v9335_v17 = vor.u32 %v9334_v59, %v9331_v29  ;;  %v9372_v29 = vshll.u32 %v8859_v18, 16  ;;  %v9388_v54 = vrot.slane %v9386_v33, 5  ;;  %v8867_v33 = vld [vmem:[#allocation2 + $0x13c] sm:$0xf] }
 0x80d   :  { %v9383_v35 = vor.u32 %v9382_v21, %v9379_v62  ;;  %v9407_v62 = vor.u32 %v9406_v34, %v9403_v11 }
 0x80e   :  { %v9336_v27 = vrot.slane %v9335_v17, 4  ;;  %v8862_v17 = vld [vmem:[#allocation2 + $0x128] sm:$0x1] }
 0x810   :  { %v9341_v10 = vsel %vm17021_vm4, %v9336_v27, %v9340_v48  ;;  %v9396_v27 = vshll.u32 %v8862_v17, 16 }
 0x811   :  { %12612 = vmatmul.mubr.bf16.gmra.mrb[124].mxu1 %v15282_v2  ;;  %v9368_v2 = vrot.slane %v9366_v57, 4  ;;  %v13688_v59 = vcombine.low %v9341_v10, %v9351_v38  ;;  %v8864_v57 = vld [vmem:[#allocation2 + $0x130] sm:$0xf]  ;;  %v8866_v10 = vld [vmem:[#allocation2 + $0x138] sm:$0xf] }
 0x812   :  { %12619 = vmatprep.mubr.bf16.mxu1 %v13686_v23  ;;  %v9390_v23 = vshrl.u32 %v8861_v55, 16  ;;  %v9410_v48 = vshll.u32 %v8864_v57, 16  ;;  %v9365_v55 = vsel %vm17021_vm4, %v9360_v40, %v9364_v63  ;;  %v9428_v40 = vshll.u32 %v8866_v10, 16 }
 0x813   :  { %v9369_v53 = vor.u32 %v9368_v2, %v9364_v63  ;;  %v15285_v2 = vld [vmem:[#allocation2 + $0x108] sm:$0xff]  }
 0x814   :  { %v9392_v45 = vrot.slane %v9390_v23, 4  ;;  %v9412_v18 = vrot.slane %v9410_v48, 5  ;;  %v9398_v23 = vrot.slane %v9396_v27, 5  ;;  %v9408_v48 = vrot.slane %v9407_v62, 4  ;;  %v8869_v27 = vld [vmem:[#allocation2 + $0x144] sm:$0xf] }
 0x815   :  { %v9370_v44 = vrot.slane %v9369_v53, 4  ;;  %v9384_v53 = vrot.slane %v9383_v35, 4  ;;  %v8868_v35 = vld [vmem:[#allocation2 + $0x140] sm:$0x1]  ;;  %v9452_v11 = vshll.u32 %v8869_v27, 16 }
 0x816   :  { %v9393_v25 = vor.u32 %v9392_v45, %v9388_v54  ;;  %v15286_v45 = vld [vmem:[#allocation2 + $0x114] sm:$0xff]  }
 0x817   :  { %v9454_v62 = vrot.slane %v9452_v11, 5 }
 0x818   :  { %v9394_v5 = vrot.slane %v9393_v25, 4  ;;  %v8870_v25 = vld [vmem:[#allocation2 + $0x148] sm:$0xf] }
 0x819   :  { %12620 = vmatmul.mubr.bf16.gmra.mrb[128].mxu1 %v15283_v58  ;;  %v9374_v58 = vrot.slane %v9372_v29, 5  ;;  %v9434_v29 = vshll.u32 %v8867_v33, 16  ;;  %v9458_v1 = vshll.u32 %v8870_v25, 16 }
 0x81a   :  { %12627 = vmatprep.mubr.bf16.mxu1 %v13687_v9  ;;  %v9414_v9 = vshrl.u32 %v8864_v57, 16  ;;  %v9399_v28 = vsel %vm17021_vm4, %v9394_v5, %v9398_v23  ;;  %v9425_v57 = vshrl.u32 %v8866_v10, 16  ;;  %v9444_v5 = vshll.u32 %v8868_v35, 16 }
 0x81b   :  { %v9375_v8 = vsel %vm17021_vm4, %v9370_v44, %v9374_v58  ;;  %v9389_v44 = vsel %vm17021_vm4, %v9384_v53, %v9388_v54  ;;  %v9436_v26 = vrot.slane %v9434_v29, 5  ;;  %v9413_v53 = vsel %vm17021_vm4, %v9408_v48, %v9412_v18 }
 0x81c   :  { %v13689_v12 = vcombine.low %v9365_v55, %v9375_v8  ;;  %v9416_v38 = vrot.slane %v9414_v9, 4  ;;  %v13690_v58 = vcombine.low %v9389_v44, %v9399_v28  ;;  %v9430_v55 = vrot.slane %v9428_v40, 5  ;;  %v8871_v44 = vld [vmem:[#allocation2 + $0x14c] sm:$0x1] }
 0x81d   :  { %v9449_v23 = vshrl.u32 %v8869_v27, 16  ;;  %v9460_v10 = vrot.slane %v9458_v1, 5 }
 0x81e   :  { %v9417_v63 = vor.u32 %v9416_v38, %v9412_v18  ;;  %v15287_v38 = vld [vmem:[#allocation2 + $0x120] sm:$0xff]  }
 0x820   :  { %v9418_v17 = vrot.slane %v9417_v63, 4  ;;  %v8873_v63 = vld [vmem:[#allocation2 + $0x154] sm:$0xf] }
 0x821   :  { %12628 = vmatmul.mubr.bf16.gmra.mrb[132].mxu1 %v15284_v16  ;;  %v8865_v16 = vld [vmem:[#allocation2 + $0x134] sm:$0x1]  ;;  %v9482_v40 = vshll.u32 %v8873_v63, 16 }
 0x822   :  { %12635 = vmatprep.mubr.bf16.mxu1 %v13688_v59  ;;  %v9438_v59 = vshrl.u32 %v8867_v33, 16  ;;  %v9420_v21 = vshll.u32 %v8865_v16, 16 }
 0x823   :  { %v9484_v27 = vrot.slane %v9482_v40, 5 }
 0x824   :  { %v9440_v8 = vrot.slane %v9438_v59, 4  ;;  %v9422_v9 = vrot.slane %v9420_v21, 5  ;;  %v9446_v59 = vrot.slane %v9444_v5, 5  ;;  %v8872_v21 = vld [vmem:[#allocation2 + $0x150] sm:$0xf] }
 0x825   :  { %v9476_v35 = vshll.u32 %v8872_v21, 16 }
 0x826   :  { %v9423_v54 = vsel %vm17021_vm4, %v9418_v17, %v9422_v9  ;;  %v9441_v0 = vor.u32 %v9440_v8, %v9436_v26  ;;  %v9468_v17 = vshll.u32 %v8871_v44, 16  ;;  %v15288_v8 = vld [vmem:[#allocation2 + $0x12c] sm:$0xff]   ;;  %v9473_v9 = vshrl.u32 %v8872_v21, 16 }
 0x827   :  { %v13691_v34 = vcombine.low %v9413_v53, %v9423_v54  ;;  %v8875_v53 = vld [vmem:[#allocation2 + $0x15c] sm:$0xf] }
 0x828   :  { %v9442_v16 = vrot.slane %v9441_v0, 4  ;;  %v8876_v0 = vld [vmem:[#allocation2 + $0x160] sm:$0xf]  ;;  %v9475_v5 = vrot.slane %v9473_v9, 4 }
 0x829   :  { %12636 = vmatmul.mubr.bf16.gmra.mrb[136].mxu1 %v15285_v2  ;;  %v9427_v2 = vrot.slane %v9425_v57, 4  ;;  %v9506_v11 = vshll.u32 %v8876_v0, 16 }
 0x82a   :  { %12643 = vmatprep.mubr.bf16.mxu1 %v13689_v12  ;;  %v9462_v12 = vshrl.u32 %v8870_v25, 16  ;;  %v9447_v57 = vsel %vm17021_vm4, %v9442_v16, %v9446_v59  ;;  %v9497_v16 = vshrl.u32 %v8875_v53, 16 }
 0x82b   :  { %v9431_v33 = vor.u32 %v9430_v55, %v9427_v2  ;;  %v9508_v21 = vrot.slane %v9506_v11, 5  ;;  %v8882_v11 = vld [vmem:[#allocation2 + $0x178] sm:$0xf] }
 0x82c   :  { %v9464_v28 = vrot.slane %v9462_v12, 4  ;;  %v9470_v12 = vrot.slane %v9468_v17, 5 }
 0x82d   :  { %v9432_v29 = vrot.slane %v9431_v33, 4  ;;  %v8874_v33 = vld [vmem:[#allocation2 + $0x158] sm:$0x1] }
 0x82e   :  { %v9465_v18 = vor.u32 %v9464_v28, %v9460_v10  ;;  %v9500_v28 = vshll.u32 %v8875_v53, 16  ;;  %v9492_v44 = vshll.u32 %v8874_v33, 16 }
 0x82f   :  { %v9437_v25 = vsel %vm17021_vm4, %v9432_v29, %v9436_v26 }
 0x830   :  { %v13692_v2 = vcombine.low %v9437_v25, %v9447_v57  ;;  %v9466_v55 = vrot.slane %v9465_v18, 4  ;;  %v9499_v18 = vrot.slane %v9497_v16, 4  ;;  %v9502_v40 = vrot.slane %v9500_v28, 5  ;;  %v8877_v25 = vld [vmem:[#allocation2 + $0x164] sm:$0x1] }
 0x831   :  { %12644 = vmatmul.mubr.bf16.gmra.mrb[140].mxu1 %v15286_v45  ;;  %v9451_v45 = vrot.slane %v9449_v23, 4 }
 0x832   :  { %12651 = vmatprep.mubr.bf16.mxu1 %v13690_v58  ;;  %v9486_v58 = vshrl.u32 %v8873_v63, 16  ;;  %v9471_v23 = vsel %vm17021_vm4, %v9466_v55, %v9470_v12  ;;  %v15289_v63 = vld [vmem:[#allocation2 + $0x138] sm:$0xff]   ;;  %v9503_v55 = vor.u32 %v9502_v40, %v9499_v18 }
 0x833   :  { %v9455_v48 = vor.u32 %v9454_v62, %v9451_v45 }
 0x834   :  { %v9488_v54 = vrot.slane %v9486_v58, 4  ;;  %v8879_v58 = vld [vmem:[#allocation2 + $0x16c] sm:$0xf] }
 0x835   :  { %v9456_v1 = vrot.slane %v9455_v48, 4  ;;  %v8878_v48 = vld [vmem:[#allocation2 + $0x168] sm:$0xf] }
 0x836   :  { %v9489_v26 = vor.u32 %v9488_v54, %v9484_v27  ;;  %v15290_v54 = vld [vmem:[#allocation2 + $0x144] sm:$0xff]   ;;  %v9521_v12 = vshrl.u32 %v8878_v48, 16 }
 0x837   :  { %v9461_v29 = vsel %vm17021_vm4, %v9456_v1, %v9460_v10  ;;  %v9530_v10 = vshll.u32 %v8879_v58, 16  ;;  %v9516_v1 = vshll.u32 %v8877_v25, 16 }
 0x838   :  { %v13693_v45 = vcombine.low %v9461_v29, %v9471_v23  ;;  %v9490_v62 = vrot.slane %v9489_v26, 4  ;;  %v9504_v26 = vrot.slane %v9503_v55, 4  ;;  %v9523_v16 = vrot.slane %v9521_v12, 4  ;;  %v8881_v29 = vld [vmem:[#allocation2 + $0x174] sm:$0xf] }
 0x839   :  { %12652 = vmatmul.mubr.bf16.gmra.mrb[144].mxu1 %v15287_v38  ;;  %v9478_v38 = vrot.slane %v9476_v35, 5  ;;  %v9532_v33 = vrot.slane %v9530_v10, 5  ;;  %v8884_v10 = vld [vmem:[#allocation2 + $0x180] sm:$0xf] }
 0x83a   :  { %12659 = vmatprep.mubr.bf16.mxu1 %v13691_v34  ;;  %v9510_v34 = vshrl.u32 %v8876_v0, 16 }
 0x83b   :  { %v9479_v59 = vor.u32 %v9478_v38, %v9475_v5  ;;  %v9524_v5 = vshll.u32 %v8878_v48, 16 }
 0x83c   :  { %v9512_v57 = vrot.slane %v9510_v34, 4  ;;  %v9518_v34 = vrot.slane %v9516_v1, 5  ;;  %v8883_v1 = vld [vmem:[#allocation2 + $0x17c] sm:$0x1] }
 0x83d   :  { %v9480_v17 = vrot.slane %v9479_v59, 4  ;;  %v9526_v28 = vrot.slane %v9524_v5, 5 }
 0x83e   :  { %v9513_v35 = vor.u32 %v9512_v57, %v9508_v21  ;;  %v15291_v57 = vld [vmem:[#allocation2 + $0x150] sm:$0xff]  }
 0x83f   :  { %v9485_v0 = vsel %vm17021_vm4, %v9480_v17, %v9484_v27  ;;  %v9527_v18 = vor.u32 %v9526_v28, %v9523_v16  ;;  %v9548_v17 = vshll.u32 %v8881_v29, 16  ;;  %v9564_v16 = vshll.u32 %v8883_v1, 16 }
 0x840   :  { %v9514_v53 = vrot.slane %v9513_v35, 4  ;;  %v8885_v35 = vld [vmem:[#allocation2 + $0x184] sm:$0xf] }
 0x841   :  { %12660 = vmatmul.mubr.bf16.gmra.mrb[148].mxu1 %v15288_v8  ;;  %v9494_v8 = vrot.slane %v9492_v44, 5  ;;  %v9554_v44 = vshll.u32 %v8882_v11, 16  ;;  %v9578_v12 = vshll.u32 %v8885_v35, 16 }
 0x842   :  { %12667 = vmatprep.mubr.bf16.mxu1 %v13692_v2  ;;  %v9534_v2 = vshrl.u32 %v8879_v58, 16  ;;  %v9519_v59 = vsel %vm17021_vm4, %v9514_v53, %v9518_v34  ;;  %v9545_v58 = vshrl.u32 %v8881_v29, 16  ;;  %v9569_v53 = vshrl.u32 %v8884_v10, 16 }
 0x843   :  { %v9495_v9 = vsel %vm17021_vm4, %v9490_v62, %v9494_v8  ;;  %v9509_v62 = vsel %vm17021_vm4, %v9504_v26, %v9508_v21  ;;  %v9556_v48 = vrot.slane %v9554_v44, 5  ;;  %v9582_v21 = vshrl.u32 %v8885_v35, 16  ;;  %v15292_v26 = vld [vmem:[#allocation2 + $0x15c] sm:$0xff]  }
 0x844   :  { %v13694_v38 = vcombine.low %v9485_v0, %v9495_v9  ;;  %v9536_v23 = vrot.slane %v9534_v2, 4  ;;  %v13695_v8 = vcombine.low %v9509_v62, %v9519_v59  ;;  %v9528_v2 = vrot.slane %v9527_v18, 4  ;;  %v8887_v59 = vld [vmem:[#allocation2 + $0x18c] sm:$0xf]  ;;  %v8888_v62 = vld [vmem:[#allocation2 + $0x190] sm:$0xf] }
 0x845   :  { %v9550_v0 = vrot.slane %v9548_v17, 5  ;;  %v9584_v29 = vrot.slane %v9582_v21, 4  ;;  %v9571_v44 = vrot.slane %v9569_v53, 4  ;;  %v9566_v18 = vrot.slane %v9564_v16, 5 }
 0x846   :  { %v9537_v27 = vor.u32 %v9536_v23, %v9532_v33  ;;  %v9572_v23 = vshll.u32 %v8884_v10, 16  ;;  %v9596_v17 = vshll.u32 %v8887_v59, 16  ;;  %v9606_v35 = vshrl.u32 %v8888_v62, 16 }
 0x848   :  { %v9538_v25 = vrot.slane %v9537_v27, 4  ;;  %v9598_v1 = vrot.slane %v9596_v17, 5 }
 0x849   :  { %12668 = vmatmul.mubr.bf16.gmra.mrb[152].mxu1 %v15289_v63  ;;  %v8880_v63 = vld [vmem:[#allocation2 + $0x170] sm:$0x1] }
 0x84a   :  { %12675 = vmatprep.mubr.bf16.mxu1 %v13693_v45  ;;  %v9558_v45 = vshrl.u32 %v8882_v11, 16  ;;  %v9540_v40 = vshll.u32 %v8880_v63, 16  ;;  %v9533_v11 = vsel %vm17021_vm4, %v9528_v2, %v9532_v33  ;;  %v9580_v63 = vrot.slane %v9578_v12, 5  ;;  %v15293_v2 = vld [vmem:[#allocation2 + $0x168] sm:$0xff]  }
 0x84c   :  { %v9560_v9 = vrot.slane %v9558_v45, 4  ;;  %v9542_v55 = vrot.slane %v9540_v40, 5  ;;  %v9574_v45 = vrot.slane %v9572_v23, 5  ;;  %v8886_v40 = vld [vmem:[#allocation2 + $0x188] sm:$0x1]  ;;  %v9608_v23 = vrot.slane %v9606_v35, 4 }
 0x84d   :  { %v9588_v10 = vshll.u32 %v8886_v40, 16 }
 0x84e   :  { %v9543_v5 = vsel %vm17021_vm4, %v9538_v25, %v9542_v55  ;;  %v9575_v25 = vor.u32 %v9574_v45, %v9571_v44 }
 0x84f   :  { %v13696_v28 = vcombine.low %v9533_v11, %v9543_v5  ;;  %v8890_v5 = vld [vmem:[#allocation2 + $0x198] sm:$0xf] }
 0x850   :  { %v15312_v11 = vld [vmem:[%s19401_s0 + $0x18] sm:$0xff]  ;;  %v9617_v44 = vshrl.u32 %v8890_v5, 16  ;;  %v9620_v40 = vshll.u32 %v8890_v5, 16  ;;  %v8893_v5 = vld [vmem:[#allocation2 + $0x1a4] sm:$0xf] }
 0x851   :  { %12676 = vmatmul.mubr.bf16.gmra.mrb[156].mxu1 %v15290_v54  ;;  %v9547_v54 = vrot.slane %v9545_v58, 4  ;;  %v9593_v58 = vshrl.u32 %v8887_v59, 16 }
 0x852   :  { %12683 = vmatprep.mubr.bf16.mxu1 %v13694_v38  ;;  %v9561_v38 = vor.u32 %v9560_v9, %v9556_v48  ;;  %v9602_v9 = vshll.u32 %v8888_v62, 16  ;;  %v15314_v62 = vld [vmem:[%s19401_s0 + $0x28] sm:$0x3] }
 0x853   :  { %v9551_v34 = vor.u32 %v9550_v0, %v9547_v54  ;;  %v8889_v54 = vld [vmem:[#allocation2 + $0x194] sm:$0x1]  ;;  %v9595_v0 = vrot.slane %v9593_v58, 4 }
 0x854   :  { %v9562_v27 = vrot.slane %v9561_v38, 4  ;;  %v9576_v38 = vrot.slane %v9575_v25, 4  ;;  %v18854_v53 = vrot.slane %v9602_v9, 5  ;;  %v9612_v59 = vshll.u32 %v8889_v54, 16 }
 0x856   :  { %v9567_v33 = vsel %vm17021_vm4, %v9562_v27, %v9566_v18  ;;  %v9599_v27 = vor.u32 %v9598_v1, %v9595_v0  ;;  %v15294_v1 = vld [vmem:[#allocation2 + $0x174] sm:$0xff]  }
 0x859   :  { %12684 = vmatmul.mubr.bf16.gmra.mrb[160].mxu1 %v15291_v57  ;;  %v9552_v57 = vrot.slane %v9551_v34, 4  ;;  %v10929_v34 = vrot.slane %v15312_v11, 1 }
 0x85a   :  { %12691 = vmatprep.mubr.bf16.mxu1 %v13695_v8  ;;  %v9585_v8 = vor.u32 %v9584_v29, %v9580_v63  ;;  %v9590_v29 = vrot.slane %v9588_v10, 5  ;;  %v9581_v10 = vsel %vm17021_vm4, %v9576_v38, %v9580_v63 }
 0x85b   :  { %v9557_v55 = vsel %vm17021_vm4, %v9552_v57, %v9556_v48  ;;  %v15313_v48 = vld [vmem:[%s19401_s0 + $0x20] sm:$0xff]  ;;  %v10932_v57 = vrot.slane %v15314_v62, 1  ;;  %v9641_v62 = vshrl.u32 %v8893_v5, 16 }
 0x85c   :  { %v13697_v12 = vcombine.low %v9557_v55, %v9567_v33  ;;  %v9586_v21 = vrot.slane %v9585_v8, 4  ;;  %v10930_v16 = vrot.slane %v15313_v48, 1  ;;  %v9609_v33 = vor.u32 %v9608_v23, %v18854_v53 }
 0x85d   :  { %v9600_v23 = vrot.slane %v9599_v27, 4 }
 0x85e   :  { %v9591_v18 = vsel %vm17021_vm4, %v9586_v21, %v9590_v29  ;;  %v10931_v9 = vsel %vm747_vm1, %v10929_v34, %v10930_v16  ;;  %v9619_v21 = vrot.slane %v9617_v44, 4  ;;  %v10933_v11 = vsel %vm747_vm1, %v10930_v16, %v10932_v57  ;;  %v8894_v34 = vld [vmem:[#allocation2 + $0x1a8] sm:$0xf]  ;;  %v15315_v44 = vld [vmem:[%s19401_s0 + $0x30] sm:$0xff]  ;;  %v15316_v16 = vld [vmem:[%s19401_s0 + $0x38] sm:$0xff] }
 0x85f   :  { %v9610_v38 = vrot.slane %v9609_v33, 4  ;;  %v10935_v27 = vrot.slane %v15316_v16, 1  ;;  %v9644_v57 = vshll.u32 %v8893_v5, 16 }
 0x861   :  { %12692 = vmatmul.mubr.bf16.gmra.mrb[164].mxu1 %v15292_v26  ;;  %v8891_v26 = vld [vmem:[#allocation2 + $0x19c] sm:$0xf] }
 0x862   :  { %12699 = vmatprep.mubr.bf16.mxu1 %v13696_v28  ;;  %v18865_v28 = vld [vmem:[%s19405_s4] ss:$0 sm:$0xff]  ;;  %v9626_v58 = vshll.u32 %v8891_v26, 16  ;;  %v9630_v25 = vshrl.u32 %v8891_v26, 16  ;;  %v9622_v26 = vrot.slane %v9620_v40, 5 }
 0x864   :  { %v18880_v48 = vrot.slane %v9626_v58, 5  ;;  %v9654_v58 = vshrl.u32 %v8894_v34, 16  ;;  %v9623_v5 = vor.u32 %v9622_v26, %v9619_v21 }
 0x866   :  { %v9656_v16 = vrot.slane %v9654_v58, 4 }
 0x869   :  { %12700 = vmatmul.mubr.bf16.gmra.mrb[168].mxu1 %v15293_v2  ;;  %v9614_v2 = vrot.slane %v9612_v59, 5  ;;  %v9632_v59 = vrot.slane %v9630_v25, 4  ;;  %v9605_v25 = vsel %vm17021_vm4, %v9600_v23, %v18854_v53 }
 0x86a   :  { %12707 = vmatprep.mubr.bf16.mxu1 %v13697_v12  ;;  %v13698_v12 = vcombine.low %v9581_v10, %v9591_v18 }
 0x86c   :  { %v12493_v45 = vpop.f32.mrb[64].mxu1 }
 0x86d   :  { %v14223_v17 = vadd.f32 %v18865_v28, %v12493_v45  ;;  %v12495_v8 = vpop.f32.mrb[65].mxu1  ;;  %v10934_v45 = vrot.slane %v15315_v44, 1 }
 0x86e   :  { %v12496_v35 = vpop.f32.mrb[66].mxu1  ;;  %v15317_v8 = vld [vmem:[%s19401_s0 + $0x40] sm:$0x3] }
 0x86f   :  { %v12783_v55 = vadd.f32 %v14223_v17, %v17877_v19  ;;  %v14224_v54 = vadd.f32 %v18865_v28, %v12496_v35  ;;  %v12498_v0 = vpop.f32.mrb[67].mxu1  ;;  %v8892_v19 = vld [vmem:[#allocation2 + $0x1a0] sm:$0x1]  ;;  %v10937_v33 = vrot.slane %v15317_v8, 1 }
 0x870   :  { %v9633_v0 = vor.u32 %v9632_v59, %v18880_v48 }
 0x871   :  { %v13037_v29 = vadd.f32 %v12783_v55, %v10931_v9  ;;  %v12786_v63 = vadd.f32 %v14224_v54, %v17881_v49  ;;  %12708 = vmatmul.mubr.bf16.gmra.mrb[172].mxu1 %v15294_v1  ;;  %v9650_v49 = vshll.u32 %v8894_v34, 16  ;;  %v9636_v9 = vshll.u32 %v8892_v19, 16  ;;  %v8895_v19 = vld [vmem:[#allocation2 + $0x1ac] sm:$0x1] }
 0x872   :  { %12715 = vmatprep.mubr.bf16.mxu1 %v13698_v12  ;;  %v9615_v54 = vsel %vm17021_vm4, %v9610_v38, %v9614_v2  ;;  %v10936_v1 = vsel %vm747_vm1, %v10934_v45, %v10935_v27  ;;  %v9646_v34 = vrot.slane %v9644_v57, 5  ;;  %v10938_v2 = vsel %vm747_vm1, %v10935_v27, %v10937_v33  ;;  %v15319_v57 = vld [vmem:[%s19401_s0 + $0x50] sm:$0xff]  ;;  %v15320_v33 = vld [vmem:[%s19401_s0 + $0x58] sm:$0x3] }
 0x873   :  { %v13101_v18 = vmax.f32 %v13037_v29, 0.0  ;;  %v13038_v40 = vadd.f32 %v12786_v63, %v10933_v11  ;;  %v9643_v11 = vrot.slane %v9641_v62, 4  ;;  %v15295_v63 = vld [vmem:[#allocation2 + $0x180] sm:$0xff]   ;;  %v18902_v44 = vrot.slane %v9650_v49, 5 }
 0x874   :  { %v12501_v17 = vpop.f32.mrb[68].mxu1  ;;  %v13699_v38 = vcombine.low %v9605_v25, %v9615_v54  ;;  %v9634_v21 = vrot.slane %v9633_v0, 4  ;;  %v9638_v26 = vrot.slane %v9636_v9, 5  ;;  %v9660_v27 = vshll.u32 %v8895_v19, 16 }
 0x875   :  { %13165 = vst [vmem:[#allocation4] sm:$0xff] %v13101_v18  ;;  %v13102_v35 = vmax.f32 %v13038_v40, 0.0  ;;  %v14225_v10 = vadd.f32 %v18865_v28, %v12501_v17  ;;  %v12503_v55 = vpop.f32.mrb[69].mxu1  ;;  %v10940_v18 = vrot.slane %v15319_v57, 1  ;;  %v9624_v40 = vrot.slane %v9623_v5, 4 }
 0x876   :  { %v12504_v12 = vpop.f32.mrb[70].mxu1  ;;  %v9647_v17 = vor.u32 %v9646_v34, %v9643_v11  ;;  %v10942_v25 = vrot.slane %v15320_v33, 1  ;;  %v9639_v55 = vsel %vm17021_vm4, %v9634_v21, %v9638_v26  ;;  %v15323_v57 = vld [vmem:[%s19401_s0 + $0x70] sm:$0x3] }
 0x877   :  { %13166 = vst [vmem:[#allocation4 + $0x8] sm:$0xff] %v13102_v35  ;;  %v12791_v53 = vadd.f32 %v14225_v10, %v17870_v46  ;;  %v14226_v23 = vadd.f32 %v18865_v28, %v12504_v12  ;;  %v12506_v29 = vpop.f32.mrb[71].mxu1  ;;  %v15318_v46 = vld [vmem:[%s19401_s0 + $0x48] sm:$0xff]  ;;  %v9662_v12 = vrot.slane %v9660_v27, 5 }
 0x878   :  { %v10939_v62 = vrot.slane %v15318_v46, 1 }
 0x879   :  { %v13039_v59 = vadd.f32 %v12791_v53, %v10936_v1  ;;  %v12794_v45 = vadd.f32 %v14226_v23, %v17879_v51  ;;  %12716 = vmatmul.mubr.bf16.gmra.mrb[176].mxu1 %v15295_v63  ;;  %v9657_v51 = vor.u32 %v9656_v16, %v18902_v44  ;;  %v9629_v1 = vsel %vm17021_vm4, %v9624_v40, %v18880_v48  ;;  %v15296_v53 = vld [vmem:[#allocation2 + $0x18c] sm:$0xff]   ;;  %v15321_v48 = vld [vmem:[%s19401_s0 + $0x60] sm:$0xff] }
 0x87a   :  { %12723 = vmatprep.mubr.bf16.mxu1 %v13699_v38  ;;  %v10941_v54 = vsel %vm747_vm1, %v10939_v62, %v10940_v18  ;;  %v9648_v23 = vrot.slane %v9647_v17, 4  ;;  %v10943_v63 = vsel %vm747_vm1, %v10940_v18, %v10942_v25  ;;  %v13700_v19 = vcombine.low %v9629_v1, %v9639_v55  ;;  %v15297_v25 = vld [vmem:[#allocation2 + $0x198] sm:$0xff]   ;;  %v18947_v1 = vld [vmem:[#allocation2 + $0x190] sm:$0xf] }
 0x87b   :  { %v13103_v49 = vmax.f32 %v13039_v59, 0.0  ;;  %v13040_v58 = vadd.f32 %v12794_v45, %v10938_v2  ;;  %v9658_v29 = vrot.slane %v9657_v51, 4  ;;  %v10944_v38 = vrot.slane %v15321_v48, 1  ;;  %v9909_v45 = vld [vmem:[#allocation2 + $0x184] sm:$0xf] }
 0x87c   :  { %v12509_v8 = vpop.f32.mrb[72].mxu1  ;;  %v9653_v46 = vsel %vm17021_vm4, %v9648_v23, %v18902_v44  ;;  %v10947_v18 = vrot.slane %v15323_v57, 1 }
 0x87d   :  { %13167 = vst [vmem:[#allocation4 + $0x10] sm:$0xff] %v13103_v49  ;;  %v13104_v9 = vmax.f32 %v13040_v58, 0.0  ;;  %v14227_v35 = vadd.f32 %v18865_v28, %v12509_v8  ;;  %v12511_v10 = vpop.f32.mrb[73].mxu1  ;;  %v10214_v58 = vrot.slane %v9909_v45, 5 }
 0x87e   :  { %v12512_v0 = vpop.f32.mrb[74].mxu1 }
 0x87f   :  { %13168 = vst [vmem:[#allocation4 + $0x18] sm:$0xff] %v13104_v9  ;;  %v12799_v5 = vadd.f32 %v14227_v35, %v17925_v47  ;;  %v14228_v11 = vadd.f32 %v18865_v28, %v12512_v0  ;;  %v12514_v34 = vpop.f32.mrb[75].mxu1  ;;  %v15322_v47 = vld [vmem:[%s19401_s0 + $0x68] sm:$0xff]  ;;  %v10216_v0 = vrot.slane %v10214_v58, 4 }
 0x880   :  { %v10945_v59 = vrot.slane %v15322_v47, 1  ;;  %v9910_v35 = vld [vmem:[#allocation2 + $0x188] sm:$0x1]  ;;  %v18955_v34 = vld [vmem:[#allocation2 + $0x19c] sm:$0xf] }
 0x881   :  { %v13041_v16 = vadd.f32 %v12799_v5, %v10941_v54  ;;  %v12802_v2 = vadd.f32 %v14228_v11, %v17931_v41  ;;  %12724 = vmatmul.mubr.bf16.gmra.mrb[180].mxu1 %v15296_v53  ;;  %v9663_v41 = vsel %vm17021_vm4, %v9658_v29, %v9662_v12  ;;  %v9908_v54 = vld [vmem:[#allocation2 + $0x180] sm:$0xe]  ;;  %v15324_v12 = vld [vmem:[%s19401_s0 + $0x78] sm:$0xff]  ;;  %v10217_v23 = vrot.slane %v9910_v35, 5  ;;  %v15327_v35 = vld [vmem:[%s19401_s0 + $0x90] sm:$0xff] }
 0x882   :  { %12731 = vmatprep.mubr.bf16.mxu1 %v13700_v19  ;;  %v10946_v17 = vsel %vm747_vm1, %v10944_v38, %v10945_v59  ;;  %v13701_v8 = vcombine.low %v9653_v46, %v9663_v41  ;;  %v10948_v9 = vsel %vm747_vm1, %v10945_v59, %v10947_v18  ;;  %v15325_v5 = vld [vmem:[%s19401_s0 + $0x80] sm:$0xff]  ;;  %v9911_v41 = vld [vmem:[#allocation2 + $0x18c] sm:$0xe] }
 0x883   :  { %v13105_v21 = vmax.f32 %v13041_v16, 0.0  ;;  %v13042_v26 = vadd.f32 %v12802_v2, %v10943_v63  ;;  %v10950_v11 = vrot.slane %v15325_v5, 1  ;;  %v15326_v63 = vld [vmem:[%s19401_s0 + $0x88] sm:$0x3]  ;;  %v13730_v16 = vrot.slane %v9908_v54, 9 }
 0x884   :  { %v12517_v62 = vpop.f32.mrb[76].mxu1  ;;  %v10952_v19 = vrot.slane %v15326_v63, 1  ;;  %v10221_v2 = vrot.slane %v18947_v1, 5  ;;  %v15298_v59 = vld [vmem:[#allocation2 + $0x1a4] sm:$0xff]   ;;  %v10218_v45 = vsel %vm17220_vm15, %v10216_v0, %v10217_v23  ;;  %v9919_v5 = vld [vmem:[#allocation2 + $0x1ac] sm:$0x1] }
 0x885   :  { %13169 = vst [vmem:[#allocation4 + $0x20] sm:$0xff] %v13105_v21  ;;  %v13106_v40 = vmax.f32 %v13042_v26, 0.0  ;;  %v14229_v27 = vadd.f32 %v18865_v28, %v12517_v62  ;;  %v12519_v49 = vpop.f32.mrb[77].mxu1  ;;  %v10228_v21 = vrot.slane %v18955_v34, 5  ;;  %v15329_v34 = vld [vmem:[%s19401_s0 + $0xa0] sm:$0x3] }
 0x886   :  { %v12520_v51 = vpop.f32.mrb[78].mxu1  ;;  %v9918_v49 = vld [vmem:[#allocation2 + $0x1a8] sm:$0xf] }
 0x887   :  { %13170 = vst [vmem:[#allocation4 + $0x28] sm:$0xff] %v13106_v40  ;;  %v12807_v39 = vadd.f32 %v14229_v27, %v17923_v50  ;;  %v14230_v44 = vadd.f32 %v18865_v28, %v12520_v51  ;;  %v12522_v33 = vpop.f32.mrb[79].mxu1  ;;  %v10949_v50 = vrot.slane %v15324_v12, 1  ;;  %v10215_v40 = vsel %vm17220_vm15, %v13730_v16, %v10214_v58  ;;  %v9913_v27 = vld [vmem:[#allocation2 + $0x194] sm:$0x1] }
 0x888   :  { %v13762_v51 = vcombine.low %v10215_v40, %v10218_v45  ;;  %v10954_v58 = vrot.slane %v15327_v35, 1  ;;  %v10224_v54 = vrot.slane %v9913_v27, 5  ;;  %v10235_v0 = vrot.slane %v9918_v49, 5 }
 0x889   :  { %v13043_v10 = vadd.f32 %v12807_v39, %v10946_v17  ;;  %v12810_v55 = vadd.f32 %v14230_v44, %v17927_v13  ;;  %12732 = vmatmul.mubr.bf16.gmra.mrb[184].mxu1 %v15297_v25  ;;  %v10951_v26 = vsel %vm747_vm1, %v10949_v50, %v10950_v11  ;;  %v10953_v17 = vsel %vm747_vm1, %v10950_v11, %v10952_v19  ;;  %v9916_v39 = vld [vmem:[#allocation2 + $0x1a0] sm:$0x1]  ;;  %v9917_v50 = vld [vmem:[#allocation2 + $0x1a4] sm:$0xe] }
 0x88a   :  { %12739 = vmatprep.mubr.bf16.mxu1 %v13701_v8  ;;  %v10223_v8 = vrot.slane %v10221_v2, 4  ;;  %v13731_v25 = vrot.slane %v9911_v41, 9  ;;  %v10237_v45 = vrot.slane %v10235_v0, 4 }
 0x88b   :  { %v13107_v53 = vmax.f32 %v13043_v10, 0.0  ;;  %v13044_v13 = vadd.f32 %v12810_v55, %v10948_v9  ;;  %v9914_v9 = vld [vmem:[#allocation2 + $0x198] sm:$0xe] }
 0x88c   :  { %v12525_v29 = vpop.f32.mrb[80].mxu1  ;;  %v15328_v10 = vld [vmem:[%s19401_s0 + $0x98] sm:$0xff]  ;;  %v13732_v23 = vrot.slane %v9914_v9, 9  ;;  %v10222_v16 = vsel %vm17220_vm15, %v13731_v25, %v10221_v2 }
 0x88d   :  { %13171 = vst [vmem:[#allocation4 + $0x30] sm:$0xff] %v13107_v53  ;;  %v13108_v48 = vmax.f32 %v13044_v13, 0.0  ;;  %v14231_v38 = vadd.f32 %v18865_v28, %v12525_v29  ;;  %v12527_v47 = vpop.f32.mrb[81].mxu1  ;;  %v10955_v55 = vrot.slane %v15328_v10, 1  ;;  %v10957_v53 = vrot.slane %v15329_v34, 1  ;;  %v15334_v34 = vld [vmem:[%s19401_s0 + $0xc8] sm:$0xff] }
 0x88e   :  { %v12528_v46 = vpop.f32.mrb[82].mxu1  ;;  %v10225_v13 = vsel %vm17220_vm15, %v10223_v8, %v10224_v54  ;;  %v15332_v25 = vld [vmem:[%s19401_s0 + $0xb8] sm:$0x3] }
 0x88f   :  { %13172 = vst [vmem:[#allocation4 + $0x38] sm:$0xff] %v13108_v48  ;;  %v12815_v62 = vadd.f32 %v14231_v38, %v17973_v52  ;;  %v14232_v57 = vadd.f32 %v18865_v28, %v12528_v46  ;;  %v12530_v18 = vpop.f32.mrb[83].mxu1  ;;  %v10230_v52 = vrot.slane %v10228_v21, 4  ;;  %v10956_v38 = vsel %vm747_vm1, %v10954_v58, %v10955_v55 }
 0x890   :  { %v10229_v18 = vsel %vm17220_vm15, %v13732_v23, %v10228_v21  ;;  %v10958_v2 = vsel %vm747_vm1, %v10955_v55, %v10957_v53  ;;  %v10962_v9 = vrot.slane %v15332_v25, 1  ;;  %v10965_v53 = vrot.slane %v15334_v34, 1 }
 0x891   :  { %v13045_v44 = vadd.f32 %v12815_v62, %v10951_v26  ;;  %v12818_v33 = vadd.f32 %v14232_v57, %v17979_v37  ;;  %12740 = vmatmul.mubr.bf16.gmra.mrb[188].mxu1 %v15298_v59  ;;  %v10231_v37 = vrot.slane %v9916_v39, 5  ;;  %v13733_v59 = vrot.slane %v9917_v50, 9 }
 0x892   :  { %14135 = vmatprep.mubr.bf16.mxu1 %v13762_v51  ;;  %v10238_v26 = vrot.slane %v9919_v5, 5  ;;  %v13763_v57 = vcombine.low %v10222_v16, %v10225_v13  ;;  %v15331_v51 = vld [vmem:[%s19401_s0 + $0xb0] sm:$0xff]  ;;  %v15333_v5 = vld [vmem:[%s19401_s0 + $0xc0] sm:$0xff] }
 0x893   :  { %v13109_v1 = vmax.f32 %v13045_v44, 0.0  ;;  %v13046_v12 = vadd.f32 %v12818_v33, %v10953_v17  ;;  %v10232_v48 = vsel %vm17220_vm15, %v10230_v52, %v10231_v37  ;;  %v15330_v17 = vld [vmem:[%s19401_s0 + $0xa8] sm:$0xff]  ;;  %v10960_v8 = vrot.slane %v15331_v51, 1 }
 0x894   :  { %v12533_v11 = vpop.f32.mrb[84].mxu1  ;;  %v13764_v40 = vcombine.low %v10229_v18, %v10232_v48  ;;  %v10236_v21 = vsel %vm17220_vm15, %v13733_v59, %v10235_v0  ;;  %v10239_v39 = vsel %vm17220_vm15, %v10237_v45, %v10238_v26  ;;  %v15337_v18 = vld [vmem:[%s19401_s0 + $0xe0] sm:$0xff] }
 0x895   :  { %13173 = vst [vmem:[#allocation4 + $0x40] sm:$0xff] %v13109_v1  ;;  %v13110_v29 = vmax.f32 %v13046_v12, 0.0  ;;  %v14233_v63 = vadd.f32 %v18865_v28, %v12533_v11  ;;  %v12535_v19 = vpop.f32.mrb[85].mxu1  ;;  %v13765_v10 = vcombine.low %v10236_v21, %v10239_v39  ;;  %v10963_v12 = vsel %vm747_vm1, %v10960_v8, %v10962_v9 }
 0x896   :  { %v12536_v47 = vpop.f32.mrb[86].mxu1  ;;  %v10964_v11 = vrot.slane %v15333_v5, 1 }
 0x897   :  { %13174 = vst [vmem:[#allocation4 + $0x48] sm:$0xff] %v13110_v29  ;;  %v12823_v46 = vadd.f32 %v14233_v63, %v17971_v36  ;;  %v14234_v41 = vadd.f32 %v18865_v28, %v12536_v47  ;;  %v12538_v62 = vpop.f32.mrb[87].mxu1  ;;  %v10959_v36 = vrot.slane %v15330_v17, 1  ;;  %v15335_v29 = vld [vmem:[%s19401_s0 + $0xd0] sm:$0x3] }
 0x898   :  { %v10967_v63 = vrot.slane %v15335_v29, 1  ;;  %v10966_v48 = vsel %vm747_vm1, %v10964_v11, %v10965_v53  ;;  %v15336_v62 = vld [vmem:[%s19401_s0 + $0xd8] sm:$0xff] }
 0x899   :  { %v13047_v27 = vadd.f32 %v12823_v46, %v10956_v38  ;;  %v12826_v49 = vadd.f32 %v14234_v41, %v17977_v60  ;;  %14136 = vmatmul.mubr.bf16.vlgmr.msra.gmra.mrb[192].mxu1 %v13763_v57  ;;  %v10961_v55 = vsel %vm747_vm1, %v10959_v36, %v10960_v8  ;;  %v10969_v57 = vrot.slane %v15336_v62, 1 }
 0x89a   :  { %14139 = vmatprep.mubr.bf16.mxu1 %v13764_v40  ;;  %v10968_v26 = vsel %vm747_vm1, %v10965_v53, %v10967_v63  ;;  %v15343_v63 = vld [vmem:[%s19401_s0 + $0x110] sm:$0xff] }
 0x89b   :  { %v13111_v44 = vmax.f32 %v13047_v27, 0.0  ;;  %v13048_v60 = vadd.f32 %v12826_v49, %v10958_v2  ;;  %v10970_v2 = vrot.slane %v15337_v18, 1  ;;  %v15338_v49 = vld [vmem:[%s19401_s0 + $0xe8] sm:$0x3] }
 0x89c   :  { %v12541_v33 = vpop.f32.mrb[88].mxu1  ;;  %v10972_v17 = vrot.slane %v15338_v49, 1 }
 0x89d   :  { %13175 = vst [vmem:[#allocation4 + $0x50] sm:$0xff] %v13111_v44  ;;  %v13112_v52 = vmax.f32 %v13048_v60, 0.0  ;;  %v14235_v35 = vadd.f32 %v18865_v28, %v12541_v33  ;;  %v12543_v58 = vpop.f32.mrb[89].mxu1  ;;  %v10971_v8 = vsel %vm747_vm1, %v10969_v57, %v10970_v2 }
 0x89e   :  { %v12544_v54 = vpop.f32.mrb[90].mxu1  ;;  %v10973_v33 = vsel %vm747_vm1, %v10970_v2, %v10972_v17  ;;  %v15340_v58 = vld [vmem:[%s19401_s0 + $0xf8] sm:$0xff] }
 0x89f   :  { %13176 = vst [vmem:[#allocation4 + $0x58] sm:$0xff] %v13112_v52  ;;  %v12831_v31 = vadd.f32 %v14235_v35, %v18023_v42  ;;  %v14236_v0 = vadd.f32 %v18865_v28, %v12544_v54  ;;  %v12546_v1 = vpop.f32.mrb[91].mxu1  ;;  %v15339_v52 = vld [vmem:[%s19401_s0 + $0xf0] sm:$0xff] }
 0x8a0   :  { %v10974_v35 = vrot.slane %v15339_v52, 1 }
 0x8a1   :  { %v13049_v37 = vadd.f32 %v12831_v31, %v10961_v55  ;;  %v12834_v50 = vadd.f32 %v14236_v0, %v18027_v7  ;;  %14140 = vmatmul.mubr.bf16.gmra.mrb[196].mxu1 %v13765_v10  ;;  %v10975_v10 = vrot.slane %v15340_v58, 1  ;;  %v15341_v31 = vld [vmem:[%s19401_s0 + $0x100] sm:$0x3]  ;;  %v15348_v58 = vld [vmem:[%s19401_s0 + $0x138] sm:$0xff] }
 0x8a2   :  { %v10977_v0 = vrot.slane %v15341_v31, 1 }
 0x8a3   :  { %v13113_v42 = vmax.f32 %v13049_v37, 0.0  ;;  %v13050_v13 = vadd.f32 %v12834_v50, %v10963_v12  ;;  %v10976_v37 = vsel %vm747_vm1, %v10974_v35, %v10975_v10 }
 0x8a4   :  { %v12549_v23 = vpop.f32.mrb[92].mxu1  ;;  %v10978_v53 = vsel %vm747_vm1, %v10975_v10, %v10977_v0  ;;  %v10989_v10 = vrot.slane %v15348_v58, 1  ;;  %v15350_v0 = vld [vmem:[%s19401_s0 + $0x148] sm:$0x3]  ;;  %v15357_v58 = vld [vmem:[%s19401_s0 + $0x180] sm:$0xff] }
 0x8a5   :  { %13177 = vst [vmem:[#allocation4 + $0x60] sm:$0xff] %v13113_v42  ;;  %v13114_v7 = vmax.f32 %v13050_v13, 0.0  ;;  %v14237_v19 = vadd.f32 %v18865_v28, %v12549_v23  ;;  %v12551_v16 = vpop.f32.mrb[93].mxu1  ;;  %v15342_v23 = vld [vmem:[%s19401_s0 + $0x108] sm:$0xff] }
 0x8a6   :  { %v12552_v38 = vpop.f32.mrb[94].mxu1  ;;  %v10979_v29 = vrot.slane %v15342_v23, 1  ;;  %v15351_v23 = vld [vmem:[%s19401_s0 + $0x150] sm:$0xff] }
 0x8a7   :  { %13178 = vst [vmem:[#allocation4 + $0x68] sm:$0xff] %v13114_v7  ;;  %v12839_v47 = vadd.f32 %v14237_v19, %v18020_v24  ;;  %v14238_v59 = vadd.f32 %v18865_v28, %v12552_v38  ;;  %v12554_v45 = vpop.f32.mrb[95].mxu1  ;;  %v10980_v7 = vrot.slane %v15343_v63, 1  ;;  %v15352_v63 = vld [vmem:[%s19401_s0 + $0x158] sm:$0xff] }
 0x8a9   :  { %v13051_v46 = vadd.f32 %v12839_v47, %v10966_v48  ;;  %v12842_v41 = vadd.f32 %v14238_v59, %v18025_v20  ;;  %v15344_v48 = vld [vmem:[%s19401_s0 + $0x118] sm:$0x3]  ;;  %v10981_v45 = vsel %vm747_vm1, %v10979_v29, %v10980_v7  ;;  %v10994_v29 = vrot.slane %v15351_v23, 1  ;;  %v19686_v23 = vld [vmem:[#allocation9_spill] sm:$0xff] }
 0x8aa   :  { %v10982_v38 = vrot.slane %v15344_v48, 1 }
 0x8ab   :  { %v13115_v40 = vmax.f32 %v13051_v46, 0.0  ;;  %v13052_v24 = vadd.f32 %v12842_v41, %v10968_v26 }
 0x8ac   :  { %v12557_v27 = vpop.f32.mrb[96].mxu1  ;;  %v10983_v57 = vsel %vm747_vm1, %v10980_v7, %v10982_v38  ;;  %v10995_v7 = vrot.slane %v15352_v63, 1  ;;  %v15360_v63 = vld [vmem:[%s19401_s0 + $0x1c8] sm:$0xff] }
 0x8ad   :  { %13179 = vst [vmem:[#allocation4 + $0x70] sm:$0xff] %v13115_v40  ;;  %v13116_v20 = vmax.f32 %v13052_v24, 0.0  ;;  %v14239_v36 = vadd.f32 %v18865_v28, %v12557_v27  ;;  %v12559_v51 = vpop.f32.mrb[97].mxu1  ;;  %v15345_v40 = vld [vmem:[%s19401_s0 + $0x120] sm:$0xff]  ;;  %v15346_v27 = vld [vmem:[%s19401_s0 + $0x128] sm:$0xff] }
 0x8ae   :  { %v12560_v21 = vpop.f32.mrb[98].mxu1  ;;  %v10984_v24 = vrot.slane %v15345_v40, 1  ;;  %v10985_v49 = vrot.slane %v15346_v27, 1 }
 0x8af   :  { %13180 = vst [vmem:[#allocation4 + $0x78] sm:$0xff] %v13116_v20  ;;  %v12847_v39 = vadd.f32 %v14239_v36, %v18053_v15  ;;  %v14240_v44 = vadd.f32 %v18865_v28, %v12560_v21  ;;  %v12562_v60 = vpop.f32.mrb[99].mxu1  ;;  %v15347_v36 = vld [vmem:[%s19401_s0 + $0x130] sm:$0x3] }
 0x8b0   :  { %v10987_v51 = vrot.slane %v15347_v36, 1 }
 0x8b1   :  { %v13053_v25 = vadd.f32 %v12847_v39, %v10971_v8  ;;  %v12850_v9 = vadd.f32 %v14240_v44, %v18057_v3  ;;  %v10986_v39 = vsel %vm747_vm1, %v10984_v24, %v10985_v49  ;;  %v15355_v24 = vld [vmem:[%s19401_s0 + $0x170] sm:$0xff] }
 0x8b2   :  { %v11000_v27 = vrot.slane %v15355_v24, 1 }
 0x8b3   :  { %v13117_v55 = vmax.f32 %v13053_v25, 0.0  ;;  %v13054_v15 = vadd.f32 %v12850_v9, %v10973_v33  ;;  %v10988_v9 = vsel %vm747_vm1, %v10985_v49, %v10987_v51 }
 0x8b4   :  { %v12565_v54 = vpop.f32.mrb[100].mxu1 }
 0x8b5   :  { %13181 = vst [vmem:[#allocation4 + $0x80] sm:$0xff] %v13117_v55  ;;  %v13118_v3 = vmax.f32 %v13054_v15, 0.0  ;;  %v14241_v1 = vadd.f32 %v18865_v28, %v12565_v54  ;;  %v12567_v12 = vpop.f32.mrb[101].mxu1  ;;  %v15349_v55 = vld [vmem:[%s19401_s0 + $0x140] sm:$0xff] }
 0x8b6   :  { %v12568_v50 = vpop.f32.mrb[102].mxu1  ;;  %v10990_v15 = vrot.slane %v15349_v55, 1  ;;  %v15358_v55 = vld [vmem:[%s19401_s0 + $0x188] sm:$0xff] }
 0x8b7   :  { %13182 = vst [vmem:[#allocation4 + $0x88] sm:$0xff] %v13118_v3  ;;  %v12855_v5 = vadd.f32 %v14241_v1, %v18051_v14  ;;  %v14242_v11 = vadd.f32 %v18865_v28, %v12568_v50  ;;  %v12570_v34 = vpop.f32.mrb[103].mxu1  ;;  %v10992_v3 = vrot.slane %v15350_v0, 1  ;;  %v15359_v0 = vld [vmem:[%s19401_s0 + $0x190] sm:$0x3] }
 0x8b9   :  { %v13055_v42 = vadd.f32 %v12855_v5, %v10976_v37  ;;  %v12858_v13 = vadd.f32 %v14242_v11, %v18055_v4  ;;  %v10991_v37 = vsel %vm747_vm1, %v10989_v10, %v10990_v15  ;;  %v11004_v10 = vrot.slane %v15357_v58, 1 }
 0x8bb   :  { %v13119_v19 = vmax.f32 %v13055_v42, 0.0  ;;  %v13056_v14 = vadd.f32 %v12858_v13, %v10978_v53  ;;  %v10993_v53 = vsel %vm747_vm1, %v10990_v15, %v10992_v3  ;;  %v11005_v15 = vrot.slane %v15358_v55, 1 }
 0x8bc   :  { %v12573_v16 = vpop.f32.mrb[104].mxu1  ;;  %v11007_v3 = vrot.slane %v15359_v0, 1 }
 0x8bd   :  { %13183 = vst [vmem:[#allocation4 + $0x90] sm:$0xff] %v13119_v19  ;;  %v13120_v4 = vmax.f32 %v13056_v14, 0.0  ;;  %v14243_v47 = vadd.f32 %v18865_v28, %v12573_v16  ;;  %v12575_v59 = vpop.f32.mrb[105].mxu1  ;;  %v15353_v16 = vld [vmem:[%s19401_s0 + $0x160] sm:$0x3] }
 0x8be   :  { %v12576_v26 = vpop.f32.mrb[106].mxu1  ;;  %v10997_v48 = vrot.slane %v15353_v16, 1 }
 0x8bf   :  { %13184 = vst [vmem:[#allocation4 + $0x98] sm:$0xff] %v13120_v4  ;;  %v12863_v46 = vadd.f32 %v14243_v47, %v18072_v43  ;;  %v14244_v41 = vadd.f32 %v18865_v28, %v12576_v26  ;;  %v12578_v62 = vpop.f32.mrb[107].mxu1  ;;  %v10996_v47 = vsel %vm747_vm1, %v10994_v29, %v10995_v7 }
 0x8c1   :  { %v13057_v18 = vadd.f32 %v12863_v46, %v10981_v45  ;;  %v12866_v2 = vadd.f32 %v14244_v41, %v18080_v30  ;;  %v10998_v41 = vsel %vm747_vm1, %v10995_v7, %v10997_v48  ;;  %v11009_v7 = vrot.slane %v15360_v63, 1 }
 0x8c3   :  { %v13121_v17 = vmax.f32 %v13057_v18, 0.0  ;;  %v13058_v43 = vadd.f32 %v12866_v2, %v10983_v57  ;;  %v19682_v57 = vld [vmem:[#allocation61_spill] sm:$0xff]  ;;  %v15354_v2 = vld [vmem:[%s19401_s0 + $0x168] sm:$0xff] }
 0x8c4   :  { %v12581_v20 = vpop.f32.mrb[108].mxu1  ;;  %v10999_v40 = vrot.slane %v15354_v2, 1 }
 0x8c5   :  { %13185 = vst [vmem:[#allocation4 + $0xa0] sm:$0xff] %v13121_v17  ;;  %v13122_v30 = vmax.f32 %v13058_v43, 0.0  ;;  %v14245_v8 = vadd.f32 %v18865_v28, %v12581_v20  ;;  %v12583_v21 = vpop.f32.mrb[109].mxu1  ;;  %v15356_v43 = vld [vmem:[%s19401_s0 + $0x178] sm:$0x3] }
 0x8c6   :  { %v12584_v44 = vpop.f32.mrb[110].mxu1  ;;  %v11002_v20 = vrot.slane %v15356_v43, 1 }
 0x8c7   :  { %13186 = vst [vmem:[#allocation4 + $0xa8] sm:$0xff] %v13122_v30  ;;  %v12871_v60 = vadd.f32 %v14245_v8, %v18070_v61  ;;  %v14246_v33 = vadd.f32 %v18865_v28, %v12584_v44  ;;  %v12586_v25 = vpop.f32.mrb[111].mxu1  ;;  %v11001_v8 = vsel %vm747_vm1, %v10999_v40, %v11000_v27  ;;  %v19688_v40 = vld [vmem:[#allocation15_spill] sm:$0xff] }
 0x8c8   :  { %v11003_v25 = vsel %vm747_vm1, %v11000_v27, %v11002_v20  ;;  %v15363_v27 = vld [vmem:[%s19401_s0 + $0x1e0] sm:$0xff] }
 0x8c9   :  { %v13059_v52 = vadd.f32 %v12871_v60, %v10986_v39  ;;  %v12874_v35 = vadd.f32 %v14246_v33, %v18077_v6  ;;  %v19683_v39 = vld [vmem:[#allocation8_spill] sm:$0xff] }
 0x8cb   :  { %v13123_v54 = vmax.f32 %v13059_v52, 0.0  ;;  %v13060_v61 = vadd.f32 %v12874_v35, %v10988_v9  ;;  %v19684_v52 = vld [vmem:[#allocation10_spill] sm:$0xff] }
 0x8cc   :  { %v12589_v31 = vpop.f32.mrb[112].mxu1 }
 0x8cd   :  { %13187 = vst [vmem:[#allocation4 + $0xb0] sm:$0xff] %v13123_v54  ;;  %v13124_v6 = vmax.f32 %v13060_v61, 0.0  ;;  %v14247_v1 = vadd.f32 %v18865_v28, %v12589_v31  ;;  %v12591_v12 = vpop.f32.mrb[113].mxu1 }
 0x8ce   :  { %v12592_v50 = vpop.f32.mrb[114].mxu1 }
 0x8cf   :  { %13188 = vst [vmem:[#allocation4 + $0xb8] sm:$0xff] %v13124_v6  ;;  %v12879_v5 = vadd.f32 %v14247_v1, %v18116_v56  ;;  %v14248_v11 = vadd.f32 %v18865_v28, %v12592_v50  ;;  %v12594_v34 = vpop.f32.mrb[115].mxu1 }
 0x8d1   :  { %v13061_v42 = vadd.f32 %v12879_v5, %v10991_v37  ;;  %v12882_v13 = vadd.f32 %v14248_v11, %v18123_v32  ;;  %v11006_v37 = vsel %vm747_vm1, %v11004_v10, %v11005_v15  ;;  %v19685_v5 = vld [vmem:[#allocation7_spill] sm:$0xff]  ;;  %v19690_v10 = vld [vmem:[#allocation13_spill] sm:$0xff] }
 0x8d3   :  { %v13125_v19 = vmax.f32 %v13061_v42, 0.0  ;;  %v13062_v56 = vadd.f32 %v12882_v13, %v10993_v53  ;;  %v11008_v42 = vsel %vm747_vm1, %v11005_v15, %v11007_v3  ;;  %v15366_v15 = vld [vmem:[%s19401_s0 + $0x1f8] sm:$0xff] }
 0x8d4   :  { %v12597_v14 = vpop.f32.mrb[116].mxu1 }
 0x8d5   :  { %13189 = vst [vmem:[#allocation4 + $0xc0] sm:$0xff] %v13125_v19  ;;  %v13126_v32 = vmax.f32 %v13062_v56, 0.0  ;;  %v14249_v38 = vadd.f32 %v18865_v28, %v12597_v14  ;;  %v12599_v4 = vpop.f32.mrb[117].mxu1  ;;  %v15361_v19 = vld [vmem:[%s19401_s0 + $0x1d0] sm:$0xff] }
 0x8d6   :  { %v12600_v59 = vpop.f32.mrb[118].mxu1  ;;  %v11010_v56 = vrot.slane %v15361_v19, 1 }
 0x8d7   :  { %13190 = vst [vmem:[#allocation4 + $0xc8] sm:$0xff] %v13126_v32  ;;  %v12887_v45 = vadd.f32 %v14249_v38, %v18114_v22  ;;  %v14250_v26 = vadd.f32 %v18865_v28, %v12600_v59  ;;  %v12602_v46 = vpop.f32.mrb[119].mxu1  ;;  %v15362_v32 = vld [vmem:[%s19401_s0 + $0x1d8] sm:$0x3] }
 0x8d8   :  { %v11012_v38 = vrot.slane %v15362_v32, 1  ;;  %v19687_v46 = vld [vmem:[#allocation12_spill] sm:$0xff] }
 0x8d9   :  { %v13063_v62 = vadd.f32 %v12887_v45, %v10996_v47  ;;  %v12890_v18 = vadd.f32 %v14250_v26, %v19682_v57  ;;  %v11011_v45 = vsel %vm747_vm1, %v11009_v7, %v11010_v56  ;;  %v19692_v7 = vld [vmem:[#allocation29_spill] sm:$0xff] }
 0x8db   :  { %v13127_v49 = vmax.f32 %v13063_v62, 0.0  ;;  %v13064_v22 = vadd.f32 %v12890_v18, %v10998_v41  ;;  %v11013_v18 = vsel %vm747_vm1, %v11010_v56, %v11012_v38  ;;  %v15369_v56 = vld [vmem:[%s19401_s0 + $0x210] sm:$0xff] }
 0x8dc   :  { %v12605_v17 = vpop.f32.mrb[120].mxu1 }
 0x8dd   :  { %13191 = vst [vmem:[#allocation4 + $0xd0] sm:$0xff] %v13127_v49  ;;  %v13128_v36 = vmax.f32 %v13064_v22, 0.0  ;;  %v14251_v51 = vadd.f32 %v18865_v28, %v12605_v17  ;;  %v12607_v30 = vpop.f32.mrb[121].mxu1  ;;  %v11014_v49 = vrot.slane %v15363_v27, 1  ;;  %v15364_v22 = vld [vmem:[%s19401_s0 + $0x1e8] sm:$0xff] }
 0x8de   :  { %v12608_v21 = vpop.f32.mrb[122].mxu1  ;;  %v11015_v17 = vrot.slane %v15364_v22, 1 }
 0x8df   :  { %13192 = vst [vmem:[#allocation4 + $0xd8] sm:$0xff] %v13128_v36  ;;  %v12895_v44 = vadd.f32 %v14251_v51, %v19683_v39  ;;  %v14252_v60 = vadd.f32 %v18865_v28, %v12608_v21  ;;  %v12610_v33 = vpop.f32.mrb[123].mxu1  ;;  %v15365_v51 = vld [vmem:[%s19401_s0 + $0x1f0] sm:$0x3] }
 0x8e0   :  { %v11017_v30 = vrot.slane %v15365_v51, 1  ;;  %v19689_v33 = vld [vmem:[#allocation11_spill] sm:$0xff] }
 0x8e1   :  { %v13065_v9 = vadd.f32 %v12895_v44, %v11001_v8  ;;  %v12898_v35 = vadd.f32 %v14252_v60, %v19684_v52  ;;  %v11016_v44 = vsel %vm747_vm1, %v11014_v49, %v11015_v17  ;;  %v19694_v49 = vld [vmem:[#allocation27_spill] sm:$0xff] }
 0x8e3   :  { %v13129_v54 = vmax.f32 %v13065_v9, 0.0  ;;  %v13066_v61 = vadd.f32 %v12898_v35, %v11003_v25  ;;  %v11018_v35 = vsel %vm747_vm1, %v11015_v17, %v11017_v30  ;;  %v15372_v17 = vld [vmem:[%s19401_s0 + $0x228] sm:$0xff] }
 0x8e4   :  { %v12613_v31 = vpop.f32.mrb[124].mxu1 }
 0x8e5   :  { %13193 = vst [vmem:[#allocation4 + $0xe0] sm:$0xff] %v13129_v54  ;;  %v13130_v6 = vmax.f32 %v13066_v61, 0.0  ;;  %v14253_v1 = vadd.f32 %v18865_v28, %v12613_v31  ;;  %v12615_v12 = vpop.f32.mrb[125].mxu1  ;;  %v11019_v54 = vrot.slane %v15366_v15, 1  ;;  %v15367_v61 = vld [vmem:[%s19401_s0 + $0x200] sm:$0xff] }
 0x8e6   :  { %v12616_v50 = vpop.f32.mrb[126].mxu1  ;;  %v11020_v31 = vrot.slane %v15367_v61, 1 }
 0x8e7   :  { %13194 = vst [vmem:[#allocation4 + $0xe8] sm:$0xff] %v13130_v6  ;;  %v12903_v11 = vadd.f32 %v14253_v1, %v19685_v5  ;;  %v14254_v34 = vadd.f32 %v18865_v28, %v12616_v50  ;;  %v12618_v53 = vpop.f32.mrb[127].mxu1  ;;  %v15368_v1 = vld [vmem:[%s19401_s0 + $0x208] sm:$0x3] }
 0x8e8   :  { %v11022_v12 = vrot.slane %v15368_v1, 1  ;;  %v19691_v53 = vld [vmem:[#allocation19_spill] sm:$0xff] }
 0x8e9   :  { %v13067_v13 = vadd.f32 %v12903_v11, %v11006_v37  ;;  %v12906_v29 = vadd.f32 %v14254_v34, %v19686_v23  ;;  %v11021_v11 = vsel %vm747_vm1, %v11019_v54, %v11020_v31  ;;  %v19696_v54 = vld [vmem:[#allocation39_spill] sm:$0xff] }
 0x8eb   :  { %v13131_v14 = vmax.f32 %v13067_v13, 0.0  ;;  %v13068_v16 = vadd.f32 %v12906_v29, %v11008_v42  ;;  %v11023_v29 = vsel %vm747_vm1, %v11020_v31, %v11022_v12  ;;  %v15375_v31 = vld [vmem:[%s19401_s0 + $0x240] sm:$0xff] }
 0x8ec   :  { %v12621_v48 = vpop.f32.mrb[128].mxu1 }
 0x8ed   :  { %13195 = vst [vmem:[#allocation4 + $0xf0] sm:$0xff] %v13131_v14  ;;  %v13132_v4 = vmax.f32 %v13068_v16, 0.0  ;;  %v14255_v47 = vadd.f32 %v18865_v28, %v12621_v48  ;;  %v12623_v59 = vpop.f32.mrb[129].mxu1  ;;  %v11024_v14 = vrot.slane %v15369_v56, 1  ;;  %v15370_v16 = vld [vmem:[%s19401_s0 + $0x218] sm:$0xff] }
 0x8ee   :  { %v12624_v26 = vpop.f32.mrb[130].mxu1  ;;  %v11025_v48 = vrot.slane %v15370_v16, 1  ;;  %v19698_v16 = vld [vmem:[#allocation35_spill] sm:$0xff] }
 0x8ef   :  { %13196 = vst [vmem:[#allocation4 + $0xf8] sm:$0xff] %v13132_v4  ;;  %v12911_v41 = vadd.f32 %v14255_v47, %v19687_v46  ;;  %v14256_v62 = vadd.f32 %v18865_v28, %v12624_v26  ;;  %v12626_v57 = vpop.f32.mrb[131].mxu1  ;;  %v15371_v47 = vld [vmem:[%s19401_s0 + $0x220] sm:$0x3] }
 0x8f0   :  { %v11027_v59 = vrot.slane %v15371_v47, 1  ;;  %v19693_v57 = vld [vmem:[#allocation17_spill] sm:$0xff] }
 0x8f1   :  { %v13069_v2 = vadd.f32 %v12911_v41, %v11011_v45  ;;  %v12914_v24 = vadd.f32 %v14256_v62, %v19688_v40  ;;  %v11026_v41 = vsel %vm747_vm1, %v11024_v14, %v11025_v48 }
 0x8f3   :  { %v13133_v43 = vmax.f32 %v13069_v2, 0.0  ;;  %v13070_v20 = vadd.f32 %v12914_v24, %v11013_v18  ;;  %v11028_v24 = vsel %vm747_vm1, %v11025_v48, %v11027_v59  ;;  %v15379_v48 = vld [vmem:[%s19401_s0 + $0x258] sm:$0xff] }
 0x8f4   :  { %v12629_v36 = vpop.f32.mrb[132].mxu1 }
 0x8f5   :  { %13197 = vst [vmem:[#allocation4 + $0x100] sm:$0xff] %v13133_v43  ;;  %v13134_v8 = vmax.f32 %v13070_v20, 0.0  ;;  %v14257_v21 = vadd.f32 %v18865_v28, %v12629_v36  ;;  %v12631_v39 = vpop.f32.mrb[133].mxu1  ;;  %v11029_v43 = vrot.slane %v15372_v17, 1  ;;  %v15373_v20 = vld [vmem:[%s19401_s0 + $0x230] sm:$0xff] }
 0x8f6   :  { %v12632_v60 = vpop.f32.mrb[134].mxu1  ;;  %v11030_v36 = vrot.slane %v15373_v20, 1 }
 0x8f7   :  { %13198 = vst [vmem:[#allocation4 + $0x108] sm:$0xff] %v13134_v8  ;;  %v12919_v25 = vadd.f32 %v14257_v21, %v19689_v33  ;;  %v14258_v9 = vadd.f32 %v18865_v28, %v12632_v60  ;;  %v12634_v52 = vpop.f32.mrb[135].mxu1  ;;  %v15374_v21 = vld [vmem:[%s19401_s0 + $0x238] sm:$0x3] }
 0x8f8   :  { %v11032_v39 = vrot.slane %v15374_v21, 1  ;;  %v19695_v52 = vld [vmem:[#allocation33_spill] sm:$0xff] }
 0x8f9   :  { %v13071_v58 = vadd.f32 %v12919_v25, %v11016_v44  ;;  %v12922_v55 = vadd.f32 %v14258_v9, %v19690_v10  ;;  %v11031_v25 = vsel %vm747_vm1, %v11029_v43, %v11030_v36  ;;  %v19700_v43 = vld [vmem:[#allocation50_spill] sm:$0xff] }
 0x8fb   :  { %v13135_v0 = vmax.f32 %v13071_v58, 0.0  ;;  %v13072_v3 = vadd.f32 %v12922_v55, %v11018_v35  ;;  %v11033_v55 = vsel %vm747_vm1, %v11030_v36, %v11032_v39  ;;  %v15382_v36 = vld [vmem:[%s19401_s0 + $0x270] sm:$0xff] }
 0x8fc   :  { %v12637_v6 = vpop.f32.mrb[136].mxu1 }
 0x8fd   :  { %13199 = vst [vmem:[#allocation4 + $0x110] sm:$0xff] %v13135_v0  ;;  %v13136_v37 = vmax.f32 %v13072_v3, 0.0  ;;  %v14259_v50 = vadd.f32 %v18865_v28, %v12637_v6  ;;  %v12639_v5 = vpop.f32.mrb[137].mxu1  ;;  %v11034_v0 = vrot.slane %v15375_v31, 1  ;;  %v15376_v3 = vld [vmem:[%s19401_s0 + $0x248] sm:$0xff] }
 0x8fe   :  { %v12640_v34 = vpop.f32.mrb[138].mxu1  ;;  %v11035_v6 = vrot.slane %v15376_v3, 1 }
 0x8ff   :  { %13200 = vst [vmem:[#allocation4 + $0x118] sm:$0xff] %v13136_v37  ;;  %v12927_v42 = vadd.f32 %v14259_v50, %v19691_v53  ;;  %v14260_v13 = vadd.f32 %v18865_v28, %v12640_v34  ;;  %v12642_v23 = vpop.f32.mrb[139].mxu1  ;;  %v15377_v50 = vld [vmem:[%s19401_s0 + $0x250] sm:$0x3] }
 0x900   :  { %v11037_v5 = vrot.slane %v15377_v50, 1  ;;  %v19697_v23 = vld [vmem:[#allocation32_spill] sm:$0xff] }
 0x901   :  { %v13073_v63 = vadd.f32 %v12927_v42, %v11021_v11  ;;  %v12930_v19 = vadd.f32 %v14260_v13, %v19692_v7  ;;  %v11036_v42 = vsel %vm747_vm1, %v11034_v0, %v11035_v6  ;;  %v19702_v0 = vld [vmem:[#allocation48_spill] sm:$0xff] }
 0x902   :  { %v11038_v56 = vsel %vm747_vm1, %v11035_v6, %v11037_v5  ;;  %v15385_v6 = vld [vmem:[%s19401_s0 + $0x288] sm:$0xff] }
 0x903   :  { %v13137_v32 = vmax.f32 %v13073_v63, 0.0  ;;  %v13074_v38 = vadd.f32 %v12930_v19, %v11023_v29  ;;  %v19239_v63 = vld [vmem:[%s19405_s4] ss:$0 sm:$0xff] }
 0x904   :  { %v12645_v4 = vpop.f32.mrb[140].mxu1 }
 0x905   :  { %13201 = vst [vmem:[#allocation4 + $0x120] sm:$0xff] %v13137_v32  ;;  %v13138_v45 = vmax.f32 %v13074_v38, 0.0  ;;  %v14261_v26 = vadd.f32 %v18865_v28, %v12645_v4  ;;  %v12647_v46 = vpop.f32.mrb[141].mxu1  ;;  %v11039_v32 = vrot.slane %v15379_v48, 1  ;;  %v15380_v38 = vld [vmem:[%s19401_s0 + $0x260] sm:$0xff] }
 0x906   :  { %v12648_v62 = vpop.f32.mrb[142].mxu1  ;;  %v11040_v4 = vrot.slane %v15380_v38, 1 }
 0x907   :  { %13202 = vst [vmem:[#allocation4 + $0x128] sm:$0xff] %v13138_v45  ;;  %v12935_v18 = vadd.f32 %v14261_v26, %v19693_v57  ;;  %v14262_v2 = vadd.f32 %v18865_v28, %v12648_v62  ;;  %v12650_v40 = vpop.f32.mrb[143].mxu1  ;;  %v15381_v26 = vld [vmem:[%s19401_s0 + $0x268] sm:$0x3] }
 0x908   :  { %v11042_v46 = vrot.slane %v15381_v26, 1  ;;  %v19699_v40 = vld [vmem:[#allocation44_spill] sm:$0xff] }
 0x909   :  { %v13075_v27 = vadd.f32 %v12935_v18, %v11026_v41  ;;  %v12938_v22 = vadd.f32 %v14262_v2, %v19694_v49  ;;  %v11041_v18 = vsel %vm747_vm1, %v11039_v32, %v11040_v4  ;;  %v19704_v32 = vld [vmem:[#allocation14_spill] sm:$0xff] }
 0x90b   :  { %v13139_v51 = vmax.f32 %v13075_v27, 0.0  ;;  %v13076_v30 = vadd.f32 %v12938_v22, %v11028_v24  ;;  %v11043_v22 = vsel %vm747_vm1, %v11040_v4, %v11042_v46  ;;  %v15388_v4 = vld [vmem:[%s19401_s0 + $0x2a0] sm:$0xff] }
 0x90c   :  { %v12653_v8 = vpop.f32.mrb[144].mxu1 }
 0x90d   :  { %13203 = vst [vmem:[#allocation4 + $0x130] sm:$0xff] %v13139_v51  ;;  %v13140_v44 = vmax.f32 %v13076_v30, 0.0  ;;  %v14263_v60 = vadd.f32 %v18865_v28, %v12653_v8  ;;  %v12655_v33 = vpop.f32.mrb[145].mxu1  ;;  %v11044_v51 = vrot.slane %v15382_v36, 1  ;;  %v15383_v30 = vld [vmem:[%s19401_s0 + $0x278] sm:$0xff] }
 0x90e   :  { %v12656_v9 = vpop.f32.mrb[146].mxu1  ;;  %v11045_v8 = vrot.slane %v15383_v30, 1 }
 0x90f   :  { %13204 = vst [vmem:[#allocation4 + $0x138] sm:$0xff] %v13140_v44  ;;  %v12943_v35 = vadd.f32 %v14263_v60, %v19695_v52  ;;  %v14264_v58 = vadd.f32 %v18865_v28, %v12656_v9  ;;  %v12658_v10 = vpop.f32.mrb[147].mxu1  ;;  %v15384_v60 = vld [vmem:[%s19401_s0 + $0x280] sm:$0x3] }
 0x910   :  { %v11047_v33 = vrot.slane %v15384_v60, 1  ;;  %v19701_v10 = vld [vmem:[#allocation41_spill] sm:$0xff] }
 0x911   :  { %v13077_v15 = vadd.f32 %v12943_v35, %v11031_v25  ;;  %v12946_v61 = vadd.f32 %v14264_v58, %v19696_v54  ;;  %v11046_v35 = vsel %vm747_vm1, %v11044_v51, %v11045_v8  ;;  %v19706_v51 = vld [vmem:[#allocation59_spill] sm:$0xff] }
 0x913   :  { %v13141_v1 = vmax.f32 %v13077_v15, 0.0  ;;  %v13078_v12 = vadd.f32 %v12946_v61, %v11033_v55  ;;  %v11048_v61 = vsel %vm747_vm1, %v11045_v8, %v11047_v33  ;;  %v15391_v8 = vld [vmem:[%s19401_s0 + $0x2b8] sm:$0xff] }
 0x914   :  { %v12661_v37 = vpop.f32.mrb[148].mxu1 }
 0x915   :  { %13205 = vst [vmem:[#allocation4 + $0x140] sm:$0xff] %v13141_v1  ;;  %v13142_v11 = vmax.f32 %v13078_v12, 0.0  ;;  %v14265_v34 = vadd.f32 %v18865_v28, %v12661_v37  ;;  %v12663_v53 = vpop.f32.mrb[149].mxu1  ;;  %v11049_v1 = vrot.slane %v15385_v6, 1  ;;  %v15386_v12 = vld [vmem:[%s19401_s0 + $0x290] sm:$0xff] }
 0x916   :  { %v12664_v13 = vpop.f32.mrb[150].mxu1  ;;  %v11050_v37 = vrot.slane %v15386_v12, 1 }
 0x917   :  { %13206 = vst [vmem:[#allocation4 + $0x148] sm:$0xff] %v13142_v11  ;;  %v12951_v29 = vadd.f32 %v14265_v34, %v19697_v23  ;;  %v14266_v7 = vadd.f32 %v19239_v63, %v12664_v13  ;;  %v12666_v19 = vpop.f32.mrb[151].mxu1  ;;  %v15387_v34 = vld [vmem:[%s19401_s0 + $0x298] sm:$0x3] }
 0x918   :  { %v11052_v53 = vrot.slane %v15387_v34, 1  ;;  %v19703_v19 = vld [vmem:[#allocation57_spill] sm:$0xff] }
 0x919   :  { %v13079_v14 = vadd.f32 %v12951_v29, %v11036_v42  ;;  %v12954_v28 = vadd.f32 %v14266_v7, %v19698_v16  ;;  %v11051_v29 = vsel %vm747_vm1, %v11049_v1, %v11050_v37  ;;  %v19708_v1 = vld [vmem:[#allocation18_spill] sm:$0xff] }
 0x91b   :  { %v13143_v47 = vmax.f32 %v13079_v14, 0.0  ;;  %v13080_v59 = vadd.f32 %v12954_v28, %v11038_v56  ;;  %v11053_v28 = vsel %vm747_vm1, %v11050_v37, %v11052_v53  ;;  %v15394_v37 = vld [vmem:[%s19401_s0 + $0x2d0] sm:$0xff] }
 0x91c   :  { %v12669_v45 = vpop.f32.mrb[152].mxu1 }
 0x91d   :  { %13207 = vst [vmem:[#allocation4 + $0x150] sm:$0xff] %v13143_v47  ;;  %v13144_v41 = vmax.f32 %v13080_v59, 0.0  ;;  %v14267_v62 = vadd.f32 %v19239_v63, %v12669_v45  ;;  %v12671_v57 = vpop.f32.mrb[153].mxu1  ;;  %v11054_v47 = vrot.slane %v15388_v4, 1  ;;  %v15389_v59 = vld [vmem:[%s19401_s0 + $0x2a8] sm:$0xff] }
 0x91e   :  { %v12672_v2 = vpop.f32.mrb[154].mxu1  ;;  %v11055_v45 = vrot.slane %v15389_v59, 1 }
 0x91f   :  { %13208 = vst [vmem:[#allocation4 + $0x158] sm:$0xff] %v13144_v41  ;;  %v12959_v24 = vadd.f32 %v14267_v62, %v19699_v40  ;;  %v14268_v27 = vadd.f32 %v19239_v63, %v12672_v2  ;;  %v12674_v49 = vpop.f32.mrb[155].mxu1  ;;  %v15390_v62 = vld [vmem:[%s19401_s0 + $0x2b0] sm:$0x3] }
 0x920   :  { %v11057_v57 = vrot.slane %v15390_v62, 1  ;;  %v19705_v49 = vld [vmem:[#allocation53_spill] sm:$0xff] }
 0x921   :  { %v13081_v17 = vadd.f32 %v12959_v24, %v11041_v18  ;;  %v12962_v20 = vadd.f32 %v14268_v27, %v19700_v43  ;;  %v11056_v24 = vsel %vm747_vm1, %v11054_v47, %v11055_v45  ;;  %v19710_v47 = vld [vmem:[#allocation23_spill] sm:$0xff] }
 0x923   :  { %v13145_v21 = vmax.f32 %v13081_v17, 0.0  ;;  %v13082_v39 = vadd.f32 %v12962_v20, %v11043_v22  ;;  %v11058_v20 = vsel %vm747_vm1, %v11055_v45, %v11057_v57 }
 0x924   :  { %v12677_v44 = vpop.f32.mrb[156].mxu1 }
 0x925   :  { %13209 = vst [vmem:[#allocation4 + $0x160] sm:$0xff] %v13145_v21  ;;  %v13146_v25 = vmax.f32 %v13082_v39, 0.0  ;;  %v14269_v9 = vadd.f32 %v19239_v63, %v12677_v44  ;;  %v12679_v52 = vpop.f32.mrb[157].mxu1  ;;  %v11059_v21 = vrot.slane %v15391_v8, 1  ;;  %v15392_v39 = vld [vmem:[%s19401_s0 + $0x2c0] sm:$0xff] }
 0x926   :  { %v12680_v58 = vpop.f32.mrb[158].mxu1  ;;  %v11060_v44 = vrot.slane %v15392_v39, 1  ;;  %v15397_v8 = vld [vmem:[%s19401_s0 + $0x300] sm:$0xff]  ;;  %v15398_v39 = vld [vmem:[%s19401_s0 + $0x308] sm:$0xff] }
 0x927   :  { %13210 = vst [vmem:[#allocation4 + $0x168] sm:$0xff] %v13146_v25  ;;  %v12967_v55 = vadd.f32 %v14269_v9, %v19701_v10  ;;  %v14270_v15 = vadd.f32 %v19239_v63, %v12680_v58  ;;  %v12682_v54 = vpop.f32.mrb[159].mxu1  ;;  %v15393_v9 = vld [vmem:[%s19401_s0 + $0x2c8] sm:$0x3] }
 0x928   :  { %v11062_v52 = vrot.slane %v15393_v9, 1  ;;  %v19707_v54 = vld [vmem:[#allocation16_spill] sm:$0xff] }
 0x929   :  { %v13083_v31 = vadd.f32 %v12967_v55, %v11046_v35  ;;  %v12970_v3 = vadd.f32 %v14270_v15, %v19702_v0  ;;  %v11061_v55 = vsel %vm747_vm1, %v11059_v21, %v11060_v44  ;;  %v11074_v21 = vrot.slane %v15397_v8, 1 }
 0x92b   :  { %v13147_v50 = vmax.f32 %v13083_v31, 0.0  ;;  %v13084_v5 = vadd.f32 %v12970_v3, %v11048_v61  ;;  %v11063_v3 = vsel %vm747_vm1, %v11060_v44, %v11062_v52  ;;  %v11075_v44 = vrot.slane %v15398_v39, 1  ;;  %v15401_v52 = vld [vmem:[%s19401_s0 + $0x310] sm:$0x3] }
 0x92c   :  { %v12685_v11 = vpop.f32.mrb[160].mxu1 }
 0x92d   :  { %13211 = vst [vmem:[#allocation4 + $0x170] sm:$0xff] %v13147_v50  ;;  %v13148_v42 = vmax.f32 %v13084_v5, 0.0  ;;  %v14271_v13 = vadd.f32 %v19239_v63, %v12685_v11  ;;  %v12687_v23 = vpop.f32.mrb[161].mxu1  ;;  %v11064_v50 = vrot.slane %v15394_v37, 1  ;;  %v15395_v5 = vld [vmem:[%s19401_s0 + $0x2d8] sm:$0xff] }
 0x92e   :  { %v12688_v7 = vpop.f32.mrb[162].mxu1  ;;  %v11065_v11 = vrot.slane %v15395_v5, 1 }
 0x92f   :  { %13212 = vst [vmem:[#allocation4 + $0x178] sm:$0xff] %v13148_v42  ;;  %v12975_v56 = vadd.f32 %v14271_v13, %v19703_v19  ;;  %v14272_v14 = vadd.f32 %v19239_v63, %v12688_v7  ;;  %v12690_v16 = vpop.f32.mrb[163].mxu1  ;;  %v15396_v13 = vld [vmem:[%s19401_s0 + $0x2e0] sm:$0x3] }
 0x930   :  { %v11067_v23 = vrot.slane %v15396_v13, 1  ;;  %v19709_v16 = vld [vmem:[#allocation21_spill] sm:$0xff] }
 0x931   :  { %v13085_v48 = vadd.f32 %v12975_v56, %v11051_v29  ;;  %v12978_v38 = vadd.f32 %v14272_v14, %v19704_v32  ;;  %v11066_v56 = vsel %vm747_vm1, %v11064_v50, %v11065_v11 }
 0x933   :  { %v13149_v26 = vmax.f32 %v13085_v48, 0.0  ;;  %v13086_v46 = vadd.f32 %v12978_v38, %v11053_v28  ;;  %v11068_v38 = vsel %vm747_vm1, %v11065_v11, %v11067_v23  ;;  %v15403_v23 = vld [vmem:[%s19401_s0 + $0x330] sm:$0xff] }
 0x934   :  { %v12693_v41 = vpop.f32.mrb[164].mxu1 }
 0x935   :  { %13213 = vst [vmem:[#allocation4 + $0x180] sm:$0xff] %v13149_v26  ;;  %v13150_v18 = vmax.f32 %v13086_v46, 0.0  ;;  %v14273_v2 = vadd.f32 %v19239_v63, %v12693_v41  ;;  %v12695_v40 = vpop.f32.mrb[165].mxu1 }
 0x936   :  { %v12696_v27 = vpop.f32.mrb[166].mxu1 }
 0x937   :  { %13214 = vst [vmem:[#allocation4 + $0x188] sm:$0xff] %v13150_v18  ;;  %v12983_v22 = vadd.f32 %v14273_v2, %v19705_v49  ;;  %v14274_v17 = vadd.f32 %v19239_v63, %v12696_v27  ;;  %v12698_v43 = vpop.f32.mrb[167].mxu1 }
 0x939   :  { %v13087_v36 = vadd.f32 %v12983_v22, %v11056_v24  ;;  %v12986_v30 = vadd.f32 %v14274_v17, %v19706_v51 }
 0x93b   :  { %v13151_v60 = vmax.f32 %v13087_v36, 0.0  ;;  %v13088_v33 = vadd.f32 %v12986_v30, %v11058_v20 }
 0x93c   :  { %v12701_v25 = vpop.f32.mrb[168].mxu1 }
 0x93d   :  { %13215 = vst [vmem:[#allocation4 + $0x190] sm:$0xff] %v13151_v60  ;;  %v13152_v35 = vmax.f32 %v13088_v33, 0.0  ;;  %v14275_v58 = vadd.f32 %v19239_v63, %v12701_v25  ;;  %v12703_v10 = vpop.f32.mrb[169].mxu1  ;;  %v15399_v60 = vld [vmem:[%s19401_s0 + $0x2e8] sm:$0xff]  ;;  %v15400_v25 = vld [vmem:[%s19401_s0 + $0x2f0] sm:$0xff] }
 0x93e   :  { %v12704_v15 = vpop.f32.mrb[170].mxu1  ;;  %v11069_v33 = vrot.slane %v15399_v60, 1  ;;  %v11070_v9 = vrot.slane %v15400_v25, 1  ;;  %v15402_v10 = vld [vmem:[%s19401_s0 + $0x2f8] sm:$0x3] }
 0x93f   :  { %13216 = vst [vmem:[#allocation4 + $0x198] sm:$0xff] %v13152_v35  ;;  %v12991_v61 = vadd.f32 %v14275_v58, %v19707_v54  ;;  %v14276_v31 = vadd.f32 %v19239_v63, %v12704_v15  ;;  %v12706_v0 = vpop.f32.mrb[171].mxu1  ;;  %v11077_v35 = vrot.slane %v15401_v52, 1  ;;  %v11076_v54 = vsel %vm747_vm1, %v11074_v21, %v11075_v44 }
 0x941   :  { %v13089_v6 = vadd.f32 %v12991_v61, %v11061_v55  ;;  %v12994_v12 = vadd.f32 %v14276_v31, %v19708_v1  ;;  %v11072_v55 = vrot.slane %v15402_v10, 1  ;;  %v11078_v37 = vsel %vm747_vm1, %v11075_v44, %v11077_v35 }
 0x943   :  { %v13153_v34 = vmax.f32 %v13089_v6, 0.0  ;;  %v13090_v53 = vadd.f32 %v12994_v12, %v11063_v3  ;;  %v11071_v3 = vsel %vm747_vm1, %v11069_v33, %v11070_v9 }
 0x944   :  { %v12709_v42 = vpop.f32.mrb[172].mxu1 }
 0x945   :  { %13217 = vst [vmem:[#allocation4 + $0x1a0] sm:$0xff] %v13153_v34  ;;  %v13154_v29 = vmax.f32 %v13090_v53, 0.0  ;;  %v14277_v7 = vadd.f32 %v19239_v63, %v12709_v42  ;;  %v12711_v19 = vpop.f32.mrb[173].mxu1  ;;  %v11073_v34 = vsel %vm747_vm1, %v11070_v9, %v11072_v55 }
 0x946   :  { %v12712_v14 = vpop.f32.mrb[174].mxu1 }
 0x947   :  { %13218 = vst [vmem:[#allocation4 + $0x1a8] sm:$0xff] %v13154_v29  ;;  %v12999_v28 = vadd.f32 %v14277_v7, %v19709_v16  ;;  %v14278_v48 = vadd.f32 %v19239_v63, %v12712_v14  ;;  %v12714_v32 = vpop.f32.mrb[175].mxu1  ;;  %v11084_v29 = vrot.slane %v15403_v23, 1  ;;  %v15404_v7 = vld [vmem:[%s19401_s0 + $0x338] sm:$0xff] }
 0x948   :  { %v11085_v19 = vrot.slane %v15404_v7, 1  ;;  %v15405_v16 = vld [vmem:[%s19401_s0 + $0x318] sm:$0xff] }
 0x949   :  { %v13091_v4 = vadd.f32 %v12999_v28, %v11066_v56  ;;  %v13002_v59 = vadd.f32 %v14278_v48, %v19710_v47  ;;  %v11079_v28 = vrot.slane %v15405_v16, 1  ;;  %v15406_v48 = vld [vmem:[%s19401_s0 + $0x320] sm:$0xff] }
 0x94a   :  { %v11080_v32 = vrot.slane %v15406_v48, 1  ;;  %v15407_v47 = vld [vmem:[%s19401_s0 + $0x340] sm:$0x3] }
 0x94b   :  { %v13155_v45 = vmax.f32 %v13091_v4, 0.0  ;;  %v13092_v26 = vadd.f32 %v13002_v59, %v11068_v38  ;;  %v11087_v59 = vrot.slane %v15407_v47, 1 }
 0x94c   :  { %v12717_v46 = vpop.f32.mrb[176].mxu1 }
 0x94d   :  { %13219 = vst [vmem:[#allocation4 + $0x1b0] sm:$0xff] %v13155_v45  ;;  %v13156_v41 = vmax.f32 %v13092_v26, 0.0  ;;  %v12719_v62 = vpop.f32.mrb[177].mxu1  ;;  %v14279_v15 = vadd.f32 %v19239_v63, %v12717_v46  ;;  %v15408_v46 = vld [vmem:[%s19401_s0 + $0x328] sm:$0x3]  ;;  %s15434_s0 = smov [#allocation4]  }
 0x94e   :  { %v12720_v57 = vpop.f32.mrb[178].mxu1  ;;  %s13234_s13 = sshll.u32 %s15434_s0, 4  ;;  %s13235_s13 = int_to_ptr.vmem [resolvable:$true] %s13234_s13 }
 0x94f   :  { %13220 = vst [vmem:[#allocation4 + $0x1b8] sm:$0xff] %v13156_v41  ;;  %v12722_v18 = vpop.f32.mrb[179].mxu1  ;;  %v14280_v1 = vadd.f32 %v19239_v63, %v12720_v57  ;;  %v11082_v41 = vrot.slane %v15408_v46, 1  ;;  %s15409_s2 = scalar_lea.vmem %s13235_s13, 8192  ;;  %p15414_p1 = scmp.lt.s32.totalorder %s13235_s13, %s13235_s13 }
 0x950   :  { %v11086_v18 = vsel %vm747_vm1, %v11084_v29, %v11085_v19  ;;  %p15410_p0 = scmp.ne.s32.totalorder %s13235_s13, %s15409_s2  ;;  %p15415_p2 = scmp.lt.s32.totalorder %s15409_s2, %s15409_s2 }
 0x951   :  { %v11083_v21 = vsel %vm747_vm1, %v11080_v32, %v11082_v41 }
 0x952   :  { %p15416_p3 = por %p15415_p2, %p15414_p1 }
 0x954   :  { %v12725_v2 = vpop.f32.mrb[180].mxu1  ;;  %p15417_p4 = pnand %p15416_p3, %p15410_p0 }
 0x955   :  { %v12727_v40 = vpop.f32.mrb[181].mxu1  ;;  %v14281_v58 = vadd.f32 %v19239_v63, %v12725_v2 }
 0x956   :  { %v12728_v24 = vpop.f32.mrb[182].mxu1 }
 0x957   :  { %v12730_v27 = vpop.f32.mrb[183].mxu1  ;;  %v14282_v31 = vadd.f32 %v19239_v63, %v12728_v24 }
 0x958   :  { %v11081_v27 = vsel %vm747_vm1, %v11079_v28, %v11080_v32 }
 0x95c   :  { %v12733_v49 = vpop.f32.mrb[184].mxu1 }
 0x95d   :  { %v12735_v22 = vpop.f32.mrb[185].mxu1  ;;  %v14283_v62 = vadd.f32 %v19239_v63, %v12733_v49 }
 0x95e   :  { %v19334_v17 = vpop.f32.mrb[186].mxu1 }
 0x95f   :  { %v12738_v43 = vpop.f32.mrb[187].mxu1 }
 0x960   :  { %v14284_v43 = vadd.f32 %v19239_v63, %v19334_v17 }
 0x964   :  { %v12741_v20 = vpop.f32.mrb[188].mxu1 }
 0x965   :  { %v12743_v36 = vpop.f32.mrb[189].mxu1  ;;  %v14285_v45 = vadd.f32 %v19239_v63, %v12741_v20 }
 0x966   :  { %v12744_v51 = vpop.f32.mrb[190].mxu1  ;;  %v11088_v36 = vsel %vm747_vm1, %v11085_v19, %v11087_v59 }
 0x967   :  { %v12746_v30 = vpop.f32.mrb[191].mxu1  ;;  %v14286_v40 = vadd.f32 %v19239_v63, %v12744_v51 }
 0x96c   :  { %v14137_v61 = vpop.f32.mrb[192].mxu1 }
 0x96d   :  { %v13015_v0 = vadd.f32 %v14281_v58, %v14137_v61  ;;  %v13006_v6 = vpop.f32.mrb[193].mxu1 }
 0x96e   :  { %v13007_v12 = vadd.f32 %v14279_v15, %v13006_v6  ;;  %v14138_v50 = vpop.f32.mrb[194].mxu1 }
 0x96f   :  { %v13095_v5 = vadd.f32 %v13015_v0, %v11076_v54  ;;  %v13018_v11 = vadd.f32 %v14282_v31, %v14138_v50  ;;  %v13009_v53 = vpop.f32.mrb[195].mxu1 }
 0x970   :  { %v13093_v42 = vadd.f32 %v13007_v12, %v11071_v3  ;;  %v13010_v13 = vadd.f32 %v14280_v1, %v13009_v53 }
 0x971   :  { %v13159_v56 = vmax.f32 %v13095_v5, 0.0  ;;  %v13096_v14 = vadd.f32 %v13018_v11, %v11078_v37 }
 0x972   :  { %v13157_v38 = vmax.f32 %v13093_v42, 0.0  ;;  %v13094_v4 = vadd.f32 %v13010_v13, %v11073_v34 }
 0x973   :  { %13223 = vst [vmem:[#allocation4 + $0x1d0] sm:$0xff] %v13159_v56  ;;  %v13160_v26 = vmax.f32 %v13096_v14, 0.0 }
 0x974   :  { %13221 = vst [vmem:[#allocation4 + $0x1c0] sm:$0xff] %v13157_v38  ;;  %v13158_v57 = vmax.f32 %v13094_v4, 0.0  ;;  %v14141_v2 = vpop.f32.mrb[196].mxu1 }
 0x975   :  { %13224 = vst [vmem:[#allocation4 + $0x1d8] sm:$0xff] %v13160_v26  ;;  %v13031_v24 = vadd.f32 %v14285_v45, %v14141_v2  ;;  %v13022_v22 = vpop.f32.mrb[197].mxu1 }
 0x976   :  { %13222 = vst [vmem:[#allocation4 + $0x1c8] sm:$0xff] %v13158_v57  ;;  %v13023_v20 = vadd.f32 %v14283_v62, %v13022_v22  ;;  %v14142_v49 = vpop.f32.mrb[198].mxu1 }
 0x977   :  { %v13099_v30 = vadd.f32 %v13031_v24, %v11086_v18  ;;  %v13034_v8 = vadd.f32 %v14286_v40, %v14142_v49  ;;  %v13025_v39 = vpop.f32.mrb[199].mxu1 }
 0x978   :  { %v13097_v44 = vadd.f32 %v13023_v20, %v11081_v27  ;;  %v13026_v51 = vadd.f32 %v14284_v43, %v13025_v39 }
 0x979   :  { %v13163_v60 = vmax.f32 %v13099_v30, 0.0  ;;  %v13100_v33 = vadd.f32 %v13034_v8, %v11088_v36 }
 0x97a   :  { %v13161_v25 = vmax.f32 %v13097_v44, 0.0  ;;  %v13098_v9 = vadd.f32 %v13026_v51, %v11083_v21 }
 0x97b   :  { %13227 = vst [vmem:[#allocation4 + $0x1f0] sm:$0xff] %v13163_v60  ;;  %v13164_v63 = vmax.f32 %v13100_v33, 0.0 }
 0x97c   :  { %13225 = vst [vmem:[#allocation4 + $0x1e0] sm:$0xff] %v13161_v25  ;;  %v13162_v17 = vmax.f32 %v13098_v9, 0.0 }
 0x97d   :  { %13228 = vst [vmem:[#allocation4 + $0x1f8] sm:$0xff] %v13164_v63 }
 0x97e   :  { %13226 = vst [vmem:[#allocation4 + $0x1e8] sm:$0xff] %v13162_v17 }
 0x97f   :  { %15420 = shalt.err (!%p15417_p4)
}
 0x980   :  { %s15421_s1 = scalar_lea.hbm %s19406_s5, 8192 }
 0x981   :  { %p15422_p5 = scmp.ne.s32.totalorder %s19406_s5, %s15421_s1  ;;  %p15425_p6 = scmp.lt.u32.totalorder %s15421_s1, %s19406_s5 }
 0x983   :  { %p15427_p7 = pnand %p15425_p6, %p15422_p5 }
 0x985   :  { %15430 = shalt.err (!%p15427_p7)
}
 0x986   :  { %s15435_s18 = smov 128   ;;  %s15436_s19 = smov 8  }
 0x987   :  { %13240 = dma.vmem_to_hbm [thread:$0]  %s13235_s13, 8192, %s19406_s5, [#allocation5], %s15435_s18, %s15435_s18, %s15436_s19  }
 0x988   :  { %15431 = dma.done.wait [#allocation5], 8192  }
 0x989   :  { %15432 = vsyncadd [#allocation5], 4294959104 }
 0x98a   :  { %13244 = vsyncpa [#allocation5], 1 }

</bundles_post_ra>
